<compile_context>
chip_gen: v7x
topology: tpu7x:2x2x1
jax: 0.10.0
libtpu: 0.0.40
codegen_flags: <defaults>
</compile_context>

<pallas_src>
import jax
import jax.numpy as jnp
from jax import lax
from jax.experimental import pallas as pl
from jax.experimental.pallas import tpu as pltpu


def _gelu(x):
    # tanh-approximate GELU; tanh rides the EUP slot (bf16-native on v6e/v7x).
    c = 0.7978845608028654  # sqrt(2/pi)
    return 0.5 * x * (1.0 + jnp.tanh(c * (x + 0.044715 * x * x * x)))


# --------------------------------------------------------------------------- #
# kernel
# --------------------------------------------------------------------------- #
def dense_to_sparse_kernel(
    sparse_ref,   # (B, Csp, S)    compute dtype (bf16 on the perf path)
    dense_ref,    # (B, C,  L=S*P) compute dtype
    mprev_ref,    # (1, 1, L)      compute dtype: 0 where p == 0   else 1
    mnext_ref,    # (1, 1, L)      compute dtype: 0 where p == P-1 else 1
    wconv_ref,    # (3, C, C)      compute dtype: conv taps [prev, cur, next], BN2d folded
    bconv_ref,    # (1, C, 1)      f32: conv bias + BN2d shift
    wenc_s_ref,   # (Csp, Csp)     compute dtype: encoder weight, sparse half (BN1d folded)
    wenc_d_ref,   # (Csp, C)       compute dtype: encoder weight, pooled half
    benc_ref,     # (1, Csp, 1)    f32: encoder bias + BN1d shift
    out_ref,      # (B, Csp, S)    f32
):
    B, C, L = dense_ref.shape
    _, Csp, S = sparse_ref.shape
    P = L // S
    dn = (((2,), (1,)), ((0,), (0,)))       # batched matmul: contract the channel dim

    x = dense_ref[...]                                          # (B, C, L)

    # Neighbour taps of the (1,3) conv via XLU lane rotation.  The lane axis is
    # S*P *per batch element*, so rolls never mix batch elements; stroke seams
    # (p == 0 / p == P-1, i.e. the conv's zero padding) are zeroed by the masks.
    x_prev = pltpu.roll(x, shift=1, axis=2) * mprev_ref[...]
    x_next = pltpu.roll(x, shift=L - 1, axis=2) * mnext_ref[...]

    # Conv2d(kernel=(1,3), pad=(0,1)) as three accumulating batched MXU pushes
    # (no (3C, L) concat: smaller working set, less ld/st slot pressure).
    w = wconv_ref[...]                                          # (3, C, C)

    def push(tap, operand):
        wb = jnp.broadcast_to(w[tap][None], (B, C, C))
        return lax.dot_general(wb, operand, dn, preferred_element_type=jnp.float32)

    y = push(0, x_prev) + push(1, x) + push(2, x_next)          # (B, C, L) f32
    y = (y + bconv_ref[...]).astype(x.dtype)                    # conv bias + BN shift (folded)
    y = _gelu(y)                                                # Dropout2d: identity in eval

    # Max over n_stk_pnt -> sparse features from the dense graph.
    # TODO(synk): swap to a fully lane-dense roll/max tree + pick once the strided
    # lane extraction lowering is verified; the reshape-reduce is a VMEM-local
    # relayout (no extra HBM traffic) and is the path with verified lowering.
    pooled = jnp.max(y.reshape(B, C, S, P), axis=-1)            # (B, C, S)

    # Encoder 1x1 Conv1d (+ folded BN1d), split into sparse/pooled halves so the
    # [sparse; pooled] channel concat never materializes.
    sp = sparse_ref[...]                                        # (B, Csp, S)
    ws = jnp.broadcast_to(wenc_s_ref[...][None], (B, Csp, Csp))
    wd = jnp.broadcast_to(wenc_d_ref[...][None], (B, Csp, C))
    z = (lax.dot_general(ws, sp, dn, preferred_element_type=jnp.float32)
         + lax.dot_general(wd, pooled, dn, preferred_element_type=jnp.float32))
    z = z + benc_ref[...]                                       # encoder bias + BN shift
    z = _gelu(z)                                                # Dropout: identity in eval
    out_ref[...] = z.astype(out_ref.dtype)


# --------------------------------------------------------------------------- #
# generation-aware tiling
# --------------------------------------------------------------------------- #
def _vmem_plan():
    """VMEM budget / Mosaic limit and grid-step preference per TPU generation.

    v5e / v6e: 128 MiB physical VMEM, 1 TensorCore  -> largest single batch tile.
    v7x (and unknown chips): assume 64 MiB VMEM, 2 TensorCores -> smaller tiles
    and an even number of grid steps so both cores get equal work.
    """
    budget, limit, want_even_steps = 40 << 20, 56 << 20, True
    try:
        kind = jax.devices()[0].device_kind.lower()
        if any(tag in kind for tag in ("v5", "v6", "trillium")):
            budget, limit, want_even_steps = 80 << 20, 100 << 20, False
    except Exception:
        pass
    try:  # clamp to what the runtime actually reports, when available
        cap = int(pltpu.get_tpu_info().vmem_capacity_bytes)
        budget = min(budget, int(cap * 0.6))
        limit = min(limit, int(cap * 0.85))
    except Exception:
        pass
    return budget, limit, want_even_steps


def _pick_b_tile(bs, C, Csp, S, P, elem_bytes):
    """Largest batch tile (divisor of bs) whose per-step working set fits VMEM."""
    L = S * P
    budget, limit, want_even_steps = _vmem_plan()

    def step_bytes(d):
        dense = d * C * L
        # dense block (double-buffered) + x_prev + x_next + activation + pool
        # relayout copy (compute dtype) + f32 conv accumulator, plus small terms.
        big = dense * (6 * elem_bytes + 2 * 4)
        small = d * Csp * S * (2 * elem_bytes + 3 * 4)
        params = (3 * C * C + Csp * (Csp + C) + 2 * L) * elem_bytes + 8 * (C + Csp)
        return big + small + params

    divisors = [d for d in range(1, bs + 1) if bs % d == 0]
    fits = [d for d in divisors if step_bytes(d) <= budget] or [1]
    if want_even_steps:
        even = [d for d in fits if (bs // d) % 2 == 0]
        b_tile = max(even) if even else max(fits)
    else:
        b_tile = max(fits)
    return b_tile, limit


# --------------------------------------------------------------------------- #
# parameter preparation (done ONCE, e.g. at model-load time)
# --------------------------------------------------------------------------- #
def prepare_params(raw_params, *, eps=1e-5, compute_dtype=jnp.bfloat16):
    """Fold eval-mode BatchNorms into the conv / encoder and pack for the kernel.

    raw_params = (conv_w[C,C,1,3], conv_b[C],
                  bn1_gamma, bn1_beta, bn1_mean, bn1_var,       # BatchNorm2d
                  enc_w[Csp, Csp+C], enc_b[Csp],
                  bn2_gamma, bn2_beta, bn2_mean, bn2_var)       # BatchNorm1d
    """
    (conv_w, conv_b, g1, b1, m1, v1, enc_w, enc_b, g2, b2, m2, v2) = raw_params
    Csp = enc_w.shape[0]

    s1 = g1 / jnp.sqrt(v1 + eps)                                 # (C,)
    w3 = conv_w[:, :, 0, :] * s1[:, None, None]                  # (C, C, 3)
    bconv = s1 * conv_b + (b1 - m1 * s1)                         # (C,)
    s2 = g2 / jnp.sqrt(v2 + eps)                                 # (Csp,)
    ew = enc_w * s2[:, None]                                     # (Csp, Csp+C)
    benc = s2 * enc_b + (b2 - m2 * s2)                           # (Csp,)

    wconv = jnp.moveaxis(w3, 2, 0).astype(compute_dtype)         # (3, C, C): taps prev/cur/next
    return (
        wconv,
        bconv.reshape(1, -1, 1).astype(jnp.float32),             # (1, C, 1)
        ew[:, :Csp].astype(compute_dtype),                       # (Csp, Csp) sparse half
        ew[:, Csp:].astype(compute_dtype),                       # (Csp, C)   pooled half
        benc.reshape(1, -1, 1).astype(jnp.float32),               # (1, Csp, 1)
    )


# --------------------------------------------------------------------------- #
# forward wrapper
# --------------------------------------------------------------------------- #
def dense_to_sparse(sparse_fea, dense_fea, packed_params, *, compute_dtype=jnp.bfloat16):
    """DenseToSparse.forward (eval) as one fused Pallas call, native layouts.

    sparse_fea: [bs, sparse_in, n_stk]
    dense_fea:  [bs, dense_in, n_stk, n_stk_pnt]
    returns:    [bs, sparse_in, n_stk] float32
    """
    wconv, bconv, wenc_s, wenc_d, benc = packed_params
    bs, Csp, S = sparse_fea.shape
    _, C, S2, P = dense_fea.shape
    assert S2 == S
    L = S * P

    # Free reshape (no HBM data movement) + dtype cast at the kernel boundary.
    # In a real pipeline the producer should already emit compute_dtype so the
    # cast fuses away; there is no transpose of any tensor in HBM.
    dense_in = dense_fea.reshape(bs, C, L).astype(compute_dtype)
    sparse_in = sparse_fea.astype(compute_dtype)

    # Stroke-boundary masks for the (1,3) conv taps: tiny, avoid any per-step
    # iota / integer modulo inside the kernel (works for any n_stk_pnt).
    p_idx = jnp.arange(L, dtype=jnp.int32) % P
    mprev = (p_idx != 0).astype(compute_dtype).reshape(1, 1, L)
    mnext = (p_idx != P - 1).astype(compute_dtype).reshape(1, 1, L)

    b_tile, vmem_limit = _pick_b_tile(bs, C, Csp, S, P, jnp.dtype(compute_dtype).itemsize)
    nb = bs // b_tile

    grid_spec = pltpu.PrefetchScalarGridSpec(
        num_scalar_prefetch=0,
        grid=(nb,),
        in_specs=[
            pl.BlockSpec((b_tile, Csp, S), lambda i: (i, 0, 0)),   # sparse features
            pl.BlockSpec((b_tile, C, L), lambda i: (i, 0, 0)),     # dense features
            pl.BlockSpec((1, 1, L), lambda i: (0, 0, 0)),          # mask: p == 0
            pl.BlockSpec((1, 1, L), lambda i: (0, 0, 0)),          # mask: p == P-1
            pl.BlockSpec((3, C, C), lambda i: (0, 0, 0)),          # conv taps
            pl.BlockSpec((1, C, 1), lambda i: (0, 0, 0)),          # conv bias
            pl.BlockSpec((Csp, Csp), lambda i: (0, 0)),            # encoder W (sparse)
            pl.BlockSpec((Csp, C), lambda i: (0, 0)),              # encoder W (pooled)
            pl.BlockSpec((1, Csp, 1), lambda i: (0, 0, 0)),        # encoder bias
        ],
        out_specs=pl.BlockSpec((b_tile, Csp, S), lambda i: (i, 0, 0)),
    )

    return pl.pallas_call(
        dense_to_sparse_kernel,
        out_shape=jax.ShapeDtypeStruct((bs, Csp, S), jnp.float32),
        grid_spec=grid_spec,
        compiler_params=pltpu.CompilerParams(
            dimension_semantics=("parallel",),
            vmem_limit_bytes=vmem_limit,
        ),
    )(sparse_in, dense_in, mprev, mnext, wconv, bconv, wenc_s, wenc_d, benc)


# --------------------------------------------------------------------------- #
# pure-JAX reference (eval mode)
# --------------------------------------------------------------------------- #
def reference(sparse_fea, dense_fea, raw, eps=1e-5):
    (conv_w, conv_b, g1, b1, m1, v1, enc_w, enc_b, g2, b2, m2, v2) = raw
    y = lax.conv_general_dilated(
        dense_fea, conv_w, window_strides=(1, 1), padding=((0, 0), (1, 1)),
        dimension_numbers=("NCHW", "OIHW", "NCHW"))
    y = y + conv_b[None, :, None, None]
    y = (y - m1[None, :, None, None]) / jnp.sqrt(v1[None, :, None, None] + eps)
    y = y * g1[None, :, None, None] + b1[None, :, None, None]
    y = _gelu(y)
    pooled = jnp.max(y, axis=3)                                   # (bs, C, S)
    union = jnp.concatenate([sparse_fea, pooled], axis=1)         # (bs, Csp+C, S)
    z = jnp.einsum("oc,bcs->bos", enc_w, union) + enc_b[None, :, None]
    z = (z - m2[None, :, None]) / jnp.sqrt(v2[None, :, None] + eps)
    z = z * g2[None, :, None] + b2[None, :, None]
    return _gelu(z)


if __name__ == "__main__":
    # Small shapes consistent with the module; S*P = 128 keeps the dense blocks
    # lane-dense and bs = 32 exercises a multi-step batch-parallel grid on v7x.
    bs, sparse_in, dense_in, n_stk, n_stk_pnt = 32, 8, 8, 16, 8

    key = jax.random.PRNGKey(0)
    keys = jax.random.split(key, 14)

    sparse_fea = jax.random.normal(keys[0], (bs, sparse_in, n_stk), jnp.float32)
    dense_fea = jax.random.normal(keys[1], (bs, dense_in, n_stk, n_stk_pnt), jnp.float32)

    # deterministic synthetic parameters (eval-mode module)
    conv_w = jax.random.normal(keys[2], (dense_in, dense_in, 1, 3), jnp.float32) * 0.2
    conv_b = jax.random.normal(keys[3], (dense_in,), jnp.float32) * 0.1
    bn1_gamma = 1.0 + 0.1 * jax.random.normal(keys[4], (dense_in,), jnp.float32)
    bn1_beta = 0.1 * jax.random.normal(keys[5], (dense_in,), jnp.float32)
    bn1_mean = 0.05 * jax.random.normal(keys[6], (dense_in,), jnp.float32)
    bn1_var = 1.0 + 0.1 * jax.random.uniform(keys[7], (dense_in,), jnp.float32)

    enc_w = jax.random.normal(keys[8], (sparse_in, sparse_in + dense_in), jnp.float32) * 0.2
    enc_b = jax.random.normal(keys[9], (sparse_in,), jnp.float32) * 0.1
    bn2_gamma = 1.0 + 0.1 * jax.random.normal(keys[10], (sparse_in,), jnp.float32)
    bn2_beta = 0.1 * jax.random.normal(keys[11], (sparse_in,), jnp.float32)
    bn2_mean = 0.05 * jax.random.normal(keys[12], (sparse_in,), jnp.float32)
    bn2_var = 1.0 + 0.1 * jax.random.uniform(keys[13], (sparse_in,), jnp.float32)

    raw = (conv_w, conv_b, bn1_gamma, bn1_beta, bn1_mean, bn1_var,
           enc_w, enc_b, bn2_gamma, bn2_beta, bn2_mean, bn2_var)

    ref = reference(sparse_fea, dense_fea, raw)

    # 1) f32 compute path: validates the kernel math tightly.
    params_f32 = prepare_params(raw, compute_dtype=jnp.float32)
    out_f32 = jax.block_until_ready(
        dense_to_sparse(sparse_fea, dense_fea, params_f32, compute_dtype=jnp.float32))
    assert out_f32.shape == (bs, sparse_in, n_stk)
    err_f32 = float(jnp.max(jnp.abs(out_f32 - ref)))
    assert jnp.allclose(out_f32, ref, atol=1e-3, rtol=1e-3), f"f32 path max err {err_f32}"

    # 2) bf16 compute path (the performance configuration: half the HBM traffic).
    #    Loose tolerance accounts for bf16 input / weight / intermediate rounding.
    params_bf16 = prepare_params(raw, compute_dtype=jnp.bfloat16)
    out_bf16 = jax.block_until_ready(
        dense_to_sparse(sparse_fea, dense_fea, params_bf16, compute_dtype=jnp.bfloat16))
    assert out_bf16.shape == (bs, sparse_in, n_stk)
    err_bf16 = float(jnp.max(jnp.abs(out_bf16 - ref)))
    assert jnp.allclose(out_bf16, ref, atol=1.5e-1, rtol=5e-2), f"bf16 path max err {err_bf16}"

    print("KERNEL_OK")
</pallas_src>

<mosaic_0001>
module attributes {stable_mosaic.version = 11 : i64} {
  func.func @dense_to_sparse_kernel(%arg0: i32, %arg1: memref<16x8x16xf32, #tpu.memory_space<vmem>>, %arg2: memref<16x8x128xf32, #tpu.memory_space<vmem>>, %arg3: memref<1x1x128xf32, #tpu.memory_space<vmem>>, %arg4: memref<1x1x128xf32, #tpu.memory_space<vmem>>, %arg5: memref<3x8x8xf32, #tpu.memory_space<vmem>>, %arg6: memref<1x8x1xf32, #tpu.memory_space<vmem>>, %arg7: memref<8x8xf32, #tpu.memory_space<vmem>>, %arg8: memref<8x8xf32, #tpu.memory_space<vmem>>, %arg9: memref<1x8x1xf32, #tpu.memory_space<vmem>>, %arg10: memref<16x8x16xf32, #tpu.memory_space<vmem>>) attributes {dimension_semantics = [#tpu.dimension_semantics<parallel>], iteration_bounds = array<i64: 2>, scalar_prefetch = 0 : i64, scratch_operands = 0 : i64, tpu.core_type = #tpu.core_type<tc>, window_params = [{transform_indices = @transform_0, window_bounds = array<i64: 16, 8, 16>}, {transform_indices = @transform_1, window_bounds = array<i64: 16, 8, 128>}, {pipeline_mode = #tpu.pipeline_mode<synchronous>, transform_indices = @transform_2, window_bounds = array<i64: 1, 1, 128>}, {pipeline_mode = #tpu.pipeline_mode<synchronous>, transform_indices = @transform_3, window_bounds = array<i64: 1, 1, 128>}, {pipeline_mode = #tpu.pipeline_mode<synchronous>, transform_indices = @transform_4, window_bounds = array<i64: 3, 8, 8>}, {pipeline_mode = #tpu.pipeline_mode<synchronous>, transform_indices = @transform_5, window_bounds = array<i64: 1, 8, 1>}, {pipeline_mode = #tpu.pipeline_mode<synchronous>, transform_indices = @transform_6, window_bounds = array<i64: 8, 8>}, {pipeline_mode = #tpu.pipeline_mode<synchronous>, transform_indices = @transform_7, window_bounds = array<i64: 8, 8>}, {pipeline_mode = #tpu.pipeline_mode<synchronous>, transform_indices = @transform_8, window_bounds = array<i64: 1, 8, 1>}, {transform_indices = @transform_9, window_bounds = array<i64: 16, 8, 16>}]} {
    %c0 = arith.constant 0 : index
    %c0_0 = arith.constant 0 : index
    %c0_1 = arith.constant 0 : index
    %0 = vector.load %arg2[%c0, %c0_0, %c0_1] : memref<16x8x128xf32, #tpu.memory_space<vmem>>, vector<16x8x128xf32>
    %c1_i32 = arith.constant 1 : i32
    %1 = tpu.dynamic_rotate %0 by %c1_i32 dim 2 : vector<16x8x128xf32>, i32 -> vector<16x8x128xf32>
    %c0_2 = arith.constant 0 : index
    %c0_3 = arith.constant 0 : index
    %c0_4 = arith.constant 0 : index
    %2 = vector.load %arg3[%c0_2, %c0_3, %c0_4] : memref<1x1x128xf32, #tpu.memory_space<vmem>>, vector<1x1x128xf32>
    %3 = vector.broadcast %2 : vector<1x1x128xf32> to vector<16x8x128xf32>
    %4 = arith.mulf %1, %3 : vector<16x8x128xf32>
    %c127_i32 = arith.constant 127 : i32
    %5 = tpu.dynamic_rotate %0 by %c127_i32 dim 2 : vector<16x8x128xf32>, i32 -> vector<16x8x128xf32>
    %c0_5 = arith.constant 0 : index
    %c0_6 = arith.constant 0 : index
    %c0_7 = arith.constant 0 : index
    %6 = vector.load %arg4[%c0_5, %c0_6, %c0_7] : memref<1x1x128xf32, #tpu.memory_space<vmem>>, vector<1x1x128xf32>
    %7 = vector.broadcast %6 : vector<1x1x128xf32> to vector<16x8x128xf32>
    %8 = arith.mulf %5, %7 : vector<16x8x128xf32>
    %c0_8 = arith.constant 0 : index
    %c0_9 = arith.constant 0 : index
    %c0_10 = arith.constant 0 : index
    %9 = vector.load %arg5[%c0_8, %c0_9, %c0_10] : memref<3x8x8xf32, #tpu.memory_space<vmem>>, vector<3x8x8xf32>
    %10 = vector.extract_strided_slice %9 {offsets = [0, 0, 0], sizes = [1, 8, 8], strides = [1, 1, 1]} : vector<3x8x8xf32> to vector<1x8x8xf32>
    %11 = vector.shape_cast %10 : vector<1x8x8xf32> to vector<8x8xf32>
    %12 = vector.shape_cast %11 : vector<8x8xf32> to vector<1x8x8xf32>
    %13 = vector.shape_cast %12 : vector<1x8x8xf32> to vector<1x8x8xf32>
    %14 = vector.broadcast %13 : vector<1x8x8xf32> to vector<16x8x8xf32>
    %cst = arith.constant dense<0.000000e+00> : vector<16x8x128xf32>
    %15 = tpu.matmul %14, %4, %cst {dimension_numbers = #tpu.dot_dimension_numbers<[2], [1], [1], [2], [0, 0, 0, 1, 1, 2], [0], [0]>} : vector<16x8x8xf32>, vector<16x8x128xf32>, vector<16x8x128xf32> -> vector<16x8x128xf32>
    %16 = vector.extract_strided_slice %9 {offsets = [1, 0, 0], sizes = [1, 8, 8], strides = [1, 1, 1]} : vector<3x8x8xf32> to vector<1x8x8xf32>
    %17 = vector.shape_cast %16 : vector<1x8x8xf32> to vector<8x8xf32>
    %18 = vector.shape_cast %17 : vector<8x8xf32> to vector<1x8x8xf32>
    %19 = vector.shape_cast %18 : vector<1x8x8xf32> to vector<1x8x8xf32>
    %20 = vector.broadcast %19 : vector<1x8x8xf32> to vector<16x8x8xf32>
    %cst_11 = arith.constant dense<0.000000e+00> : vector<16x8x128xf32>
    %21 = tpu.matmul %20, %0, %cst_11 {dimension_numbers = #tpu.dot_dimension_numbers<[2], [1], [1], [2], [0, 0, 0, 1, 1, 2], [0], [0]>} : vector<16x8x8xf32>, vector<16x8x128xf32>, vector<16x8x128xf32> -> vector<16x8x128xf32>
    %22 = arith.addf %15, %21 : vector<16x8x128xf32>
    %23 = vector.extract_strided_slice %9 {offsets = [2, 0, 0], sizes = [1, 8, 8], strides = [1, 1, 1]} : vector<3x8x8xf32> to vector<1x8x8xf32>
    %24 = vector.shape_cast %23 : vector<1x8x8xf32> to vector<8x8xf32>
    %25 = vector.shape_cast %24 : vector<8x8xf32> to vector<1x8x8xf32>
    %26 = vector.shape_cast %25 : vector<1x8x8xf32> to vector<1x8x8xf32>
    %27 = vector.broadcast %26 : vector<1x8x8xf32> to vector<16x8x8xf32>
    %cst_12 = arith.constant dense<0.000000e+00> : vector<16x8x128xf32>
    %28 = tpu.matmul %27, %8, %cst_12 {dimension_numbers = #tpu.dot_dimension_numbers<[2], [1], [1], [2], [0, 0, 0, 1, 1, 2], [0], [0]>} : vector<16x8x8xf32>, vector<16x8x128xf32>, vector<16x8x128xf32> -> vector<16x8x128xf32>
    %29 = arith.addf %22, %28 : vector<16x8x128xf32>
    %c0_13 = arith.constant 0 : index
    %c0_14 = arith.constant 0 : index
    %c0_15 = arith.constant 0 : index
    %30 = vector.load %arg6[%c0_13, %c0_14, %c0_15] : memref<1x8x1xf32, #tpu.memory_space<vmem>>, vector<1x8x1xf32>
    %31 = vector.broadcast %30 : vector<1x8x1xf32> to vector<16x8x128xf32>
    %32 = arith.addf %29, %31 : vector<16x8x128xf32>
    %cst_16 = arith.constant 5.000000e-01 : f32
    %33 = vector.broadcast %cst_16 : f32 to vector<16x8x128xf32>
    %34 = arith.mulf %33, %32 : vector<16x8x128xf32>
    %cst_17 = arith.constant 4.471500e-02 : f32
    %35 = vector.broadcast %cst_17 : f32 to vector<16x8x128xf32>
    %36 = arith.mulf %35, %32 : vector<16x8x128xf32>
    %37 = arith.mulf %36, %32 : vector<16x8x128xf32>
    %38 = arith.mulf %37, %32 : vector<16x8x128xf32>
    %39 = arith.addf %32, %38 : vector<16x8x128xf32>
    %cst_18 = arith.constant 0.797884583 : f32
    %40 = vector.broadcast %cst_18 : f32 to vector<16x8x128xf32>
    %41 = arith.mulf %40, %39 : vector<16x8x128xf32>
    %42 = math.tanh %41 : vector<16x8x128xf32>
    %cst_19 = arith.constant 1.000000e+00 : f32
    %43 = vector.broadcast %cst_19 : f32 to vector<16x8x128xf32>
    %44 = arith.addf %43, %42 : vector<16x8x128xf32>
    %45 = arith.mulf %34, %44 : vector<16x8x128xf32>
    %46 = vector.shape_cast %45 : vector<16x8x128xf32> to vector<16x8x16x8xf32>
    %cst_20 = arith.constant dense<0xFF800000> : vector<16x8x16xf32>
    %47 = vector.multi_reduction <maximumf>, %46, %cst_20 [3] : vector<16x8x16x8xf32> to vector<16x8x16xf32>
    %c0_21 = arith.constant 0 : index
    %c0_22 = arith.constant 0 : index
    %c0_23 = arith.constant 0 : index
    %48 = vector.load %arg1[%c0_21, %c0_22, %c0_23] : memref<16x8x16xf32, #tpu.memory_space<vmem>>, vector<16x8x16xf32>
    %c0_24 = arith.constant 0 : index
    %c0_25 = arith.constant 0 : index
    %49 = vector.load %arg7[%c0_24, %c0_25] : memref<8x8xf32, #tpu.memory_space<vmem>>, vector<8x8xf32>
    %50 = vector.shape_cast %49 : vector<8x8xf32> to vector<1x8x8xf32>
    %51 = vector.shape_cast %50 : vector<1x8x8xf32> to vector<1x8x8xf32>
    %52 = vector.broadcast %51 : vector<1x8x8xf32> to vector<16x8x8xf32>
    %c0_26 = arith.constant 0 : index
    %c0_27 = arith.constant 0 : index
    %53 = vector.load %arg8[%c0_26, %c0_27] : memref<8x8xf32, #tpu.memory_space<vmem>>, vector<8x8xf32>
    %54 = vector.shape_cast %53 : vector<8x8xf32> to vector<1x8x8xf32>
    %55 = vector.shape_cast %54 : vector<1x8x8xf32> to vector<1x8x8xf32>
    %56 = vector.broadcast %55 : vector<1x8x8xf32> to vector<16x8x8xf32>
    %cst_28 = arith.constant dense<0.000000e+00> : vector<16x8x16xf32>
    %57 = tpu.matmul %52, %48, %cst_28 {dimension_numbers = #tpu.dot_dimension_numbers<[2], [1], [1], [2], [0, 0, 0, 1, 1, 2], [0], [0]>} : vector<16x8x8xf32>, vector<16x8x16xf32>, vector<16x8x16xf32> -> vector<16x8x16xf32>
    %cst_29 = arith.constant dense<0.000000e+00> : vector<16x8x16xf32>
    %58 = tpu.matmul %56, %47, %cst_29 {dimension_numbers = #tpu.dot_dimension_numbers<[2], [1], [1], [2], [0, 0, 0, 1, 1, 2], [0], [0]>} : vector<16x8x8xf32>, vector<16x8x16xf32>, vector<16x8x16xf32> -> vector<16x8x16xf32>
    %59 = arith.addf %57, %58 : vector<16x8x16xf32>
    %c0_30 = arith.constant 0 : index
    %c0_31 = arith.constant 0 : index
    %c0_32 = arith.constant 0 : index
    %60 = vector.load %arg9[%c0_30, %c0_31, %c0_32] : memref<1x8x1xf32, #tpu.memory_space<vmem>>, vector<1x8x1xf32>
    %61 = vector.broadcast %60 : vector<1x8x1xf32> to vector<16x8x16xf32>
    %62 = arith.addf %59, %61 : vector<16x8x16xf32>
    %cst_33 = arith.constant 5.000000e-01 : f32
    %63 = vector.broadcast %cst_33 : f32 to vector<16x8x16xf32>
    %64 = arith.mulf %63, %62 : vector<16x8x16xf32>
    %cst_34 = arith.constant 4.471500e-02 : f32
    %65 = vector.broadcast %cst_34 : f32 to vector<16x8x16xf32>
    %66 = arith.mulf %65, %62 : vector<16x8x16xf32>
    %67 = arith.mulf %66, %62 : vector<16x8x16xf32>
    %68 = arith.mulf %67, %62 : vector<16x8x16xf32>
    %69 = arith.addf %62, %68 : vector<16x8x16xf32>
    %cst_35 = arith.constant 0.797884583 : f32
    %70 = vector.broadcast %cst_35 : f32 to vector<16x8x16xf32>
    %71 = arith.mulf %70, %69 : vector<16x8x16xf32>
    %72 = math.tanh %71 : vector<16x8x16xf32>
    %cst_36 = arith.constant 1.000000e+00 : f32
    %73 = vector.broadcast %cst_36 : f32 to vector<16x8x16xf32>
    %74 = arith.addf %73, %72 : vector<16x8x16xf32>
    %75 = arith.mulf %64, %74 : vector<16x8x16xf32>
    %c0_37 = arith.constant 0 : index
    %c0_38 = arith.constant 0 : index
    %c0_39 = arith.constant 0 : index
    %76 = vector.load %arg10[%c0_37, %c0_38, %c0_39] : memref<16x8x16xf32, #tpu.memory_space<vmem>>, vector<16x8x16xf32>
    tpu.vector_store %arg10[%c0_37, %c0_38, %c0_39], %75 {strides = array<i32>} : memref<16x8x16xf32, #tpu.memory_space<vmem>>, vector<16x8x16xf32>,
    return
  }
  func.func @transform_0(%arg0: i32) -> (i32, i32, i32) {
    %c0_i32 = arith.constant 0 : i32
    %c0_i32_0 = arith.constant 0 : i32
    %c0_i32_1 = arith.constant 0 : i32
    return %arg0, %c0_i32, %c0_i32_0 : i32, i32, i32
  }
  func.func @transform_1(%arg0: i32) -> (i32, i32, i32) {
    %c0_i32 = arith.constant 0 : i32
    %c0_i32_0 = arith.constant 0 : i32
    %c0_i32_1 = arith.constant 0 : i32
    return %arg0, %c0_i32, %c0_i32_0 : i32, i32, i32
  }
  func.func @transform_2(%arg0: i32) -> (i32, i32, i32) {
    %c0_i32 = arith.constant 0 : i32
    %c0_i32_0 = arith.constant 0 : i32
    %c0_i32_1 = arith.constant 0 : i32
    %c0_i32_2 = arith.constant 0 : i32
    return %c0_i32, %c0_i32_0, %c0_i32_1 : i32, i32, i32
  }
  func.func @transform_3(%arg0: i32) -> (i32, i32, i32) {
    %c0_i32 = arith.constant 0 : i32
    %c0_i32_0 = arith.constant 0 : i32
    %c0_i32_1 = arith.constant 0 : i32
    %c0_i32_2 = arith.constant 0 : i32
    return %c0_i32, %c0_i32_0, %c0_i32_1 : i32, i32, i32
  }
  func.func @transform_4(%arg0: i32) -> (i32, i32, i32) {
    %c0_i32 = arith.constant 0 : i32
    %c0_i32_0 = arith.constant 0 : i32
    %c0_i32_1 = arith.constant 0 : i32
    %c0_i32_2 = arith.constant 0 : i32
    return %c0_i32, %c0_i32_0, %c0_i32_1 : i32, i32, i32
  }
  func.func @transform_5(%arg0: i32) -> (i32, i32, i32) {
    %c0_i32 = arith.constant 0 : i32
    %c0_i32_0 = arith.constant 0 : i32
    %c0_i32_1 = arith.constant 0 : i32
    %c0_i32_2 = arith.constant 0 : i32
    return %c0_i32, %c0_i32_0, %c0_i32_1 : i32, i32, i32
  }
  func.func @transform_6(%arg0: i32) -> (i32, i32) {
    %c0_i32 = arith.constant 0 : i32
    %c0_i32_0 = arith.constant 0 : i32
    %c0_i32_1 = arith.constant 0 : i32
    return %c0_i32, %c0_i32_0 : i32, i32
  }
  func.func @transform_7(%arg0: i32) -> (i32, i32) {
    %c0_i32 = arith.constant 0 : i32
    %c0_i32_0 = arith.constant 0 : i32
    %c0_i32_1 = arith.constant 0 : i32
    return %c0_i32, %c0_i32_0 : i32, i32
  }
  func.func @transform_8(%arg0: i32) -> (i32, i32, i32) {
    %c0_i32 = arith.constant 0 : i32
    %c0_i32_0 = arith.constant 0 : i32
    %c0_i32_1 = arith.constant 0 : i32
    %c0_i32_2 = arith.constant 0 : i32
    return %c0_i32, %c0_i32_0, %c0_i32_1 : i32, i32, i32
  }
  func.func @transform_9(%arg0: i32) -> (i32, i32, i32) {
    %c0_i32 = arith.constant 0 : i32
    %c0_i32_0 = arith.constant 0 : i32
    %c0_i32_1 = arith.constant 0 : i32
    return %arg0, %c0_i32, %c0_i32_0 : i32, i32, i32
  }
}

</mosaic_0001>

<bundles_post_ra>
// kernel: tpu_custom_call.1
= control target key start
LH: loop header
LB: loop body
LE: loop exit
PB: predicated region body
PF: predicated region fallthrough
CT: control target
= control target key end

     0   :  { %s14790_s30 = smov 0   ;;  %s20302_s0 = inlined_call_operand.vmem [shape: f32[32,8,16], index: 0, kind: input, shape index: {}]   ;;  %s20303_s1 = inlined_call_operand.vmem [shape: f32[32,8,128], index: 1, kind: input, shape index: {}]   ;;  %s20304_s2 = inlined_call_operand.vmem [shape: f32[1,1,128], index: 2, kind: input, shape index: {}]   ;;  %s20305_s3 = inlined_call_operand.vmem [shape: f32[1,1,128], index: 3, kind: input, shape index: {}]   ;;  %s20306_s4 = inlined_call_operand.vmem [shape: f32[3,8,8], index: 4, kind: input, shape index: {}]   ;;  %s20307_s5 = inlined_call_operand.vmem [shape: f32[1,8,1], index: 5, kind: input, shape index: {}]   ;;  %s20308_s6 = inlined_call_operand.vmem [shape: f32[8,8], index: 6, kind: input, shape index: {}]   ;;  %s20309_s7 = inlined_call_operand.vmem [shape: f32[8,8], index: 7, kind: input, shape index: {}]   ;;  %s20310_s8 = inlined_call_operand.vmem [shape: f32[1,8,1], index: 8, kind: input, shape index: {}]   ;;  %s20311_s9 = inlined_call_operand.vmem [shape: f32[32,8,16], index: 9, kind: output, shape index: {}]  }
   0x1 LB: > { %s13957_s10 = sadd.s32 4294967295, %s14716_s30   ;;  %p13961_p0 = scmp.ge.s32.totalorder %s14716_s30, 1  ;;  %s14716_s30 = sphi %s14790_s30, %s19_s30  }
   0x2   : > { %p299_p1 = scmp.lt.s32.totalorder %s14716_s30, 3 }
   0x4   : > { %p300_p2 = pnand %p13961_p0, %p299_p1 }
   0x6   : > { %303 = sbr.rel (%p300_p2) target bundleno = 1916 (0x77c), region = 56 }
   0xd   : > { %s13962_s11 = sshll.u32 %s13957_s10, 4  ;;  %v20312_v0 = vmov 0.0   ;;  %vm14719_vm0 = vmmov 0   ;;  %v14821_v3 = vld [vmem:[%s20306_s4 + $0x8] sm:$0xff]  ;;  %vm487_vm1 = vcmask 64512   ;;  %s14720_s18 = smov 1  }
   0xe   : > { %p341_p3 = scmp.lt.s32.totalorder %s13962_s11, 31  ;;  %14212 = vmatprep.subr.mxu0 %v20312_v0  ;;  %14214 = vmatprep.mubr.msk.f32.mxu0 %vm14719_vm0, %v20312_v0  ;;  %s14721_s19 = smov 127   ;;  %v14722_v18 = vmov 0   ;;  %v3873_v19 = vld [vmem:[%s20307_s5] sm:$0xff]  ;;  %v15105_v59 = vld [vmem:[%s20306_s4 + $0x10] sm:$0xff]  ;;  %vm9940_vm2 = vcmask 130112  }
   0xf   : > { %14217 = vmatprep.subr.mxu1 %v20312_v0  ;;  %14219 = vmatprep.mubr.msk.f32.mxu1 %vm14719_vm0, %v20312_v0  ;;  %v15001_v20 = vld [vmem:[%s20304_s2] ss:$0 sm:$0xff]  ;;  %s14723_s10 = smov 112   ;;  %s14725_s13 = smov 104   ;;  %vm10005_vm3 = vcmask 1041409   ;;  %vm10007_vm4 = vcmask 1042434  }
  0x10   : > { %s21302_s11 = smov (!%p341_p3, %s13962_s11), 31  ;;  %14642 = vset.pattern.permute.xlu0 %v14722_v18  ;;  %14643 = vset.pattern.permute.xlu1 %v14722_v18  ;;  %v15008_v25 = vld [vmem:[%s20306_s4] sm:$0xff]  ;;  %s14726_s14 = smov 96   ;;  %vm10009_vm5 = vcmask 1043459   ;;  %vm10011_vm6 = vcmask 1044484   ;;  %vm10013_vm7 = vcmask 1045509  }
  0x11   : > { %s14804_s12 = sshll.u32 %s21302_s11, 3  ;;  %v15092_v54 = vld [vmem:[%s20305_s3] ss:$0 sm:$0xff]  ;;  %s14724_s11 = smov 120   ;;  %vm10015_vm8 = vcmask 1046534   ;;  %vm10017_vm9 = vcmask 1047559  }
  0x12   : > { %s14810_s15 = scalar_lea.vmem %s20303_s1, %s14804_s12  ;;  %s14728_s16 = smov 80   ;;  %vm13872_vm10 = vcmask 130048  }
  0x13   : > { %v14813_v1 = vld [vmem:[%s14810_s15] sm:$0xff]  ;;  %v14816_v2 = vld [vmem:[%s14810_s15 + $0x10] sm:$0xff]  ;;  %v14828_v4 = vld [vmem:[%s14810_s15 + $0x8] sm:$0xff]  ;;  %s14729_s17 = smov 72   ;;  %s14732_s20 = smov 48  }
  0x14   : > { %374 = vrot.lane.b32.xlu0 %v14813_v1, %s14720_s18  ;;  %378 = vrot.lane.b32.xlu1 %v14816_v2, %s14720_s18  ;;  %v14831_v5 = vld [vmem:[%s14810_s15 + $0x18] sm:$0xff]  ;;  %v14846_v6 = vld [vmem:[%s14810_s15 + $0x20] sm:$0xff]  ;;  %s14733_s21 = smov 40   ;;  %s14734_s22 = smov 32  }
  0x15   : > { %14213 = vmatpush3.msra.mxu0 %v14813_v1  ;;  %14218 = vmatpush3.msra.mxu1 %v14828_v4  ;;  %v14849_v7 = vld [vmem:[%s14810_s15 + $0x28] sm:$0xff]  ;;  %v14865_v8 = vld [vmem:[%s14810_s15 + $0x30] sm:$0xff]  ;;  %v14868_v9 = vld [vmem:[%s14810_s15 + $0x38] sm:$0xff]  ;;  %s14737_s23 = smov 24   ;;  %s14738_s24 = smov 16  }
  0x16   : > { %14215 = vmatmul.mubr.msk.f32.vlgmr.msra.gmra.mrb[0].mxu0 %vm487_vm1, %v14821_v3  ;;  %14222 = vmatprep.subr.mxu0 %v20312_v0  ;;  %v14884_v10 = vld [vmem:[%s14810_s15 + $0x40] sm:$0xff]  ;;  %v14887_v11 = vld [vmem:[%s14810_s15 + $0x48] sm:$0xff]  ;;  %v368_v12 = vld [vmem:[%s14810_s15 + $0x50] sm:$0xff]  ;;  %s14739_s25 = smov 8  }
  0x17   : > { %14223 = vmatpush3.msra.mxu0 %v14816_v2  ;;  %14224 = vmatprep.mubr.msk.f32.mxu0 %vm14719_vm0, %v20312_v0  ;;  %v369_v13 = vld [vmem:[%s14810_s15 + $0x58] sm:$0xff]  ;;  %v370_v14 = vld [vmem:[%s14810_s15 + $0x60] sm:$0xff]  ;;  %v371_v15 = vld [vmem:[%s14810_s15 + $0x68] sm:$0xff] }
  0x18   : > { %376 = vrot.lane.b32.xlu0 %v14828_v4, %s14720_s18  ;;  %380 = vrot.lane.b32.xlu1 %v14831_v5, %s14720_s18  ;;  %v372_v16 = vld [vmem:[%s14810_s15 + $0x70] sm:$0xff]  ;;  %v373_v17 = vld [vmem:[%s14810_s15 + $0x78] sm:$0xff]  ;;  %s14727_s15 = smov 88  }
  0x19   : > { %14220 = vmatmul.mubr.msk.f32.vlgmr.msra.gmra.mrb[0].mxu1 %vm487_vm1, %v14821_v3  ;;  %14232 = vmatprep.subr.mxu0 %v20312_v0 }
  0x1a   : > { %14225 = vmatmul.mubr.msk.f32.vlgmr.msra.gmra.mrb[2].mxu0 %vm487_vm1, %v14821_v3  ;;  %14227 = vmatprep.subr.mxu1 %v20312_v0 }
  0x1b   : > { %14233 = vmatpush3.msra.mxu0 %v14846_v6  ;;  %14234 = vmatprep.mubr.msk.f32.mxu0 %vm14719_vm0, %v20312_v0 }
  0x1c   : > { %382 = vrot.lane.b32.xlu0 %v14846_v6, %s14720_s18  ;;  %384 = vrot.lane.b32.xlu1 %v14849_v7, %s14720_s18 }
  0x1d   : > { %14228 = vmatpush3.msra.mxu1 %v14831_v5  ;;  %14229 = vmatprep.mubr.msk.f32.mxu1 %vm14719_vm0, %v20312_v0 }
  0x1e   : > { %14235 = vmatmul.mubr.msk.f32.vlgmr.msra.gmra.mrb[4].mxu0 %vm487_vm1, %v14821_v3  ;;  %14230 = vmatmul.mubr.msk.f32.vlgmr.msra.gmra.mrb[2].mxu1 %vm487_vm1, %v14821_v3 }
  0x1f   : > { %14242 = vmatprep.subr.mxu0 %v20312_v0  ;;  %14237 = vmatprep.subr.mxu1 %v20312_v0 }
  0x20   : > { %386 = vrot.lane.b32.xlu0 %v14865_v8, %s14720_s18  ;;  %388 = vrot.lane.b32.xlu1 %v14868_v9, %s14720_s18 }
  0x21   : > { %14243 = vmatpush3.msra.mxu0 %v14865_v8  ;;  %14244 = vmatprep.mubr.msk.f32.mxu0 %vm14719_vm0, %v20312_v0 }
  0x22   : > { %14238 = vmatpush3.msra.mxu1 %v14849_v7  ;;  %14239 = vmatprep.mubr.msk.f32.mxu1 %vm14719_vm0, %v20312_v0 }
  0x23   : > { %14245 = vmatmul.mubr.msk.f32.vlgmr.msra.gmra.mrb[6].mxu0 %vm487_vm1, %v14821_v3  ;;  %14240 = vmatmul.mubr.msk.f32.vlgmr.msra.gmra.mrb[4].mxu1 %vm487_vm1, %v14821_v3 }
  0x24   : > { %390 = vrot.lane.b32.xlu0 %v14884_v10, %s14720_s18  ;;  %392 = vrot.lane.b32.xlu1 %v14887_v11, %s14720_s18 }
  0x25   : > { %14252 = vmatprep.subr.mxu0 %v20312_v0  ;;  %14247 = vmatprep.subr.mxu1 %v20312_v0 }
  0x26   : > { %14253 = vmatpush3.msra.mxu0 %v14884_v10  ;;  %14254 = vmatprep.mubr.msk.f32.mxu0 %vm14719_vm0, %v20312_v0 }
  0x27   : > { %14248 = vmatpush3.msra.mxu1 %v14868_v9  ;;  %14249 = vmatprep.mubr.msk.f32.mxu1 %vm14719_vm0, %v20312_v0 }
  0x28   : > { %394 = vrot.lane.b32.xlu0 %v368_v12, %s14720_s18  ;;  %396 = vrot.lane.b32.xlu1 %v369_v13, %s14720_s18 }
  0x29   : > { %14255 = vmatmul.mubr.msk.f32.vlgmr.msra.gmra.mrb[8].mxu0 %vm487_vm1, %v14821_v3  ;;  %14250 = vmatmul.mubr.msk.f32.vlgmr.msra.gmra.mrb[6].mxu1 %vm487_vm1, %v14821_v3 }
  0x2a   : > { %14262 = vmatprep.subr.mxu0 %v20312_v0  ;;  %14257 = vmatprep.subr.mxu1 %v20312_v0 }
  0x2b   : > { %14263 = vmatpush3.msra.mxu0 %v368_v12  ;;  %14264 = vmatprep.mubr.msk.f32.mxu0 %vm14719_vm0, %v20312_v0 }
  0x2c   : > { %398 = vrot.lane.b32.xlu0 %v370_v14, %s14720_s18  ;;  %400 = vrot.lane.b32.xlu1 %v371_v15, %s14720_s18 }
  0x2d   : > { %14258 = vmatpush3.msra.mxu1 %v14887_v11  ;;  %14259 = vmatprep.mubr.msk.f32.mxu1 %vm14719_vm0, %v20312_v0 }
  0x2e   : > { %14265 = vmatmul.mubr.msk.f32.vlgmr.msra.gmra.mrb[10].mxu0 %vm487_vm1, %v14821_v3  ;;  %14260 = vmatmul.mubr.msk.f32.vlgmr.msra.gmra.mrb[8].mxu1 %vm487_vm1, %v14821_v3 }
  0x2f   : > { %14272 = vmatprep.subr.mxu0 %v20312_v0  ;;  %14267 = vmatprep.subr.mxu1 %v20312_v0 }
  0x30   : > { %402 = vrot.lane.b32.xlu0 %v372_v16, %s14720_s18  ;;  %404 = vrot.lane.b32.xlu1 %v373_v17, %s14720_s18  ;;  %s14730_s18 = smov 64  }
  0x31   : > { %14273 = vmatpush3.msra.mxu0 %v370_v14  ;;  %14274 = vmatprep.mubr.msk.f32.mxu0 %vm14719_vm0, %v20312_v0 }
  0x32   : > { %14268 = vmatpush3.msra.mxu1 %v369_v13  ;;  %14269 = vmatprep.mubr.msk.f32.mxu1 %vm14719_vm0, %v20312_v0 }
  0x33   : > { %14275 = vmatmul.mubr.msk.f32.vlgmr.msra.gmra.mrb[12].mxu0 %vm487_vm1, %v14821_v3  ;;  %14270 = vmatmul.mubr.msk.f32.vlgmr.msra.gmra.mrb[10].mxu1 %vm487_vm1, %v14821_v3 }
  0x34   : > { %429 = vrot.lane.b32.xlu0 %v14813_v1, %s14721_s19  ;;  %431 = vrot.lane.b32.xlu1 %v14828_v4, %s14721_s19 }
  0x35   : > { %14282 = vmatprep.subr.mxu0 %v20312_v0  ;;  %14277 = vmatprep.subr.mxu1 %v20312_v0 }
  0x36   : > { %14283 = vmatpush3.msra.mxu0 %v372_v16  ;;  %14284 = vmatprep.mubr.msk.f32.mxu0 %vm14719_vm0, %v20312_v0 }
  0x37   : > { %14278 = vmatpush3.msra.mxu1 %v371_v15  ;;  %14279 = vmatprep.mubr.msk.f32.mxu1 %vm14719_vm0, %v20312_v0 }
  0x38   : > { %433 = vrot.lane.b32.xlu0 %v14816_v2, %s14721_s19  ;;  %435 = vrot.lane.b32.xlu1 %v14831_v5, %s14721_s19 }
  0x39   : > { %14285 = vmatmul.mubr.msk.f32.vlgmr.msra.gmra.mrb[14].mxu0 %vm487_vm1, %v14821_v3  ;;  %14280 = vmatmul.mubr.msk.f32.vlgmr.msra.gmra.mrb[12].mxu1 %vm487_vm1, %v14821_v3 }
  0x3a   : > { %14287 = vmatprep.subr.mxu1 %v20312_v0  ;;  %14292 = vmatprep.subr.mxu0 %v20312_v0 }
  0x3b   : > { %14288 = vmatpush3.msra.mxu1 %v373_v17  ;;  %14289 = vmatprep.mubr.msk.f32.mxu1 %vm14719_vm0, %v20312_v0 }
  0x3c   : > { %437 = vrot.lane.b32.xlu0 %v14846_v6, %s14721_s19  ;;  %439 = vrot.lane.b32.xlu1 %v14849_v7, %s14721_s19 }
  0x3d   : > { %14294 = vmatprep.mubr.msk.f32.mxu0 %vm14719_vm0, %v20312_v0  ;;  %14290 = vmatmul.mubr.msk.f32.vlgmr.msra.gmra.mrb[14].mxu1 %vm487_vm1, %v14821_v3 }
  0x3e   : > { %14297 = vmatprep.subr.mxu1 %v20312_v0  ;;  %14299 = vmatprep.mubr.msk.f32.mxu1 %vm14719_vm0, %v20312_v0 }
  0x40   : > { %441 = vrot.lane.b32.xlu0 %v14865_v8, %s14721_s19  ;;  %443 = vrot.lane.b32.xlu1 %v14868_v9, %s14721_s19 }
  0x44   : > { %445 = vrot.lane.b32.xlu0 %v14884_v10, %s14721_s19  ;;  %447 = vrot.lane.b32.xlu1 %v14887_v11, %s14721_s19 }
  0x48   : > { %449 = vrot.lane.b32.xlu0 %v368_v12, %s14721_s19  ;;  %451 = vrot.lane.b32.xlu1 %v369_v13, %s14721_s19 }
  0x4c   : > { %453 = vrot.lane.b32.xlu0 %v370_v14, %s14721_s19  ;;  %455 = vrot.lane.b32.xlu1 %v371_v15, %s14721_s19 }
  0x50   : > { %457 = vrot.lane.b32.xlu0 %v372_v16, %s14721_s19  ;;  %459 = vrot.lane.b32.xlu1 %v373_v17, %s14721_s19  ;;  %s14731_s19 = smov 56  }
  0x54   : > { %3876 = vperm.xlu0 %14642, %v3873_v19  }
  0x86   : > { %v375_v21 = vpop.permute.xlu0 %374  ;;  %v379_v22 = vpop.permute.xlu1 %378 }
  0x87   : > { %v413_v23 = vmul.f32 %v15001_v20, %v375_v21  ;;  %v415_v24 = vmul.f32 %v15001_v20, %v379_v22 }
  0x89   : > { %14293 = vmatpush3.msra.mxu0 %v413_v23 }
  0x8a   : > { %v377_v26 = vpop.permute.xlu0 %376  ;;  %14295 = vmatmul.mubr.msk.f32.vlgmr.msra.gmra.mrb[16].mxu0 %vm487_vm1, %v15008_v25  ;;  %14302 = vmatprep.subr.mxu0 %v20312_v0  ;;  %v381_v27 = vpop.permute.xlu1 %380 }
  0x8b   : > { %v414_v28 = vmul.f32 %v15001_v20, %v377_v26  ;;  %14303 = vmatpush3.msra.mxu0 %v415_v24  ;;  %14304 = vmatprep.mubr.msk.f32.mxu0 %vm14719_vm0, %v20312_v0  ;;  %v416_v29 = vmul.f32 %v15001_v20, %v381_v27 }
  0x8c   : > { %14312 = vmatprep.subr.mxu0 %v20312_v0 }
  0x8d   : > { %14298 = vmatpush3.msra.mxu1 %v414_v28 }
  0x8e   : > { %14300 = vmatmul.mubr.msk.f32.vlgmr.msra.gmra.mrb[16].mxu1 %vm487_vm1, %v15008_v25  ;;  %v383_v30 = vpop.permute.xlu0 %382  ;;  %14305 = vmatmul.mubr.msk.f32.vlgmr.msra.gmra.mrb[18].mxu0 %vm487_vm1, %v15008_v25  ;;  %v385_v31 = vpop.permute.xlu1 %384 }
  0x8f   : > { %v417_v32 = vmul.f32 %v15001_v20, %v383_v30  ;;  %14307 = vmatprep.subr.mxu1 %v20312_v0  ;;  %14309 = vmatprep.mubr.msk.f32.mxu1 %vm14719_vm0, %v20312_v0  ;;  %v418_v33 = vmul.f32 %v15001_v20, %v385_v31 }
  0x90   : > { %14308 = vmatpush3.msra.mxu1 %v416_v29  ;;  %14314 = vmatprep.mubr.msk.f32.mxu0 %vm14719_vm0, %v20312_v0 }
  0x91   : > { %14313 = vmatpush3.msra.mxu0 %v417_v32  ;;  %14317 = vmatprep.subr.mxu1 %v20312_v0 }
  0x92   : > { %14310 = vmatmul.mubr.msk.f32.vlgmr.msra.gmra.mrb[18].mxu1 %vm487_vm1, %v15008_v25  ;;  %v387_v34 = vpop.permute.xlu0 %386  ;;  %14315 = vmatmul.mubr.msk.f32.vlgmr.msra.gmra.mrb[20].mxu0 %vm487_vm1, %v15008_v25  ;;  %v389_v35 = vpop.permute.xlu1 %388 }
  0x93   : > { %v419_v36 = vmul.f32 %v15001_v20, %v387_v34  ;;  %14322 = vmatprep.subr.mxu0 %v20312_v0  ;;  %14318 = vmatpush3.msra.mxu1 %v418_v33  ;;  %v420_v37 = vmul.f32 %v15001_v20, %v389_v35 }
  0x94   : > { %14319 = vmatprep.mubr.msk.f32.mxu1 %vm14719_vm0, %v20312_v0  ;;  %14324 = vmatprep.mubr.msk.f32.mxu0 %vm14719_vm0, %v20312_v0 }
  0x95   : > { %14323 = vmatpush3.msra.mxu0 %v419_v36  ;;  %14327 = vmatprep.subr.mxu1 %v20312_v0 }
  0x96   : > { %14320 = vmatmul.mubr.msk.f32.vlgmr.msra.gmra.mrb[20].mxu1 %vm487_vm1, %v15008_v25  ;;  %v391_v38 = vpop.permute.xlu0 %390  ;;  %14325 = vmatmul.mubr.msk.f32.vlgmr.msra.gmra.mrb[22].mxu0 %vm487_vm1, %v15008_v25  ;;  %v393_v39 = vpop.permute.xlu1 %392 }
  0x97   : > { %v421_v40 = vmul.f32 %v15001_v20, %v391_v38  ;;  %14332 = vmatprep.subr.mxu0 %v20312_v0  ;;  %14328 = vmatpush3.msra.mxu1 %v420_v37  ;;  %v422_v41 = vmul.f32 %v15001_v20, %v393_v39 }
  0x98   : > { %14329 = vmatprep.mubr.msk.f32.mxu1 %vm14719_vm0, %v20312_v0  ;;  %14334 = vmatprep.mubr.msk.f32.mxu0 %vm14719_vm0, %v20312_v0 }
  0x99   : > { %14333 = vmatpush3.msra.mxu0 %v421_v40  ;;  %14337 = vmatprep.subr.mxu1 %v20312_v0 }
  0x9a   : > { %14330 = vmatmul.mubr.msk.f32.vlgmr.msra.gmra.mrb[22].mxu1 %vm487_vm1, %v15008_v25  ;;  %v395_v42 = vpop.permute.xlu0 %394  ;;  %14335 = vmatmul.mubr.msk.f32.vlgmr.msra.gmra.mrb[24].mxu0 %vm487_vm1, %v15008_v25  ;;  %v397_v43 = vpop.permute.xlu1 %396 }
  0x9b   : > { %v423_v44 = vmul.f32 %v15001_v20, %v395_v42  ;;  %14342 = vmatprep.subr.mxu0 %v20312_v0  ;;  %14338 = vmatpush3.msra.mxu1 %v422_v41  ;;  %v424_v45 = vmul.f32 %v15001_v20, %v397_v43 }
  0x9c   : > { %14339 = vmatprep.mubr.msk.f32.mxu1 %vm14719_vm0, %v20312_v0  ;;  %14344 = vmatprep.mubr.msk.f32.mxu0 %vm14719_vm0, %v20312_v0 }
  0x9d   : > { %14343 = vmatpush3.msra.mxu0 %v423_v44  ;;  %14347 = vmatprep.subr.mxu1 %v20312_v0 }
  0x9e   : > { %14340 = vmatmul.mubr.msk.f32.vlgmr.msra.gmra.mrb[24].mxu1 %vm487_vm1, %v15008_v25  ;;  %v399_v46 = vpop.permute.xlu0 %398  ;;  %14345 = vmatmul.mubr.msk.f32.vlgmr.msra.gmra.mrb[26].mxu0 %vm487_vm1, %v15008_v25  ;;  %v401_v47 = vpop.permute.xlu1 %400 }
  0x9f   : > { %v425_v48 = vmul.f32 %v15001_v20, %v399_v46  ;;  %14352 = vmatprep.subr.mxu0 %v20312_v0  ;;  %14348 = vmatpush3.msra.mxu1 %v424_v45  ;;  %v426_v49 = vmul.f32 %v15001_v20, %v401_v47 }
  0xa0   : > { %14349 = vmatprep.mubr.msk.f32.mxu1 %vm14719_vm0, %v20312_v0  ;;  %14354 = vmatprep.mubr.msk.f32.mxu0 %vm14719_vm0, %v20312_v0 }
  0xa1   : > { %14353 = vmatpush3.msra.mxu0 %v425_v48  ;;  %14357 = vmatprep.subr.mxu1 %v20312_v0 }
  0xa2   : > { %14350 = vmatmul.mubr.msk.f32.vlgmr.msra.gmra.mrb[26].mxu1 %vm487_vm1, %v15008_v25  ;;  %v403_v50 = vpop.permute.xlu0 %402  ;;  %14355 = vmatmul.mubr.msk.f32.vlgmr.msra.gmra.mrb[28].mxu0 %vm487_vm1, %v15008_v25  ;;  %v405_v51 = vpop.permute.xlu1 %404 }
  0xa3   : > { %v427_v52 = vmul.f32 %v15001_v20, %v403_v50  ;;  %14362 = vmatprep.subr.mxu0 %v20312_v0  ;;  %14358 = vmatpush3.msra.mxu1 %v426_v49  ;;  %v428_v53 = vmul.f32 %v15001_v20, %v405_v51 }
  0xa4   : > { %14359 = vmatprep.mubr.msk.f32.mxu1 %vm14719_vm0, %v20312_v0  ;;  %14364 = vmatprep.mubr.msk.f32.mxu0 %vm14719_vm0, %v20312_v0 }
  0xa5   : > { %14363 = vmatpush3.msra.mxu0 %v427_v52  ;;  %14367 = vmatprep.subr.mxu1 %v20312_v0 }
  0xa6   : > { %14360 = vmatmul.mubr.msk.f32.vlgmr.msra.gmra.mrb[28].mxu1 %vm487_vm1, %v15008_v25  ;;  %v430_v55 = vpop.permute.xlu0 %429  ;;  %14365 = vmatmul.mubr.msk.f32.vlgmr.msra.gmra.mrb[30].mxu0 %vm487_vm1, %v15008_v25  ;;  %v432_v56 = vpop.permute.xlu1 %431 }
  0xa7   : > { %v468_v57 = vmul.f32 %v15092_v54, %v430_v55  ;;  %14372 = vmatprep.subr.mxu0 %v20312_v0  ;;  %14368 = vmatpush3.msra.mxu1 %v428_v53  ;;  %v469_v58 = vmul.f32 %v15092_v54, %v432_v56 }
  0xa8   : > { %14369 = vmatprep.mubr.msk.f32.mxu1 %vm14719_vm0, %v20312_v0  ;;  %14374 = vmatprep.mubr.msk.f32.mxu0 %vm14719_vm0, %v20312_v0 }
  0xa9   : > { %14373 = vmatpush3.msra.mxu0 %v468_v57  ;;  %14377 = vmatprep.subr.mxu1 %v20312_v0 }
  0xaa   : > { %14370 = vmatmul.mubr.msk.f32.vlgmr.msra.gmra.mrb[30].mxu1 %vm487_vm1, %v15008_v25  ;;  %v434_v60 = vpop.permute.xlu0 %433  ;;  %14375 = vmatmul.mubr.msk.f32.vlgmr.msra.gmra.mrb[32].mxu0 %vm487_vm1, %v15105_v59  ;;  %v436_v61 = vpop.permute.xlu1 %435 }
  0xab   : > { %v470_v62 = vmul.f32 %v15092_v54, %v434_v60  ;;  %14382 = vmatprep.subr.mxu0 %v20312_v0  ;;  %14378 = vmatpush3.msra.mxu1 %v469_v58  ;;  %v471_v63 = vmul.f32 %v15092_v54, %v436_v61 }
  0xac   : > { %14379 = vmatprep.mubr.msk.f32.mxu1 %vm14719_vm0, %v20312_v0  ;;  %14384 = vmatprep.mubr.msk.f32.mxu0 %vm14719_vm0, %v20312_v0 }
  0xad   : > { %14383 = vmatpush3.msra.mxu0 %v470_v62  ;;  %14387 = vmatprep.subr.mxu1 %v20312_v0 }
  0xae   : > { %14380 = vmatmul.mubr.msk.f32.vlgmr.msra.gmra.mrb[32].mxu1 %vm487_vm1, %v15105_v59  ;;  %v438_v1 = vpop.permute.xlu0 %437  ;;  %14385 = vmatmul.mubr.msk.f32.vlgmr.msra.gmra.mrb[34].mxu0 %vm487_vm1, %v15105_v59  ;;  %v440_v2 = vpop.permute.xlu1 %439 }
  0xaf   : > { %v472_v3 = vmul.f32 %v15092_v54, %v438_v1  ;;  %14392 = vmatprep.subr.mxu0 %v20312_v0  ;;  %14388 = vmatpush3.msra.mxu1 %v471_v63  ;;  %v473_v4 = vmul.f32 %v15092_v54, %v440_v2 }
  0xb0   : > { %14389 = vmatprep.mubr.msk.f32.mxu1 %vm14719_vm0, %v20312_v0  ;;  %14394 = vmatprep.mubr.msk.f32.mxu0 %vm14719_vm0, %v20312_v0 }
  0xb1   : > { %14393 = vmatpush3.msra.mxu0 %v472_v3  ;;  %14397 = vmatprep.subr.mxu1 %v20312_v0 }
  0xb2   : > { %14390 = vmatmul.mubr.msk.f32.vlgmr.msra.gmra.mrb[34].mxu1 %vm487_vm1, %v15105_v59  ;;  %v442_v5 = vpop.permute.xlu0 %441  ;;  %14395 = vmatmul.mubr.msk.f32.vlgmr.msra.gmra.mrb[36].mxu0 %vm487_vm1, %v15105_v59  ;;  %v444_v6 = vpop.permute.xlu1 %443 }
  0xb3   : > { %v474_v7 = vmul.f32 %v15092_v54, %v442_v5  ;;  %14402 = vmatprep.subr.mxu0 %v20312_v0  ;;  %14398 = vmatpush3.msra.mxu1 %v473_v4  ;;  %v475_v8 = vmul.f32 %v15092_v54, %v444_v6 }
  0xb4   : > { %14399 = vmatprep.mubr.msk.f32.mxu1 %vm14719_vm0, %v20312_v0  ;;  %14404 = vmatprep.mubr.msk.f32.mxu0 %vm14719_vm0, %v20312_v0 }
  0xb5   : > { %14403 = vmatpush3.msra.mxu0 %v474_v7  ;;  %14407 = vmatprep.subr.mxu1 %v20312_v0 }
  0xb6   : > { %14400 = vmatmul.mubr.msk.f32.vlgmr.msra.gmra.mrb[36].mxu1 %vm487_vm1, %v15105_v59  ;;  %v446_v9 = vpop.permute.xlu0 %445  ;;  %14405 = vmatmul.mubr.msk.f32.vlgmr.msra.gmra.mrb[38].mxu0 %vm487_vm1, %v15105_v59  ;;  %v448_v10 = vpop.permute.xlu1 %447 }
  0xb7   : > { %v476_v11 = vmul.f32 %v15092_v54, %v446_v9  ;;  %14412 = vmatprep.subr.mxu0 %v20312_v0  ;;  %14408 = vmatpush3.msra.mxu1 %v475_v8  ;;  %v477_v12 = vmul.f32 %v15092_v54, %v448_v10 }
  0xb8   : > { %14409 = vmatprep.mubr.msk.f32.mxu1 %vm14719_vm0, %v20312_v0  ;;  %14414 = vmatprep.mubr.msk.f32.mxu0 %vm14719_vm0, %v20312_v0 }
  0xb9   : > { %14413 = vmatpush3.msra.mxu0 %v476_v11  ;;  %14417 = vmatprep.subr.mxu1 %v20312_v0 }
  0xba   : > { %14410 = vmatmul.mubr.msk.f32.vlgmr.msra.gmra.mrb[38].mxu1 %vm487_vm1, %v15105_v59  ;;  %v450_v13 = vpop.permute.xlu0 %449  ;;  %14415 = vmatmul.mubr.msk.f32.vlgmr.msra.gmra.mrb[40].mxu0 %vm487_vm1, %v15105_v59  ;;  %v452_v14 = vpop.permute.xlu1 %451 }
  0xbb   : > { %v478_v15 = vmul.f32 %v15092_v54, %v450_v13  ;;  %14422 = vmatprep.subr.mxu0 %v20312_v0  ;;  %14418 = vmatpush3.msra.mxu1 %v477_v12  ;;  %v479_v16 = vmul.f32 %v15092_v54, %v452_v14 }
  0xbc   : > { %14419 = vmatprep.mubr.msk.f32.mxu1 %vm14719_vm0, %v20312_v0  ;;  %14424 = vmatprep.mubr.msk.f32.mxu0 %vm14719_vm0, %v20312_v0 }
  0xbd   : > { %14423 = vmatpush3.msra.mxu0 %v478_v15  ;;  %14427 = vmatprep.subr.mxu1 %v20312_v0 }
  0xbe   : > { %14420 = vmatmul.mubr.msk.f32.vlgmr.msra.gmra.mrb[40].mxu1 %vm487_vm1, %v15105_v59  ;;  %v454_v17 = vpop.permute.xlu0 %453  ;;  %14425 = vmatmul.mubr.msk.f32.vlgmr.msra.gmra.mrb[42].mxu0 %vm487_vm1, %v15105_v59  ;;  %v456_v18 = vpop.permute.xlu1 %455 }
  0xbf   : > { %v480_v19 = vmul.f32 %v15092_v54, %v454_v17  ;;  %14432 = vmatprep.subr.mxu0 %v20312_v0  ;;  %14428 = vmatpush3.msra.mxu1 %v479_v16  ;;  %v481_v20 = vmul.f32 %v15092_v54, %v456_v18 }
  0xc0   : > { %14429 = vmatprep.mubr.msk.f32.mxu1 %vm14719_vm0, %v20312_v0  ;;  %14434 = vmatprep.mubr.msk.f32.mxu0 %vm14719_vm0, %v20312_v0 }
  0xc1   : > { %14433 = vmatpush3.msra.mxu0 %v480_v19  ;;  %14437 = vmatprep.subr.mxu1 %v20312_v0 }
  0xc2   : > { %14430 = vmatmul.mubr.msk.f32.vlgmr.msra.gmra.mrb[42].mxu1 %vm487_vm1, %v15105_v59  ;;  %v458_v21 = vpop.permute.xlu0 %457  ;;  %14435 = vmatmul.mubr.msk.f32.vlgmr.msra.gmra.mrb[44].mxu0 %vm487_vm1, %v15105_v59  ;;  %v460_v22 = vpop.permute.xlu1 %459 }
  0xc3   : > { %v482_v23 = vmul.f32 %v15092_v54, %v458_v21  ;;  %14442 = vmatprep.subr.mxu0 %v20312_v0  ;;  %14438 = vmatpush3.msra.mxu1 %v481_v20  ;;  %v483_v24 = vmul.f32 %v15092_v54, %v460_v22 }
  0xc4   : > { %14439 = vmatprep.mubr.msk.f32.mxu1 %vm14719_vm0, %v20312_v0  ;;  %14444 = vmatprep.mubr.msk.f32.mxu0 %vm14719_vm0, %v20312_v0 }
  0xc5   : > { %14443 = vmatpush3.msra.mxu0 %v482_v23  ;;  %14447 = vmatprep.subr.mxu1 %v20312_v0 }
  0xc6   : > { %14440 = vmatmul.mubr.msk.f32.vlgmr.msra.gmra.mrb[44].mxu1 %vm487_vm1, %v15105_v59  ;;  %14445 = vmatmul.mubr.msk.f32.vlgmr.msra.gmra.mrb[46].mxu0 %vm487_vm1, %v15105_v59 }
  0xc7   : > { %14448 = vmatpush3.msra.mxu1 %v483_v24  ;;  %14449 = vmatprep.mubr.msk.f32.mxu1 %vm14719_vm0, %v20312_v0 }
  0xc8   : > { %14452 = vmatprep.subr.mxu0 %v20312_v0  ;;  %14457 = vmatprep.subr.mxu1 %v20312_v0 }
  0xc9   : > { %14454 = vmatprep.mubr.msk.f32.mxu0 %vm14719_vm0, %v20312_v0 }
  0xca   : > { %14450 = vmatmul.mubr.msk.f32.vlgmr.msra.gmra.mrb[46].mxu1 %vm487_vm1, %v15105_v59 }
  0xcb   : > { %14459 = vmatprep.mubr.msk.f32.mxu1 %vm14719_vm0, %v20312_v0 }
  0xe9   : > { %v557_v25 = vpop.f32.mrb[0].mxu0 }
  0xea   : > { %v14216_v26 = vpop.f32.mrb[1].mxu0 }
  0xec   : > { %v627_v27 = vpop.f32.mrb[0].mxu1 }
  0xed   : > { %v697_v28 = vpop.f32.mrb[2].mxu0  ;;  %v14221_v29 = vpop.f32.mrb[1].mxu1 }
  0xee   : > { %v14226_v30 = vpop.f32.mrb[3].mxu0 }
  0xf1   : > { %v837_v31 = vpop.f32.mrb[4].mxu0  ;;  %v767_v32 = vpop.f32.mrb[2].mxu1 }
  0xf2   : > { %v14236_v33 = vpop.f32.mrb[5].mxu0  ;;  %v14231_v34 = vpop.f32.mrb[3].mxu1 }
  0xf6   : > { %v977_v35 = vpop.f32.mrb[6].mxu0  ;;  %v907_v36 = vpop.f32.mrb[4].mxu1 }
  0xf7   : > { %v14246_v37 = vpop.f32.mrb[7].mxu0  ;;  %v14241_v38 = vpop.f32.mrb[5].mxu1 }
  0xfc   : > { %v1117_v39 = vpop.f32.mrb[8].mxu0  ;;  %v1047_v40 = vpop.f32.mrb[6].mxu1 }
  0xfd   : > { %v14256_v41 = vpop.f32.mrb[9].mxu0  ;;  %v14251_v42 = vpop.f32.mrb[7].mxu1 }
 0x101   : > { %v1257_v43 = vpop.f32.mrb[10].mxu0  ;;  %v1187_v44 = vpop.f32.mrb[8].mxu1 }
 0x102   : > { %v14266_v45 = vpop.f32.mrb[11].mxu0  ;;  %v14261_v46 = vpop.f32.mrb[9].mxu1 }
 0x106   : > { %v1397_v47 = vpop.f32.mrb[12].mxu0  ;;  %v1327_v48 = vpop.f32.mrb[10].mxu1 }
 0x107   : > { %v14276_v49 = vpop.f32.mrb[13].mxu0  ;;  %v14271_v50 = vpop.f32.mrb[11].mxu1 }
 0x10c   : > { %v1537_v51 = vpop.f32.mrb[14].mxu0  ;;  %v1467_v52 = vpop.f32.mrb[12].mxu1 }
 0x10d   : > { %v14286_v53 = vpop.f32.mrb[15].mxu0  ;;  %v14281_v54 = vpop.f32.mrb[13].mxu1 }
 0x110   : > { %v1607_v55 = vpop.f32.mrb[14].mxu1 }
 0x111   : > { %v14291_v56 = vpop.f32.mrb[15].mxu1 }
 0x15d   : > { %v1680_v57 = vpop.f32.mrb[16].mxu0 }
 0x15e   : > { %v1681_v58 = vadd.f32 %v1680_v57, %v557_v25  ;;  %v14296_v59 = vpop.f32.mrb[17].mxu0 }
 0x161   : > { %v1750_v60 = vpop.f32.mrb[16].mxu1  ;;  %v1820_v61 = vpop.f32.mrb[18].mxu0 }
 0x162   : > { %v1751_v62 = vadd.f32 %v1750_v60, %v627_v27  ;;  %v1821_v63 = vadd.f32 %v1820_v61, %v697_v28  ;;  %v14306_v1 = vpop.f32.mrb[19].mxu0  ;;  %v14301_v2 = vpop.f32.mrb[17].mxu1 }
 0x165   : > { %v1890_v3 = vpop.f32.mrb[18].mxu1  ;;  %v1960_v4 = vpop.f32.mrb[20].mxu0 }
 0x166   : > { %v1891_v5 = vadd.f32 %v1890_v3, %v767_v32  ;;  %v1961_v6 = vadd.f32 %v1960_v4, %v837_v31  ;;  %v14316_v7 = vpop.f32.mrb[21].mxu0  ;;  %v14311_v8 = vpop.f32.mrb[19].mxu1 }
 0x169   : > { %v2030_v9 = vpop.f32.mrb[20].mxu1  ;;  %v2100_v10 = vpop.f32.mrb[22].mxu0 }
 0x16a   : > { %v2031_v11 = vadd.f32 %v2030_v9, %v907_v36  ;;  %v2101_v12 = vadd.f32 %v2100_v10, %v977_v35  ;;  %v14326_v13 = vpop.f32.mrb[23].mxu0  ;;  %v14321_v14 = vpop.f32.mrb[21].mxu1 }
 0x16d   : > { %v2170_v15 = vpop.f32.mrb[22].mxu1  ;;  %v2240_v16 = vpop.f32.mrb[24].mxu0 }
 0x16e   : > { %v15210_v17 = vadd.f32 %v2170_v15, %v1047_v40  ;;  %v15212_v18 = vadd.f32 %v2240_v16, %v1117_v39  ;;  %v14336_v19 = vpop.f32.mrb[25].mxu0  ;;  %v14331_v20 = vpop.f32.mrb[23].mxu1 }
 0x16f   : > { %v15226_v39 = vpop.permute.xlu0 %3876 }
 0x171   : > { %v2310_v21 = vpop.f32.mrb[24].mxu1  ;;  %v2380_v22 = vpop.f32.mrb[26].mxu0 }
 0x172   : > { %v15214_v23 = vadd.f32 %v2310_v21, %v1187_v44  ;;  %v15216_v24 = vadd.f32 %v2380_v22, %v1257_v43  ;;  %v14346_v25 = vpop.f32.mrb[27].mxu0  ;;  %v14341_v26 = vpop.f32.mrb[25].mxu1 }
 0x175   : > { %v2450_v27 = vpop.f32.mrb[26].mxu1  ;;  %v2520_v28 = vpop.f32.mrb[28].mxu0 }
 0x176   : > { %v15218_v29 = vadd.f32 %v2450_v27, %v1327_v48  ;;  %v15220_v30 = vadd.f32 %v2520_v28, %v1397_v47  ;;  %v14356_v31 = vpop.f32.mrb[29].mxu0  ;;  %v14351_v32 = vpop.f32.mrb[27].mxu1 }
 0x179   : > { %v2590_v33 = vpop.f32.mrb[28].mxu1  ;;  %v2660_v34 = vpop.f32.mrb[30].mxu0 }
 0x17a   : > { %v15222_v35 = vadd.f32 %v2590_v33, %v1467_v52  ;;  %v15224_v36 = vadd.f32 %v2660_v34, %v1537_v51  ;;  %v14366_v37 = vpop.f32.mrb[31].mxu0  ;;  %v14361_v38 = vpop.f32.mrb[29].mxu1 }
 0x17d   : > { %v2730_v40 = vpop.f32.mrb[30].mxu1  ;;  %v2803_v41 = vpop.f32.mrb[32].mxu0 }
 0x17e   : > { %v15228_v42 = vadd.f32 %v2730_v40, %v1607_v55  ;;  %v3857_v43 = vadd.f32 %v2803_v41, %v1681_v58  ;;  %v14376_v44 = vpop.f32.mrb[33].mxu0  ;;  %v14371_v45 = vpop.f32.mrb[31].mxu1 }
 0x180   : > { %v3879_v46 = vadd.f32 %v15226_v39, %v3857_v43 }
 0x181   : > { %v2873_v47 = vpop.f32.mrb[32].mxu1  ;;  %v2943_v48 = vpop.f32.mrb[34].mxu0 }
 0x182   : > { %v3911_v49 = vmul.f32 0.044715, %v3879_v46  ;;  %v3858_v50 = vadd.f32 %v2873_v47, %v1751_v62  ;;  %v3859_v52 = vadd.f32 %v2943_v48, %v1821_v63  ;;  %v14381_v51 = vpop.f32.mrb[33].mxu1  ;;  %v14386_v53 = vpop.f32.mrb[35].mxu0 }
 0x184   : > { %v3927_v54 = vmul.f32 %v3911_v49, %v3879_v46  ;;  %v3880_v56 = vadd.f32 %v15226_v39, %v3858_v50 }
 0x185   : > { %v3013_v57 = vpop.f32.mrb[34].mxu1  ;;  %v3083_v59 = vpop.f32.mrb[36].mxu0 }
 0x186   : > { %v3943_v60 = vmul.f32 %v3927_v54, %v3879_v46  ;;  %v3912_v55 = vmul.f32 0.044715, %v3880_v56  ;;  %v14391_v61 = vpop.f32.mrb[35].mxu1  ;;  %v14396_v58 = vpop.f32.mrb[37].mxu0  ;;  %v15232_v1 = vadd.f32 %v3013_v57, %v1891_v5  ;;  %v15234_v2 = vadd.f32 %v3083_v59, %v1961_v6 }
 0x187   : > { %v3896_v47 = vmul.f32 0.5, %v3880_v56 }
 0x188   : > { %v3959_v3 = vadd.f32 %v3943_v60, %v3879_v46  ;;  %v3928_v4 = vmul.f32 %v3912_v55, %v3880_v56  ;;  %v3882_v53 = vadd.f32 %v15226_v39, %v15232_v1 }
 0x189   : > { %v3153_v7 = vpop.f32.mrb[36].mxu1  ;;  %v3223_v62 = vpop.f32.mrb[38].mxu0 }
 0x18a   : > { %v3975_v63 = vmul.f32 0.7978846, %v3959_v3  ;;  %v3944_v8 = vmul.f32 %v3928_v4, %v3880_v56  ;;  %v15236_v9 = vadd.f32 %v3153_v7, %v2031_v11  ;;  %v15238_v10 = vadd.f32 %v3223_v62, %v2101_v12  ;;  %v14401_v13 = vpop.f32.mrb[37].mxu1  ;;  %v14406_v14 = vpop.f32.mrb[39].mxu0 }
 0x18c   : > { %14644 = vtanh.f32 %v3975_v63  ;;  %v3960_v15 = vadd.f32 %v3944_v8, %v3880_v56  ;;  %v3914_v56 = vmul.f32 0.044715, %v3882_v53  ;;  %v3898_v63 = vmul.f32 0.5, %v3882_v53 }
 0x18d   : > { %v3293_v16 = vpop.f32.mrb[38].mxu1  ;;  %v3363_v19 = vpop.f32.mrb[40].mxu0  ;;  %v3883_v8 = vadd.f32 %v15226_v39, %v15234_v2 }
 0x18e   : > { %v3976_v5 = vmul.f32 0.7978846, %v3960_v15  ;;  %v14411_v20 = vpop.f32.mrb[39].mxu1  ;;  %v14416_v6 = vpop.f32.mrb[41].mxu0  ;;  %v15241_v21 = vadd.f32 %v3293_v16, %v15210_v17  ;;  %v15244_v22 = vadd.f32 %v3363_v19, %v15212_v18  ;;  %v3895_v17 = vmul.f32 0.5, %v3879_v46 }
 0x18f   : > { %v3930_v59 = vmul.f32 %v3914_v56, %v3882_v53  ;;  %v3915_v14 = vmul.f32 0.044715, %v3883_v8  ;;  %v3884_v16 = vadd.f32 %v15226_v39, %v15236_v9 }
 0x190   : > { %14646 = vtanh.f32 %v3976_v5 }
 0x191   : > { %v3433_v11 = vpop.f32.mrb[40].mxu1  ;;  %v3503_v25 = vpop.f32.mrb[42].mxu0  ;;  %v3946_v60 = vmul.f32 %v3930_v59, %v3882_v53  ;;  %v3931_v15 = vmul.f32 %v3915_v14, %v3883_v8  ;;  %v3916_v19 = vmul.f32 0.044715, %v3884_v16 }
 0x192   : > { %v15247_v12 = vadd.f32 %v3433_v11, %v15214_v23  ;;  %v14421_v26 = vpop.f32.mrb[41].mxu1  ;;  %v14426_v27 = vpop.f32.mrb[43].mxu0  ;;  %v15250_v28 = vadd.f32 %v3503_v25, %v15216_v24 }
 0x193   : > { %v3962_v55 = vadd.f32 %v3946_v60, %v3882_v53  ;;  %v3947_v2 = vmul.f32 %v3931_v15, %v3883_v8  ;;  %v3932_v20 = vmul.f32 %v3916_v19, %v3884_v16  ;;  %v14736_v19 = vmov 1934713408  }
 0x195   : > { %v3573_v31 = vpop.f32.mrb[42].mxu1  ;;  %v3643_v32 = vpop.f32.mrb[44].mxu0  ;;  %v3978_v61 = vmul.f32 0.7978846, %v3962_v55  ;;  %v3963_v5 = vadd.f32 %v3947_v2, %v3883_v8  ;;  %v3948_v6 = vmul.f32 %v3932_v20, %v3884_v16 }
 0x196   : > { %v14645_v33 = vpop.eup %14644  ;;  %v14431_v34 = vpop.f32.mrb[43].mxu1  ;;  %v15255_v23 = vadd.f32 %v3573_v31, %v15218_v29  ;;  %v15258_v48 = vadd.f32 %v3643_v32, %v15220_v30  ;;  %v3881_v29 = vadd.f32 %v15226_v39, %v3859_v52  ;;  %v3899_v31 = vmul.f32 0.5, %v3883_v8 }
 0x197   : > { %v14436_v37 = vpop.f32.mrb[45].mxu0  ;;  %v4007_v38 = vadd.f32 1.0, %v14645_v33  ;;  %v3979_v9 = vmul.f32 0.7978846, %v3963_v5  ;;  %v3964_v11 = vadd.f32 %v3948_v6, %v3884_v16  ;;  %v3885_v34 = vadd.f32 %v15226_v39, %v15238_v10 }
 0x198   : > { %v3913_v30 = vmul.f32 0.044715, %v3881_v29  ;;  %v3897_v3 = vmul.f32 0.5, %v3881_v29  ;;  %v15394_v10 = vadd.f32 %v15226_v39, %v15241_v21  ;;  %v14735_v21 = vmov 1983009808  }
 0x199   : > { %v15252_v40 = vmul.f32 %v4007_v38, %v3895_v17  ;;  %v3713_v18 = vpop.f32.mrb[44].mxu1  ;;  %v3783_v41 = vpop.f32.mrb[46].mxu0  ;;  %v3980_v25 = vmul.f32 0.7978846, %v3964_v11  ;;  %v3900_v17 = vmul.f32 0.5, %v3884_v16  ;;  %v4842_v5 = vunpack.c.l.s4 %v14736_v19 }
 0x19a   : > { %v14647_v43 = vpop.eup %14646  ;;  %v14441_v44 = vpop.f32.mrb[45].mxu1  ;;  %v15261_v49 = vadd.f32 %v3713_v18, %v15222_v35  ;;  %v15275_v35 = vadd.f32 %v3783_v41, %v15224_v36  ;;  %v3929_v52 = vmul.f32 %v3913_v30, %v3881_v29  ;;  %v3917_v38 = vmul.f32 0.044715, %v3885_v34 }
 0x19b   : > { %v14446_v45 = vpop.f32.mrb[47].mxu0  ;;  %v4008_v24 = vadd.f32 1.0, %v14647_v43  ;;  %4103 = vrot.lane.b32.xlu0 %v15252_v40, %s14723_s10  ;;  %4055 = vrot.lane.b32.xlu1 %v15252_v40, %s14724_s11  ;;  %v3918_v44 = vmul.f32 0.044715, %v15394_v10  ;;  %v3901_v20 = vmul.f32 0.5, %v3885_v34 }
 0x19c   : > { %v3945_v36 = vmul.f32 %v3929_v52, %v3881_v29  ;;  %v3933_v41 = vmul.f32 %v3917_v38, %v3885_v34 }
 0x19d   : > { %v15268_v46 = vmul.f32 %v4008_v24, %v3896_v47  ;;  %v3853_v50 = vpop.f32.mrb[46].mxu1  ;;  %v3934_v47 = vmul.f32 %v3918_v44, %v15394_v10  ;;  %v4778_v24 = vunpack.c.l.s4 %v14735_v21 }
 0x19e   : > { %v14451_v51 = vpop.f32.mrb[47].mxu1  ;;  %v15284_v54 = vadd.f32 %v3853_v50, %v15228_v42  ;;  %v3961_v57 = vadd.f32 %v3945_v36, %v3881_v29  ;;  %v3949_v43 = vmul.f32 %v3933_v41, %v3885_v34  ;;  %v20314_v29 = vlaneseq }
 0x19f   : > { %4151 = vrot.lane.b32.xlu0 %v15252_v40, %s14725_s13  ;;  %4057 = vrot.lane.b32.xlu1 %v15268_v46, %s14724_s11  ;;  %v3950_v51 = vmul.f32 %v3934_v47, %v15394_v10  ;;  %v4779_v30 = vunpack.c.0.s8 %v4778_v24 }
 0x1a0   : > { %v3977_v42 = vmul.f32 0.7978846, %v3961_v57  ;;  %v3965_v45 = vadd.f32 %v3949_v43, %v3885_v34  ;;  %v15412_v52 = vshrl.u32 %v20314_v29, 7 }
 0x1a1   : > { %v3966_v56 = vadd.f32 %v3950_v51, %v15394_v10 }
 0x1a2   : > { %14648 = vtanh.f32 %v3977_v42  ;;  %v3981_v50 = vmul.f32 0.7978846, %v3965_v45  ;;  %20600 = vst [vmem:[#allocation3_spill] sm:$0xff] %v15412_v52  ;;  %v15424_v57 = vsub.s32 %v4779_v30, %v15412_v52 }
 0x1a3   : > { %4199 = vrot.lane.b32.xlu0 %v15252_v40, %s14726_s14  ;;  %4105 = vrot.lane.b32.xlu1 %v15268_v46, %s14723_s10  ;;  %14650 = vtanh.f32 %v3978_v61  ;;  %v3982_v61 = vmul.f32 0.7978846, %v3966_v56 }
 0x1a4   : > { %14652 = vtanh.f32 %v3979_v9 }
 0x1a5   : > { %14654 = vtanh.f32 %v3980_v25 }
 0x1a6   : > { %14656 = vtanh.f32 %v3981_v50 }
 0x1a7   : > { %4247 = vrot.lane.b32.xlu0 %v15252_v40, %s14727_s15  ;;  %4153 = vrot.lane.b32.xlu1 %v15268_v46, %s14725_s13  ;;  %14658 = vtanh.f32 %v3982_v61 }
 0x1ab   : > { %4295 = vrot.lane.b32.xlu0 %v15252_v40, %s14728_s16  ;;  %4201 = vrot.lane.b32.xlu1 %v15268_v46, %s14726_s14 }
 0x1ac   : > { %v14649_v58 = vpop.eup %14648 }
 0x1ad   : > { %v4009_v1 = vadd.f32 1.0, %v14649_v58  ;;  %v14651_v7 = vpop.eup %14650 }
 0x1ae   : > { %v4010_v62 = vadd.f32 1.0, %v14651_v7  ;;  %v14653_v26 = vpop.eup %14652 }
 0x1af   : > { %4343 = vrot.lane.b32.xlu0 %v15252_v40, %s14729_s17  ;;  %4249 = vrot.lane.b32.xlu1 %v15268_v46, %s14727_s15  ;;  %v15318_v4 = vmul.f32 %v4009_v1, %v3897_v3  ;;  %v4011_v27 = vadd.f32 1.0, %v14653_v26  ;;  %v14655_v33 = vpop.eup %14654  ;;  %v4843_v26 = vunpack.c.0.s8 %v4842_v5 }
 0x1b0   : > { %v15330_v13 = vmul.f32 %v4010_v62, %v3898_v63  ;;  %v4012_v37 = vadd.f32 1.0, %v14655_v33  ;;  %v14657_v14 = vpop.eup %14656  ;;  %v15486_v33 = vadd.f32 %v15226_v39, %v15244_v22  ;;  %v3902_v22 = vmul.f32 0.5, %v15394_v10 }
 0x1b1   : > { %v15374_v32 = vmul.f32 %v4011_v27, %v3899_v31  ;;  %v4013_v15 = vadd.f32 1.0, %v14657_v14  ;;  %v14659_v27 = vpop.eup %14658  ;;  %v15499_v43 = vsub.s32 %v4843_v26, %v15412_v52 }
 0x1b2   : > { %v15386_v18 = vmul.f32 %v4012_v37, %v3900_v17  ;;  %v4014_v17 = vadd.f32 1.0, %v14659_v27  ;;  %v3919_v45 = vmul.f32 0.044715, %v15486_v33  ;;  %v3903_v29 = vmul.f32 0.5, %v15486_v33 }
 0x1b3   : > { %4391 = vrot.lane.b32.xlu0 %v15252_v40, %s14730_s18  ;;  %4297 = vrot.lane.b32.xlu1 %v15268_v46, %s14728_s16  ;;  %v15472_v6 = vmul.f32 %v4013_v15, %v3901_v20 }
 0x1b4   : > { %20599 = vst [vmem:[#allocation2_spill] sm:$0xff] %v15386_v18  ;;  %v15512_v21 = vmul.f32 %v4014_v17, %v3902_v22  ;;  %v3935_v56 = vmul.f32 %v3919_v45, %v15486_v33 }
 0x1b5   : > { %20601 = vst [vmem:[#allocation4_spill] sm:$0xff] %v15472_v6 }
 0x1b6   : > { %20602 = vst [vmem:[#allocation5_spill] sm:$0xff] %v15512_v21 }
 0x1b7   : > { %4439 = vrot.lane.b32.xlu0 %v15252_v40, %s14731_s19  ;;  %4345 = vrot.lane.b32.xlu1 %v15268_v46, %s14729_s17 }
 0x1bb   : > { %4487 = vrot.lane.b32.xlu0 %v15252_v40, %s14732_s20  ;;  %4393 = vrot.lane.b32.xlu1 %v15268_v46, %s14730_s18 }
 0x1bf   : > { %4535 = vrot.lane.b32.xlu0 %v15252_v40, %s14733_s21  ;;  %4441 = vrot.lane.b32.xlu1 %v15268_v46, %s14731_s19 }
 0x1c3   : > { %4583 = vrot.lane.b32.xlu0 %v15252_v40, %s14734_s22  ;;  %4489 = vrot.lane.b32.xlu1 %v15268_v46, %s14732_s20 }
 0x1c7   : > { %4537 = vrot.lane.b32.xlu1 %v15268_v46, %s14733_s21  ;;  %4059 = vrot.lane.b32.xlu0 %v15318_v4, %s14724_s11 }
 0x1cb   : > { %4585 = vrot.lane.b32.xlu1 %v15268_v46, %s14734_s22  ;;  %4107 = vrot.lane.b32.xlu0 %v15318_v4, %s14723_s10 }
 0x1cf   : > { %4061 = vrot.lane.b32.xlu1 %v15330_v13, %s14724_s11  ;;  %4155 = vrot.lane.b32.xlu0 %v15318_v4, %s14725_s13 }
 0x1d3   : > { %4109 = vrot.lane.b32.xlu1 %v15330_v13, %s14723_s10  ;;  %4203 = vrot.lane.b32.xlu0 %v15318_v4, %s14726_s14 }
 0x1d7   : > { %4157 = vrot.lane.b32.xlu1 %v15330_v13, %s14725_s13  ;;  %4251 = vrot.lane.b32.xlu0 %v15318_v4, %s14727_s15 }
 0x1db   : > { %4205 = vrot.lane.b32.xlu1 %v15330_v13, %s14726_s14  ;;  %4299 = vrot.lane.b32.xlu0 %v15318_v4, %s14728_s16 }
 0x1df   : > { %4253 = vrot.lane.b32.xlu1 %v15330_v13, %s14727_s15  ;;  %4347 = vrot.lane.b32.xlu0 %v15318_v4, %s14729_s17 }
 0x1e3   : > { %4301 = vrot.lane.b32.xlu1 %v15330_v13, %s14728_s16  ;;  %4395 = vrot.lane.b32.xlu0 %v15318_v4, %s14730_s18 }
 0x1e7   : > { %4349 = vrot.lane.b32.xlu1 %v15330_v13, %s14729_s17  ;;  %4443 = vrot.lane.b32.xlu0 %v15318_v4, %s14731_s19 }
 0x1eb   : > { %4397 = vrot.lane.b32.xlu1 %v15330_v13, %s14730_s18  ;;  %4491 = vrot.lane.b32.xlu0 %v15318_v4, %s14732_s20 }
 0x1ef   : > { %4445 = vrot.lane.b32.xlu1 %v15330_v13, %s14731_s19  ;;  %4539 = vrot.lane.b32.xlu0 %v15318_v4, %s14733_s21 }
 0x1f3   : > { %4493 = vrot.lane.b32.xlu1 %v15330_v13, %s14732_s20  ;;  %4587 = vrot.lane.b32.xlu0 %v15318_v4, %s14734_s22 }
 0x1f7   : > { %4541 = vrot.lane.b32.xlu1 %v15330_v13, %s14733_s21  ;;  %4063 = vrot.lane.b32.xlu0 %v15374_v32, %s14724_s11 }
 0x1fb   : > { %4589 = vrot.lane.b32.xlu1 %v15330_v13, %s14734_s22  ;;  %4111 = vrot.lane.b32.xlu0 %v15374_v32, %s14723_s10 }
 0x1ff   : > { %4065 = vrot.lane.b32.xlu1 %v15386_v18, %s14724_s11  ;;  %4159 = vrot.lane.b32.xlu0 %v15374_v32, %s14725_s13 }
 0x203   : > { %4113 = vrot.lane.b32.xlu1 %v15386_v18, %s14723_s10  ;;  %4207 = vrot.lane.b32.xlu0 %v15374_v32, %s14726_s14 }
 0x207   : > { %4161 = vrot.lane.b32.xlu1 %v15386_v18, %s14725_s13  ;;  %4255 = vrot.lane.b32.xlu0 %v15374_v32, %s14727_s15 }
 0x20b   : > { %4209 = vrot.lane.b32.xlu1 %v15386_v18, %s14726_s14  ;;  %4303 = vrot.lane.b32.xlu0 %v15374_v32, %s14728_s16 }
 0x20d   : > { %v15414_v53 = vpop.permute.xlu0 %4103  ;;  %v15416_v36 = vpop.permute.xlu1 %4055 }
 0x20e   : > { %v4775_v59 = vcombine.low %v15252_v40, %v15414_v53 }
 0x20f   : > { %4257 = vrot.lane.b32.xlu1 %v15386_v18, %s14727_s15  ;;  %4351 = vrot.lane.b32.xlu0 %v15374_v32, %s14729_s17 }
 0x210   : > { %v15439_v58 = vrot.slane %v4775_v59, %v15424_v57  ;;  %v3888_v59 = vadd.f32 %v15226_v39, %v15247_v12 }
 0x211   : > { %v15428_v42 = vpop.permute.xlu0 %4151  ;;  %v15430_v60 = vpop.permute.xlu1 %4057 }
 0x212   : > { %v4791_v55 = vcombine.low %v15416_v36, %v15428_v42  ;;  %v3920_v14 = vmul.f32 0.044715, %v3888_v59 }
 0x213   : > { %4305 = vrot.lane.b32.xlu1 %v15386_v18, %s14728_s16  ;;  %4399 = vrot.lane.b32.xlu0 %v15374_v32, %s14730_s18 }
 0x214   : > { %v15442_v1 = vrot.slane %v4791_v55, %v15424_v57  ;;  %v3936_v5 = vmul.f32 %v3920_v14, %v3888_v59 }
 0x215   : > { %v15444_v3 = vpop.permute.xlu0 %4199  ;;  %v15446_v7 = vpop.permute.xlu1 %4105 }
 0x216   : > { %v4840_v62 = vcombine.high %v15439_v58, %v15442_v1  ;;  %v3952_v27 = vmul.f32 %v3936_v5, %v3888_v59 }
 0x217   : > { %4353 = vrot.lane.b32.xlu1 %v15386_v18, %s14729_s17  ;;  %4447 = vrot.lane.b32.xlu0 %v15374_v32, %s14731_s19 }
 0x218   : > { %v15519_v51 = vrot.slane %v4840_v62, %v15499_v43  ;;  %v3951_v62 = vmul.f32 %v3935_v56, %v15486_v33 }
 0x219   : > { %v15454_v63 = vpop.permute.xlu0 %4247  ;;  %v15456_v8 = vpop.permute.xlu1 %4153 }
 0x21a   : > { %v3967_v12 = vadd.f32 %v3951_v62, %v15486_v33  ;;  %v3889_v33 = vadd.f32 %v15226_v39, %v15250_v28 }
 0x21b   : > { %4401 = vrot.lane.b32.xlu1 %v15386_v18, %s14730_s18  ;;  %4495 = vrot.lane.b32.xlu0 %v15374_v32, %s14732_s20 }
 0x21c   : > { %v3983_v26 = vmul.f32 0.7978846, %v3967_v12 }
 0x21d   : > { %v15462_v16 = vpop.permute.xlu0 %4295  ;;  %v15464_v2 = vpop.permute.xlu1 %4201 }
 0x21e   : > { %v4807_v9 = vcombine.low %v15444_v3, %v15462_v16  ;;  %14660 = vtanh.f32 %v3983_v26 }
 0x21f   : > { %4449 = vrot.lane.b32.xlu1 %v15386_v18, %s14731_s19  ;;  %4543 = vrot.lane.b32.xlu0 %v15374_v32, %s14733_s21 }
 0x220   : > { %v15489_v34 = vrot.slane %v4807_v9, %v15424_v57 }
 0x221   : > { %v15474_v11 = vpop.permute.xlu0 %4343  ;;  %v15476_v25 = vpop.permute.xlu1 %4249 }
 0x222   : > { %v4823_v31 = vcombine.low %v15454_v63, %v15474_v11 }
 0x223   : > { %4497 = vrot.lane.b32.xlu1 %v15386_v18, %s14732_s20  ;;  %4067 = vrot.lane.b32.xlu0 %v15472_v6, %s14724_s11 }
 0x224   : > { %v15492_v37 = vrot.slane %v4823_v31, %v15424_v57 }
 0x225   : > { %v15494_v38 = vpop.permute.xlu0 %4391  ;;  %v15496_v41 = vpop.permute.xlu1 %4297 }
 0x226   : > { %v4872_v44 = vcombine.high %v15489_v34, %v15492_v37 }
 0x227   : > { %4545 = vrot.lane.b32.xlu1 %v15386_v18, %s14733_s21  ;;  %4115 = vrot.lane.b32.xlu0 %v15472_v6, %s14723_s10 }
 0x228   : > { %v15510_v47 = vrot.slane %v4872_v44, %v15499_v43  ;;  %v3968_v44 = vadd.f32 %v3952_v27, %v3888_v59  ;;  %v14661_v26 = vpop.eup %14660 }
 0x229   : > { %v15514_v24 = vpop.permute.xlu0 %4439  ;;  %v15516_v50 = vpop.permute.xlu1 %4345  ;;  %v4015_v27 = vadd.f32 1.0, %v14661_v26 }
 0x22a   : > { %v3984_v56 = vmul.f32 0.7978846, %v3968_v44 }
 0x22b   : > { %4069 = vrot.lane.b32.xlu1 %v15512_v21, %s14724_s11  ;;  %4163 = vrot.lane.b32.xlu0 %v15472_v6, %s14725_s13 }
 0x22c   : > { %14662 = vtanh.f32 %v3984_v56  ;;  %v15599_v56 = vmul.f32 %v4015_v27, %v3903_v29  ;;  %v3904_v29 = vmul.f32 0.5, %v3888_v59  ;;  %v3921_v27 = vmul.f32 0.044715, %v3889_v33 }
 0x22d   : > { %v15532_v55 = vpop.permute.xlu0 %4487  ;;  %v15534_v61 = vpop.permute.xlu1 %4393 }
 0x22e   : > { %20608 = vst [vmem:[#allocation11_spill] sm:$0xff] %v15599_v56  ;;  %v3937_v28 = vmul.f32 %v3921_v27, %v3889_v33 }
 0x22f   : > { %4117 = vrot.lane.b32.xlu1 %v15512_v21, %s14723_s10  ;;  %4211 = vrot.lane.b32.xlu0 %v15472_v6, %s14726_s14 }
 0x231   : > { %v15541_v15 = vpop.permute.xlu0 %4535  ;;  %v15543_v19 = vpop.permute.xlu1 %4441 }
 0x233   : > { %4165 = vrot.lane.b32.xlu1 %v15512_v21, %s14725_s13  ;;  %4259 = vrot.lane.b32.xlu0 %v15472_v6, %s14727_s15 }
 0x235   : > { %v15550_v20 = vpop.permute.xlu0 %4583  ;;  %v15552_v9 = vpop.permute.xlu1 %4489 }
 0x236   : > { %v14663_v52 = vpop.eup %14662 }
 0x237   : > { %4213 = vrot.lane.b32.xlu1 %v15512_v21, %s14726_s14  ;;  %4307 = vrot.lane.b32.xlu0 %v15472_v6, %s14728_s16  ;;  %v4016_v26 = vadd.f32 1.0, %v14663_v52  ;;  %v3890_v52 = vadd.f32 %v15226_v39, %v15255_v23 }
 0x239   : > { %v15558_v31 = vpop.permute.xlu1 %4537  ;;  %v15560_v17 = vpop.permute.xlu0 %4059 }
 0x23b   : > { %4261 = vrot.lane.b32.xlu1 %v15512_v21, %s14727_s15  ;;  %4355 = vrot.lane.b32.xlu0 %v15472_v6, %s14729_s17 }
 0x23d   : > { %v15566_v22 = vpop.permute.xlu1 %4585  ;;  %v15568_v45 = vpop.permute.xlu0 %4107 }
 0x23e   : > { %20603 = vst [vmem:[#allocation6_spill] sm:$0xff] %v15568_v45 }
 0x23f   : > { %4309 = vrot.lane.b32.xlu1 %v15512_v21, %s14728_s16  ;;  %4403 = vrot.lane.b32.xlu0 %v15472_v6, %s14730_s18 }
 0x241   : > { %v15574_v62 = vpop.permute.xlu1 %4061  ;;  %v15576_v14 = vpop.permute.xlu0 %4155 }
 0x242   : > { %20604 = vst [vmem:[#allocation7_spill] sm:$0xff] %v15574_v62 }
 0x243   : > { %4357 = vrot.lane.b32.xlu1 %v15512_v21, %s14729_s17  ;;  %4451 = vrot.lane.b32.xlu0 %v15472_v6, %s14731_s19 }
 0x245   : > { %v15582_v12 = vpop.permute.xlu1 %4109  ;;  %v15584_v5 = vpop.permute.xlu0 %4203 }
 0x246   : > { %20605 = vst [vmem:[#allocation8_spill] sm:$0xff] %v15582_v12  ;;  %20606 = vst [vmem:[#allocation9_spill] sm:$0xff] %v15584_v5 }
 0x247   : > { %4405 = vrot.lane.b32.xlu1 %v15512_v21, %s14730_s18  ;;  %4499 = vrot.lane.b32.xlu0 %v15472_v6, %s14732_s20 }
 0x249   : > { %v15590_v44 = vpop.permute.xlu1 %4157  ;;  %v15592_v0 = vpop.permute.xlu0 %4251 }
 0x24a   : > { %20607 = vst [vmem:[#allocation10_spill] sm:$0xff] %v15590_v44 }
 0x24b   : > { %4453 = vrot.lane.b32.xlu1 %v15512_v21, %s14731_s19  ;;  %4547 = vrot.lane.b32.xlu0 %v15472_v6, %s14733_s21 }
 0x24d   : > { %v15601_v30 = vpop.permute.xlu1 %4205  ;;  %v15603_v10 = vpop.permute.xlu0 %4299 }
 0x24e   : > { %20609 = vst [vmem:[#allocation12_spill] sm:$0xff] %v15601_v30  ;;  %v15619_v30 = vmul.f32 %v4016_v26, %v3904_v29  ;;  %v3953_v26 = vmul.f32 %v3937_v28, %v3889_v33  ;;  %v3922_v29 = vmul.f32 0.044715, %v3890_v52 }
 0x24f   : > { %4501 = vrot.lane.b32.xlu1 %v15512_v21, %s14732_s20  ;;  %4071 = vrot.lane.b32.xlu0 %v15599_v56, %s14724_s11 }
 0x250   : > { %20611 = vst [vmem:[#allocation14_spill] sm:$0xff] %v15619_v30  ;;  %v3969_v23 = vadd.f32 %v3953_v26, %v3889_v33  ;;  %v3938_v27 = vmul.f32 %v3922_v29, %v3890_v52 }
 0x251   : > { %v15611_v12 = vpop.permute.xlu1 %4253  ;;  %v15613_v62 = vpop.permute.xlu0 %4347 }
 0x252   : > { %20610 = vst [vmem:[#allocation13_spill] sm:$0xff] %v15611_v12  ;;  %v3985_v28 = vmul.f32 0.7978846, %v3969_v23 }
 0x253   : > { %4549 = vrot.lane.b32.xlu1 %v15512_v21, %s14733_s21  ;;  %4119 = vrot.lane.b32.xlu0 %v15599_v56, %s14723_s10 }
 0x254   : > { %14664 = vtanh.f32 %v3985_v28 }
 0x255   : > { %v15621_v44 = vpop.permute.xlu1 %4301  ;;  %v15623_v45 = vpop.permute.xlu0 %4395 }
 0x256   : > { %20612 = vst [vmem:[#allocation15_spill] sm:$0xff] %v15621_v44  ;;  %20613 = vst [vmem:[#allocation16_spill] sm:$0xff] %v15623_v45 }
 0x257   : > { %4073 = vrot.lane.b32.xlu1 %v15619_v30, %s14724_s11  ;;  %4167 = vrot.lane.b32.xlu0 %v15599_v56, %s14725_s13 }
 0x259   : > { %v15631_v59 = vpop.permute.xlu1 %4349  ;;  %v15633_v12 = vpop.permute.xlu0 %4443 }
 0x25a   : > { %20614 = vst [vmem:[#allocation17_spill] sm:$0xff] %v15631_v59  ;;  %20615 = vst [vmem:[#allocation18_spill] sm:$0xff] %v15633_v12 }
 0x25b   : > { %4121 = vrot.lane.b32.xlu1 %v15619_v30, %s14723_s10  ;;  %4215 = vrot.lane.b32.xlu0 %v15599_v56, %s14726_s14 }
 0x25d   : > { %v15639_v44 = vpop.permute.xlu1 %4397  ;;  %v15641_v45 = vpop.permute.xlu0 %4491 }
 0x25e   : > { %20616 = vst [vmem:[#allocation19_spill] sm:$0xff] %v15639_v44  ;;  %20617 = vst [vmem:[#allocation20_spill] sm:$0xff] %v15641_v45  ;;  %v3954_v44 = vmul.f32 %v3938_v27, %v3890_v52 }
 0x25f   : > { %4169 = vrot.lane.b32.xlu1 %v15619_v30, %s14725_s13  ;;  %4263 = vrot.lane.b32.xlu0 %v15599_v56, %s14727_s15 }
 0x260   : > { %v3970_v26 = vadd.f32 %v3954_v44, %v3890_v52 }
 0x261   : > { %v15647_v59 = vpop.permute.xlu1 %4445  ;;  %v15649_v12 = vpop.permute.xlu0 %4539 }
 0x262   : > { %20618 = vst [vmem:[#allocation21_spill] sm:$0xff] %v15647_v59  ;;  %20619 = vst [vmem:[#allocation22_spill] sm:$0xff] %v15649_v12  ;;  %v3986_v23 = vmul.f32 0.7978846, %v3970_v26 }
 0x263   : > { %4217 = vrot.lane.b32.xlu1 %v15619_v30, %s14726_s14  ;;  %4311 = vrot.lane.b32.xlu0 %v15599_v56, %s14728_s16 }
 0x264   : > { %14666 = vtanh.f32 %v3986_v23 }
 0x265   : > { %v15655_v45 = vpop.permute.xlu1 %4493  ;;  %v15657_v5 = vpop.permute.xlu0 %4587 }
 0x266   : > { %20620 = vst [vmem:[#allocation23_spill] sm:$0xff] %v15655_v45  ;;  %20621 = vst [vmem:[#allocation24_spill] sm:$0xff] %v15657_v5 }
 0x267   : > { %4265 = vrot.lane.b32.xlu1 %v15619_v30, %s14727_s15  ;;  %4359 = vrot.lane.b32.xlu0 %v15599_v56, %s14729_s17 }
 0x269   : > { %v15663_v29 = vpop.permute.xlu1 %4541  ;;  %v15665_v59 = vpop.permute.xlu0 %4063 }
 0x26a   : > { %20622 = vst [vmem:[#allocation25_spill] sm:$0xff] %v15663_v29  ;;  %20623 = vst [vmem:[#allocation26_spill] sm:$0xff] %v15665_v59  ;;  %v14665_v59 = vpop.eup %14664  ;;  %v3905_v29 = vmul.f32 0.5, %v3889_v33 }
 0x26b   : > { %4313 = vrot.lane.b32.xlu1 %v15619_v30, %s14728_s16  ;;  %4407 = vrot.lane.b32.xlu0 %v15599_v56, %s14730_s18  ;;  %v4017_v26 = vadd.f32 1.0, %v14665_v59  ;;  %v3891_v59 = vadd.f32 %v15226_v39, %v15258_v48  ;;  %v3892_v48 = vadd.f32 %v15226_v39, %v15261_v49 }
 0x26d   : > { %v15671_v27 = vpop.permute.xlu1 %4589  ;;  %v15673_v45 = vpop.permute.xlu0 %4111  ;;  %v15695_v23 = vmul.f32 %v4017_v26, %v3905_v29  ;;  %v3906_v29 = vmul.f32 0.5, %v3890_v52 }
 0x26e   : > { %20624 = vst [vmem:[#allocation27_spill] sm:$0xff] %v15671_v27  ;;  %20625 = vst [vmem:[#allocation28_spill] sm:$0xff] %v15673_v45  ;;  %v14667_v5 = vpop.eup %14666 }
 0x26f   : > { %4361 = vrot.lane.b32.xlu1 %v15619_v30, %s14729_s17  ;;  %4455 = vrot.lane.b32.xlu0 %v15599_v56, %s14731_s19  ;;  %20630 = vst [vmem:[#allocation33_spill] sm:$0xff] %v15695_v23  ;;  %v4018_v33 = vadd.f32 1.0, %v14667_v5 }
 0x271   : > { %v15679_v44 = vpop.permute.xlu1 %4065  ;;  %v15681_v28 = vpop.permute.xlu0 %4159  ;;  %v15715_v26 = vmul.f32 %v4018_v33, %v3906_v29  ;;  %v3924_v33 = vmul.f32 0.044715, %v3892_v48 }
 0x272   : > { %20626 = vst [vmem:[#allocation29_spill] sm:$0xff] %v15679_v44  ;;  %20627 = vst [vmem:[#allocation30_spill] sm:$0xff] %v15681_v28 }
 0x273   : > { %4409 = vrot.lane.b32.xlu1 %v15619_v30, %s14730_s18  ;;  %4503 = vrot.lane.b32.xlu0 %v15599_v56, %s14732_s20  ;;  %20635 = vst [vmem:[#allocation38_spill] sm:$0xff] %v15715_v26  ;;  %v3940_v49 = vmul.f32 %v3924_v33, %v3892_v48 }
 0x275   : > { %v15687_v45 = vpop.permute.xlu1 %4113  ;;  %v15689_v27 = vpop.permute.xlu0 %4207 }
 0x276   : > { %20628 = vst [vmem:[#allocation31_spill] sm:$0xff] %v15687_v45  ;;  %20629 = vst [vmem:[#allocation32_spill] sm:$0xff] %v15689_v27 }
 0x277   : > { %4457 = vrot.lane.b32.xlu1 %v15619_v30, %s14731_s19  ;;  %4551 = vrot.lane.b32.xlu0 %v15599_v56, %s14733_s21 }
 0x279   : > { %v15697_v44 = vpop.permute.xlu1 %4161  ;;  %v15699_v28 = vpop.permute.xlu0 %4255 }
 0x27a   : > { %20631 = vst [vmem:[#allocation34_spill] sm:$0xff] %v15697_v44  ;;  %20632 = vst [vmem:[#allocation35_spill] sm:$0xff] %v15699_v28  ;;  %v3923_v44 = vmul.f32 0.044715, %v3891_v59 }
 0x27b   : > { %4505 = vrot.lane.b32.xlu1 %v15619_v30, %s14732_s20  ;;  %4075 = vrot.lane.b32.xlu0 %v15695_v23, %s14724_s11 }
 0x27c   : > { %v3939_v52 = vmul.f32 %v3923_v44, %v3891_v59 }
 0x27d   : > { %v15707_v45 = vpop.permute.xlu1 %4209  ;;  %v15709_v27 = vpop.permute.xlu0 %4303 }
 0x27e   : > { %20633 = vst [vmem:[#allocation36_spill] sm:$0xff] %v15707_v45  ;;  %20634 = vst [vmem:[#allocation37_spill] sm:$0xff] %v15709_v27  ;;  %v3955_v29 = vmul.f32 %v3939_v52, %v3891_v59  ;;  %v3956_v52 = vmul.f32 %v3940_v49, %v3892_v48 }
 0x27f   : > { %4553 = vrot.lane.b32.xlu1 %v15619_v30, %s14733_s21  ;;  %4123 = vrot.lane.b32.xlu0 %v15695_v23, %s14723_s10 }
 0x280   : > { %v3971_v44 = vadd.f32 %v3955_v29, %v3891_v59  ;;  %v3972_v33 = vadd.f32 %v3956_v52, %v3892_v48 }
 0x281   : > { %v15717_v28 = vpop.permute.xlu1 %4257  ;;  %v15719_v5 = vpop.permute.xlu0 %4351 }
 0x282   : > { %20636 = vst [vmem:[#allocation39_spill] sm:$0xff] %v15717_v28  ;;  %20637 = vst [vmem:[#allocation40_spill] sm:$0xff] %v15719_v5  ;;  %v3988_v49 = vmul.f32 0.7978846, %v3972_v33 }
 0x283   : > { %4077 = vrot.lane.b32.xlu1 %v15715_v26, %s14724_s11  ;;  %4171 = vrot.lane.b32.xlu0 %v15695_v23, %s14725_s13 }
 0x285   : > { %v15727_v45 = vpop.permute.xlu1 %4305  ;;  %v15729_v27 = vpop.permute.xlu0 %4399 }
 0x286   : > { %20638 = vst [vmem:[#allocation41_spill] sm:$0xff] %v15727_v45  ;;  %20639 = vst [vmem:[#allocation42_spill] sm:$0xff] %v15729_v27 }
 0x287   : > { %4125 = vrot.lane.b32.xlu1 %v15715_v26, %s14723_s10  ;;  %4219 = vrot.lane.b32.xlu0 %v15695_v23, %s14726_s14 }
 0x289   : > { %v15735_v28 = vpop.permute.xlu1 %4353  ;;  %v15737_v5 = vpop.permute.xlu0 %4447 }
 0x28a   : > { %20640 = vst [vmem:[#allocation43_spill] sm:$0xff] %v15735_v28  ;;  %20641 = vst [vmem:[#allocation44_spill] sm:$0xff] %v15737_v5  ;;  %v3987_v28 = vmul.f32 0.7978846, %v3971_v44 }
 0x28b   : > { %4173 = vrot.lane.b32.xlu1 %v15715_v26, %s14725_s13  ;;  %4267 = vrot.lane.b32.xlu0 %v15695_v23, %s14727_s15 }
 0x28c   : > { %14668 = vtanh.f32 %v3987_v28 }
 0x28d   : > { %v15743_v45 = vpop.permute.xlu1 %4401  ;;  %v15745_v27 = vpop.permute.xlu0 %4495  ;;  %14670 = vtanh.f32 %v3988_v49  ;;  %v3907_v49 = vmul.f32 0.5, %v3891_v59  ;;  %v3893_v59 = vadd.f32 %v15226_v39, %v15275_v35  ;;  %v3894_v35 = vadd.f32 %v15226_v39, %v15284_v54 }
 0x28e   : > { %20642 = vst [vmem:[#allocation45_spill] sm:$0xff] %v15743_v45  ;;  %20643 = vst [vmem:[#allocation46_spill] sm:$0xff] %v15745_v27 }
 0x28f   : > { %4221 = vrot.lane.b32.xlu1 %v15715_v26, %s14726_s14  ;;  %4315 = vrot.lane.b32.xlu0 %v15695_v23, %s14728_s16 }
 0x291   : > { %v15751_v5 = vpop.permute.xlu1 %4449  ;;  %v15753_v12 = vpop.permute.xlu0 %4543 }
 0x292   : > { %20644 = vst [vmem:[#allocation47_spill] sm:$0xff] %v15751_v5 }
 0x293   : > { %4269 = vrot.lane.b32.xlu1 %v15715_v26, %s14727_s15  ;;  %4363 = vrot.lane.b32.xlu0 %v15695_v23, %s14729_s17 }
 0x295   : > { %v15759_v29 = vpop.permute.xlu1 %4497  ;;  %v15761_v45 = vpop.permute.xlu0 %4067 }
 0x296   : > { %20645 = vst [vmem:[#allocation48_spill] sm:$0xff] %v15759_v29  ;;  %20646 = vst [vmem:[#allocation49_spill] sm:$0xff] %v15761_v45  ;;  %v14669_v45 = vpop.eup %14668 }
 0x297   : > { %4317 = vrot.lane.b32.xlu1 %v15715_v26, %s14728_s16  ;;  %4411 = vrot.lane.b32.xlu0 %v15695_v23, %s14730_s18  ;;  %v4019_v29 = vadd.f32 1.0, %v14669_v45 }
 0x299   : > { %v15767_v44 = vpop.permute.xlu1 %4545  ;;  %v15769_v5 = vpop.permute.xlu0 %4115  ;;  %v15795_v27 = vmul.f32 %v4019_v29, %v3907_v49  ;;  %v3925_v49 = vmul.f32 0.044715, %v3893_v59 }
 0x29a   : > { %20647 = vst [vmem:[#allocation50_spill] sm:$0xff] %v15767_v44  ;;  %20648 = vst [vmem:[#allocation51_spill] sm:$0xff] %v15769_v5  ;;  %v14671_v44 = vpop.eup %14670 }
 0x29b   : > { %4365 = vrot.lane.b32.xlu1 %v15715_v26, %s14729_s17  ;;  %4459 = vrot.lane.b32.xlu0 %v15695_v23, %s14731_s19  ;;  %20655 = vst [vmem:[#allocation58_spill] sm:$0xff] %v15795_v27  ;;  %v4020_v45 = vadd.f32 1.0, %v14671_v44 }
 0x29d   : > { %v15775_v28 = vpop.permute.xlu1 %4069  ;;  %v15777_v52 = vpop.permute.xlu0 %4163 }
 0x29e   : > { %20649 = vst [vmem:[#allocation52_spill] sm:$0xff] %v15775_v28  ;;  %20650 = vst [vmem:[#allocation53_spill] sm:$0xff] %v15777_v52 }
 0x29f   : > { %4413 = vrot.lane.b32.xlu1 %v15715_v26, %s14730_s18  ;;  %4507 = vrot.lane.b32.xlu0 %v15695_v23, %s14732_s20 }
 0x2a1   : > { %v15783_v33 = vpop.permute.xlu1 %4117  ;;  %v15785_v5 = vpop.permute.xlu0 %4211 }
 0x2a2   : > { %20651 = vst [vmem:[#allocation54_spill] sm:$0xff] %v15783_v33  ;;  %20652 = vst [vmem:[#allocation55_spill] sm:$0xff] %v15785_v5 }
 0x2a3   : > { %4461 = vrot.lane.b32.xlu1 %v15715_v26, %s14731_s19  ;;  %4555 = vrot.lane.b32.xlu0 %v15695_v23, %s14733_s21 }
 0x2a5   : > { %v15791_v28 = vpop.permute.xlu1 %4165  ;;  %v15793_v52 = vpop.permute.xlu0 %4259 }
 0x2a6   : > { %20653 = vst [vmem:[#allocation56_spill] sm:$0xff] %v15791_v28  ;;  %20654 = vst [vmem:[#allocation57_spill] sm:$0xff] %v15793_v52  ;;  %v3908_v28 = vmul.f32 0.5, %v3892_v48  ;;  %v3941_v48 = vmul.f32 %v3925_v49, %v3893_v59 }
 0x2a7   : > { %4509 = vrot.lane.b32.xlu1 %v15715_v26, %s14732_s20  ;;  %4079 = vrot.lane.b32.xlu0 %v15795_v27, %s14724_s11 }
 0x2a8   : > { %v15811_v29 = vmul.f32 %v4020_v45, %v3908_v28  ;;  %v3926_v28 = vmul.f32 0.044715, %v3894_v35  ;;  %v3957_v45 = vmul.f32 %v3941_v48, %v3893_v59 }
 0x2a9   : > { %v15803_v33 = vpop.permute.xlu1 %4213  ;;  %v15805_v5 = vpop.permute.xlu0 %4307 }
 0x2aa   : > { %20656 = vst [vmem:[#allocation59_spill] sm:$0xff] %v15803_v33  ;;  %20657 = vst [vmem:[#allocation60_spill] sm:$0xff] %v15805_v5  ;;  %v3942_v39 = vmul.f32 %v3926_v28, %v3894_v35  ;;  %v3973_v54 = vadd.f32 %v3957_v45, %v3893_v59 }
 0x2ab   : > { %4557 = vrot.lane.b32.xlu1 %v15715_v26, %s14733_s21  ;;  %4127 = vrot.lane.b32.xlu0 %v15795_v27, %s14723_s10  ;;  %20658 = vst [vmem:[#allocation61_spill] sm:$0xff] %v15811_v29 }
 0x2ac   : > { %v3958_v48 = vmul.f32 %v3942_v39, %v3894_v35 }
 0x2ad   : > { %v15813_v52 = vpop.permute.xlu1 %4261  ;;  %v15815_v44 = vpop.permute.xlu0 %4355 }
 0x2ae   : > { %20659 = vst [vmem:[#allocation62_spill] sm:$0xff] %v15813_v52  ;;  %20660 = vst [vmem:[#allocation63_spill] sm:$0xff] %v15815_v44  ;;  %v3974_v28 = vadd.f32 %v3958_v48, %v3894_v35 }
 0x2af   : > { %4081 = vrot.lane.b32.xlu1 %v15811_v29, %s14724_s11  ;;  %4175 = vrot.lane.b32.xlu0 %v15795_v27, %s14725_s13 }
 0x2b0   : > { %v3990_v39 = vmul.f32 0.7978846, %v3974_v28 }
 0x2b1   : > { %v15823_v33 = vpop.permute.xlu1 %4309  ;;  %v15825_v5 = vpop.permute.xlu0 %4403 }
 0x2b2   : > { %20661 = vst [vmem:[#allocation64_spill] sm:$0xff] %v15823_v33  ;;  %20662 = vst [vmem:[#allocation65_spill] sm:$0xff] %v15825_v5 }
 0x2b3   : > { %4129 = vrot.lane.b32.xlu1 %v15811_v29, %s14723_s10  ;;  %4223 = vrot.lane.b32.xlu0 %v15795_v27, %s14726_s14 }
 0x2b5   : > { %v15831_v52 = vpop.permute.xlu1 %4357  ;;  %v15833_v44 = vpop.permute.xlu0 %4451 }
 0x2b6   : > { %20663 = vst [vmem:[#allocation66_spill] sm:$0xff] %v15831_v52  ;;  %20664 = vst [vmem:[#allocation67_spill] sm:$0xff] %v15833_v44  ;;  %v3989_v52 = vmul.f32 0.7978846, %v3973_v54 }
 0x2b7   : > { %4177 = vrot.lane.b32.xlu1 %v15811_v29, %s14725_s13  ;;  %4271 = vrot.lane.b32.xlu0 %v15795_v27, %s14727_s15 }
 0x2b8   : > { %14672 = vtanh.f32 %v3989_v52 }
 0x2b9   : > { %v15839_v49 = vpop.permute.xlu1 %4405  ;;  %v15841_v33 = vpop.permute.xlu0 %4499  ;;  %14674 = vtanh.f32 %v3990_v39  ;;  %v3909_v39 = vmul.f32 0.5, %v3893_v59 }
 0x2ba   : > { %20665 = vst [vmem:[#allocation68_spill] sm:$0xff] %v15839_v49  ;;  %20666 = vst [vmem:[#allocation69_spill] sm:$0xff] %v15841_v33 }
 0x2bb   : > { %4225 = vrot.lane.b32.xlu1 %v15811_v29, %s14726_s14  ;;  %4319 = vrot.lane.b32.xlu0 %v15795_v27, %s14728_s16 }
 0x2bd   : > { %v15847_v5 = vpop.permute.xlu1 %4453  ;;  %v15849_v44 = vpop.permute.xlu0 %4547 }
 0x2be   : > { %20667 = vst [vmem:[#allocation70_spill] sm:$0xff] %v15847_v5  ;;  %20668 = vst [vmem:[#allocation71_spill] sm:$0xff] %v15849_v44 }
 0x2bf   : > { %4273 = vrot.lane.b32.xlu1 %v15811_v29, %s14727_s15  ;;  %4367 = vrot.lane.b32.xlu0 %v15795_v27, %s14729_s17 }
 0x2c1   : > { %v15855_v45 = vpop.permute.xlu1 %4501  ;;  %v15857_v49 = vpop.permute.xlu0 %4071 }
 0x2c2   : > { %20669 = vst [vmem:[#allocation72_spill] sm:$0xff] %v15855_v45  ;;  %20670 = vst [vmem:[#allocation73_spill] sm:$0xff] %v15857_v49  ;;  %v14673_v49 = vpop.eup %14672 }
 0x2c3   : > { %4321 = vrot.lane.b32.xlu1 %v15811_v29, %s14728_s16  ;;  %4415 = vrot.lane.b32.xlu0 %v15795_v27, %s14730_s18  ;;  %v14675_v45 = vpop.eup %14674 }
 0x2c5   : > { %v15863_v54 = vpop.permute.xlu1 %4549  ;;  %v15865_v5 = vpop.permute.xlu0 %4119 }
 0x2c6   : > { %20671 = vst [vmem:[#allocation74_spill] sm:$0xff] %v15863_v54  ;;  %20672 = vst [vmem:[#allocation75_spill] sm:$0xff] %v15865_v5  ;;  %v4021_v54 = vadd.f32 1.0, %v14673_v49  ;;  %v4022_v49 = vadd.f32 1.0, %v14675_v45 }
 0x2c7   : > { %4369 = vrot.lane.b32.xlu1 %v15811_v29, %s14729_s17  ;;  %4463 = vrot.lane.b32.xlu0 %v15795_v27, %s14731_s19 }
 0x2c8   : > { %v15891_v33 = vmul.f32 %v4021_v54, %v3909_v39 }
 0x2c9   : > { %v15871_v52 = vpop.permute.xlu1 %4073  ;;  %v15873_v48 = vpop.permute.xlu0 %4167 }
 0x2ca   : > { %20673 = vst [vmem:[#allocation76_spill] sm:$0xff] %v15871_v52  ;;  %20674 = vst [vmem:[#allocation77_spill] sm:$0xff] %v15873_v48 }
 0x2cb   : > { %4417 = vrot.lane.b32.xlu1 %v15811_v29, %s14730_s18  ;;  %4511 = vrot.lane.b32.xlu0 %v15795_v27, %s14732_s20  ;;  %20679 = vst [vmem:[#allocation82_spill] sm:$0xff] %v15891_v33 }
 0x2cd   : > { %v15879_v28 = vpop.permute.xlu1 %4121  ;;  %v15881_v5 = vpop.permute.xlu0 %4215 }
 0x2ce   : > { %20675 = vst [vmem:[#allocation78_spill] sm:$0xff] %v15879_v28  ;;  %20676 = vst [vmem:[#allocation79_spill] sm:$0xff] %v15881_v5  ;;  %v3910_v5 = vmul.f32 0.5, %v3894_v35 }
 0x2cf   : > { %4465 = vrot.lane.b32.xlu1 %v15811_v29, %s14731_s19  ;;  %4559 = vrot.lane.b32.xlu0 %v15795_v27, %s14733_s21 }
 0x2d0   : > { %v15905_v54 = vmul.f32 %v4022_v49, %v3910_v5 }
 0x2d1   : > { %v15887_v52 = vpop.permute.xlu1 %4169  ;;  %v15889_v48 = vpop.permute.xlu0 %4263 }
 0x2d2   : > { %20677 = vst [vmem:[#allocation80_spill] sm:$0xff] %v15887_v52  ;;  %20678 = vst [vmem:[#allocation81_spill] sm:$0xff] %v15889_v48 }
 0x2d3   : > { %4513 = vrot.lane.b32.xlu1 %v15811_v29, %s14732_s20  ;;  %4083 = vrot.lane.b32.xlu0 %v15891_v33, %s14724_s11  ;;  %20682 = vst [vmem:[#allocation85_spill] sm:$0xff] %v15905_v54 }
 0x2d5   : > { %v15897_v28 = vpop.permute.xlu1 %4217  ;;  %v15899_v59 = vpop.permute.xlu0 %4311 }
 0x2d6   : > { %20680 = vst [vmem:[#allocation83_spill] sm:$0xff] %v15897_v28  ;;  %20681 = vst [vmem:[#allocation84_spill] sm:$0xff] %v15899_v59 }
 0x2d7   : > { %4561 = vrot.lane.b32.xlu1 %v15811_v29, %s14733_s21  ;;  %4131 = vrot.lane.b32.xlu0 %v15891_v33, %s14723_s10 }
 0x2d9   : > { %v15907_v39 = vpop.permute.xlu1 %4265  ;;  %v15909_v52 = vpop.permute.xlu0 %4359 }
 0x2da   : > { %20683 = vst [vmem:[#allocation86_spill] sm:$0xff] %v15907_v39  ;;  %20684 = vst [vmem:[#allocation87_spill] sm:$0xff] %v15909_v52 }
 0x2db   : > { %4085 = vrot.lane.b32.xlu1 %v15905_v54, %s14724_s11  ;;  %4179 = vrot.lane.b32.xlu0 %v15891_v33, %s14725_s13 }
 0x2dd   : > { %v15915_v45 = vpop.permute.xlu1 %4313  ;;  %v15917_v35 = vpop.permute.xlu0 %4407 }
 0x2de   : > { %20685 = vst [vmem:[#allocation88_spill] sm:$0xff] %v15915_v45  ;;  %20686 = vst [vmem:[#allocation89_spill] sm:$0xff] %v15917_v35 }
 0x2df   : > { %4133 = vrot.lane.b32.xlu1 %v15905_v54, %s14723_s10  ;;  %4227 = vrot.lane.b32.xlu0 %v15891_v33, %s14726_s14 }
 0x2e1   : > { %v15923_v5 = vpop.permute.xlu1 %4361  ;;  %v15925_v49 = vpop.permute.xlu0 %4455 }
 0x2e2   : > { %20687 = vst [vmem:[#allocation90_spill] sm:$0xff] %v15923_v5  ;;  %20688 = vst [vmem:[#allocation91_spill] sm:$0xff] %v15925_v49 }
 0x2e3   : > { %4181 = vrot.lane.b32.xlu1 %v15905_v54, %s14725_s13  ;;  %4275 = vrot.lane.b32.xlu0 %v15891_v33, %s14727_s15 }
 0x2e5   : > { %v15931_v28 = vpop.permute.xlu1 %4409  ;;  %v15933_v45 = vpop.permute.xlu0 %4503 }
 0x2e6   : > { %20689 = vst [vmem:[#allocation92_spill] sm:$0xff] %v15931_v28  ;;  %20690 = vst [vmem:[#allocation93_spill] sm:$0xff] %v15933_v45 }
 0x2e7   : > { %4229 = vrot.lane.b32.xlu1 %v15905_v54, %s14726_s14  ;;  %4323 = vrot.lane.b32.xlu0 %v15891_v33, %s14728_s16 }
 0x2e9   : > { %v15939_v35 = vpop.permute.xlu1 %4457  ;;  %v15941_v39 = vpop.permute.xlu0 %4551 }
 0x2ea   : > { %20691 = vst [vmem:[#allocation94_spill] sm:$0xff] %v15939_v35  ;;  %20692 = vst [vmem:[#allocation95_spill] sm:$0xff] %v15941_v39 }
 0x2eb   : > { %4277 = vrot.lane.b32.xlu1 %v15905_v54, %s14727_s15  ;;  %4371 = vrot.lane.b32.xlu0 %v15891_v33, %s14729_s17 }
 0x2ed   : > { %v15947_v49 = vpop.permute.xlu1 %4505  ;;  %v15949_v28 = vpop.permute.xlu0 %4075 }
 0x2ee   : > { %20693 = vst [vmem:[#allocation96_spill] sm:$0xff] %v15947_v49  ;;  %20694 = vst [vmem:[#allocation97_spill] sm:$0xff] %v15949_v28 }
 0x2ef   : > { %4325 = vrot.lane.b32.xlu1 %v15905_v54, %s14728_s16  ;;  %4419 = vrot.lane.b32.xlu0 %v15891_v33, %s14730_s18 }
 0x2f1   : > { %v15955_v45 = vpop.permute.xlu1 %4553  ;;  %v15957_v35 = vpop.permute.xlu0 %4123 }
 0x2f2   : > { %20695 = vst [vmem:[#allocation98_spill] sm:$0xff] %v15955_v45  ;;  %20696 = vst [vmem:[#allocation99_spill] sm:$0xff] %v15957_v35 }
 0x2f3   : > { %4373 = vrot.lane.b32.xlu1 %v15905_v54, %s14729_s17  ;;  %4467 = vrot.lane.b32.xlu0 %v15891_v33, %s14731_s19  ;;  %s19983_s17 = scalar_lea.vmem %s20302_s0, %s14804_s12 }
 0x2f5   : > { %v15963_v39 = vpop.permute.xlu1 %4077  ;;  %v15965_v49 = vpop.permute.xlu0 %4171 }
 0x2f6   : > { %20697 = vst [vmem:[#allocation100_spill] sm:$0xff] %v15963_v39  ;;  %20698 = vst [vmem:[#allocation101_spill] sm:$0xff] %v15965_v49 }
 0x2f7   : > { %4421 = vrot.lane.b32.xlu1 %v15905_v54, %s14730_s18  ;;  %4515 = vrot.lane.b32.xlu0 %v15891_v33, %s14732_s20 }
 0x2f9   : > { %v15971_v28 = vpop.permute.xlu1 %4125  ;;  %v15973_v45 = vpop.permute.xlu0 %4219 }
 0x2fa   : > { %20699 = vst [vmem:[#allocation102_spill] sm:$0xff] %v15971_v28  ;;  %20700 = vst [vmem:[#allocation103_spill] sm:$0xff] %v15973_v45 }
 0x2fb   : > { %4469 = vrot.lane.b32.xlu1 %v15905_v54, %s14731_s19  ;;  %4563 = vrot.lane.b32.xlu0 %v15891_v33, %s14733_s21 }
 0x2fd   : > { %v15979_v35 = vpop.permute.xlu1 %4173  ;;  %v15981_v39 = vpop.permute.xlu0 %4267 }
 0x2fe   : > { %20701 = vst [vmem:[#allocation104_spill] sm:$0xff] %v15979_v35  ;;  %20702 = vst [vmem:[#allocation105_spill] sm:$0xff] %v15981_v39 }
 0x2ff   : > { %4517 = vrot.lane.b32.xlu1 %v15905_v54, %s14732_s20  ;;  %4591 = vrot.lane.b32.xlu0 %v15374_v32, %s14734_s22 }
 0x301   : > { %v15987_v49 = vpop.permute.xlu1 %4221  ;;  %v15989_v28 = vpop.permute.xlu0 %4315 }
 0x302   : > { %20703 = vst [vmem:[#allocation106_spill] sm:$0xff] %v15987_v49  ;;  %20704 = vst [vmem:[#allocation107_spill] sm:$0xff] %v15989_v28 }
 0x303   : > { %4565 = vrot.lane.b32.xlu1 %v15905_v54, %s14733_s21  ;;  %4595 = vrot.lane.b32.xlu0 %v15472_v6, %s14734_s22 }
 0x305   : > { %v15995_v45 = vpop.permute.xlu1 %4269  ;;  %v15997_v35 = vpop.permute.xlu0 %4363 }
 0x306   : > { %20705 = vst [vmem:[#allocation108_spill] sm:$0xff] %v15995_v45  ;;  %20706 = vst [vmem:[#allocation109_spill] sm:$0xff] %v15997_v35 }
 0x307   : > { %4593 = vrot.lane.b32.xlu1 %v15386_v18, %s14734_s22  ;;  %4599 = vrot.lane.b32.xlu0 %v15599_v56, %s14734_s22 }
 0x309   : > { %v16003_v39 = vpop.permute.xlu1 %4317  ;;  %v16005_v49 = vpop.permute.xlu0 %4411 }
 0x30a   : > { %20707 = vst [vmem:[#allocation110_spill] sm:$0xff] %v16003_v39  ;;  %20708 = vst [vmem:[#allocation111_spill] sm:$0xff] %v16005_v49 }
 0x30b   : > { %4597 = vrot.lane.b32.xlu1 %v15512_v21, %s14734_s22  ;;  %4603 = vrot.lane.b32.xlu0 %v15695_v23, %s14734_s22 }
 0x30d   : > { %v16011_v28 = vpop.permute.xlu1 %4365  ;;  %v16013_v45 = vpop.permute.xlu0 %4459 }
 0x30e   : > { %20709 = vst [vmem:[#allocation112_spill] sm:$0xff] %v16011_v28  ;;  %20710 = vst [vmem:[#allocation113_spill] sm:$0xff] %v16013_v45 }
 0x30f   : > { %4601 = vrot.lane.b32.xlu1 %v15619_v30, %s14734_s22  ;;  %4607 = vrot.lane.b32.xlu0 %v15795_v27, %s14734_s22 }
 0x311   : > { %v16019_v35 = vpop.permute.xlu1 %4413  ;;  %v16021_v39 = vpop.permute.xlu0 %4507 }
 0x312   : > { %20711 = vst [vmem:[#allocation114_spill] sm:$0xff] %v16019_v35  ;;  %20712 = vst [vmem:[#allocation115_spill] sm:$0xff] %v16021_v39 }
 0x313   : > { %4605 = vrot.lane.b32.xlu1 %v15715_v26, %s14734_s22  ;;  %4611 = vrot.lane.b32.xlu0 %v15891_v33, %s14734_s22 }
 0x315   : > { %v16027_v49 = vpop.permute.xlu1 %4461  ;;  %v16029_v28 = vpop.permute.xlu0 %4555 }
 0x316   : > { %20713 = vst [vmem:[#allocation116_spill] sm:$0xff] %v16027_v49  ;;  %20714 = vst [vmem:[#allocation117_spill] sm:$0xff] %v16029_v28 }
 0x317   : > { %4609 = vrot.lane.b32.xlu1 %v15811_v29, %s14734_s22  ;;  %4631 = vrot.lane.b32.xlu0 %v15252_v40, %s14737_s23 }
 0x319   : > { %v16035_v35 = vpop.permute.xlu1 %4509  ;;  %v16037_v39 = vpop.permute.xlu0 %4079 }
 0x31a   : > { %20715 = vst [vmem:[#allocation118_spill] sm:$0xff] %v16035_v35  ;;  %20716 = vst [vmem:[#allocation119_spill] sm:$0xff] %v16037_v39 }
 0x31b   : > { %4613 = vrot.lane.b32.xlu1 %v15905_v54, %s14734_s22  ;;  %4635 = vrot.lane.b32.xlu0 %v15318_v4, %s14737_s23  ;;  %s20206_s22 = scalar_lea.vmem %s20311_s9, %s14804_s12 }
 0x31d   : > { %v16043_v49 = vpop.permute.xlu1 %4557  ;;  %v16045_v45 = vpop.permute.xlu0 %4127 }
 0x31e   : > { %20717 = vst [vmem:[#allocation120_spill] sm:$0xff] %v16043_v49  ;;  %20718 = vst [vmem:[#allocation121_spill] sm:$0xff] %v16045_v45 }
 0x31f   : > { %4633 = vrot.lane.b32.xlu1 %v15268_v46, %s14737_s23  ;;  %4639 = vrot.lane.b32.xlu0 %v15374_v32, %s14737_s23 }
 0x321   : > { %v16051_v28 = vpop.permute.xlu1 %4081  ;;  %v16053_v35 = vpop.permute.xlu0 %4175 }
 0x322   : > { %20719 = vst [vmem:[#allocation122_spill] sm:$0xff] %v16051_v28  ;;  %20720 = vst [vmem:[#allocation123_spill] sm:$0xff] %v16053_v35 }
 0x323   : > { %4637 = vrot.lane.b32.xlu1 %v15330_v13, %s14737_s23  ;;  %4643 = vrot.lane.b32.xlu0 %v15472_v6, %s14737_s23 }
 0x325   : > { %v16059_v39 = vpop.permute.xlu1 %4129  ;;  %v16061_v49 = vpop.permute.xlu0 %4223 }
 0x326   : > { %20721 = vst [vmem:[#allocation124_spill] sm:$0xff] %v16059_v39  ;;  %20722 = vst [vmem:[#allocation125_spill] sm:$0xff] %v16061_v49 }
 0x327   : > { %4641 = vrot.lane.b32.xlu1 %v15386_v18, %s14737_s23  ;;  %4647 = vrot.lane.b32.xlu0 %v15599_v56, %s14737_s23 }
 0x329   : > { %v16067_v45 = vpop.permute.xlu1 %4177  ;;  %v16069_v28 = vpop.permute.xlu0 %4271 }
 0x32a   : > { %20723 = vst [vmem:[#allocation126_spill] sm:$0xff] %v16067_v45  ;;  %20724 = vst [vmem:[#allocation127_spill] sm:$0xff] %v16069_v28 }
 0x32b   : > { %4645 = vrot.lane.b32.xlu1 %v15512_v21, %s14737_s23  ;;  %4651 = vrot.lane.b32.xlu0 %v15695_v23, %s14737_s23 }
 0x32d   : > { %v16075_v35 = vpop.permute.xlu1 %4225  ;;  %v16077_v39 = vpop.permute.xlu0 %4319 }
 0x32e   : > { %20725 = vst [vmem:[#allocation128_spill] sm:$0xff] %v16075_v35  ;;  %20726 = vst [vmem:[#allocation129_spill] sm:$0xff] %v16077_v39 }
 0x32f   : > { %4649 = vrot.lane.b32.xlu1 %v15619_v30, %s14737_s23  ;;  %4655 = vrot.lane.b32.xlu0 %v15795_v27, %s14737_s23 }
 0x331   : > { %v16083_v49 = vpop.permute.xlu1 %4273  ;;  %v16085_v45 = vpop.permute.xlu0 %4367 }
 0x332   : > { %20727 = vst [vmem:[#allocation130_spill] sm:$0xff] %v16083_v49  ;;  %20728 = vst [vmem:[#allocation131_spill] sm:$0xff] %v16085_v45 }
 0x333   : > { %4653 = vrot.lane.b32.xlu1 %v15715_v26, %s14737_s23  ;;  %4659 = vrot.lane.b32.xlu0 %v15891_v33, %s14737_s23 }
 0x335   : > { %v16091_v28 = vpop.permute.xlu1 %4321  ;;  %v16093_v35 = vpop.permute.xlu0 %4415 }
 0x336   : > { %20729 = vst [vmem:[#allocation132_spill] sm:$0xff] %v16091_v28  ;;  %20730 = vst [vmem:[#allocation133_spill] sm:$0xff] %v16093_v35 }
 0x337   : > { %4657 = vrot.lane.b32.xlu1 %v15811_v29, %s14737_s23  ;;  %4679 = vrot.lane.b32.xlu0 %v15252_v40, %s14738_s24 }
 0x339   : > { %v16099_v49 = vpop.permute.xlu1 %4369  ;;  %v16101_v39 = vpop.permute.xlu0 %4463 }
 0x33a   : > { %20731 = vst [vmem:[#allocation134_spill] sm:$0xff] %v16099_v49  ;;  %20732 = vst [vmem:[#allocation135_spill] sm:$0xff] %v16101_v39 }
 0x33b   : > { %4661 = vrot.lane.b32.xlu1 %v15905_v54, %s14737_s23  ;;  %4683 = vrot.lane.b32.xlu0 %v15318_v4, %s14738_s24 }
 0x33d   : > { %v16107_v28 = vpop.permute.xlu1 %4417  ;;  %v16109_v35 = vpop.permute.xlu0 %4511 }
 0x33e   : > { %20733 = vst [vmem:[#allocation136_spill] sm:$0xff] %v16107_v28  ;;  %20734 = vst [vmem:[#allocation137_spill] sm:$0xff] %v16109_v35 }
 0x33f   : > { %4681 = vrot.lane.b32.xlu1 %v15268_v46, %s14738_s24  ;;  %4687 = vrot.lane.b32.xlu0 %v15374_v32, %s14738_s24 }
 0x341   : > { %v16115_v45 = vpop.permute.xlu1 %4465  ;;  %v16117_v49 = vpop.permute.xlu0 %4559 }
 0x342   : > { %20735 = vst [vmem:[#allocation138_spill] sm:$0xff] %v16115_v45  ;;  %20736 = vst [vmem:[#allocation139_spill] sm:$0xff] %v16117_v49 }
 0x343   : > { %4685 = vrot.lane.b32.xlu1 %v15330_v13, %s14738_s24  ;;  %4691 = vrot.lane.b32.xlu0 %v15472_v6, %s14738_s24 }
 0x345   : > { %v16123_v39 = vpop.permute.xlu1 %4513  ;;  %v16125_v28 = vpop.permute.xlu0 %4083 }
 0x346   : > { %20737 = vst [vmem:[#allocation140_spill] sm:$0xff] %v16123_v39  ;;  %20738 = vst [vmem:[#allocation141_spill] sm:$0xff] %v16125_v28 }
 0x347   : > { %4689 = vrot.lane.b32.xlu1 %v15386_v18, %s14738_s24  ;;  %4695 = vrot.lane.b32.xlu0 %v15599_v56, %s14738_s24 }
 0x349   : > { %v16131_v35 = vpop.permute.xlu1 %4561  ;;  %v16133_v45 = vpop.permute.xlu0 %4131 }
 0x34a   : > { %20739 = vst [vmem:[#allocation142_spill] sm:$0xff] %v16131_v35  ;;  %20740 = vst [vmem:[#allocation143_spill] sm:$0xff] %v16133_v45 }
 0x34b   : > { %4693 = vrot.lane.b32.xlu1 %v15512_v21, %s14738_s24  ;;  %4699 = vrot.lane.b32.xlu0 %v15695_v23, %s14738_s24 }
 0x34d   : > { %v16139_v49 = vpop.permute.xlu1 %4085  ;;  %v16141_v39 = vpop.permute.xlu0 %4179 }
 0x34e   : > { %20741 = vst [vmem:[#allocation144_spill] sm:$0xff] %v16139_v49  ;;  %20742 = vst [vmem:[#allocation145_spill] sm:$0xff] %v16141_v39 }
 0x34f   : > { %4697 = vrot.lane.b32.xlu1 %v15619_v30, %s14738_s24  ;;  %4703 = vrot.lane.b32.xlu0 %v15795_v27, %s14738_s24 }
 0x351   : > { %v16147_v28 = vpop.permute.xlu1 %4133  ;;  %v16149_v35 = vpop.permute.xlu0 %4227 }
 0x352   : > { %20743 = vst [vmem:[#allocation146_spill] sm:$0xff] %v16147_v28  ;;  %20744 = vst [vmem:[#allocation147_spill] sm:$0xff] %v16149_v35 }
 0x353   : > { %4701 = vrot.lane.b32.xlu1 %v15715_v26, %s14738_s24  ;;  %4707 = vrot.lane.b32.xlu0 %v15891_v33, %s14738_s24 }
 0x355   : > { %v16155_v45 = vpop.permute.xlu1 %4181  ;;  %v16157_v49 = vpop.permute.xlu0 %4275 }
 0x356   : > { %20745 = vst [vmem:[#allocation148_spill] sm:$0xff] %v16155_v45  ;;  %20746 = vst [vmem:[#allocation149_spill] sm:$0xff] %v16157_v49 }
 0x357   : > { %4705 = vrot.lane.b32.xlu1 %v15811_v29, %s14738_s24  ;;  %4727 = vrot.lane.b32.xlu0 %v15252_v40, %s14739_s25 }
 0x359   : > { %v16163_v28 = vpop.permute.xlu1 %4229  ;;  %v16165_v35 = vpop.permute.xlu0 %4323 }
 0x35a   : > { %20747 = vst [vmem:[#allocation150_spill] sm:$0xff] %v16163_v28  ;;  %20748 = vst [vmem:[#allocation151_spill] sm:$0xff] %v16165_v35 }
 0x35b   : > { %4709 = vrot.lane.b32.xlu1 %v15905_v54, %s14738_s24  ;;  %4731 = vrot.lane.b32.xlu0 %v15318_v4, %s14739_s25 }
 0x35d   : > { %v16171_v45 = vpop.permute.xlu1 %4277  ;;  %v16173_v49 = vpop.permute.xlu0 %4371 }
 0x35e   : > { %20749 = vst [vmem:[#allocation152_spill] sm:$0xff] %v16171_v45  ;;  %20750 = vst [vmem:[#allocation153_spill] sm:$0xff] %v16173_v49 }
 0x35f   : > { %4729 = vrot.lane.b32.xlu1 %v15268_v46, %s14739_s25  ;;  %4735 = vrot.lane.b32.xlu0 %v15374_v32, %s14739_s25 }
 0x361   : > { %v16179_v39 = vpop.permute.xlu1 %4325  ;;  %v16181_v28 = vpop.permute.xlu0 %4419 }
 0x362   : > { %20751 = vst [vmem:[#allocation154_spill] sm:$0xff] %v16179_v39  ;;  %20752 = vst [vmem:[#allocation155_spill] sm:$0xff] %v16181_v28 }
 0x363   : > { %4733 = vrot.lane.b32.xlu1 %v15330_v13, %s14739_s25  ;;  %4739 = vrot.lane.b32.xlu0 %v15472_v6, %s14739_s25 }
 0x365   : > { %v16187_v35 = vpop.permute.xlu1 %4373  ;;  %v16189_v45 = vpop.permute.xlu0 %4467 }
 0x366   : > { %20753 = vst [vmem:[#allocation156_spill] sm:$0xff] %v16187_v35  ;;  %20754 = vst [vmem:[#allocation157_spill] sm:$0xff] %v16189_v45 }
 0x367   : > { %4737 = vrot.lane.b32.xlu1 %v15386_v18, %s14739_s25  ;;  %4743 = vrot.lane.b32.xlu0 %v15599_v56, %s14739_s25 }
 0x369   : > { %v16195_v49 = vpop.permute.xlu1 %4421  ;;  %v16197_v39 = vpop.permute.xlu0 %4515 }
 0x36a   : > { %20755 = vst [vmem:[#allocation158_spill] sm:$0xff] %v16195_v49  ;;  %20756 = vst [vmem:[#allocation159_spill] sm:$0xff] %v16197_v39 }
 0x36b   : > { %4741 = vrot.lane.b32.xlu1 %v15512_v21, %s14739_s25  ;;  %4747 = vrot.lane.b32.xlu0 %v15695_v23, %s14739_s25 }
 0x36d   : > { %v16203_v28 = vpop.permute.xlu1 %4469  ;;  %v16205_v35 = vpop.permute.xlu0 %4563 }
 0x36e   : > { %20757 = vst [vmem:[#allocation160_spill] sm:$0xff] %v16203_v28  ;;  %20758 = vst [vmem:[#allocation161_spill] sm:$0xff] %v16205_v35 }
 0x36f   : > { %4745 = vrot.lane.b32.xlu1 %v15619_v30, %s14739_s25  ;;  %4751 = vrot.lane.b32.xlu0 %v15795_v27, %s14739_s25 }
 0x371   : > { %v16211_v45 = vpop.permute.xlu1 %4517  ;;  %v16213_v49 = vpop.permute.xlu0 %4591 }
 0x372   : > { %20759 = vst [vmem:[#allocation162_spill] sm:$0xff] %v16211_v45  ;;  %20760 = vst [vmem:[#allocation163_spill] sm:$0xff] %v16213_v49 }
 0x373   : > { %4749 = vrot.lane.b32.xlu1 %v15715_v26, %s14739_s25  ;;  %4755 = vrot.lane.b32.xlu0 %v15891_v33, %s14739_s25 }
 0x375   : > { %v16219_v39 = vpop.permute.xlu1 %4565  ;;  %v16221_v28 = vpop.permute.xlu0 %4595 }
 0x376   : > { %20761 = vst [vmem:[#allocation164_spill] sm:$0xff] %v16219_v39  ;;  %20762 = vst [vmem:[#allocation165_spill] sm:$0xff] %v16221_v28 }
 0x377   : > { %4753 = vrot.lane.b32.xlu1 %v15811_v29, %s14739_s25  ;;  %v4871_v29 = vcombine.low %v15489_v34, %v15492_v37 }
 0x379   : > { %v16225_v35 = vpop.permute.xlu1 %4593  ;;  %v16227_v27 = vpop.permute.xlu0 %4599 }
 0x37a   : > { %20763 = vst [vmem:[#allocation166_spill] sm:$0xff] %v16225_v35  ;;  %20764 = vst [vmem:[#allocation167_spill] sm:$0xff] %v16227_v27  ;;  %v4839_v27 = vcombine.low %v15439_v58, %v15442_v1 }
 0x37b   : > { %4757 = vrot.lane.b32.xlu1 %v15905_v54, %s14739_s25 }
 0x37d   : > { %v16231_v45 = vpop.permute.xlu1 %4597  ;;  %v16233_v26 = vpop.permute.xlu0 %4603 }
 0x37e   : > { %20765 = vst [vmem:[#allocation168_spill] sm:$0xff] %v16231_v45  ;;  %20766 = vst [vmem:[#allocation169_spill] sm:$0xff] %v16233_v26  ;;  %v4879_v26 = vrot.slane %v4871_v29, %v15499_v43 }
 0x381   : > { %v16235_v23 = vpop.permute.xlu1 %4601  ;;  %v16237_v33 = vpop.permute.xlu0 %4607 }
 0x382   : > { %20767 = vst [vmem:[#allocation170_spill] sm:$0xff] %v16235_v23  ;;  %20768 = vst [vmem:[#allocation171_spill] sm:$0xff] %v16237_v33  ;;  %v4847_v23 = vrot.slane %v4839_v27, %v15499_v43 }
 0x384   : > { %v4904_v58 = vcombine.high %v4847_v23, %v4879_v26 }
 0x385   : > { %v16239_v39 = vpop.permute.xlu1 %4605  ;;  %v16243_v30 = vpop.permute.xlu0 %4611 }
 0x386   : > { %20769 = vst [vmem:[#allocation172_spill] sm:$0xff] %v16239_v39  ;;  %20770 = vst [vmem:[#allocation173_spill] sm:$0xff] %v16243_v30  ;;  %v4903_v39 = vcombine.low %v4847_v23, %v4879_v26  ;;  %v9133_v29 = vsel %vm487_vm1, %v4904_v58, -inf }
 0x388   : > { %v9127_v37 = vsel %vm487_vm1, %v4903_v39, -inf }
 0x389   : > { %v16247_v5 = vpop.permute.xlu1 %4609  ;;  %v16249_v54 = vpop.permute.xlu0 %4631 }
 0x38a   : > { %20771 = vst [vmem:[#allocation174_spill] sm:$0xff] %v16247_v5 }
 0x38d   : > { %v16253_v56 = vpop.permute.xlu1 %4613  ;;  %v16255_v33 = vpop.permute.xlu0 %4635 }
 0x38e   : > { %20772 = vst [vmem:[#allocation175_spill] sm:$0xff] %v16253_v56 }
 0x391   : > { %v16257_v59 = vpop.permute.xlu1 %4633  ;;  %v16259_v34 = vpop.permute.xlu0 %4639 }
 0x392   : > { %9128 = vmax.xlane.f32.xlu0 %v9127_v37 }
 0x395   : > { %v16262_v1 = vpop.permute.xlu1 %4637  ;;  %v16264_v30 = vpop.permute.xlu0 %4643 }
 0x396   : > { %20773 = vst [vmem:[#allocation176_spill] sm:$0xff] %v16264_v30  ;;  %9134 = vmax.xlane.f32.xlu0 %v9133_v29 }
 0x399   : > { %v16267_v27 = vpop.permute.xlu1 %4641  ;;  %v16269_v56 = vpop.permute.xlu0 %4647 }
 0x39a   : > { %20774 = vst [vmem:[#allocation177_spill] sm:$0xff] %v16267_v27  ;;  %20775 = vst [vmem:[#allocation178_spill] sm:$0xff] %v16269_v56 }
 0x39d   : > { %v16271_v5 = vpop.permute.xlu1 %4645  ;;  %v16273_v48 = vpop.permute.xlu0 %4651 }
 0x39e   : > { %20776 = vst [vmem:[#allocation179_spill] sm:$0xff] %v16271_v5  ;;  %20777 = vst [vmem:[#allocation180_spill] sm:$0xff] %v16273_v48 }
 0x3a1   : > { %v16275_v52 = vpop.permute.xlu1 %4649  ;;  %v16277_v39 = vpop.permute.xlu0 %4655 }
 0x3a2   : > { %20778 = vst [vmem:[#allocation181_spill] sm:$0xff] %v16275_v52  ;;  %20779 = vst [vmem:[#allocation182_spill] sm:$0xff] %v16277_v39 }
 0x3a5   : > { %v16279_v23 = vpop.permute.xlu1 %4653  ;;  %v16281_v26 = vpop.permute.xlu0 %4659 }
 0x3a6   : > { %20780 = vst [vmem:[#allocation183_spill] sm:$0xff] %v16279_v23  ;;  %20781 = vst [vmem:[#allocation184_spill] sm:$0xff] %v16281_v26 }
 0x3a9   : > { %v16283_v37 = vpop.permute.xlu1 %4657  ;;  %v4680_v58 = vpop.permute.xlu0 %4679 }
 0x3aa   : > { %20782 = vst [vmem:[#allocation185_spill] sm:$0xff] %v16283_v37 }
 0x3ad   : > { %v16285_v29 = vpop.permute.xlu1 %4661  ;;  %v16287_v45 = vpop.permute.xlu0 %4683 }
 0x3ae   : > { %20783 = vst [vmem:[#allocation186_spill] sm:$0xff] %v16285_v29  ;;  %v4927_v29 = vcombine.low %v15514_v24, %v15541_v15 }
 0x3b0   : > { %v4935_v30 = vrot.slane %v4927_v29, %v15424_v57  ;;  %v4792_v29 = vcombine.high %v15416_v36, %v15428_v42  ;;  %v4928_v36 = vcombine.high %v15514_v24, %v15541_v15  ;;  %v4944_v42 = vcombine.high %v15550_v20, %v4680_v58 }
 0x3b1   : > { %v16289_v56 = vpop.permute.xlu1 %4681  ;;  %v16291_v5 = vpop.permute.xlu0 %4687 }
 0x3b2   : > { %20784 = vst [vmem:[#allocation187_spill] sm:$0xff] %v16291_v5 }
 0x3b5   : > { %v16293_v48 = vpop.permute.xlu0 %4691  ;;  %v16295_v52 = vpop.permute.xlu1 %4685 }
 0x3b6   : > { %20785 = vst [vmem:[#allocation188_spill] sm:$0xff] %v16293_v48  ;;  %v4911_v48 = vcombine.low %v15494_v38, %v15532_v55 }
 0x3b9   : > { %v16297_v39 = vpop.permute.xlu0 %4695  ;;  %v16299_v23 = vpop.permute.xlu1 %4689 }
 0x3ba   : > { %20786 = vst [vmem:[#allocation189_spill] sm:$0xff] %v16297_v39  ;;  %20787 = vst [vmem:[#allocation190_spill] sm:$0xff] %v16299_v23  ;;  %v4943_v39 = vcombine.low %v15550_v20, %v4680_v58 }
 0x3bc   : > { %v4951_v35 = vrot.slane %v4943_v39, %v15424_v57 }
 0x3bd   : > { %v16301_v26 = vpop.permute.xlu0 %4699  ;;  %v16305_v21 = vpop.permute.xlu1 %4693 }
 0x3be   : > { %20788 = vst [vmem:[#allocation191_spill] sm:$0xff] %v16301_v26  ;;  %20790 = vst [vmem:[#allocation193_spill] sm:$0xff] %v16305_v21  ;;  %v4919_v26 = vrot.slane %v4911_v48, %v15424_v57 }
 0x3c0   : > { %v4975_v21 = vcombine.low %v4919_v26, %v4935_v30 }
 0x3c1   : > { %v16303_v37 = vpop.permute.xlu0 %4703  ;;  %v16315_v44 = vpop.permute.xlu1 %4697 }
 0x3c2   : > { %20789 = vst [vmem:[#allocation192_spill] sm:$0xff] %v16303_v37  ;;  %20792 = vst [vmem:[#allocation195_spill] sm:$0xff] %v16315_v44  ;;  %v4808_v44 = vcombine.high %v15444_v3, %v15462_v16  ;;  %v4983_v49 = vrot.slane %v4975_v21, %v15499_v43  ;;  %v4976_v3 = vcombine.high %v4919_v26, %v4935_v30 }
 0x3c3   : > { %v4806_v16 = vrot.slane %v4792_v29, %v15424_v57  ;;  %v4912_v21 = vcombine.high %v15494_v38, %v15532_v55 }
 0x3c4   : > { %v4990_v38 = vrot.slane %v4976_v3, %v15499_v43 }
 0x3c5   : > { %v16309_v28 = vpop.permute.xlu0 %4707  ;;  %v16325_v18 = vpop.permute.xlu1 %4701 }
 0x3c6   : > { %20791 = vst [vmem:[#allocation194_spill] sm:$0xff] %v16309_v28  ;;  %v4824_v28 = vcombine.high %v15454_v63, %v15474_v11  ;;  %20793 = vst [vmem:[#allocation196_spill] sm:$0xff] %v16325_v18 }
 0x3c8   : > { %v4838_v63 = vrot.slane %v4824_v28, %v15424_v57 }
 0x3c9   : > { %v4728_v6 = vpop.permute.xlu0 %4727 }
 0x3ca   : > { %v4959_v37 = vcombine.low %v16249_v54, %v4728_v6  ;;  %v4960_v48 = vcombine.high %v16249_v54, %v4728_v6  ;;  %v4822_v6 = vrot.slane %v4808_v44, %v15424_v57  ;;  %v16352_v54 = vrot.slane %v4928_v36, %v15424_v57 }
 0x3cb   : > { %v4958_v44 = vrot.slane %v4944_v42, %v15424_v57  ;;  %v5095_v36 = vcombine.low %v15476_v25, %v15516_v50  ;;  %v20797_v42 = vcombine.high %v15519_v51, %v15510_v47 }
 0x3cc   : > { %v4967_v23 = vrot.slane %v4959_v37, %v15424_v57  ;;  %v4776_v37 = vcombine.high %v15252_v40, %v15414_v53  ;;  %v16343_v40 = vrot.slane %v4960_v48, %v15424_v57  ;;  %v16345_v53 = vpop.permute.xlu1 %4705  ;;  %v4887_v20 = vcombine.low %v4822_v6, %v4838_v63 }
 0x3cd   : > { %20794 = vst [vmem:[#allocation197_spill] sm:$0xff] %v16345_v53  ;;  %v9145_v3 = vsel %vm487_vm1, %v20797_v42, -inf  ;;  %v20868_v53 = vld [vmem:[#allocation176_spill] sm:$0xff] }
 0x3ce   : > { %v5007_v27 = vcombine.low %v4951_v35, %v4967_v23  ;;  %v5008_v11 = vcombine.high %v4951_v35, %v4967_v23  ;;  %v4790_v30 = vrot.slane %v4776_v37, %v15424_v57  ;;  %v4926_v35 = vrot.slane %v4912_v21, %v15424_v57 }
 0x3cf   : > { %v4895_v26 = vrot.slane %v4887_v20, %v15499_v43 }
 0x3d0   : > { %v5015_v39 = vrot.slane %v5007_v27, %v15499_v43  ;;  %v5022_v15 = vrot.slane %v5008_v11, %v15499_v43  ;;  %v4855_v55 = vcombine.low %v4790_v30, %v4806_v16  ;;  %v20795_v27 = vcombine.low %v15519_v51, %v15510_v47  ;;  %v16364_v58 = vpop.permute.xlu1 %4709 }
 0x3d1   : > { %20796 = vst [vmem:[#allocation198_spill] sm:$0xff] %v16364_v58  ;;  %v4888_v11 = vcombine.high %v4822_v6, %v4838_v63  ;;  %v5079_v63 = vcombine.low %v15464_v2, %v15496_v41  ;;  %v5103_v51 = vrot.slane %v5095_v36, %v15424_v57  ;;  %v5215_v36 = vcombine.low %v15566_v22, %v16289_v56 }
 0x3d2   : > { %v5040_v18 = vcombine.high %v4983_v49, %v5015_v39  ;;  %v5039_v5 = vcombine.low %v4983_v49, %v5015_v39  ;;  %v4991_v49 = vcombine.low %v4926_v35, %v16352_v54  ;;  %v9139_v23 = vsel %vm487_vm1, %v20795_v27, -inf }
 0x3d3   : > { %v5042_v48 = vcombine.high %v4990_v38, %v5022_v15  ;;  %v4863_v37 = vrot.slane %v4855_v55, %v15499_v43  ;;  %v4902_v55 = vrot.slane %v4888_v11, %v15499_v43  ;;  %v20867_v58 = vlaneseq }
 0x3d4   : > { %v9136_v28 = vsel %vm487_vm1, %v5040_v18, -inf  ;;  %v9130_v24 = vsel %vm487_vm1, %v5039_v5, -inf  ;;  %v5023_v18 = vcombine.low %v4958_v44, %v16343_v40  ;;  %v5041_v5 = vcombine.low %v4990_v38, %v5022_v15  ;;  %v16383_v47 = vpop.permute.xlu1 %4729 }
 0x3d5   : > { %9137 = vmax.xlane.f32.xlu0 %v9136_v28  ;;  %9131 = vmax.xlane.f32.xlu1 %v9130_v24  ;;  %v4999_v21 = vrot.slane %v4991_v49, %v15499_v43  ;;  %v4907_v28 = vcombine.low %v4863_v37, %v4895_v26  ;;  %v4856_v24 = vcombine.high %v4790_v30, %v4806_v16  ;;  %v9148_v6 = vsel %vm487_vm1, %v5042_v48, -inf }
 0x3d6   : > { %v9142_v29 = vsel %vm487_vm1, %v5041_v5, -inf  ;;  %v5031_v39 = vrot.slane %v5023_v18, %v15499_v43  ;;  %v5063_v15 = vcombine.low %v15430_v60, %v15456_v8  ;;  %v5047_v38 = vcombine.low %v15268_v46, %v15446_v7 }
 0x3d7   : > { %v9151_v16 = vsel %vm487_vm1, %v4907_v28, -inf  ;;  %v4908_v30 = vcombine.high %v4863_v37, %v4895_v26  ;;  %v4870_v5 = vrot.slane %v4856_v24, %v15499_v43  ;;  %v5087_v49 = vrot.slane %v5079_v63, %v15424_v57 }
 0x3d8   : > { %v5043_v20 = vcombine.low %v4999_v21, %v5031_v39  ;;  %v5071_v18 = vrot.slane %v5063_v15, %v15424_v57  ;;  %v5231_v27 = vcombine.low %v16257_v59, %v16383_v47  ;;  %v5055_v48 = vrot.slane %v5047_v38, %v15424_v57 }
 0x3d9   : > { %9140 = vmax.xlane.f32.xlu1 %v9139_v23  ;;  %9143 = vmax.xlane.f32.xlu0 %v9142_v29  ;;  %v5044_v29 = vcombine.high %v4999_v21, %v5031_v39  ;;  %v5199_v26 = vcombine.low %v15543_v19, %v15558_v31  ;;  %v5024_v37 = vcombine.high %v4958_v44, %v16343_v40  ;;  %v9157_v42 = vsel %vm487_vm1, %v4908_v30, -inf }
 0x3da   : > { %v9154_v23 = vsel %vm487_vm1, %v5043_v20, -inf  ;;  %v5143_v11 = vcombine.low %v5087_v49, %v5103_v51  ;;  %v4992_v28 = vcombine.high %v4926_v35, %v16352_v54  ;;  %v5183_v39 = vcombine.low %v15534_v61, %v15552_v9 }
 0x3db   : > { %v5111_v21 = vcombine.low %v5055_v48, %v5071_v18  ;;  %v5239_v24 = vrot.slane %v5231_v27, %v15424_v57  ;;  %v9160_v15 = vsel %vm487_vm1, %v5044_v29, -inf  ;;  %v5207_v40 = vrot.slane %v5199_v26, %v15424_v57 }
 0x3dc   : > { %v5038_v44 = vrot.slane %v5024_v37, %v15499_v43  ;;  %v5223_v63 = vrot.slane %v5215_v36, %v15424_v57  ;;  %v4910_v20 = vcombine.high %v4870_v5, %v4902_v55  ;;  %v5151_v54 = vrot.slane %v5143_v11, %v15499_v43 }
 0x3dd   : > { %9146 = vmax.xlane.f32.xlu1 %v9145_v3  ;;  %9149 = vmax.xlane.f32.xlu0 %v9148_v6  ;;  %v4909_v3 = vcombine.low %v4870_v5, %v4902_v55  ;;  %v5191_v35 = vrot.slane %v5183_v39, %v15424_v57  ;;  %v5006_v38 = vrot.slane %v4992_v28, %v15499_v43 }
 0x3de   : > { %v5119_v30 = vrot.slane %v5111_v21, %v15499_v43  ;;  %v5096_v29 = vcombine.high %v15476_v25, %v15516_v50  ;;  %v5144_v26 = vcombine.high %v5087_v49, %v5103_v51  ;;  %v9169_v37 = vsel %vm487_vm1, %v4910_v20, -inf }
 0x3df   : > { %v9163_v6 = vsel %vm487_vm1, %v4909_v3, -inf  ;;  %v5247_v27 = vcombine.low %v5191_v35, %v5207_v40  ;;  %v5064_v55 = vcombine.high %v15430_v60, %v15456_v8  ;;  %v5112_v11 = vcombine.high %v5055_v48, %v5071_v18 }
 0x3e0   : > { %v5175_v36 = vcombine.low %v5119_v30, %v5151_v54  ;;  %v5046_v3 = vcombine.high %v5006_v38, %v5038_v44  ;;  %v5048_v25 = vcombine.high %v15268_v46, %v15446_v7  ;;  %v5110_v51 = vrot.slane %v5096_v29, %v15424_v57 }
 0x3e1   : > { %9152 = vmax.xlane.f32.xlu1 %v9151_v16  ;;  %9155 = vmax.xlane.f32.xlu0 %v9154_v23  ;;  %v5279_v16 = vcombine.low %v5223_v63, %v5239_v24  ;;  %v5045_v23 = vcombine.low %v5006_v38, %v5038_v44  ;;  %v5255_v50 = vrot.slane %v5247_v27, %v15499_v43 }
 0x3e2   : > { %v9175_v60 = vsel %vm487_vm1, %v5175_v36, -inf  ;;  %v5176_v8 = vcombine.high %v5119_v30, %v5151_v54  ;;  %v5158_v49 = vrot.slane %v5144_v26, %v15499_v43  ;;  %v5232_v18 = vcombine.high %v16257_v59, %v16383_v47 }
 0x3e3   : > { %v9166_v5 = vsel %vm487_vm1, %v5045_v23, -inf  ;;  %v5287_v28 = vrot.slane %v5279_v16, %v15499_v43  ;;  %v5078_v39 = vrot.slane %v5064_v55, %v15424_v57  ;;  %v5126_v7 = vrot.slane %v5112_v11, %v15499_v43 }
 0x3e4   : > { %v5062_v21 = vrot.slane %v5048_v25, %v15424_v57  ;;  %v5248_v44 = vcombine.high %v5191_v35, %v5207_v40  ;;  %v5216_v59 = vcombine.high %v15566_v22, %v16289_v56  ;;  %v5246_v20 = vrot.slane %v5232_v18, %v15424_v57  ;;  %v20799_v18 = vld [vmem:[#allocation6_spill] sm:$0xff] }
 0x3e5   : > { %9158 = vmax.xlane.f32.xlu1 %v9157_v42  ;;  %9161 = vmax.xlane.f32.xlu0 %v9160_v15  ;;  %v5080_v42 = vcombine.high %v15464_v2, %v15496_v41  ;;  %v5280_v2 = vcombine.high %v5223_v63, %v5239_v24  ;;  %v9172_v41 = vsel %vm487_vm1, %v5046_v3, -inf  ;;  %v5311_v48 = vcombine.low %v5255_v50, %v5287_v28 }
 0x3e6   : > { %v5200_v15 = vcombine.high %v15543_v19, %v15558_v31  ;;  %v5184_v24 = vcombine.high %v15534_v61, %v15552_v9  ;;  %v9181_v63 = vsel %vm487_vm1, %v5176_v8, -inf  ;;  %v5312_v38 = vcombine.high %v5255_v50, %v5287_v28  ;;  %v20798_v50 = vld [vmem:[#allocation9_spill] sm:$0xff] }
 0x3e7   : > { %v5094_v46 = vrot.slane %v5080_v42, %v15424_v57  ;;  %v9178_v54 = vsel %vm487_vm1, %v5311_v48, -inf  ;;  %v5294_v16 = vrot.slane %v5280_v2, %v15499_v43  ;;  %v5127_v19 = vcombine.low %v5062_v21, %v5078_v39 }
 0x3e8   : > { %v5214_v31 = vrot.slane %v5200_v15, %v15424_v57  ;;  %v5230_v22 = vrot.slane %v5216_v59, %v15424_v57  ;;  %v5262_v56 = vrot.slane %v5248_v44, %v15499_v43  ;;  %v5178_v9 = vcombine.high %v5126_v7, %v5158_v49 }
 0x3e9   : > { %9164 = vmax.xlane.f32.xlu1 %v9163_v6  ;;  %9167 = vmax.xlane.f32.xlu0 %v9166_v5  ;;  %v5159_v47 = vcombine.low %v5094_v46, %v5110_v51  ;;  %v5177_v6 = vcombine.low %v5126_v7, %v5158_v49  ;;  %v5198_v35 = vrot.slane %v5184_v24, %v15424_v57  ;;  %v9184_v27 = vsel %vm487_vm1, %v5312_v38, -inf  ;;  %v20802_v38 = vld [vmem:[#allocation24_spill] sm:$0xff] }
 0x3ea   : > { %v5295_v30 = vcombine.low %v5230_v22, %v5246_v20  ;;  %v5313_v23 = vcombine.low %v5262_v56, %v5294_v16  ;;  %v5135_v29 = vrot.slane %v5127_v19, %v15499_v43  ;;  %v5367_v36 = vcombine.low %v15592_v0, %v15613_v62 }
 0x3eb   : > { %v9187_v61 = vsel %vm487_vm1, %v5177_v6, -inf  ;;  %v5167_v40 = vrot.slane %v5159_v47, %v15499_v43  ;;  %v5263_v26 = vcombine.low %v5198_v35, %v5214_v31  ;;  %v9193_v55 = vsel %vm487_vm1, %v5178_v9, -inf  ;;  %v20801_v6 = vld [vmem:[#allocation18_spill] sm:$0xff] }
 0x3ec   : > { %v9190_v11 = vsel %vm487_vm1, %v5313_v23, -inf  ;;  %v5314_v42 = vcombine.high %v5262_v56, %v5294_v16  ;;  %v5303_v3 = vrot.slane %v5295_v30, %v15499_v43  ;;  %v5128_v28 = vcombine.high %v5062_v21, %v5078_v39  ;;  %v20803_v56 = vld [vmem:[#allocation20_spill] sm:$0xff] }
 0x3ed   : > { %9170 = vmax.xlane.f32.xlu1 %v9169_v37  ;;  %9173 = vmax.xlane.f32.xlu0 %v9172_v41  ;;  %v5160_v37 = vcombine.high %v5094_v46, %v5110_v51  ;;  %v5179_v5 = vcombine.low %v5135_v29, %v5167_v40  ;;  %v5335_v25 = vcombine.low %v15560_v17, %v15576_v14  ;;  %v16463_v51 = vpop.permute.xlu0 %4731 }
 0x3ee   : > { %v5271_v8 = vrot.slane %v5263_v26, %v15499_v43  ;;  %v5180_v49 = vcombine.high %v5135_v29, %v5167_v40  ;;  %v5319_v2 = vcombine.low %v15318_v4, %v20799_v18  ;;  %v5375_v41 = vrot.slane %v5367_v36, %v15424_v57 }
 0x3ef   : > { %v9199_v48 = vsel %vm487_vm1, %v5179_v5, -inf  ;;  %v5174_v39 = vrot.slane %v5160_v37, %v15499_v43  ;;  %v5503_v46 = vcombine.low %v16255_v33, %v16463_v51  ;;  %v5296_v7 = vcombine.high %v5230_v22, %v5246_v20 }
 0x3f0   : > { %v9196_v21 = vsel %vm487_vm1, %v5314_v42, -inf  ;;  %v5315_v15 = vcombine.low %v5271_v8, %v5303_v3  ;;  %v5343_v44 = vrot.slane %v5335_v25, %v15424_v57  ;;  %v5142_v47 = vrot.slane %v5128_v28, %v15499_v43 }
 0x3f1   : > { %9176 = vmax.xlane.f32.xlu1 %v9175_v60  ;;  %9179 = vmax.xlane.f32.xlu0 %v9178_v54  ;;  %v5351_v60 = vcombine.low %v20798_v50, %v15603_v10  ;;  %v5264_v24 = vcombine.high %v5198_v35, %v5214_v31  ;;  %v5487_v16 = vcombine.low %v20802_v38, %v16287_v45  ;;  %v9205_v20 = vsel %vm487_vm1, %v5180_v49, -inf }
 0x3f2   : > { %v5327_v19 = vrot.slane %v5319_v2, %v15424_v57  ;;  %v5181_v40 = vcombine.low %v5142_v47, %v5174_v39  ;;  %v5511_v30 = vrot.slane %v5503_v46, %v15424_v57  ;;  %v5316_v31 = vcombine.high %v5271_v8, %v5303_v3 }
 0x3f3   : > { %v5359_v59 = vrot.slane %v5351_v60, %v15424_v57  ;;  %v5310_v35 = vrot.slane %v5296_v7, %v15499_v43  ;;  %v5495_v26 = vrot.slane %v5487_v16, %v15424_v57  ;;  %v5278_v37 = vrot.slane %v5264_v24, %v15499_v43 }
 0x3f4   : > { %v5383_v23 = vcombine.low %v5327_v19, %v5343_v44  ;;  %v9211_v36 = vsel %vm487_vm1, %v5181_v40, -inf  ;;  %v9208_v3 = vsel %vm487_vm1, %v5316_v31, -inf  ;;  %v5368_v8 = vcombine.high %v15592_v0, %v15613_v62 }
 0x3f5   : > { %9182 = vmax.xlane.f32.xlu1 %v9181_v63  ;;  %9185 = vmax.xlane.f32.xlu0 %v9184_v27  ;;  %v20800_v63 = vld [vmem:[#allocation22_spill] sm:$0xff]  ;;  %v5415_v22 = vcombine.low %v5359_v59, %v5375_v41  ;;  %v9202_v27 = vsel %vm487_vm1, %v5315_v15, -inf  ;;  %v5551_v42 = vcombine.low %v5495_v26, %v5511_v30  ;;  %v5317_v28 = vcombine.low %v5278_v37, %v5310_v35 }
 0x3f6   : > { %v5471_v54 = vcombine.low %v20801_v6, %v20800_v63  ;;  %v5391_v25 = vrot.slane %v5383_v23, %v15499_v43  ;;  %v5416_v49 = vcombine.high %v5359_v59, %v5375_v41  ;;  %v5318_v46 = vcombine.high %v5278_v37, %v5310_v35 }
 0x3f7   : > { %v5423_v5 = vrot.slane %v5415_v22, %v15499_v43  ;;  %v5559_v7 = vrot.slane %v5551_v42, %v15499_v43  ;;  %v5384_v15 = vcombine.high %v5327_v19, %v5343_v44  ;;  %v5320_v0 = vcombine.high %v15318_v4, %v20799_v18  ;;  %v20805_v42 = vld [vmem:[#allocation17_spill] sm:$0xff] }
 0x3f8   : > { %v5479_v29 = vrot.slane %v5471_v54, %v15424_v57  ;;  %v5382_v41 = vrot.slane %v5368_v8, %v15424_v57  ;;  %v5430_v54 = vrot.slane %v5416_v49, %v15499_v43  ;;  %v9220_v44 = vsel %vm487_vm1, %v5318_v46, -inf  ;;  %v20808_v46 = vld [vmem:[#allocation7_spill] sm:$0xff] }
 0x3f9   : > { %9188 = vmax.xlane.f32.xlu1 %v9187_v61  ;;  %9191 = vmax.xlane.f32.xlu0 %v9190_v11  ;;  %v20804_v61 = vld [vmem:[#allocation16_spill] sm:$0xff]  ;;  %v5448_v24 = vcombine.high %v5391_v25, %v5423_v5  ;;  %v5398_v18 = vrot.slane %v5384_v15, %v15499_v43  ;;  %v5334_v16 = vrot.slane %v5320_v0, %v15424_v57  ;;  %v16545_v0 = vpop.permute.xlu1 %4733 }
 0x3fa   : > { %v5455_v9 = vcombine.low %v20804_v61, %v20803_v56  ;;  %v5456_v22 = vcombine.high %v20804_v61, %v20803_v56  ;;  %v20810_v15 = vld [vmem:[#allocation12_spill] sm:$0xff] }
 0x3fb   : > { %v5449_v40 = vcombine.low %v5398_v18, %v5430_v54  ;;  %v5450_v61 = vcombine.high %v5398_v18, %v5430_v54 }
 0x3fc   : > { %v5463_v11 = vrot.slane %v5455_v9, %v15424_v57  ;;  %v9229_v9 = vsel %vm487_vm1, %v5448_v24, -inf }
 0x3fd   : > { %9194 = vmax.xlane.f32.xlu1 %v9193_v55  ;;  %9197 = vmax.xlane.f32.xlu0 %v9196_v21  ;;  %v5182_v55 = vcombine.high %v5142_v47, %v5174_v39  ;;  %v9214_v39 = vsel %vm487_vm1, %v5317_v28, -inf  ;;  %v5336_v21 = vcombine.high %v15560_v17, %v15576_v14  ;;  %v5352_v47 = vcombine.high %v20798_v50, %v15603_v10 }
 0x3fe   : > { %v5519_v60 = vcombine.low %v5463_v11, %v5479_v29  ;;  %v5504_v17 = vcombine.high %v16255_v33, %v16463_v51  ;;  %v5552_v14 = vcombine.high %v5495_v26, %v5511_v30  ;;  %v5520_v19 = vcombine.high %v5463_v11, %v5479_v29 }
 0x3ff   : > { %v9217_v2 = vsel %vm487_vm1, %v5182_v55, -inf  ;;  %v5350_v50 = vrot.slane %v5336_v21, %v15424_v57  ;;  %v5366_v4 = vrot.slane %v5352_v47, %v15424_v57  ;;  %v5488_v33 = vcombine.high %v20802_v38, %v16287_v45  ;;  %v20809_v21 = vld [vmem:[#allocation15_spill] sm:$0xff] }
 0x400   : > { %v5527_v62 = vrot.slane %v5519_v60, %v15499_v43  ;;  %v5518_v30 = vrot.slane %v5504_v17, %v15424_v57  ;;  %v5566_v35 = vrot.slane %v5552_v14, %v15499_v43  ;;  %v5534_v38 = vrot.slane %v5520_v19, %v15499_v43 }
 0x401   : > { %9200 = vmax.xlane.f32.xlu1 %v9199_v48  ;;  %9203 = vmax.xlane.f32.xlu0 %v9202_v27  ;;  %v5447_v48 = vcombine.low %v5391_v25, %v5423_v5  ;;  %v5431_v51 = vcombine.low %v5366_v4, %v5382_v41  ;;  %v5502_v45 = vrot.slane %v5488_v33, %v15424_v57  ;;  %v9235_v56 = vsel %vm487_vm1, %v5449_v40, -inf  ;;  %v20814_v40 = vld [vmem:[#allocation27_spill] sm:$0xff] }
 0x402   : > { %v5583_v10 = vcombine.low %v5527_v62, %v5559_v7  ;;  %v5584_v31 = vcombine.high %v5527_v62, %v5559_v7  ;;  %v5470_v29 = vrot.slane %v5456_v22, %v15424_v57  ;;  %v5432_v11 = vcombine.high %v5366_v4, %v5382_v41  ;;  %v20811_v62 = vld [vmem:[#allocation8_spill] sm:$0xff]  ;;  %v20813_v22 = vld [vmem:[#allocation21_spill] sm:$0xff] }
 0x403   : > { %v9223_v59 = vsel %vm487_vm1, %v5447_v48, -inf  ;;  %v5439_v23 = vrot.slane %v5431_v51, %v15499_v43  ;;  %v5567_v26 = vcombine.low %v5502_v45, %v5518_v30  ;;  %v9241_v25 = vsel %vm487_vm1, %v5450_v61, -inf  ;;  %v20812_v51 = vld [vmem:[#allocation25_spill] sm:$0xff] }
 0x404   : > { %v9226_v27 = vsel %vm487_vm1, %v5583_v10, -inf  ;;  %v9232_v37 = vsel %vm487_vm1, %v5584_v31, -inf  ;;  %v5586_v49 = vcombine.high %v5534_v38, %v5566_v35  ;;  %v5400_v48 = vcombine.high %v5334_v16, %v5350_v50  ;;  %v20815_v31 = vld [vmem:[#allocation23_spill] sm:$0xff] }
 0x405   : > { %9206 = vmax.xlane.f32.xlu1 %v9205_v20  ;;  %9209 = vmax.xlane.f32.xlu0 %v9208_v3  ;;  %v5472_v20 = vcombine.high %v20801_v6, %v20800_v63  ;;  %v5399_v63 = vcombine.low %v5334_v16, %v5350_v50  ;;  %v20806_v3 = vld [vmem:[#allocation13_spill] sm:$0xff]  ;;  %v5623_v47 = vcombine.low %v20810_v15, %v20809_v21 }
 0x406   : > { %v5639_v28 = vcombine.low %v20806_v3, %v20805_v42  ;;  %v5591_v41 = vcombine.low %v15330_v13, %v20811_v62  ;;  %v5446_v14 = vrot.slane %v5432_v11, %v15499_v43  ;;  %v5775_v10 = vcombine.low %v16262_v1, %v16545_v0 }
 0x407   : > { %v5486_v6 = vrot.slane %v5472_v20, %v15424_v57  ;;  %v5407_v55 = vrot.slane %v5399_v63, %v15499_v43  ;;  %v9244_v50 = vsel %vm487_vm1, %v5586_v49, -inf  ;;  %v5631_v16 = vrot.slane %v5623_v47, %v15424_v57 }
 0x408   : > { %v5647_v24 = vrot.slane %v5639_v28, %v15424_v57  ;;  %v5414_v20 = vrot.slane %v5400_v48, %v15499_v43  ;;  %v5599_v19 = vrot.slane %v5591_v41, %v15424_v57  ;;  %v5640_v48 = vcombine.high %v20806_v3, %v20805_v42 }
 0x409   : > { %9212 = vmax.xlane.f32.xlu1 %v9211_v36  ;;  %9215 = vmax.xlane.f32.xlu0 %v9214_v39  ;;  %v5585_v36 = vcombine.low %v5534_v38, %v5566_v35  ;;  %v5535_v5 = vcombine.low %v5470_v29, %v5486_v6  ;;  %v5451_v60 = vcombine.low %v5407_v55, %v5439_v23  ;;  %v20807_v39 = vld [vmem:[#allocation10_spill] sm:$0xff]  ;;  %v20816_v35 = vld [vmem:[#allocation19_spill] sm:$0xff] }
 0x40a   : > { %v5607_v7 = vcombine.low %v20808_v46, %v20807_v39  ;;  %v5452_v17 = vcombine.high %v5407_v55, %v5439_v23  ;;  %v5536_v33 = vcombine.high %v5470_v29, %v5486_v6  ;;  %v5727_v63 = vcombine.low %v20816_v35, %v20815_v31 }
 0x40b   : > { %v9238_v8 = vsel %vm487_vm1, %v5585_v36, -inf  ;;  %v9247_v54 = vsel %vm487_vm1, %v5451_v60, -inf  ;;  %v5453_v38 = vcombine.low %v5414_v20, %v5446_v14  ;;  %v5624_v47 = vcombine.high %v20810_v15, %v20809_v21 }
 0x40c   : > { %v5615_v18 = vrot.slane %v5607_v7, %v15424_v57  ;;  %v5550_v36 = vrot.slane %v5536_v33, %v15499_v43  ;;  %v5735_v28 = vrot.slane %v5727_v63, %v15424_v57  ;;  %v5688_v41 = vcombine.high %v5631_v16, %v5647_v24 }
 0x40d   : > { %9218 = vmax.xlane.f32.xlu1 %v9217_v2  ;;  %9221 = vmax.xlane.f32.xlu0 %v9220_v44  ;;  %v5575_v2 = vrot.slane %v5567_v26, %v15499_v43  ;;  %v5568_v44 = vcombine.high %v5502_v45, %v5518_v30  ;;  %v5759_v30 = vcombine.low %v20814_v40, %v16295_v52  ;;  %v9253_v45 = vsel %vm487_vm1, %v5452_v17, -inf }
 0x40e   : > { %v5655_v29 = vcombine.low %v5599_v19, %v5615_v18  ;;  %v9259_v55 = vsel %vm487_vm1, %v5453_v38, -inf  ;;  %v5654_v3 = vrot.slane %v5640_v48, %v15424_v57  ;;  %v5638_v15 = vrot.slane %v5624_v47, %v15424_v57 }
 0x40f   : > { %v5582_v6 = vrot.slane %v5568_v44, %v15499_v43  ;;  %v5744_v33 = vcombine.high %v20813_v22, %v20812_v51 }
 0x410   : > { %v5663_v49 = vrot.slane %v5655_v29, %v15499_v43 }
 0x411   : > { %9224 = vmax.xlane.f32.xlu1 %v9223_v59  ;;  %9227 = vmax.xlane.f32.xlu0 %v9226_v27  ;;  %v5543_v59 = vrot.slane %v5535_v5, %v15499_v43  ;;  %v5687_v27 = vcombine.low %v5631_v16, %v5647_v24  ;;  %v5454_v5 = vcombine.high %v5414_v20, %v5446_v14 }
 0x412   : > { %v5590_v14 = vcombine.high %v5550_v36, %v5582_v6 }
 0x413   : > { %v5587_v4 = vcombine.low %v5543_v59, %v5575_v2  ;;  %v5588_v23 = vcombine.high %v5543_v59, %v5575_v2  ;;  %v5695_v11 = vrot.slane %v5687_v27, %v15499_v43  ;;  %v5608_v2 = vcombine.high %v20808_v46, %v20807_v39 }
 0x414   : > { %v9265_v59 = vsel %vm487_vm1, %v5454_v5, -inf  ;;  %v5592_v39 = vcombine.high %v15330_v13, %v20811_v62  ;;  %v5656_v46 = vcombine.high %v5599_v19, %v5615_v18  ;;  %v9268_v13 = vsel %vm487_vm1, %v5590_v14, -inf  ;;  %v20821_v14 = vld [vmem:[#allocation26_spill] sm:$0xff] }
 0x415   : > { %9230 = vmax.xlane.f32.xlu1 %v9229_v9  ;;  %9233 = vmax.xlane.f32.xlu0 %v9232_v37  ;;  %v5743_v9 = vcombine.low %v20813_v22, %v20812_v51  ;;  %v9250_v61 = vsel %vm487_vm1, %v5587_v4, -inf  ;;  %v5767_v37 = vrot.slane %v5759_v30, %v15424_v57  ;;  %v9256_v60 = vsel %vm487_vm1, %v5588_v23, -inf }
 0x416   : > { %v5622_v42 = vrot.slane %v5608_v2, %v15424_v57  ;;  %v5776_v4 = vcombine.high %v16262_v1, %v16545_v0  ;;  %v5606_v18 = vrot.slane %v5592_v39, %v15424_v57  ;;  %v5670_v20 = vrot.slane %v5656_v46, %v15499_v43  ;;  %v20822_v39 = vld [vmem:[#allocation37_spill] sm:$0xff]  ;;  %v20823_v46 = vld [vmem:[#allocation32_spill] sm:$0xff] }
 0x417   : > { %v5751_v26 = vrot.slane %v5743_v9, %v15424_v57  ;;  %v5703_v19 = vcombine.low %v5638_v15, %v5654_v3  ;;  %v5760_v30 = vcombine.high %v20814_v40, %v16295_v52  ;;  %v5728_v1 = vcombine.high %v20816_v35, %v20815_v31 }
 0x418   : > { %v5671_v27 = vcombine.low %v5606_v18, %v5622_v42  ;;  %v5704_v22 = vcombine.high %v5638_v15, %v5654_v3  ;;  %v16615_v52 = vrot.slane %v5744_v33, %v15424_v57  ;;  %v5672_v23 = vcombine.high %v5606_v18, %v5622_v42 }
 0x419   : > { %9236 = vmax.xlane.f32.xlu1 %v9235_v56  ;;  %9239 = vmax.xlane.f32.xlu0 %v9238_v8  ;;  %v5783_v56 = vrot.slane %v5775_v10, %v15424_v57  ;;  %v5589_v8 = vcombine.low %v5550_v36, %v5582_v6  ;;  %v5791_v7 = vcombine.low %v5735_v28, %v5751_v26 }
 0x41a   : > { %v5720_v10 = vcombine.high %v5663_v49, %v5695_v11  ;;  %v5792_v9 = vcombine.high %v5735_v28, %v5751_v26  ;;  %v5774_v40 = vrot.slane %v5760_v30, %v15424_v57  ;;  %v5711_v35 = vrot.slane %v5703_v19, %v15499_v43 }
 0x41b   : > { %v9262_v17 = vsel %vm487_vm1, %v5589_v8, -inf  ;;  %v5799_v21 = vrot.slane %v5791_v7, %v15499_v43  ;;  %v5824_v16 = vcombine.high %v5767_v37, %v5783_v56  ;;  %v5679_v26 = vrot.slane %v5671_v27, %v15499_v43  ;;  %v20818_v8 = vld [vmem:[#allocation35_spill] sm:$0xff] }
 0x41c   : > { %v9277_v0 = vsel %vm487_vm1, %v5720_v10, -inf  ;;  %v5806_v31 = vrot.slane %v5792_v9, %v15499_v43  ;;  %v5895_v42 = vcombine.low %v20823_v46, %v20822_v39 }
 0x41d   : > { %9242 = vmax.xlane.f32.xlu1 %v9241_v25  ;;  %9245 = vmax.xlane.f32.xlu0 %v9244_v50  ;;  %v5823_v25 = vcombine.low %v5767_v37, %v5783_v56  ;;  %v5702_v50 = vrot.slane %v5688_v41, %v15499_v43  ;;  %v5838_v51 = vrot.slane %v5824_v16, %v15499_v43  ;;  %v16654_v16 = vpop.permute.xlu1 %4737 }
 0x41e   : > { %v5742_v37 = vrot.slane %v5728_v1, %v15424_v57  ;;  %v5723_v28 = vcombine.low %v5679_v26, %v5711_v35  ;;  %v5724_v7 = vcombine.high %v5679_v26, %v5711_v35  ;;  %v16666_v27 = vrot.slane %v5895_v42, %v15424_v57  ;;  %v20830_v35 = vld [vmem:[#allocation42_spill] sm:$0xff] }
 0x41f   : > { %v5831_v44 = vrot.slane %v5823_v25, %v15499_v43  ;;  %v5721_v63 = vcombine.low %v5670_v20, %v5702_v50  ;;  %v5722_v29 = vcombine.high %v5670_v20, %v5702_v50  ;;  %v5857_v5 = vcombine.low %v5806_v31, %v5838_v51 }
 0x420   : > { %v16627_v25 = vrot.slane %v5704_v22, %v15499_v43  ;;  %v5858_v41 = vcombine.high %v5806_v31, %v5838_v51  ;;  %v9295_v3 = vsel %vm487_vm1, %v5723_v28, -inf  ;;  %v5808_v33 = vcombine.high %v5742_v37, %v16615_v52  ;;  %v20829_v31 = vld [vmem:[#allocation46_spill] sm:$0xff] }
 0x421   : > { %9248 = vmax.xlane.f32.xlu1 %v9247_v54  ;;  %9251 = vmax.xlane.f32.xlu0 %v9250_v61  ;;  %v5719_v54 = vcombine.low %v5663_v49, %v5695_v11  ;;  %v5855_v62 = vcombine.low %v5799_v21, %v5831_v44  ;;  %v5856_v56 = vcombine.high %v5799_v21, %v5831_v44  ;;  %v16612_v61 = vpop.permute.xlu0 %4735  ;;  %v9283_v6 = vsel %vm487_vm1, %v5721_v63, -inf }
 0x422   : > { %v5807_v11 = vcombine.low %v5742_v37, %v16615_v52  ;;  %v9289_v48 = vsel %vm487_vm1, %v5722_v29, -inf  ;;  %v9286_v47 = vsel %vm487_vm1, %v5857_v5, -inf  ;;  %v9292_v20 = vsel %vm487_vm1, %v5858_v41, -inf  ;;  %v20831_v5 = vld [vmem:[#allocation34_spill] sm:$0xff] }
 0x423   : > { %v9271_v24 = vsel %vm487_vm1, %v5719_v54, -inf  ;;  %v9274_v38 = vsel %vm487_vm1, %v5855_v62, -inf  ;;  %v16637_v54 = vrot.slane %v5672_v23, %v15499_v43  ;;  %v6047_v62 = vcombine.low %v16259_v34, %v16612_v61 }
 0x424   : > { %v5815_v21 = vrot.slane %v5807_v11, %v15499_v43  ;;  %v5999_v23 = vcombine.low %v20830_v35, %v20829_v31  ;;  %v20832_v11 = vld [vmem:[#allocation29_spill] sm:$0xff] }
 0x425   : > { %9254 = vmax.xlane.f32.xlu1 %v9253_v45  ;;  %9257 = vmax.xlane.f32.xlu0 %v9256_v60  ;;  %v16608_v45 = vrot.slane %v5776_v4, %v15424_v57  ;;  %v20817_v60 = vld [vmem:[#allocation40_spill] sm:$0xff]  ;;  %v16631_v2 = vpop.permute.xlu0 %4739  ;;  %v5725_v15 = vcombine.low %v16637_v54, %v16627_v25  ;;  %v5726_v22 = vcombine.high %v16637_v54, %v16627_v25  ;;  %v16691_v25 = vpop.permute.xlu1 %4741  ;;  %v20833_v54 = vld [vmem:[#allocation31_spill] sm:$0xff] }
 0x426   : > { %v5911_v49 = vcombine.low %v20818_v8, %v20817_v60  ;;  %20819 = vst [vmem:[#allocation9_spill] sm:$0xff] %v16631_v2  ;;  %v6151_v28 = vcombine.low %v20832_v11, %v20831_v5 }
 0x427   : > { %v5839_v36 = vcombine.low %v5774_v40, %v16608_v45  ;;  %v5840_v18 = vcombine.high %v5774_v40, %v16608_v45  ;;  %v20827_v45 = vld [vmem:[#allocation187_spill] sm:$0xff]  ;;  %v9307_v51 = vsel %vm487_vm1, %v5725_v15, -inf }
 0x428   : > { %v16652_v4 = vrot.slane %v5911_v49, %v15424_v57  ;;  %v5822_v49 = vrot.slane %v5808_v33, %v15499_v43 }
 0x429   : > { %9260 = vmax.xlane.f32.xlu1 %v9259_v55  ;;  %9263 = vmax.xlane.f32.xlu0 %v9262_v17  ;;  %v9280_v55 = vsel %vm487_vm1, %v5856_v56, -inf  ;;  %v20820_v17 = vld [vmem:[#allocation30_spill] sm:$0xff]  ;;  %v16668_v1 = vpop.permute.xlu0 %4743  ;;  %v5854_v37 = vrot.slane %v5840_v18, %v15499_v43 }
 0x42a   : > { %v5879_v44 = vcombine.low %v20821_v14, %v20820_v17  ;;  %v5880_v50 = vcombine.high %v20821_v14, %v20820_v17  ;;  %20825 = vst [vmem:[#allocation6_spill] sm:$0xff] %v16668_v1  ;;  %v5959_v40 = vcombine.low %v16666_v27, %v16652_v4  ;;  %v20834_v17 = vld [vmem:[#allocation2_spill] sm:$0xff] }
 0x42b   : > { %v6135_v14 = vcombine.low %v20834_v17, %v20833_v54 }
 0x42c   : > { %v5887_v30 = vrot.slane %v5879_v44, %v15424_v57  ;;  %v5894_v52 = vrot.slane %v5880_v50, %v15424_v57  ;;  %v6136_v44 = vcombine.high %v20834_v17, %v20833_v54 }
 0x42d   : > { %9266 = vmax.xlane.f32.xlu1 %v9265_v59  ;;  %9269 = vmax.xlane.f32.xlu0 %v9268_v13  ;;  %v5847_v59 = vrot.slane %v5839_v36, %v15499_v43  ;;  %v9301_v13 = vsel %vm487_vm1, %v5724_v7, -inf  ;;  %v6152_v7 = vcombine.high %v20832_v11, %v20831_v5  ;;  %v16706_v42 = vpop.permute.xlu0 %4747 }
 0x42e   : > { %20835 = vst [vmem:[#allocation22_spill] sm:$0xff] %v16706_v42 }
 0x42f   : > { %v5859_v19 = vcombine.low %v5815_v21, %v5847_v59  ;;  %v5860_v26 = vcombine.high %v5815_v21, %v5847_v59  ;;  %v16710_v21 = vrot.slane %v5999_v23, %v15424_v57 }
 0x431   : > { %9272 = vmax.xlane.f32.xlu1 %v9271_v24  ;;  %9275 = vmax.xlane.f32.xlu0 %v9274_v38  ;;  %v20824_v24 = vld [vmem:[#allocation28_spill] sm:$0xff]  ;;  %v20828_v38 = vld [vmem:[#allocation163_spill] sm:$0xff]  ;;  %v9298_v29 = vsel %vm487_vm1, %v5859_v19, -inf  ;;  %v5896_v19 = vcombine.high %v20823_v46, %v20822_v39  ;;  %v5862_v46 = vcombine.high %v5822_v49, %v5854_v37 }
 0x432   : > { %v5863_v10 = vcombine.low %v15374_v32, %v20824_v24  ;;  %v5864_v9 = vcombine.high %v15374_v32, %v20824_v24  ;;  %v6031_v56 = vcombine.low %v20828_v38, %v20827_v45  ;;  %v9304_v24 = vsel %vm487_vm1, %v5860_v26, -inf }
 0x433   : > { %v5910_v26 = vrot.slane %v5896_v19, %v15424_v57 }
 0x434   : > { %v5871_v32 = vrot.slane %v5863_v10, %v15424_v57  ;;  %v5878_v36 = vrot.slane %v5864_v9, %v15424_v57  ;;  %v16700_v41 = vrot.slane %v6031_v56, %v15424_v57  ;;  %v5861_v10 = vcombine.low %v5822_v49, %v5854_v37 }
 0x435   : > { %9278 = vmax.xlane.f32.xlu1 %v9277_v0  ;;  %9281 = vmax.xlane.f32.xlu0 %v9280_v55  ;;  %v20826_v0 = vld [vmem:[#allocation44_spill] sm:$0xff]  ;;  %v9313_v9 = vsel %vm487_vm1, %v5726_v22, -inf }
 0x436   : > { %v6015_v63 = vcombine.low %v20826_v0, %v15753_v12  ;;  %v5927_v55 = vcombine.low %v5871_v32, %v5887_v30  ;;  %v5943_v59 = vcombine.low %v5878_v36, %v5894_v52  ;;  %v5944_v50 = vcombine.high %v5878_v36, %v5894_v52  ;;  %v20838_v36 = vld [vmem:[#allocation43_spill] sm:$0xff] }
 0x437   : > { %v9310_v39 = vsel %vm487_vm1, %v5861_v10, -inf }
 0x438   : > { %v5935_v18 = vrot.slane %v5927_v55, %v15499_v43  ;;  %v16750_v52 = vrot.slane %v5943_v59, %v15499_v43  ;;  %v20839_v55 = vld [vmem:[#allocation39_spill] sm:$0xff]  ;;  %v9316_v59 = vsel %vm487_vm1, %v5862_v46, -inf }
 0x439   : > { %9284 = vmax.xlane.f32.xlu1 %v9283_v6  ;;  %9287 = vmax.xlane.f32.xlu0 %v9286_v47  ;;  %v16684_v6 = vrot.slane %v6047_v62, %v15424_v57  ;;  %v16697_v47 = vrot.slane %v6015_v63, %v15424_v57  ;;  %v5912_v62 = vcombine.high %v20818_v8, %v20817_v60  ;;  %v16734_v8 = vpop.permute.xlu1 %4745 }
 0x43a   : > { %v5960_v60 = vcombine.high %v16666_v27, %v16652_v4  ;;  %20836 = vst [vmem:[#allocation18_spill] sm:$0xff] %v16734_v8  ;;  %v16747_v27 = vpop.permute.xlu0 %4751  ;;  %v6183_v5 = vcombine.low %v20839_v55, %v20838_v36 }
 0x43b   : > { %v6095_v15 = vcombine.low %v16700_v41, %v16684_v6  ;;  %v6063_v33 = vcombine.low %v16710_v21, %v16697_v47  ;;  %v5926_v4 = vrot.slane %v5912_v62, %v15424_v57  ;;  %20837 = vst [vmem:[#allocation24_spill] sm:$0xff] %v16747_v27 }
 0x43c   : > { %v5974_v49 = vrot.slane %v5960_v60, %v15499_v43 }
 0x43d   : > { %9290 = vmax.xlane.f32.xlu1 %v9289_v48  ;;  %9293 = vmax.xlane.f32.xlu0 %v9292_v20  ;;  %v5928_v48 = vcombine.high %v5871_v32, %v5887_v30  ;;  %v16722_v20 = vrot.slane %v6152_v7, %v15424_v57  ;;  %v16730_v30 = vrot.slane %v6135_v14, %v15424_v57  ;;  %v16774_v10 = vpop.permute.xlu1 %4749 }
 0x43e   : > { %v6103_v22 = vrot.slane %v6095_v15, %v15499_v43  ;;  %v6071_v37 = vrot.slane %v6063_v33, %v15499_v43  ;;  %v6096_v7 = vcombine.high %v16700_v41, %v16684_v6  ;;  %v5975_v14 = vcombine.low %v5910_v26, %v5926_v4  ;;  %v20840_v15 = vld [vmem:[#allocation41_spill] sm:$0xff]  ;;  %20842 = vst [vmem:[#allocation20_spill] sm:$0xff] %v16774_v10  ;;  %v16787_v62 = vpop.permute.xlu0 %4755 }
 0x43f   : > { %v16737_v56 = vrot.slane %v5928_v48, %v15499_v43  ;;  %v6048_v48 = vcombine.high %v16259_v34, %v16612_v61  ;;  %v6184_v34 = vcombine.high %v20839_v55, %v20838_v36  ;;  %v6016_v61 = vcombine.high %v20826_v0, %v15753_v12  ;;  %20843 = vst [vmem:[#allocation16_spill] sm:$0xff] %v16787_v62 }
 0x440   : > { %v6127_v54 = vcombine.low %v6071_v37, %v6103_v22  ;;  %v6064_v6 = vcombine.high %v16710_v21, %v16697_v47  ;;  %v6032_v41 = vcombine.high %v20828_v38, %v20827_v45  ;;  %v6128_v0 = vcombine.high %v6071_v37, %v6103_v22 }
 0x441   : > { %9296 = vmax.xlane.f32.xlu1 %v9295_v3  ;;  %9299 = vmax.xlane.f32.xlu0 %v9298_v29  ;;  %v5967_v3 = vrot.slane %v5959_v40, %v15499_v43  ;;  %v16753_v40 = vrot.slane %v5944_v50, %v15499_v43  ;;  %v6191_v50 = vrot.slane %v6183_v5, %v15424_v57 }
 0x442   : > { %v16792_v19 = vrot.slane %v6048_v48, %v15424_v57  ;;  %v9322_v12 = vsel %vm487_vm1, %v6127_v54, -inf  ;;  %v6110_v45 = vrot.slane %v6096_v7, %v15499_v43  ;;  %v16804_v21 = vrot.slane %v6016_v61, %v15424_v57  ;;  %v20849_v61 = vld [vmem:[#allocation166_spill] sm:$0xff] }
 0x443   : > { %v5991_v63 = vcombine.low %v5935_v18, %v5967_v3  ;;  %v16807_v33 = vrot.slane %v6032_v41, %v15424_v57  ;;  %v6198_v60 = vrot.slane %v6184_v34, %v15424_v57  ;;  %v5994_v22 = vcombine.high %v16737_v56, %v5974_v49  ;;  %v20848_v34 = vld [vmem:[#allocation190_spill] sm:$0xff] }
 0x445   : > { %9302 = vmax.xlane.f32.xlu1 %v9301_v13  ;;  %v16716_v13 = vrot.slane %v6151_v28, %v15424_v57  ;;  %9305 = vmax.xlane.f32.xlu0 %v9304_v24  ;;  %v9319_v11 = vsel %vm487_vm1, %v5991_v63, -inf  ;;  %v5992_v28 = vcombine.high %v5935_v18, %v5967_v3  ;;  %v20841_v24 = vld [vmem:[#allocation36_spill] sm:$0xff] }
 0x446   : > { %v6167_v3 = vcombine.low %v20841_v24, %v20840_v15  ;;  %v6168_v38 = vcombine.high %v20841_v24, %v20840_v15  ;;  %v20846_v24 = vld [vmem:[#allocation50_spill] sm:$0xff] }
 0x447   : > { %v6199_v32 = vcombine.low %v16730_v30, %v16716_v13  ;;  %v6200_v23 = vcombine.high %v16730_v30, %v16716_v13  ;;  %v6000_v13 = vcombine.high %v20830_v35, %v20829_v31  ;;  %v9325_v18 = vsel %vm487_vm1, %v5992_v28, -inf }
 0x448   : > { %v6175_v31 = vrot.slane %v6167_v3, %v15424_v57  ;;  %v5983_v35 = vrot.slane %v5975_v14, %v15499_v43  ;;  %v6182_v36 = vrot.slane %v6168_v38, %v15424_v57  ;;  %v9337_v14 = vsel %vm487_vm1, %v5994_v22, -inf  ;;  %v20851_v38 = vld [vmem:[#allocation48_spill] sm:$0xff] }
 0x449   : > { %9308 = vmax.xlane.f32.xlu1 %v9307_v51  ;;  %v16740_v51 = vrot.slane %v6136_v44, %v15424_v57  ;;  %9311 = vmax.xlane.f32.xlu0 %v9310_v39  ;;  %v5976_v44 = vcombine.high %v5910_v26, %v5926_v4  ;;  %v16801_v47 = vrot.slane %v6199_v32, %v15499_v43  ;;  %v16816_v39 = vpop.xlane.xlu0 %9128  ;;  %v9328_v26 = vsel %vm487_vm1, %v6128_v0, -inf }
 0x44a   : > { %v6231_v63 = vcombine.low %v6175_v31, %v6191_v50  ;;  %v16821_v32 = vrot.slane %v6000_v13, %v15424_v57  ;;  %v6111_v4 = vcombine.low %v16807_v33, %v16792_v19  ;;  %v6232_v55 = vcombine.high %v6175_v31, %v6191_v50  ;;  %v20852_v31 = vld [vmem:[#allocation45_spill] sm:$0xff] }
 0x44b   : > { %v6215_v29 = vcombine.low %v16740_v51, %v16722_v20  ;;  %v6216_v17 = vcombine.high %v16740_v51, %v16722_v20  ;;  %v5993_v20 = vcombine.low %v16737_v56, %v5974_v49  ;;  %v16811_v30 = vrot.slane %v5976_v44, %v15499_v43  ;;  %v16814_v51 = vpop.permute.xlu1 %4753 }
 0x44c   : > { %20844 = vst [vmem:[#allocation17_spill] sm:$0xff] %v16814_v51  ;;  %v5995_v5 = vcombine.low %v16750_v52, %v5983_v35  ;;  %v6079_v56 = vcombine.low %v16821_v32, %v16804_v21  ;;  %v5996_v28 = vcombine.high %v16750_v52, %v5983_v35  ;;  %v6247_v7 = vcombine.low %v6182_v36, %v6198_v60 }
 0x44d   : > { %9314 = vmax.xlane.f32.xlu1 %v9313_v9  ;;  %9317 = vmax.xlane.f32.xlu0 %v9316_v59  ;;  %v6078_v9 = vrot.slane %v6064_v6, %v15499_v43  ;;  %v9331_v46 = vsel %vm487_vm1, %v5993_v20, -inf  ;;  %v16835_v49 = vrot.slane %v6215_v29, %v15499_v43  ;;  %v16838_v48 = vrot.slane %v6216_v17, %v15499_v43  ;;  %v20845_v59 = vld [vmem:[#allocation177_spill] sm:$0xff]  ;;  %v20847_v17 = vld [vmem:[#allocation47_spill] sm:$0xff]  ;;  %v16854_v50 = vpop.xlane.xlu0 %9134 }
 0x44e   : > { %v6319_v54 = vcombine.low %v20845_v59, %v16654_v16  ;;  %v6119_v52 = vrot.slane %v6111_v4, %v15499_v43  ;;  %v6239_v29 = vrot.slane %v6231_v63, %v15499_v43  ;;  %v6287_v3 = vcombine.low %v20847_v17, %v20846_v24 }
 0x44f   : > { %v6129_v37 = vcombine.low %v6078_v9, %v6110_v45  ;;  %v6130_v15 = vcombine.high %v6078_v9, %v6110_v45  ;;  %v6303_v6 = vcombine.low %v20849_v61, %v20848_v34  ;;  %v16852_v41 = vpop.permute.xlu1 %4757  ;;  %v9343_v13 = vsel %vm487_vm1, %v5995_v5, -inf }
 0x450   : > { %20850 = vst [vmem:[#allocation13_spill] sm:$0xff] %v16852_v41  ;;  %v6248_v20 = vcombine.high %v6182_v36, %v6198_v60  ;;  %v9349_v0 = vsel %vm487_vm1, %v5996_v28, -inf  ;;  %v5998_v45 = vcombine.high %v16753_v40, %v16811_v30  ;;  %v6271_v35 = vcombine.low %v20852_v31, %v20851_v38 }
 0x451   : > { %9320 = vmax.xlane.f32.xlu1 %v9319_v11  ;;  %9323 = vmax.xlane.f32.xlu0 %v9322_v12  ;;  %v16829_v11 = vrot.slane %v6200_v23, %v15499_v43  ;;  %v5997_v23 = vcombine.low %v16753_v40, %v16811_v30  ;;  %v9334_v44 = vsel %vm487_vm1, %v6129_v37, -inf  ;;  %v6087_v12 = vrot.slane %v6079_v56, %v15499_v43 }
 0x452   : > { %v16865_v9 = vrot.slane %v6319_v54, %v15424_v57  ;;  %v6112_v60 = vcombine.high %v16807_v33, %v16792_v19  ;;  %v9340_v22 = vsel %vm487_vm1, %v6130_v15, -inf  ;;  %v6263_v40 = vcombine.low %v16801_v47, %v6239_v29 }
 0x453   : > { %v9355_v63 = vsel %vm487_vm1, %v5997_v23, -inf  ;;  %v6131_v4 = vcombine.low %v6087_v12, %v6119_v52  ;;  %v6295_v30 = vrot.slane %v6287_v3, %v15424_v57  ;;  %v6080_v33 = vcombine.high %v16821_v32, %v16804_v21 }
 0x454   : > { %v6288_v5 = vcombine.high %v20847_v17, %v20846_v24  ;;  %v16891_v28 = vrot.slane %v6248_v20, %v15499_v43  ;;  %v6279_v54 = vrot.slane %v6271_v35, %v15424_v57  ;;  %v6132_v32 = vcombine.high %v6087_v12, %v6119_v52  ;;  %v20855_v52 = vld [vmem:[#allocation51_spill] sm:$0xff] }
 0x455   : > { %9326 = vmax.xlane.f32.xlu1 %v9325_v18  ;;  %9329 = vmax.xlane.f32.xlu0 %v9328_v26  ;;  %v6246_v18 = vrot.slane %v6232_v55, %v15499_v43  ;;  %v16877_v26 = vrot.slane %v6303_v6, %v15424_v57  ;;  %v6264_v55 = vcombine.high %v16801_v47, %v6239_v29  ;;  %v9346_v21 = vsel %vm487_vm1, %v6131_v4, -inf  ;;  %v20856_v6 = vld [vmem:[#allocation4_spill] sm:$0xff] }
 0x456   : > { %v9361_v23 = vsel %vm487_vm1, %v5998_v45, -inf  ;;  %v9367_v29 = vsel %vm487_vm1, %v6263_v40, -inf  ;;  %v16915_v3 = vrot.slane %v6288_v5, %v15424_v57  ;;  %v6336_v35 = vcombine.high %v6279_v54, %v6295_v30 }
 0x457   : > { %v6265_v19 = vcombine.low %v16829_v11, %v6246_v18  ;;  %v6266_v56 = vcombine.high %v16829_v11, %v6246_v18  ;;  %v6367_v47 = vcombine.low %v16877_v26, %v16865_v9  ;;  %v16902_v11 = vrot.slane %v6112_v60, %v15499_v43  ;;  %v20859_v60 = vld [vmem:[#allocation53_spill] sm:$0xff] }
 0x458   : > { %v16909_v24 = vsel %vm487_vm1, %v6264_v55, -inf  ;;  %20854 = vst [vmem:[#allocation7_spill] sm:$0xff] %v16915_v3  ;;  %v16920_v18 = vrot.slane %v6080_v33, %v15499_v43  ;;  %v9352_v40 = vsel %vm487_vm1, %v6132_v32, -inf  ;;  %v20862_v33 = vld [vmem:[#allocation57_spill] sm:$0xff]  ;;  %v6591_v51 = vcombine.low %v20868_v53, %v16631_v2  ;;  %v20884_v2 = vld [vmem:[#allocation62_spill] sm:$0xff] }
 0x459   : > { %9332 = vmax.xlane.f32.xlu1 %v9331_v46  ;;  %9335 = vmax.xlane.f32.xlu0 %v9334_v44  ;;  %v16869_v46 = vrot.slane %v6247_v7, %v15499_v43  ;;  %v6272_v7 = vcombine.high %v20852_v31, %v20851_v38  ;;  %20853 = vst [vmem:[#allocation10_spill] sm:$0xff] %v16902_v11  ;;  %v16912_v17 = vsel %vm487_vm1, %v6265_v19, -inf  ;;  %v16923_v20 = vsel %vm487_vm1, %v6266_v56, -inf  ;;  %v20861_v19 = vld [vmem:[#allocation63_spill] sm:$0xff] }
 0x45a   : > { %v6335_v44 = vcombine.low %v6279_v54, %v6295_v30  ;;  %20857 = vst [vmem:[#allocation15_spill] sm:$0xff] %v16920_v18  ;;  %v6375_v45 = vrot.slane %v6367_v47, %v15499_v43  ;;  %v6133_v55 = vcombine.low %v16920_v18, %v16902_v11  ;;  %v6455_v5 = vcombine.low %v20862_v33, %v20861_v19  ;;  %v20882_v18 = vld [vmem:[#allocation59_spill] sm:$0xff]  ;;  %v20889_v33 = vld [vmem:[#allocation70_spill] sm:$0xff]  ;;  %v20890_v19 = vld [vmem:[#allocation193_spill] sm:$0xff] }
 0x45b   : > { %v16926_v12 = vrot.slane %v6272_v7, %v15424_v57  ;;  %v6320_v56 = vcombine.high %v20845_v59, %v16654_v16  ;;  %v6368_v16 = vcombine.high %v16877_v26, %v16865_v9  ;;  %v20865_v59 = vld [vmem:[#allocation71_spill] sm:$0xff]  ;;  %v9930_v54 = vand.u32 127, %v20867_v58  ;;  %v20870_v58 = vld [vmem:[#allocation65_spill] sm:$0xff] }
 0x45c   : > { %v6343_v30 = vrot.slane %v6335_v44, %v15499_v43  ;;  %v6304_v44 = vcombine.high %v20849_v61, %v20848_v34  ;;  %v9358_v27 = vsel %vm487_vm1, %v6133_v55, -inf  ;;  %v16973_v9 = vrot.slane %v6336_v35, %v15499_v43  ;;  %v20869_v34 = vld [vmem:[#allocation69_spill] sm:$0xff] }
 0x45d   : > { %9338 = vmax.xlane.f32.xlu1 %v9337_v14  ;;  %9341 = vmax.xlane.f32.xlu0 %v9340_v22  ;;  %v6267_v14 = vcombine.low %v16835_v49, %v16869_v46  ;;  %20858 = vst [vmem:[#allocation12_spill] sm:$0xff] %v16926_v12  ;;  %v20860_v22 = vld [vmem:[#allocation49_spill] sm:$0xff]  ;;  %v16976_v26 = vrot.slane %v6455_v5, %v15424_v57 }
 0x45e   : > { %v6423_v4 = vcombine.low %v20860_v22, %v20859_v60  ;;  %v6399_v62 = vcombine.low %v6343_v30, %v6375_v45  ;;  %v6543_v61 = vcombine.low %v20870_v58, %v20869_v34  ;;  %v16981_v10 = vrot.slane %v6320_v56, %v15424_v57  ;;  %v20873_v55 = vld [vmem:[#allocation165_spill] sm:$0xff] }
 0x45f   : > { %v16932_v38 = vsel %vm487_vm1, %v6267_v14, -inf  ;;  %v20863_v14 = vld [vmem:[#allocation60_spill] sm:$0xff]  ;;  %v16991_v1 = vrot.slane %v6368_v16, %v15499_v43  ;;  %v17000_v56 = vrot.slane %v6304_v44, %v15424_v57  ;;  %v6400_v34 = vcombine.high %v6343_v30, %v6375_v45  ;;  %v20876_v16 = vld [vmem:[#allocation5_spill] sm:$0xff]  ;;  %v20879_v45 = vld [vmem:[#allocation3_spill] sm:$0xff] }
 0x460   : > { %20871 = vst [vmem:[#allocation8_spill] sm:$0xff] %v16981_v10  ;;  %v17017_v11 = vrot.slane %v6543_v61, %v15424_v57 }
 0x461   : > { %9344 = vmax.xlane.f32.xlu1 %v9343_v13  ;;  %9347 = vmax.xlane.f32.xlu0 %v9346_v21  ;;  %v6407_v13 = vcombine.low %v20856_v6, %v20855_v52  ;;  %v20864_v21 = vld [vmem:[#allocation55_spill] sm:$0xff]  ;;  %20874 = vst [vmem:[#allocation25_spill] sm:$0xff] %v17000_v56  ;;  %v6401_v61 = vcombine.low %v16973_v9, %v16991_v1  ;;  %v9376_v53 = vsel %vm487_vm1, %v6400_v34, -inf }
 0x462   : > { %v16879_v37 = vpop.xlane.xlu1 %9131  ;;  %v16881_v36 = vpop.xlane.xlu0 %9137  ;;  %v6439_v32 = vcombine.low %v20864_v21, %v20863_v14  ;;  %v20885_v14 = vld [vmem:[#allocation72_spill] sm:$0xff]  ;;  %v20892_v6 = vld [vmem:[#allocation179_spill] sm:$0xff] }
 0x463   : > { %v16953_v47 = vrot.slane %v6407_v13, %v15424_v57  ;;  %v16967_v13 = vrot.slane %v6423_v4, %v15424_v57  ;;  %v9935_v4 = vadd.s32 4294967288, %v9930_v54  ;;  %v6863_v44 = vcombine.low %v20892_v6, %v16691_v25 }
 0x464   : > { %v16986_v8 = vrot.slane %v6439_v32, %v15424_v57  ;;  %v9370_v32 = vsel %vm487_vm1, %v6399_v62, -inf  ;;  %v6383_v62 = vcombine.low %v17000_v56, %v16981_v10  ;;  %v20888_v10 = vld [vmem:[#allocation74_spill] sm:$0xff] }
 0x465   : > { %9350 = vmax.xlane.f32.xlu1 %v9349_v0  ;;  %9353 = vmax.xlane.f32.xlu0 %v9352_v40  ;;  %v20866_v40 = vld [vmem:[#allocation67_spill] sm:$0xff]  ;;  %v17022_v30 = vsub.s32 %v9935_v4, %v20879_v45  ;;  %v20886_v4 = vld [vmem:[#allocation68_spill] sm:$0xff]  ;;  %v17073_v6 = vrot.slane %v6863_v44, %v15424_v57 }
 0x466   : > { %v16905_v15 = vpop.xlane.xlu1 %9140  ;;  %v16928_v0 = vpop.xlane.xlu0 %9143  ;;  %v6559_v31 = vcombine.low %v20866_v40, %v20865_v59  ;;  %v20877_v59 = vld [vmem:[#allocation56_spill] sm:$0xff]  ;;  %v17055_v56 = vrot.slane %v6383_v62, %v15499_v43 }
 0x467   : > { %20880 = vst [vmem:[#allocation21_spill] sm:$0xff] %v17022_v30  ;;  %v9949_v34 = vrot.slane %v16881_v36, %v17022_v30 }
 0x468   : > { %v16997_v58 = vrot.slane %v6559_v31, %v15424_v57  ;;  %v17012_v31 = vrot.slane %v6591_v51, %v15424_v57  ;;  %v20883_v51 = vld [vmem:[#allocation66_spill] sm:$0xff] }
 0x469   : > { %9356 = vmax.xlane.f32.xlu1 %v9355_v63  ;;  %v6351_v63 = vcombine.low %v16926_v12, %v16915_v3  ;;  %9359 = vmax.xlane.f32.xlu0 %v9358_v27 }
 0x46a   : > { %v16945_v7 = vpop.xlane.xlu1 %9146  ;;  %v16964_v41 = vpop.xlane.xlu0 %9149 }
 0x46b   : > { %v16994_v5 = vrot.slane %v6351_v63, %v15499_v43  ;;  %v20878_v63 = vld [vmem:[#allocation52_spill] sm:$0xff] }
 0x46d   : > { %9362 = vmax.xlane.f32.xlu1 %v9361_v23  ;;  %v20872_v23 = vld [vmem:[#allocation188_spill] sm:$0xff]  ;;  %9368 = vmax.xlane.f32.xlu0 %v9367_v29  ;;  %v17038_v29 = vsub.s32 %v9930_v54, %v20879_v45  ;;  %v9939_v54 = vrot.slane %v16879_v37, %v17022_v30  ;;  %v6402_v37 = vcombine.high %v16973_v9, %v16991_v1 }
 0x46e   : > { %v16983_v42 = vpop.xlane.xlu1 %9152  ;;  %v6575_v35 = vcombine.low %v20873_v55, %v20872_v23  ;;  %v17002_v27 = vpop.xlane.xlu0 %9155  ;;  %v20875_v23 = vld [vmem:[#allocation54_spill] sm:$0xff]  ;;  %v20881_v55 = vld [vmem:[#allocation64_spill] sm:$0xff] }
 0x46f   : > { %20887 = vst [vmem:[#allocation27_spill] sm:$0xff] %v17038_v29  ;;  %v9954_v12 = vrot.slane %v16905_v15, %v17038_v29  ;;  %v9934_v36 = vrot.slane %v16816_v39, %v17038_v29  ;;  %v9963_v62 = vrot.slane %v16945_v7, %v17038_v29  ;;  %v9967_v15 = vrot.slane %v16964_v41, %v17022_v30 }
 0x470   : > { %v17029_v21 = vrot.slane %v6575_v35, %v15424_v57  ;;  %v20891_v35 = vld [vmem:[#allocation168_spill] sm:$0xff]  ;;  %v9976_v1 = vrot.slane %v17002_v27, %v17022_v30 }
 0x471   : > { %9371 = vmax.xlane.f32.xlu1 %v9370_v32  ;;  %9374 = vmax.xlane.f32.xlu0 %v16909_v24  ;;  %v9958_v32 = vrot.slane %v16928_v0, %v17022_v30  ;;  %v9945_v24 = vrot.slane %v16854_v50, %v17038_v29  ;;  %v9972_v0 = vrot.slane %v16983_v42, %v17038_v29 }
 0x472   : > { %v9159_v40 = vpop.xlane.xlu1 %9158  ;;  %v6639_v3 = vcombine.low %v17029_v21, %v17012_v31  ;;  %v9162_v52 = vpop.xlane.xlu0 %9161  ;;  %v9941_v39 = vsel %vm9940_vm2, %v9939_v54, %v9934_v36  ;;  %v9968_v27 = vsel %vm9940_vm2, %v9967_v15, %v9963_v62  ;;  %v6404_v62 = vcombine.high %v16994_v5, %v17055_v56 }
 0x473   : > { %v9950_v50 = vsel %vm9940_vm2, %v9949_v34, %v9945_v24  ;;  %v9981_v7 = vrot.slane %v9159_v40, %v17038_v29  ;;  %v9985_v9 = vrot.slane %v9162_v52, %v17022_v30  ;;  %v9959_v44 = vsel %vm9940_vm2, %v9958_v32, %v9954_v12 }
 0x474   : > { %v9388_v34 = vsel %vm487_vm1, %v6402_v37, -inf  ;;  %v6403_v40 = vcombine.low %v16994_v5, %v17055_v56  ;;  %v10006_v52 = vsel %vm10005_vm3, %v9950_v50, %v9941_v39  ;;  %v20893_v39 = vcombine.low %v20884_v2, %v20883_v51 }
 0x475   : > { %9377 = vmax.xlane.f32.xlu1 %v9376_v53  ;;  %v9382_v53 = vsel %vm487_vm1, %v6401_v61, -inf  ;;  %9380 = vmax.xlane.f32.xlu0 %v16912_v17  ;;  %v9977_v17 = vsel %vm9940_vm2, %v9976_v1, %v9972_v0  ;;  %v10008_v12 = vsel %vm10007_vm4, %v9959_v44, %v10006_v52  ;;  %v9986_v32 = vsel %vm9940_vm2, %v9985_v9, %v9981_v7 }
 0x476   : > { %v9165_v45 = vpop.xlane.xlu1 %9164  ;;  %v9168_v61 = vpop.xlane.xlu0 %9167  ;;  %v10010_v37 = vsel %vm10009_vm5, %v9968_v27, %v10008_v12  ;;  %v17107_v1 = vrot.slane %v6639_v3, %v15499_v43  ;;  %v17113_v50 = vrot.slane %v20893_v39, %v15424_v57  ;;  %v20894_v5 = vcombine.low %v16986_v8, %v16976_v26 }
 0x477   : > { %v9990_v42 = vrot.slane %v9165_v45, %v17038_v29  ;;  %v9994_v54 = vrot.slane %v9168_v61, %v17022_v30  ;;  %v10012_v15 = vsel %vm10011_vm6, %v9977_v17, %v10010_v37  ;;  %v20895_v3 = vcombine.low %v17017_v11, %v16997_v58 }
 0x478   : > { %v10014_v7 = vsel %vm10013_vm7, %v9986_v32, %v10012_v15  ;;  %v17120_v56 = vrot.slane %v20894_v5, %v15499_v43  ;;  %v20899_v17 = vcombine.low %v20882_v18, %v20881_v55 }
 0x479   : > { %9383 = vmax.xlane.f32.xlu1 %v9382_v53  ;;  %9386 = vmax.xlane.f32.xlu0 %v16923_v20  ;;  %v9995_v36 = vsel %vm9940_vm2, %v9994_v54, %v9990_v42  ;;  %v9394_v20 = vsel %vm487_vm1, %v6403_v40, -inf  ;;  %v6615_v9 = vrot.slane %v20895_v3, %v15499_v43  ;;  %v20897_v42 = vcombine.low %v20891_v35, %v20890_v19 }
 0x47a   : > { %v9171_v41 = vpop.xlane.xlu1 %9170  ;;  %v9174_v24 = vpop.xlane.xlu0 %9173  ;;  %v10016_v54 = vsel %vm10015_vm8, %v9995_v36, %v10014_v7  ;;  %v20898_v40 = vcombine.low %v20878_v63, %v20877_v59  ;;  %v17153_v12 = vrot.slane %v20899_v17, %v15424_v57  ;;  %v17165_v36 = vld [vmem:[%s20309_s7] sm:$0xff]  ;;  %v20902_v7 = vcombine.low %v20876_v16, %v20875_v23 }
 0x47b   : > { %v9999_v45 = vrot.slane %v9171_v41, %v17038_v29  ;;  %v10003_v0 = vrot.slane %v9174_v24, %v17022_v30  ;;  %v20896_v41 = vcombine.low %v20889_v33, %v20888_v10  ;;  %v17136_v61 = vrot.slane %v20897_v42, %v15424_v57 }
 0x47c   : > { %v17147_v52 = vrot.slane %v20898_v40, %v15424_v57  ;;  %v20901_v24 = vcombine.low %v20886_v4, %v20885_v14  ;;  %v6671_v39 = vcombine.low %v6615_v9, %v17107_v1  ;;  %v17181_v5 = vrot.slane %v20902_v7, %v15424_v57  ;;  %v20908_v4 = vld [vmem:[#allocation7_spill] sm:$0xff] }
 0x47d   : > { %9389 = vmax.xlane.f32.xlu1 %v9388_v34  ;;  %v17130_v44 = vrot.slane %v20896_v41, %v15424_v57  ;;  %9392 = vmax.xlane.f32.xlu0 %v16932_v38  ;;  %v10004_v27 = vsel %vm9940_vm2, %v10003_v0, %v9999_v45  ;;  %v20900_v45 = vcombine.low %v16953_v47, %v16967_v13 }
 0x47e   : > { %v17097_v53 = vpop.xlane.xlu1 %9176  ;;  %v17155_v32 = vpop.xlane.xlu0 %9179  ;;  %v10018_v38 = vsel %vm10017_vm9, %v10004_v27, %v10016_v54  ;;  %v17171_v15 = vrot.slane %v20901_v24, %v15424_v57  ;;  %v6911_v0 = vcombine.low %v17136_v61, %v17073_v6  ;;  %v6775_v3 = vcombine.low %v17153_v12, %v17113_v50 }
 0x47f   : > { %v6479_v37 = vrot.slane %v20900_v45, %v15499_v43  ;;  %14453 = vmatpush3.msra.mxu0 %v10018_v38  ;;  %v20903_v41 = vcombine.high %v16835_v49, %v16869_v46  ;;  %v6424_v54 = vcombine.high %v20860_v22, %v20859_v60  ;;  %v6270_v38 = vcombine.high %v16838_v48, %v16891_v28  ;;  %v20905_v49 = vld [vmem:[#allocation51_spill] sm:$0xff]  ;;  %v20906_v46 = vld [vmem:[#allocation4_spill] sm:$0xff] }
 0x480   : > { %v6879_v40 = vcombine.low %v17171_v15, %v17130_v44  ;;  %14455 = vmatmul.mubr.msk.f32.vlgmr.msra.gmra.mrb[48].mxu0 %vm487_vm1, %v17165_v36  ;;  %v6408_v45 = vcombine.high %v20906_v46, %v20905_v49  ;;  %v6696_v24 = vcombine.high %v20878_v63, %v20877_v59  ;;  %v6743_v60 = vcombine.low %v17181_v5, %v17147_v52 }
 0x481   : > { %9395 = vmax.xlane.f32.xlu1 %v9394_v20  ;;  %v9400_v20 = vsel %vm487_vm1, %v6404_v62, -inf  ;;  %v9397_v42 = vsel %vm487_vm1, %v20903_v41, -inf  ;;  %v6535_v27 = vcombine.low %v6479_v37, %v17120_v56  ;;  %v20904_v62 = vmov 0.0  }
 0x482   : > { %v17141_v34 = vpop.xlane.xlu1 %9182  ;;  %14462 = vmatprep.subr.mxu0 %v20904_v62  ;;  %9398 = vmax.xlane.f32.xlu0 %v9397_v42  ;;  %v17207_v22 = vpop.xlane.xlu0 %9185  ;;  %v6672_v7 = vcombine.high %v6615_v9, %v17107_v1  ;;  %v6919_v41 = vrot.slane %v6911_v0, %v15499_v43  ;;  %v20907_v42 = vcombine.low %v16838_v48, %v16891_v28  ;;  %v20909_v1 = vld [vmem:[#allocation12_spill] sm:$0xff] }
 0x483   : > { %14464 = vmatprep.mubr.msk.f32.mxu0 %vm14719_vm0, %v20904_v62  ;;  %v6680_v59 = vcombine.high %v20876_v16, %v20875_v23  ;;  %v9415_v63 = vsel %vm487_vm1, %v6535_v27, -inf  ;;  %v6536_v46 = vcombine.high %v6479_v37, %v17120_v56  ;;  %v6352_v9 = vcombine.high %v20909_v1, %v20908_v4  ;;  %v20910_v56 = vld [vmem:[#allocation63_spill] sm:$0xff]  ;;  %v20911_v37 = vld [vmem:[#allocation57_spill] sm:$0xff]  ;;  %v20912_v27 = vld [vmem:[#allocation8_spill] sm:$0xff] }
 0x484   : > { %v17218_v49 = vsel %vm487_vm1, %v20907_v42, -inf  ;;  %v17228_v0 = vrot.slane %v6424_v54, %v15424_v57  ;;  %v6887_v28 = vrot.slane %v6879_v40, %v15499_v43  ;;  %v17234_v23 = vsel %vm487_vm1, %v6270_v38, -inf }
 0x485   : > { %9401 = vmax.xlane.f32.xlu1 %v9400_v20  ;;  %v9418_v20 = vsel %vm487_vm1, %v6671_v39, -inf  ;;  %v6783_v39 = vrot.slane %v6775_v3, %v15499_v43  ;;  %v17237_v16 = vrot.slane %v6696_v24, %v15424_v57  ;;  %v6456_v3 = vcombine.high %v20911_v37, %v20910_v56  ;;  %v20914_v56 = vld [vmem:[#allocation60_spill] sm:$0xff]  ;;  %v20915_v37 = vld [vmem:[#allocation55_spill] sm:$0xff] }
 0x486   : > { %v17195_v17 = vpop.xlane.xlu1 %9188  ;;  %9416 = vmax.xlane.f32.xlu0 %v9415_v63  ;;  %v17243_v42 = vpop.xlane.xlu0 %9191  ;;  %v6751_v54 = vrot.slane %v6743_v60, %v15499_v43  ;;  %v17247_v63 = vrot.slane %v6408_v45, %v15424_v57  ;;  %v6472_v40 = vcombine.high %v16953_v47, %v16967_v13  ;;  %v9424_v38 = vsel %vm487_vm1, %v6672_v7, -inf }
 0x487   : > { %v6943_v24 = vcombine.low %v6887_v28, %v6919_v41  ;;  %v17253_v1 = vrot.slane %v6680_v59, %v15424_v57  ;;  %v6440_v14 = vcombine.high %v20915_v37, %v20914_v56  ;;  %v6744_v60 = vcombine.high %v17181_v5, %v17147_v52 }
 0x488   : > { %v6487_v45 = vcombine.low %v17247_v63, %v17228_v0  ;;  %v6504_v47 = vcombine.high %v16986_v8, %v16976_v26  ;;  %v17267_v7 = vrot.slane %v6352_v9, %v15499_v43  ;;  %v6944_v5 = vcombine.high %v6887_v28, %v6919_v41  ;;  %v20931_v8 = vld [vmem:[#allocation65_spill] sm:$0xff] }
 0x489   : > { %9419 = vmax.xlane.f32.xlu1 %v9418_v20  ;;  %v20913_v20 = vld [vmem:[#allocation25_spill] sm:$0xff]  ;;  %v6759_v59 = vcombine.low %v17253_v1, %v17237_v16  ;;  %v9466_v26 = vsel %vm487_vm1, %v6943_v24, -inf  ;;  %v17285_v9 = vrot.slane %v6472_v40, %v15499_v43  ;;  %v6912_v37 = vcombine.high %v17136_v61, %v17073_v6 }
 0x48a   : > { %v17230_v48 = vpop.xlane.xlu1 %9194  ;;  %v6384_v4 = vcombine.high %v20913_v20, %v20912_v27  ;;  %v9421_v27 = vsel %vm487_vm1, %v6536_v46, -inf  ;;  %v6807_v20 = vcombine.low %v6751_v54, %v6783_v39  ;;  %v17272_v46 = vrot.slane %v6456_v3, %v15424_v57  ;;  %v17276_v56 = vpop.xlane.xlu0 %9197 }
 0x48b   : > { %9422 = vmax.xlane.f32.xlu0 %v9421_v27  ;;  %v17288_v3 = vrot.slane %v6440_v14, %v15424_v57  ;;  %v17296_v41 = vrot.slane %v6504_v47, %v15499_v43  ;;  %v17299_v28 = vrot.slane %v6744_v60, %v15499_v43  ;;  %v17302_v14 = vrot.slane %v6487_v45, %v15499_v43 }
 0x48c   : > { %v17279_v52 = vrot.slane %v6384_v4, %v15499_v43  ;;  %v6808_v4 = vcombine.high %v6751_v54, %v6783_v39  ;;  %v17312_v61 = vrot.slane %v6759_v59, %v15499_v43  ;;  %v6712_v40 = vcombine.high %v20882_v18, %v20881_v55 }
 0x48d   : > { %9425 = vmax.xlane.f32.xlu1 %v9424_v38  ;;  %v6640_v38 = vcombine.high %v17029_v21, %v17012_v31  ;;  %v6608_v21 = vcombine.high %v17017_v11, %v16997_v58  ;;  %v9463_v31 = vsel %vm487_vm1, %v6807_v20, -inf  ;;  %v6519_v11 = vcombine.low %v17288_v3, %v17272_v46 }
 0x48e   : > { %v17264_v13 = vpop.xlane.xlu1 %9200  ;;  %v9204_v58 = vpop.xlane.xlu0 %9203  ;;  %v6405_v39 = vcombine.low %v17267_v7, %v17279_v52  ;;  %v6728_v24 = vcombine.high %v20884_v2, %v20883_v51  ;;  %v9472_v20 = vsel %vm487_vm1, %v6944_v5, -inf  ;;  %v6776_v45 = vcombine.high %v17153_v12, %v17113_v50 }
 0x48f   : > { %9464 = vmax.xlane.f32.xlu0 %v9463_v31  ;;  %v17309_v6 = vrot.slane %v6640_v38, %v15499_v43  ;;  %v6880_v60 = vcombine.high %v17171_v15, %v17130_v44  ;;  %v9469_v47 = vsel %vm487_vm1, %v6808_v4, -inf  ;;  %v17327_v59 = vrot.slane %v6608_v21, %v15499_v43 }
 0x490   : > { %v10121_v18 = vrot.slane %v17141_v34, %v17038_v29  ;;  %v10125_v2 = vrot.slane %v17207_v22, %v17022_v30  ;;  %v6537_v51 = vcombine.low %v17285_v9, %v17296_v41  ;;  %v17336_v50 = vrot.slane %v6912_v37, %v15499_v43 }
 0x491   : > { %9467 = vmax.xlane.f32.xlu1 %v9466_v26  ;;  %v10130_v44 = vrot.slane %v17195_v17, %v17038_v29  ;;  %v10134_v12 = vrot.slane %v17243_v42, %v17022_v30  ;;  %v9406_v34 = vsel %vm487_vm1, %v6405_v39, -inf  ;;  %v6673_v22 = vcombine.low %v17327_v59, %v17309_v6 }
 0x492   : > { %v9207_v27 = vpop.xlane.xlu1 %9206  ;;  %v9210_v15 = vpop.xlane.xlu0 %9209  ;;  %v10112_v38 = vrot.slane %v17097_v53, %v17038_v29  ;;  %v10116_v26 = vrot.slane %v17155_v32, %v17022_v30  ;;  %v10139_v5 = vrot.slane %v17230_v48, %v17038_v29  ;;  %v10143_v17 = vrot.slane %v17276_v56, %v17022_v30 }
 0x493   : > { %9470 = vmax.xlane.f32.xlu0 %v9469_v47  ;;  %v10148_v42 = vrot.slane %v17264_v13, %v17038_v29  ;;  %v10152_v21 = vrot.slane %v9204_v58, %v17022_v30  ;;  %v17357_v31 = vrot.slane %v6776_v45, %v15499_v43  ;;  %v17360_v53 = vrot.slane %v6880_v60, %v15499_v43 }
 0x494   : > { %v17363_v32 = vrot.slane %v6712_v40, %v15424_v57  ;;  %v10126_v48 = vsel %vm9940_vm2, %v10125_v2, %v10121_v18  ;;  %v10157_v4 = vrot.slane %v9207_v27, %v17038_v29  ;;  %v10161_v56 = vrot.slane %v9210_v15, %v17022_v30 }
 0x495   : > { %9473 = vmax.xlane.f32.xlu1 %v9472_v20  ;;  %v17370_v37 = vrot.slane %v6728_v24, %v15424_v57  ;;  %v10135_v58 = vsel %vm9940_vm2, %v10134_v12, %v10130_v44  ;;  %v6945_v40 = vcombine.low %v17360_v53, %v17336_v50  ;;  %v10117_v45 = vsel %vm9940_vm2, %v10116_v26, %v10112_v38 }
 0x496   : > { %v9213_v55 = vpop.xlane.xlu1 %9212  ;;  %v9216_v20 = vpop.xlane.xlu0 %9215  ;;  %v10144_v27 = vsel %vm9940_vm2, %v10143_v17, %v10139_v5  ;;  %v10181_v47 = vsel %vm10005_vm3, %v10126_v48, %v10117_v45  ;;  %v10153_v24 = vsel %vm9940_vm2, %v10152_v21, %v10148_v42  ;;  %v9427_v18 = vsel %vm487_vm1, %v6537_v51, -inf  ;;  %v20916_v17 = vld [vmem:[#allocation87_spill] sm:$0xff]  ;;  %v20917_v42 = vld [vmem:[#allocation81_spill] sm:$0xff]  ;;  %v20920_v45 = vld [vmem:[#allocation10_spill] sm:$0xff] }
 0x497   : > { %9404 = vmax.xlane.f32.xlu0 %v17218_v49  ;;  %v10166_v39 = vrot.slane %v9213_v55, %v17038_v29  ;;  %v10170_v60 = vrot.slane %v9216_v20, %v17022_v30  ;;  %v9430_v49 = vsel %vm487_vm1, %v6673_v22, -inf  ;;  %v6809_v2 = vcombine.low %v17299_v28, %v17357_v31 }
 0x498   : > { %v10182_v55 = vsel %vm10007_vm4, %v10135_v58, %v10181_v47  ;;  %v10162_v44 = vsel %vm9940_vm2, %v10161_v56, %v10157_v4  ;;  %v6791_v22 = vcombine.low %v17363_v32, %v17370_v37  ;;  %v6538_v5 = vcombine.high %v17285_v9, %v17296_v41  ;;  %v20918_v56 = vld [vmem:[#allocation9_spill] sm:$0xff]  ;;  %v20924_v47 = vld [vmem:[#allocation84_spill] sm:$0xff] }
 0x499   : > { %9407 = vmax.xlane.f32.xlu1 %v9406_v34  ;;  %v17391_v34 = vrot.slane %v6519_v11, %v15499_v43  ;;  %v10183_v51 = vsel %vm10009_vm5, %v10144_v27, %v10182_v55  ;;  %v10171_v38 = vsel %vm9940_vm2, %v10170_v60, %v10166_v39  ;;  %v6999_v21 = vcombine.low %v20917_v42, %v20916_v17  ;;  %v20921_v27 = vld [vmem:[#allocation15_spill] sm:$0xff]  ;;  %v20922_v41 = vld [vmem:[#allocation77_spill] sm:$0xff]  ;;  %v20949_v17 = vld [vmem:[#allocation78_spill] sm:$0xff] }
 0x49a   : > { %v9219_v13 = vpop.xlane.xlu1 %9218  ;;  %v9222_v26 = vpop.xlane.xlu0 %9221  ;;  %v10184_v48 = vsel %vm10011_vm6, %v10153_v24, %v10183_v51  ;;  %v9478_v11 = vsel %vm487_vm1, %v6945_v40, -inf  ;;  %v9475_v20 = vsel %vm487_vm1, %v6809_v2, -inf  ;;  %v6134_v9 = vcombine.high %v20921_v27, %v20920_v45  ;;  %v20923_v60 = vld [vmem:[#allocation73_spill] sm:$0xff]  ;;  %v20925_v24 = vld [vmem:[#allocation79_spill] sm:$0xff] }
 0x49b   : > { %9428 = vmax.xlane.f32.xlu0 %v9427_v18  ;;  %v10175_v12 = vrot.slane %v9219_v13, %v17038_v29  ;;  %v10179_v4 = vrot.slane %v9222_v26, %v17022_v30  ;;  %v20919_v13 = vld [vmem:[#allocation176_spill] sm:$0xff]  ;;  %v10185_v39 = vsel %vm10013_vm7, %v10162_v44, %v10184_v48  ;;  %v6983_v18 = vcombine.low %v20925_v24, %v20924_v47  ;;  %v20926_v2 = vld [vmem:[#allocation71_spill] sm:$0xff]  ;;  %v20950_v24 = vld [vmem:[#allocation14_spill] sm:$0xff] }
 0x49c   : > { %v6592_v58 = vcombine.high %v20919_v13, %v20918_v56  ;;  %v10186_v55 = vsel %vm10015_vm8, %v10171_v38, %v10185_v39  ;;  %v20927_v26 = vld [vmem:[#allocation67_spill] sm:$0xff]  ;;  %v20928_v48 = vld [vmem:[#allocation188_spill] sm:$0xff]  ;;  %v6539_v27 = vcombine.low %v17302_v14, %v17391_v34  ;;  %v17432_v54 = vrot.slane %v6999_v21, %v15424_v57 }
 0x49d   : > { %9431 = vmax.xlane.f32.xlu1 %v9430_v49  ;;  %v6967_v49 = vcombine.low %v20923_v60, %v20922_v41  ;;  %v10180_v40 = vsel %vm9940_vm2, %v10179_v4, %v10175_v12  ;;  %v6560_v44 = vcombine.high %v20927_v26, %v20926_v2  ;;  %v20932_v4 = vld [vmem:[#allocation75_spill] sm:$0xff]  ;;  %v17435_v2 = vrot.slane %v6791_v22, %v15499_v43 }
 0x49e   : > { %v17388_v15 = vpop.xlane.xlu1 %9224  ;;  %v17422_v13 = vpop.xlane.xlu0 %9227  ;;  %v10187_v45 = vsel %vm10017_vm9, %v10180_v40, %v10186_v55  ;;  %v20933_v38 = vld [vmem:[#allocation11_spill] sm:$0xff]  ;;  %v17438_v26 = vrot.slane %v6592_v58, %v15424_v57  ;;  %v17451_v22 = vrot.slane %v6983_v18, %v15424_v57  ;;  %v7223_v47 = vcombine.low %v20950_v24, %v20949_v17  ;;  %v20956_v24 = vld [vmem:[#allocation178_spill] sm:$0xff] }
 0x49f   : > { %9476 = vmax.xlane.f32.xlu0 %v9475_v20  ;;  %v20930_v20 = vld [vmem:[#allocation69_spill] sm:$0xff]  ;;  %v6951_v39 = vcombine.low %v20933_v38, %v20932_v4  ;;  %14458 = vmatpush3.msra.mxu1 %v10187_v45  ;;  %v20934_v40 = vld [vmem:[#allocation179_spill] sm:$0xff]  ;;  %v17448_v21 = vrot.slane %v6967_v49, %v15424_v57  ;;  %v6848_v49 = vcombine.high %v20891_v35, %v20890_v19 }
 0x4a0   : > { %v6544_v12 = vcombine.high %v20931_v8, %v20930_v20  ;;  %v6864_v55 = vcombine.high %v20934_v40, %v16691_v25  ;;  %v6406_v8 = vcombine.high %v17267_v7, %v17279_v52  ;;  %14467 = vmatprep.subr.mxu1 %v20904_v62  ;;  %v9433_v25 = vsel %vm487_vm1, %v6538_v5, -inf  ;;  %14460 = vmatmul.mubr.msk.f32.vlgmr.msra.gmra.mrb[48].mxu1 %vm487_vm1, %v17165_v36  ;;  %v20939_v5 = vld [vmem:[#allocation68_spill] sm:$0xff] }
 0x4a1   : > { %9479 = vmax.xlane.f32.xlu1 %v9478_v11  ;;  %v20929_v11 = vld [vmem:[#allocation165_spill] sm:$0xff]  ;;  %20935 = vst [vmem:[#allocation23_spill] sm:$0xff] %v17448_v21  ;;  %v6832_v7 = vcombine.high %v20889_v33, %v20888_v10  ;;  %14469 = vmatprep.mubr.msk.f32.mxu1 %vm14719_vm0, %v20904_v62  ;;  %v7047_v10 = vcombine.low %v17451_v22, %v17432_v54 }
 0x4a2   : > { %v17416_v51 = vpop.xlane.xlu1 %9230  ;;  %v6576_v56 = vcombine.high %v20929_v11, %v20928_v48  ;;  %v9364_v48 = vsel %vm487_vm1, %v6134_v9, -inf  ;;  %v6810_v9 = vcombine.high %v17299_v28, %v17357_v31  ;;  %v17470_v18 = vpop.xlane.xlu0 %9233  ;;  %v17475_v28 = vrot.slane %v6544_v12, %v15424_v57  ;;  %v20938_v31 = vld [vmem:[#allocation72_spill] sm:$0xff] }
 0x4a3   : > { %9365 = vmax.xlane.f32.xlu0 %v9364_v48  ;;  %v17480_v11 = vrot.slane %v6951_v39, %v15424_v57  ;;  %v17487_v33 = vrot.slane %v6864_v55, %v15424_v57  ;;  %v9412_v35 = vsel %vm487_vm1, %v6406_v8, -inf  ;;  %v9439_v12 = vsel %vm487_vm1, %v6539_v27, -inf }
 0x4a4   : > { %v17466_v52 = vrot.slane %v6576_v56, %v15424_v57  ;;  %20937 = vst [vmem:[#allocation40_spill] sm:$0xff] %v17475_v28  ;;  %v6674_v56 = vcombine.high %v17327_v59, %v17309_v6  ;;  %v6811_v39 = vcombine.low %v17312_v61, %v17435_v2  ;;  %v6540_v40 = vcombine.high %v17302_v14, %v17391_v34  ;;  %v20947_v14 = vld [vmem:[#allocation90_spill] sm:$0xff] }
 0x4a5   : > { %9410 = vmax.xlane.f32.xlu1 %v17234_v23  ;;  %v17461_v23 = vrot.slane %v6560_v44, %v15424_v57  ;;  %v6816_v44 = vcombine.high %v20939_v5, %v20938_v31  ;;  %20940 = vst [vmem:[#allocation35_spill] sm:$0xff] %v17480_v11  ;;  %20941 = vst [vmem:[#allocation30_spill] sm:$0xff] %v17487_v33  ;;  %v7015_v45 = vcombine.low %v17480_v11, %v17448_v21  ;;  %v20946_v31 = vld [vmem:[#allocation76_spill] sm:$0xff]  ;;  %v20948_v34 = vld [vmem:[#allocation86_spill] sm:$0xff] }
 0x4a6   : > { %v17453_v58 = vpop.xlane.xlu1 %9236  ;;  %v6655_v19 = vcombine.low %v17466_v52, %v17438_v26  ;;  %v17504_v48 = vrot.slane %v6832_v7, %v15424_v57  ;;  %v17507_v6 = vrot.slane %v6848_v49, %v15424_v57  ;;  %v17509_v59 = vpop.xlane.xlu0 %9239  ;;  %v9481_v8 = vsel %vm487_vm1, %v6810_v9, -inf  ;;  %v20961_v11 = vld [vmem:[#allocation167_spill] sm:$0xff] }
 0x4a7   : > { %20936 = vst [vmem:[#allocation19_spill] sm:$0xff] %v17461_v23  ;;  %9413 = vmax.xlane.f32.xlu0 %v9412_v35  ;;  %v6623_v55 = vcombine.low %v17475_v28, %v17461_v23  ;;  %v17513_v27 = vrot.slane %v6816_v44, %v15424_v57  ;;  %v7271_v35 = vcombine.low %v20948_v34, %v20947_v14  ;;  %v9436_v49 = vsel %vm487_vm1, %v6674_v56, -inf  ;;  %v20952_v34 = vld [vmem:[#allocation91_spill] sm:$0xff]  ;;  %v20974_v23 = vld [vmem:[#allocation170_spill] sm:$0xff] }
 0x4a8   : > { %20942 = vst [vmem:[#allocation26_spill] sm:$0xff] %v17504_v48  ;;  %20943 = vst [vmem:[#allocation37_spill] sm:$0xff] %v17507_v6  ;;  %v17520_v42 = vrot.slane %v7047_v10, %v15499_v43  ;;  %v6927_v7 = vcombine.low %v17507_v6, %v17487_v33  ;;  %v6946_v9 = vcombine.high %v17360_v53, %v17336_v50  ;;  %v20953_v53 = vld [vmem:[#allocation88_spill] sm:$0xff]  ;;  %v20955_v6 = vld [vmem:[#allocation6_spill] sm:$0xff]  ;;  %v9487_v21 = vsel %vm487_vm1, %v6811_v39, -inf }
 0x4a9   : > { %9434 = vmax.xlane.f32.xlu1 %v9433_v25  ;;  %20944 = vst [vmem:[#allocation32_spill] sm:$0xff] %v17513_v27  ;;  %v20945_v25 = vld [vmem:[#allocation80_spill] sm:$0xff]  ;;  %v17528_v44 = vrot.slane %v6655_v19, %v15499_v43  ;;  %v17539_v56 = vrot.slane %v7015_v45, %v15499_v43  ;;  %v6895_v50 = vcombine.low %v17513_v27, %v17504_v48  ;;  %v20954_v19 = vld [vmem:[#allocation83_spill] sm:$0xff]  ;;  %v20959_v45 = vld [vmem:[#allocation89_spill] sm:$0xff] }
 0x4aa   : > { %v17494_v20 = vpop.xlane.xlu1 %9242  ;;  %v7239_v5 = vcombine.low %v20946_v31, %v20945_v25  ;;  %v20951_v31 = vld [vmem:[#allocation95_spill] sm:$0xff]  ;;  %v6812_v25 = vcombine.high %v17312_v61, %v17435_v2  ;;  %v7135_v17 = vcombine.low %v20956_v24, %v20955_v6  ;;  %v17547_v33 = vpop.xlane.xlu0 %9245  ;;  %v17556_v61 = vrot.slane %v7271_v35, %v15424_v57  ;;  %v20958_v2 = vld [vmem:[#allocation93_spill] sm:$0xff] }
 0x4ab   : > { %v7103_v14 = vcombine.low %v20952_v34, %v20951_v31  ;;  %9437 = vmax.xlane.f32.xlu0 %v9436_v49  ;;  %v17550_v49 = vrot.slane %v6623_v55, %v15499_v43  ;;  %v7087_v31 = vcombine.low %v20959_v45, %v20958_v2  ;;  %v9484_v6 = vsel %vm487_vm1, %v6946_v9, -inf }
 0x4ac   : > { %v17553_v34 = vrot.slane %v7239_v5, %v15424_v57  ;;  %20957 = vst [vmem:[#allocation28_spill] sm:$0xff] %v17556_v61  ;;  %v17568_v5 = vrot.slane %v6927_v7, %v15499_v43  ;;  %v17571_v35 = vrot.slane %v7223_v47, %v15424_v57  ;;  %v17582_v9 = vrot.slane %v7135_v17, %v15424_v57 }
 0x4ad   : > { %9482 = vmax.xlane.f32.xlu1 %v9481_v8  ;;  %v7255_v8 = vcombine.low %v20954_v19, %v20953_v53  ;;  %v7079_v19 = vcombine.low %v17539_v56, %v17520_v42  ;;  %v20960_v53 = vld [vmem:[#allocation189_spill] sm:$0xff]  ;;  %v6675_v55 = vcombine.low %v17550_v49, %v17528_v44  ;;  %v17574_v45 = vrot.slane %v7103_v14, %v15424_v57 }
 0x4ae   : > { %v17534_v10 = vpop.xlane.xlu1 %9248  ;;  %v7119_v24 = vcombine.low %v20961_v11, %v20960_v53  ;;  %v9445_v11 = vsel %vm487_vm1, %v6540_v40, -inf  ;;  %20964 = vst [vmem:[#allocation163_spill] sm:$0xff] %v17582_v9  ;;  %v9252_v7 = vpop.xlane.xlu0 %9251  ;;  %v17585_v53 = vrot.slane %v6895_v50, %v15499_v43  ;;  %v9493_v47 = vsel %vm487_vm1, %v6812_v25, -inf }
 0x4af   : > { %20962 = vst [vmem:[#allocation44_spill] sm:$0xff] %v17574_v45  ;;  %9485 = vmax.xlane.f32.xlu0 %v9484_v6  ;;  %v17591_v14 = vrot.slane %v7087_v31, %v15424_v57  ;;  %v17594_v39 = vsel %vm487_vm1, %v7079_v19, -inf  ;;  %v9442_v25 = vsel %vm487_vm1, %v6675_v55, -inf  ;;  %v20967_v19 = vld [vmem:[#allocation96_spill] sm:$0xff]  ;;  %v10287_v40 = vrot.slane %v17416_v51, %v17038_v29  ;;  %v20969_v55 = vld [vmem:[#allocation18_spill] sm:$0xff] }
 0x4b0   : > { %v17601_v50 = vrot.slane %v7119_v24, %v15424_v57  ;;  %v20968_v6 = vld [vmem:[#allocation92_spill] sm:$0xff]  ;;  %v10278_v51 = vrot.slane %v17388_v15, %v17038_v29  ;;  %v6676_v15 = vcombine.high %v17550_v49, %v17528_v44 }
 0x4b1   : > { %9440 = vmax.xlane.f32.xlu1 %v9439_v12  ;;  %v17579_v12 = vrot.slane %v7255_v8, %v15424_v57  ;;  %20965 = vst [vmem:[#allocation46_spill] sm:$0xff] %v17591_v14  ;;  %v6947_v8 = vcombine.low %v17585_v53, %v17568_v5  ;;  %v7151_v31 = vcombine.low %v17591_v14, %v17574_v45 }
 0x4b2   : > { %v9255_v2 = vpop.xlane.xlu1 %9254  ;;  %20966 = vst [vmem:[#allocation42_spill] sm:$0xff] %v17601_v50  ;;  %v7359_v27 = vcombine.low %v20968_v6, %v20967_v19  ;;  %v10296_v14 = vrot.slane %v17453_v58, %v17038_v29  ;;  %v10300_v6 = vrot.slane %v17509_v59, %v17022_v30  ;;  %v9258_v19 = vpop.xlane.xlu0 %9257  ;;  %v10309_v45 = vrot.slane %v17547_v33, %v17022_v30 }
 0x4b3   : > { %20963 = vst [vmem:[#allocation187_spill] sm:$0xff] %v17579_v12  ;;  %v7319_v17 = vcombine.low %v17579_v12, %v17556_v61  ;;  %v10291_v12 = vrot.slane %v17470_v18, %v17022_v30  ;;  %9443 = vmax.xlane.f32.xlu0 %v9442_v25  ;;  %v20970_v61 = vld [vmem:[#allocation181_spill] sm:$0xff]  ;;  %v10282_v18 = vrot.slane %v17422_v13, %v17022_v30  ;;  %v9490_v59 = vsel %vm487_vm1, %v6947_v8, -inf }
 0x4b4   : > { %v7407_v48 = vcombine.low %v20970_v61, %v20969_v55  ;;  %v10305_v25 = vrot.slane %v17494_v20, %v17038_v29  ;;  %v10314_v61 = vrot.slane %v17534_v10, %v17038_v29  ;;  %v10318_v58 = vrot.slane %v9252_v7, %v17022_v30  ;;  %v20971_v55 = vld [vmem:[#allocation98_spill] sm:$0xff]  ;;  %v20973_v10 = vld [vmem:[#allocation195_spill] sm:$0xff] }
 0x4b5   : > { %9488 = vmax.xlane.f32.xlu1 %v9487_v21  ;;  %v7183_v21 = vcombine.low %v17601_v50, %v17582_v9  ;;  %v20972_v50 = vld [vmem:[#allocation94_spill] sm:$0xff]  ;;  %v10292_v9 = vsel %vm9940_vm2, %v10291_v12, %v10287_v40  ;;  %v10323_v20 = vrot.slane %v9255_v2, %v17038_v29  ;;  %v10327_v33 = vrot.slane %v9258_v19, %v17022_v30 }
 0x4b6   : > { %v9261_v24 = vpop.xlane.xlu1 %9260  ;;  %v7375_v13 = vcombine.low %v20972_v50, %v20971_v55  ;;  %v7391_v7 = vcombine.low %v20974_v23, %v20973_v10  ;;  %v17644_v8 = vrot.slane %v7407_v48, %v15424_v57  ;;  %v9264_v49 = vpop.xlane.xlu0 %9263  ;;  %v10283_v50 = vsel %vm9940_vm2, %v10282_v18, %v10278_v51 }
 0x4b7   : > { %9491 = vmax.xlane.f32.xlu0 %v9490_v59  ;;  %v10332_v44 = vrot.slane %v9261_v24, %v17038_v29  ;;  %v10310_v12 = vsel %vm9940_vm2, %v10309_v45, %v10305_v25  ;;  %v10336_v2 = vrot.slane %v9264_v49, %v17022_v30  ;;  %v17652_v40 = vrot.slane %v7183_v21, %v15499_v43 }
 0x4b8   : > { %v10347_v19 = vsel %vm10005_vm3, %v10292_v9, %v10283_v50  ;;  %v10319_v59 = vsel %vm9940_vm2, %v10318_v58, %v10314_v61  ;;  %v9448_v48 = vsel %vm487_vm1, %v6676_v15, -inf  ;;  %v10328_v24 = vsel %vm9940_vm2, %v10327_v33, %v10323_v20 }
 0x4b9   : > { %9446 = vmax.xlane.f32.xlu1 %v9445_v11  ;;  %v10301_v11 = vsel %vm9940_vm2, %v10300_v6, %v10296_v14  ;;  %v6948_v6 = vcombine.high %v17585_v53, %v17568_v5  ;;  %v7159_v21 = vrot.slane %v7151_v31, %v15499_v43  ;;  %v17666_v9 = vrot.slane %v7375_v13, %v15424_v57 }
 0x4ba   : > { %v9267_v28 = vpop.xlane.xlu1 %9266  ;;  %v10348_v14 = vsel %vm10007_vm4, %v10301_v11, %v10347_v19  ;;  %v17669_v61 = vrot.slane %v7391_v7, %v15424_v57  ;;  %v10337_v53 = vsel %vm9940_vm2, %v10336_v2, %v10332_v44  ;;  %v9270_v5 = vpop.xlane.xlu0 %9269  ;;  %v17674_v50 = vrot.slane %v7359_v27, %v15424_v57 }
 0x4bb   : > { %9449 = vmax.xlane.f32.xlu0 %v9448_v48  ;;  %v10341_v45 = vrot.slane %v9267_v28, %v17038_v29  ;;  %v10345_v18 = vrot.slane %v9270_v5, %v17022_v30  ;;  %v7327_v31 = vrot.slane %v7319_v17, %v15499_v43  ;;  %v9496_v58 = vsel %vm487_vm1, %v6948_v6, -inf }
 0x4bc   : > { %v7455_v25 = vcombine.low %v17669_v61, %v17644_v8  ;;  %v7215_v13 = vcombine.low %v7159_v21, %v17652_v40  ;;  %v20975_v17 = vcombine.low %v17571_v35, %v17553_v34  ;;  %v20976_v11 = vcombine.high %v17288_v3, %v17272_v46 }
 0x4bd   : > { %9494 = vmax.xlane.f32.xlu1 %v9493_v47  ;;  %v10349_v47 = vsel %vm10009_vm5, %v10310_v12, %v10348_v14  ;;  %v10346_v27 = vsel %vm9940_vm2, %v10345_v18, %v10341_v45  ;;  %v7423_v49 = vcombine.low %v17674_v50, %v17666_v9  ;;  %v6760_v19 = vcombine.high %v17253_v1, %v17237_v16  ;;  %v20980_v18 = vld [vmem:[#allocation40_spill] sm:$0xff] }
 0x4be   : > { %v17662_v51 = vpop.xlane.xlu1 %9272  ;;  %v10350_v28 = vsel %vm10011_vm6, %v10319_v59, %v10349_v47  ;;  %v7295_v7 = vrot.slane %v20975_v17, %v15499_v43  ;;  %v6534_v44 = vrot.slane %v20976_v11, %v15499_v43  ;;  %v17701_v12 = vpop.xlane.xlu0 %9275  ;;  %v20977_v59 = vcombine.high %v17539_v56, %v17520_v42 }
 0x4bf   : > { %v10351_v15 = vsel %vm10013_vm7, %v10328_v24, %v10350_v28  ;;  %9497 = vmax.xlane.f32.xlu0 %v9496_v58  ;;  %v9514_v48 = vsel %vm487_vm1, %v7215_v13, -inf  ;;  %v7216_v6 = vcombine.high %v7159_v21, %v17652_v40  ;;  %v7463_v14 = vrot.slane %v7455_v25, %v15499_v43  ;;  %v20979_v28 = vld [vmem:[#allocation19_spill] sm:$0xff]  ;;  %v20981_v58 = vld [vmem:[#allocation26_spill] sm:$0xff] }
 0x4c0   : > { %v10352_v20 = vsel %vm10015_vm8, %v10337_v53, %v10351_v15  ;;  %v9517_v46 = vsel %vm487_vm1, %v20977_v59, -inf  ;;  %v7351_v3 = vcombine.low %v7295_v7, %v7327_v31  ;;  %v7431_v56 = vrot.slane %v7423_v49, %v15499_v43  ;;  %v20988_v49 = vld [vmem:[#allocation76_spill] sm:$0xff] }
 0x4c1   : > { %9512 = vmax.xlane.f32.xlu1 %v17594_v39  ;;  %v6792_v39 = vcombine.high %v17363_v32, %v17370_v37  ;;  %v10353_v2 = vsel %vm10017_vm9, %v10346_v27, %v10352_v20  ;;  %v20978_v32 = vcombine.high %v17247_v63, %v17228_v0  ;;  %v6968_v0 = vcombine.high %v20923_v60, %v20922_v41  ;;  %v20985_v27 = vld [vmem:[#allocation30_spill] sm:$0xff]  ;;  %v20986_v20 = vld [vmem:[#allocation37_spill] sm:$0xff] }
 0x4c2   : > { %v17687_v33 = vpop.xlane.xlu1 %9278  ;;  %14463 = vmatpush3.msra.mxu0 %v10353_v2  ;;  %v17724_v63 = vpop.xlane.xlu0 %9281  ;;  %v6952_v24 = vcombine.high %v20933_v38, %v20932_v4  ;;  %v9559_v45 = vsel %vm487_vm1, %v7351_v3, -inf  ;;  %v7352_v21 = vcombine.high %v7295_v7, %v7327_v31  ;;  %v6774_v47 = vrot.slane %v6760_v19, %v15499_v43  ;;  %v20982_v4 = vld [vmem:[#allocation32_spill] sm:$0xff] }
 0x4c3   : > { %v6502_v37 = vrot.slane %v20978_v32, %v15499_v43  ;;  %14472 = vmatprep.subr.mxu0 %v20904_v62  ;;  %9515 = vmax.xlane.f32.xlu0 %v9514_v48  ;;  %v6806_v40 = vrot.slane %v6792_v39, %v15499_v43  ;;  %v7048_v41 = vcombine.high %v17451_v22, %v17432_v54  ;;  %v9520_v53 = vsel %vm487_vm1, %v7216_v6, -inf  ;;  %v20983_v22 = vld [vmem:[#allocation23_spill] sm:$0xff]  ;;  %v20987_v39 = vld [vmem:[#allocation80_spill] sm:$0xff]  ;;  %v20989_v48 = vld [vmem:[#allocation78_spill] sm:$0xff] }
 0x4c4   : > { %14465 = vmatmul.mubr.msk.f32.vlgmr.msra.gmra.mrb[50].mxu0 %vm487_vm1, %v17165_v36  ;;  %v6656_v60 = vcombine.high %v17466_v52, %v17438_v26  ;;  %v7487_v5 = vcombine.low %v7431_v56, %v7463_v14  ;;  %v6624_v25 = vcombine.high %v20980_v18, %v20979_v28  ;;  %v6896_v38 = vcombine.high %v20982_v4, %v20981_v58  ;;  %v20984_v52 = vld [vmem:[#allocation35_spill] sm:$0xff]  ;;  %v20990_v6 = vld [vmem:[#allocation14_spill] sm:$0xff]  ;;  %v20993_v28 = vld [vmem:[#allocation84_spill] sm:$0xff] }
 0x4c5   : > { %9518 = vmax.xlane.f32.xlu1 %v9517_v46  ;;  %v6541_v1 = vcombine.low %v6502_v37, %v6534_v44  ;;  %v6542_v42 = vcombine.high %v6502_v37, %v6534_v44  ;;  %14474 = vmatprep.mubr.msk.f32.mxu0 %vm14719_vm0, %v20904_v62  ;;  %v6982_v26 = vrot.slane %v6968_v0, %v15424_v57  ;;  %v9565_v19 = vsel %vm487_vm1, %v7352_v21, -inf  ;;  %v20992_v0 = vld [vmem:[#allocation187_spill] sm:$0xff]  ;;  %v20996_v4 = vld [vmem:[#allocation81_spill] sm:$0xff] }
 0x4c6   : > { %v17718_v16 = vpop.xlane.xlu1 %9284  ;;  %v7016_v13 = vcombine.high %v20984_v52, %v20983_v22  ;;  %v6928_v17 = vcombine.high %v20986_v20, %v20985_v27  ;;  %v17754_v7 = vpop.xlane.xlu0 %9287  ;;  %v6813_v11 = vcombine.low %v6774_v47, %v6806_v40  ;;  %v6966_v44 = vrot.slane %v6952_v24, %v15424_v57  ;;  %v20994_v18 = vld [vmem:[#allocation79_spill] sm:$0xff]  ;;  %v20998_v22 = vld [vmem:[#allocation42_spill] sm:$0xff] }
 0x4c7   : > { %9521 = vmax.xlane.f32.xlu0 %v9520_v53  ;;  %v9451_v15 = vsel %vm487_vm1, %v6541_v1, -inf  ;;  %v17747_v54 = vsel %vm487_vm1, %v6542_v42, -inf  ;;  %v7240_v2 = vcombine.high %v20988_v49, %v20987_v39  ;;  %v6814_v59 = vcombine.high %v6774_v47, %v6806_v40  ;;  %v20991_v42 = vld [vmem:[#allocation28_spill] sm:$0xff]  ;;  %v20995_v58 = vld [vmem:[#allocation87_spill] sm:$0xff] }
 0x4c8   : > { %v9562_v46 = vsel %vm487_vm1, %v7487_v5, -inf  ;;  %v7488_v3 = vcombine.high %v7431_v56, %v7463_v14  ;;  %v17762_v32 = vrot.slane %v6656_v60, %v15499_v43  ;;  %v17765_v37 = vrot.slane %v7048_v41, %v15499_v43 }
 0x4c9   : > { %9560 = vmax.xlane.f32.xlu1 %v9559_v45  ;;  %v7224_v1 = vcombine.high %v20990_v6, %v20989_v48  ;;  %v7320_v24 = vcombine.high %v20992_v0, %v20991_v42  ;;  %v17774_v40 = vrot.slane %v6624_v25, %v15499_v43  ;;  %v17777_v14 = vrot.slane %v6896_v38, %v15499_v43 }
 0x4ca   : > { %v17743_v31 = vpop.xlane.xlu1 %9290  ;;  %v7031_v56 = vcombine.low %v6966_v44, %v6982_v26  ;;  %v7032_v21 = vcombine.high %v6966_v44, %v6982_v26  ;;  %v17779_v47 = vpop.xlane.xlu0 %9293  ;;  %v17782_v41 = vrot.slane %v6928_v17, %v15499_v43  ;;  %v17785_v60 = vrot.slane %v7016_v13, %v15499_v43  ;;  %v20997_v26 = vld [vmem:[#allocation163_spill] sm:$0xff]  ;;  %v21000_v17 = vld [vmem:[#allocation46_spill] sm:$0xff] }
 0x4cb   : > { %9563 = vmax.xlane.f32.xlu0 %v9562_v46  ;;  %v17788_v53 = vrot.slane %v7240_v2, %v15424_v57  ;;  %v7288_v5 = vcombine.high %v17571_v35, %v17553_v34  ;;  %v6984_v25 = vcombine.high %v20994_v18, %v20993_v28  ;;  %v7000_v38 = vcombine.high %v20996_v4, %v20995_v58  ;;  %v20999_v35 = vld [vmem:[#allocation44_spill] sm:$0xff] }
 0x4cc   : > { %v7184_v52 = vcombine.high %v20998_v22, %v20997_v26  ;;  %v9568_v27 = vsel %vm487_vm1, %v7488_v3, -inf  ;;  %v6677_v13 = vcombine.low %v17774_v40, %v17762_v32  ;;  %v7081_v20 = vcombine.low %v17785_v60, %v17765_v37  ;;  %v21001_v22 = vld [vmem:[#allocation90_spill] sm:$0xff] }
 0x4cd   : > { %9566 = vmax.xlane.f32.xlu1 %v9565_v19  ;;  %v17804_v34 = vrot.slane %v7224_v1, %v15424_v57  ;;  %v7152_v44 = vcombine.high %v21000_v17, %v20999_v35  ;;  %v9499_v49 = vsel %vm487_vm1, %v6813_v11, -inf  ;;  %v17810_v2 = vrot.slane %v7320_v24, %v15499_v43 }
 0x4ce   : > { %v17771_v45 = vpop.xlane.xlu1 %9296  ;;  %v6949_v19 = vcombine.low %v17777_v14, %v17782_v41  ;;  %v17815_v46 = vsel %vm487_vm1, %v6814_v59, -inf  ;;  %v17818_v3 = vrot.slane %v7031_v56, %v15499_v43  ;;  %v17821_v48 = vrot.slane %v7032_v21, %v15499_v43 }
 0x4cf   : > { %9569 = vmax.xlane.f32.xlu0 %v9568_v27  ;;  %v7303_v6 = vcombine.low %v17804_v34, %v17788_v53  ;;  %v17826_v11 = vrot.slane %v6984_v25, %v15424_v57  ;;  %v17829_v1 = vrot.slane %v7000_v38, %v15424_v57  ;;  %v17832_v42 = vrot.slane %v7288_v5, %v15499_v43 }
 0x4d0   : > { %v7456_v59 = vcombine.high %v17669_v61, %v17644_v8  ;;  %v9454_v0 = vsel %vm487_vm1, %v6677_v13, -inf  ;;  %v9523_v24 = vsel %vm487_vm1, %v7081_v20, -inf  ;;  %v17839_v56 = vrot.slane %v7184_v52, %v15499_v43  ;;  %v21003_v13 = vld [vmem:[#allocation88_spill] sm:$0xff]  ;;  %v21004_v20 = vld [vmem:[#allocation83_spill] sm:$0xff] }
 0x4d1   : > { %9452 = vmax.xlane.f32.xlu1 %v9451_v15  ;;  %v9300_v15 = vpop.xlane.xlu0 %9299  ;;  %v10453_v21 = vrot.slane %v17687_v33, %v17038_v29  ;;  %v10457_v28 = vrot.slane %v17724_v63, %v17022_v30  ;;  %v17846_v18 = vrot.slane %v7152_v44, %v15499_v43  ;;  %v7353_v8 = vcombine.low %v17832_v42, %v17810_v2 }
 0x4d2   : > { %v9303_v39 = vpop.xlane.xlu1 %9302  ;;  %v7424_v61 = vcombine.high %v17674_v50, %v17666_v9  ;;  %v10462_v25 = vrot.slane %v17718_v16, %v17038_v29  ;;  %v10466_v33 = vrot.slane %v17754_v7, %v17022_v30  ;;  %v9502_v63 = vsel %vm487_vm1, %v6949_v19, -inf }
 0x4d3   : > { %9455 = vmax.xlane.f32.xlu0 %v9454_v0  ;;  %v10444_v4 = vrot.slane %v17662_v51, %v17038_v29  ;;  %v10448_v38 = vrot.slane %v17701_v12, %v17022_v30  ;;  %v10471_v26 = vrot.slane %v17743_v31, %v17038_v29  ;;  %v10475_v9 = vrot.slane %v17779_v47, %v17022_v30  ;;  %v21002_v12 = vld [vmem:[#allocation86_spill] sm:$0xff] }
 0x4d4   : > { %v10480_v50 = vrot.slane %v17771_v45, %v17038_v29  ;;  %v10484_v16 = vrot.slane %v9300_v15, %v17022_v30  ;;  %v7217_v7 = vcombine.low %v17846_v18, %v17839_v56  ;;  %v17871_v51 = vrot.slane %v7456_v59, %v15499_v43 }
 0x4d5   : > { %9500 = vmax.xlane.f32.xlu1 %v9499_v49  ;;  %v9306_v58 = vpop.xlane.xlu0 %9305  ;;  %v7272_v52 = vcombine.high %v21002_v12, %v21001_v22  ;;  %v10458_v31 = vsel %vm9940_vm2, %v10457_v28, %v10453_v21  ;;  %v10489_v27 = vrot.slane %v9303_v39, %v17038_v29  ;;  %v7256_v35 = vcombine.high %v21004_v20, %v21003_v13  ;;  %v21005_v12 = vld [vmem:[#allocation6_spill] sm:$0xff] }
 0x4d6   : > { %v9309_v5 = vpop.xlane.xlu1 %9308  ;;  %v10493_v47 = vrot.slane %v9306_v58, %v17022_v30  ;;  %v10467_v17 = vsel %vm9940_vm2, %v10466_v33, %v10462_v25  ;;  %v17883_v15 = vrot.slane %v7424_v61, %v15499_v43  ;;  %v10449_v19 = vsel %vm9940_vm2, %v10448_v38, %v10444_v4 }
 0x4d7   : > { %9503 = vmax.xlane.f32.xlu0 %v9502_v63  ;;  %v10498_v44 = vrot.slane %v9309_v5, %v17038_v29  ;;  %v10476_v59 = vsel %vm9940_vm2, %v10475_v9, %v10471_v26  ;;  %v9571_v0 = vsel %vm487_vm1, %v7353_v8, -inf  ;;  %v10485_v21 = vsel %vm9940_vm2, %v10484_v16, %v10480_v50  ;;  %v21038_v63 = vld [vmem:[#allocation115_spill] sm:$0xff] }
 0x4d8   : > { %v9526_v28 = vsel %vm487_vm1, %v7217_v7, -inf  ;;  %v7489_v5 = vcombine.low %v17883_v15, %v17871_v51  ;;  %v17895_v61 = vrot.slane %v7272_v52, %v15424_v57  ;;  %v10494_v33 = vsel %vm9940_vm2, %v10493_v47, %v10489_v27  ;;  %v21006_v52 = vld [vmem:[#allocation178_spill] sm:$0xff] }
 0x4d9   : > { %9524 = vmax.xlane.f32.xlu1 %v9523_v24  ;;  %v9312_v49 = vpop.xlane.xlu0 %9311  ;;  %v10513_v24 = vsel %vm10005_vm3, %v10458_v31, %v10449_v19  ;;  %v7063_v4 = vcombine.low %v17826_v11, %v17829_v1  ;;  %v17907_v50 = vrot.slane %v7256_v35, %v15424_v57  ;;  %v7082_v22 = vcombine.high %v17785_v60, %v17765_v37  ;;  %v21009_v19 = vld [vmem:[#allocation189_spill] sm:$0xff] }
 0x4da   : > { %v9315_v45 = vpop.xlane.xlu1 %9314  ;;  %v10502_v39 = vrot.slane %v9312_v49, %v17022_v30  ;;  %v10514_v25 = vsel %vm10007_vm4, %v10467_v17, %v10513_v24  ;;  %v7136_v31 = vcombine.high %v21006_v52, %v21005_v12  ;;  %v9574_v27 = vsel %vm487_vm1, %v7489_v5, -inf  ;;  %v21007_v17 = vld [vmem:[#allocation95_spill] sm:$0xff]  ;;  %v21011_v24 = vld [vmem:[#allocation93_spill] sm:$0xff] }
 0x4db   : > { %9527 = vmax.xlane.f32.xlu0 %v9526_v28  ;;  %v10507_v8 = vrot.slane %v9315_v45, %v17038_v29  ;;  %v10515_v38 = vsel %vm10009_vm5, %v10476_v59, %v10514_v25  ;;  %v6678_v45 = vcombine.high %v17774_v40, %v17762_v32  ;;  %v7335_v13 = vcombine.low %v17907_v50, %v17895_v61  ;;  %v21010_v59 = vld [vmem:[#allocation167_spill] sm:$0xff] }
 0x4dc   : > { %v10503_v26 = vsel %vm9940_vm2, %v10502_v39, %v10498_v44  ;;  %v10516_v16 = vsel %vm10011_vm6, %v10485_v21, %v10515_v38  ;;  %v21008_v44 = vld [vmem:[#allocation91_spill] sm:$0xff]  ;;  %v17934_v40 = vrot.slane %v7303_v6, %v15499_v43  ;;  %v21012_v21 = vld [vmem:[#allocation89_spill] sm:$0xff]  ;;  %v17942_v25 = vrot.slane %v7063_v4, %v15499_v43 }
 0x4dd   : > { %9572 = vmax.xlane.f32.xlu1 %v9571_v0  ;;  %v9318_v9 = vpop.xlane.xlu0 %9317  ;;  %v10517_v47 = vsel %vm10013_vm7, %v10494_v33, %v10516_v16  ;;  %v7104_v49 = vcombine.high %v21008_v44, %v21007_v17  ;;  %v7088_v28 = vcombine.high %v21012_v21, %v21011_v24  ;;  %v17945_v33 = vrot.slane %v7136_v31, %v15424_v57  ;;  %v21039_v0 = vld [vmem:[#allocation111_spill] sm:$0xff] }
 0x4de   : > { %v9321_v58 = vpop.xlane.xlu1 %9320  ;;  %v10511_v7 = vrot.slane %v9318_v9, %v17022_v30  ;;  %v10518_v60 = vsel %vm10015_vm8, %v10503_v26, %v10517_v47  ;;  %v9460_v6 = vsel %vm487_vm1, %v6678_v45, -inf  ;;  %v6950_v26 = vcombine.high %v17777_v14, %v17782_v41  ;;  %v21015_v14 = vld [vmem:[#allocation94_spill] sm:$0xff]  ;;  %v21017_v47 = vld [vmem:[#allocation92_spill] sm:$0xff] }
 0x4df   : > { %9575 = vmax.xlane.f32.xlu0 %v9574_v27  ;;  %v10610_v20 = vrot.slane %v9321_v58, %v17038_v29  ;;  %v21014_v58 = vld [vmem:[#allocation181_spill] sm:$0xff]  ;;  %v17958_v12 = vrot.slane %v7335_v13, %v15499_v43  ;;  %v7376_v41 = vcombine.high %v21015_v14, %v20971_v55  ;;  %v7392_v31 = vcombine.high %v20974_v23, %v20973_v10 }
 0x4e0   : > { %v10512_v37 = vsel %vm9940_vm2, %v10511_v7, %v10507_v8  ;;  %v21013_v8 = vld [vmem:[#allocation18_spill] sm:$0xff]  ;;  %v9529_v7 = vsel %vm487_vm1, %v7082_v22, -inf  ;;  %v17975_v22 = vrot.slane %v7088_v28, %v15424_v57  ;;  %v7354_v55 = vcombine.high %v17832_v42, %v17810_v2 }
 0x4e1   : > { %9458 = vmax.xlane.f32.xlu1 %v17747_v54  ;;  %v7120_v54 = vcombine.high %v21010_v59, %v21009_v19  ;;  %v9324_v39 = vpop.xlane.xlu0 %9323  ;;  %v10519_v32 = vsel %vm10017_vm9, %v10512_v37, %v10518_v60  ;;  %v7408_v38 = vcombine.high %v21014_v58, %v21013_v8  ;;  %v9508_v10 = vsel %vm487_vm1, %v6950_v26, -inf }
 0x4e2   : > { %v9327_v35 = vpop.xlane.xlu1 %9326  ;;  %v10614_v5 = vrot.slane %v9324_v39, %v17022_v30  ;;  %14468 = vmatpush3.msra.mxu1 %v10519_v32  ;;  %v7218_v37 = vcombine.high %v17846_v18, %v17839_v56  ;;  %v7083_v2 = vcombine.low %v17818_v3, %v17942_v25  ;;  %v7355_v42 = vcombine.low %v17934_v40, %v17958_v12  ;;  %v21019_v39 = vld [vmem:[#allocation105_spill] sm:$0xff] }
 0x4e3   : > { %14477 = vmatprep.subr.mxu1 %v20904_v62  ;;  %9461 = vmax.xlane.f32.xlu0 %v9460_v6  ;;  %v10619_v4 = vrot.slane %v9327_v35, %v17038_v29  ;;  %v17968_v52 = vrot.slane %v7120_v54, %v15424_v57  ;;  %v17985_v23 = vrot.slane %v7408_v38, %v15424_v57  ;;  %v21018_v54 = vld [vmem:[#allocation109_spill] sm:$0xff]  ;;  %v9577_v21 = vsel %vm487_vm1, %v7354_v55, -inf }
 0x4e4   : > { %v10615_v9 = vsel %vm9940_vm2, %v10614_v5, %v10610_v20  ;;  %14470 = vmatmul.mubr.msk.f32.vlgmr.msra.gmra.mrb[50].mxu1 %vm487_vm1, %v17165_v36  ;;  %v21016_v36 = vld [vmem:[#allocation96_spill] sm:$0xff]  ;;  %v18002_v56 = vrot.slane %v7392_v31, %v15424_v57  ;;  %v7543_v32 = vcombine.low %v21019_v39, %v21018_v54  ;;  %v9532_v5 = vsel %vm487_vm1, %v7218_v37, -inf  ;;  %v21020_v38 = vld [vmem:[#allocation101_spill] sm:$0xff]  ;;  %v21027_v37 = vld [vmem:[#allocation22_spill] sm:$0xff] }
 0x4e5   : > { %9506 = vmax.xlane.f32.xlu1 %v17815_v46  ;;  %v17963_v46 = vrot.slane %v7104_v49, %v15424_v57  ;;  %v9330_v27 = vpop.xlane.xlu0 %9329  ;;  %14479 = vmatprep.mubr.msk.f32.mxu1 %vm14719_vm0, %v20904_v62  ;;  %v7360_v45 = vcombine.high %v21017_v47, %v21016_v36  ;;  %v7199_v20 = vcombine.low %v17968_v52, %v17945_v33  ;;  %v21021_v6 = vld [vmem:[#allocation97_spill] sm:$0xff]  ;;  %v21025_v47 = vld [vmem:[#allocation99_spill] sm:$0xff] }
 0x4e6   : > { %v9333_v16 = vpop.xlane.xlu1 %9332  ;;  %v10623_v13 = vrot.slane %v9330_v27, %v17022_v30  ;;  %v17999_v49 = vrot.slane %v7376_v41, %v15424_v57  ;;  %v7471_v28 = vcombine.low %v18002_v56, %v17985_v23  ;;  %v7490_v8 = vcombine.high %v17883_v15, %v17871_v51 }
 0x4e7   : > { %9509 = vmax.xlane.f32.xlu0 %v9508_v10  ;;  %v10628_v35 = vrot.slane %v9333_v16, %v17038_v29  ;;  %v7167_v44 = vcombine.low %v17975_v22, %v17963_v46  ;;  %v18006_v59 = vrot.slane %v7360_v45, %v15424_v57  ;;  %v18018_v58 = vrot.slane %v7199_v20, %v15499_v43  ;;  %v21026_v45 = vld [vmem:[#allocation33_spill] sm:$0xff] }
 0x4e8   : > { %v10624_v60 = vsel %vm9940_vm2, %v10623_v13, %v10619_v4  ;;  %v7511_v26 = vcombine.low %v21021_v6, %v21020_v38  ;;  %v21023_v4 = vld [vmem:[#allocation103_spill] sm:$0xff]  ;;  %v7084_v36 = vcombine.high %v17818_v3, %v17942_v25  ;;  %v7495_v13 = vcombine.low %v21026_v45, %v21025_v47 }
 0x4e9   : > { %9530 = vmax.xlane.f32.xlu1 %v9529_v7  ;;  %v10679_v18 = vsel %vm10005_vm3, %v10624_v60, %v10615_v9  ;;  %v9336_v19 = vpop.xlane.xlu0 %9335  ;;  %v21022_v9 = vld [vmem:[#allocation107_spill] sm:$0xff]  ;;  %v7439_v31 = vcombine.low %v18006_v59, %v17999_v49  ;;  %v18032_v27 = vrot.slane %v7167_v44, %v15499_v43  ;;  %v18039_v55 = vrot.slane %v7543_v32, %v15424_v57  ;;  %v21028_v60 = vld [vmem:[#allocation180_spill] sm:$0xff] }
 0x4ea   : > { %v9339_v17 = vpop.xlane.xlu1 %9338  ;;  %v10632_v24 = vrot.slane %v9336_v19, %v17022_v30  ;;  %v7527_v16 = vcombine.low %v21023_v4, %v21022_v9  ;;  %v9535_v10 = vsel %vm487_vm1, %v7083_v2, -inf  ;;  %v18049_v3 = vrot.slane %v7471_v28, %v15499_v43 }
 0x4eb   : > { %9533 = vmax.xlane.f32.xlu0 %v9532_v5  ;;  %v10637_v14 = vrot.slane %v9339_v17, %v17038_v29  ;;  %v9580_v17 = vsel %vm487_vm1, %v7490_v8, -inf  ;;  %v7219_v44 = vcombine.low %v18032_v27, %v18018_v58  ;;  %v18052_v25 = vrot.slane %v7511_v26, %v15424_v57  ;;  %v21032_v8 = vld [vmem:[#allocation191_spill] sm:$0xff] }
 0x4ec   : > { %v10633_v7 = vsel %vm9940_vm2, %v10632_v24, %v10628_v35  ;;  %v7679_v35 = vcombine.low %v21028_v60, %v21027_v37  ;;  %v9583_v32 = vsel %vm487_vm1, %v7355_v42, -inf  ;;  %v21030_v24 = vld [vmem:[#allocation117_spill] sm:$0xff]  ;;  %v7631_v62 = vcombine.low %v21039_v0, %v21038_v63  ;;  %v21062_v0 = vld [vmem:[#allocation114_spill] sm:$0xff] }
 0x4ed   : > { %9578 = vmax.xlane.f32.xlu1 %v9577_v21  ;;  %v10680_v51 = vsel %vm10007_vm4, %v10633_v7, %v10679_v18  ;;  %v9342_v15 = vpop.xlane.xlu0 %9341  ;;  %v18055_v18 = vrot.slane %v7527_v16, %v15424_v57  ;;  %v21031_v21 = vld [vmem:[#allocation113_spill] sm:$0xff]  ;;  %v18071_v16 = vrot.slane %v7439_v31, %v15499_v43  ;;  %v7336_v37 = vcombine.high %v17907_v50, %v17895_v61 }
 0x4ee   : > { %v18026_v41 = vpop.xlane.xlu1 %9344  ;;  %v10641_v20 = vrot.slane %v9342_v15, %v17022_v30  ;;  %v7647_v5 = vcombine.low %v21031_v21, %v21030_v24  ;;  %v21033_v7 = vld [vmem:[#allocation169_spill] sm:$0xff]  ;;  %v7356_v29 = vcombine.high %v17934_v40, %v17958_v12  ;;  %v21050_v30 = vld [vmem:[#allocation102_spill] sm:$0xff]  ;;  %v7220_v40 = vcombine.high %v18032_v27, %v18018_v58  ;;  %v21058_v27 = vld [vmem:[#allocation196_spill] sm:$0xff] }
 0x4ef   : > { %21024 = vst [vmem:[#allocation34_spill] sm:$0xff] %v18026_v41  ;;  %9581 = vmax.xlane.f32.xlu0 %v9580_v17  ;;  %v7663_v28 = vcombine.low %v21033_v7, %v21032_v8  ;;  %v7591_v42 = vcombine.low %v18055_v18, %v18039_v55  ;;  %v7491_v31 = vcombine.low %v18071_v16, %v18049_v3  ;;  %v21043_v41 = vld [vmem:[#allocation100_spill] sm:$0xff]  ;;  %v21045_v8 = vld [vmem:[#allocation106_spill] sm:$0xff] }
 0x4f0   : > { %v10642_v2 = vsel %vm9940_vm2, %v10641_v20, %v10637_v14  ;;  %v18074_v14 = vrot.slane %v7495_v13, %v15424_v57  ;;  %v21036_v20 = vld [vmem:[#allocation112_spill] sm:$0xff]  ;;  %v21041_v13 = vcombine.high %v17826_v11, %v17829_v1  ;;  %v18106_v11 = vrot.slane %v7647_v5, %v15424_v57 }
 0x4f1   : > { %9536 = vmax.xlane.f32.xlu1 %v9535_v10  ;;  %v18066_v15 = vsel %vm10009_vm5, %v10642_v2, %v10680_v51  ;;  %v18068_v26 = vpop.xlane.xlu0 %9347  ;;  %v21037_v10 = vld [vmem:[#allocation108_spill] sm:$0xff]  ;;  %v18083_v51 = vrot.slane %v7679_v35, %v15424_v57  ;;  %v9538_v2 = vsel %vm487_vm1, %v7219_v44, -inf  ;;  %v21044_v35 = vld [vmem:[#allocation110_spill] sm:$0xff]  ;;  %v18109_v1 = vrot.slane %v7663_v28, %v15424_v57  ;;  %v21054_v28 = vld [vmem:[#allocation183_spill] sm:$0xff] }
 0x4f2   : > { %v18058_v19 = vpop.xlane.xlu1 %9350  ;;  %21034 = vst [vmem:[#allocation31_spill] sm:$0xff] %v18066_v15  ;;  %21035 = vst [vmem:[#allocation2_spill] sm:$0xff] %v18068_v26  ;;  %v7815_v17 = vcombine.low %v21037_v10, %v21036_v20  ;;  %v18092_v15 = vrot.slane %v21041_v13, %v15499_v43  ;;  %v21042_v26 = vld [vmem:[#allocation104_spill] sm:$0xff]  ;;  %v7799_v60 = vcombine.low %v21045_v8, %v21044_v35  ;;  %v9586_v24 = vsel %vm487_vm1, %v7491_v31, -inf }
 0x4f3   : > { %21029 = vst [vmem:[#allocation29_spill] sm:$0xff] %v18058_v19  ;;  %21040 = vst [vmem:[#allocation43_spill] sm:$0xff] %v18083_v51  ;;  %v7559_v19 = vcombine.low %v18074_v14, %v18052_v25  ;;  %v7783_v7 = vcombine.low %v21043_v41, %v21042_v26  ;;  %9539 = vmax.xlane.f32.xlu0 %v9538_v2  ;;  %v21051_v2 = vld [vmem:[#allocation38_spill] sm:$0xff]  ;;  %v7599_v61 = vrot.slane %v7591_v42, %v15499_v43  ;;  %v21053_v5 = vld [vmem:[#allocation20_spill] sm:$0xff] }
 0x4f4   : > { %21047 = vst [vmem:[#allocation41_spill] sm:$0xff] %v18106_v11  ;;  %21048 = vst [vmem:[#allocation36_spill] sm:$0xff] %v18109_v1  ;;  %v7767_v21 = vcombine.low %v21051_v2, %v21050_v30  ;;  %v7727_v50 = vcombine.low %v18109_v1, %v18083_v51 }
 0x4f5   : > { %9584 = vmax.xlane.f32.xlu1 %v9583_v32  ;;  %v9541_v32 = vsel %vm487_vm1, %v7084_v36, -inf  ;;  %v18111_v13 = vpop.xlane.xlu0 %9353  ;;  %v18121_v36 = vrot.slane %v7631_v62, %v15424_v57  ;;  %v18132_v12 = vrot.slane %v7783_v7, %v15424_v57  ;;  %v18135_v62 = vrot.slane %v7799_v60, %v15424_v57  ;;  %v21059_v7 = vld [vmem:[#allocation172_spill] sm:$0xff] }
 0x4f6   : > { %v18100_v44 = vpop.xlane.xlu1 %9356  ;;  %21049 = vst [vmem:[#allocation177_spill] sm:$0xff] %v18111_v13  ;;  %v7951_v13 = vcombine.low %v21054_v28, %v21053_v5  ;;  %v7085_v28 = vcombine.low %v17821_v48, %v18092_v15  ;;  %v21057_v5 = vld [vmem:[#allocation116_spill] sm:$0xff]  ;;  %v7935_v1 = vcombine.low %v21059_v7, %v21058_v27  ;;  %v9589_v60 = vsel %vm487_vm1, %v7356_v29, -inf }
 0x4f7   : > { %21046 = vst [vmem:[#allocation39_spill] sm:$0xff] %v18100_v44  ;;  %v18118_v44 = vrot.slane %v7815_v17, %v15424_v57  ;;  %21052 = vst [vmem:[#allocation50_spill] sm:$0xff] %v18121_v36  ;;  %9587 = vmax.xlane.f32.xlu0 %v9586_v24  ;;  %v7567_v17 = vrot.slane %v7559_v19, %v15499_v43  ;;  %v7695_v31 = vcombine.low %v18121_v36, %v18106_v11 }
 0x4f8   : > { %v18152_v24 = vrot.slane %v7767_v21, %v15424_v57  ;;  %v18159_v11 = vrot.slane %v7951_v13, %v15424_v57  ;;  %v7735_v29 = vrot.slane %v7727_v50, %v15499_v43  ;;  %v7496_v21 = vcombine.high %v21026_v45, %v21025_v47 }
 0x4f9   : > { %9542 = vmax.xlane.f32.xlu1 %v9541_v32  ;;  %v21056_v32 = vld [vmem:[#allocation120_spill] sm:$0xff]  ;;  %v18148_v51 = vpop.xlane.xlu0 %9359  ;;  %v7863_v19 = vcombine.low %v18135_v62, %v18118_v44  ;;  %v7623_v36 = vcombine.low %v7567_v17, %v7599_v61  ;;  %v18172_v13 = vrot.slane %v7336_v37, %v15499_v43  ;;  %v18182_v47 = vrot.slane %v7935_v1, %v15424_v57 }
 0x4fa   : > { %v18137_v42 = vpop.xlane.xlu1 %9362  ;;  %v7919_v58 = vcombine.low %v21057_v5, %v21056_v32  ;;  %21060 = vst [vmem:[#allocation190_spill] sm:$0xff] %v18148_v51  ;;  %v9544_v5 = vsel %vm487_vm1, %v7220_v40, -inf  ;;  %v7492_v51 = vcombine.high %v18071_v16, %v18049_v3  ;;  %v7831_v7 = vcombine.low %v18152_v24, %v18132_v12 }
 0x4fb   : > { %21055 = vst [vmem:[#allocation47_spill] sm:$0xff] %v18137_v42  ;;  %v21061_v42 = vld [vmem:[#allocation118_spill] sm:$0xff]  ;;  %9545 = vmax.xlane.f32.xlu0 %v9544_v5  ;;  %v7086_v40 = vcombine.high %v17821_v48, %v18092_v15  ;;  %v7512_v3 = vcombine.high %v21021_v6, %v21020_v38  ;;  %v7703_v50 = vrot.slane %v7695_v31, %v15499_v43  ;;  %v9607_v5 = vsel %vm487_vm1, %v7623_v36, -inf }
 0x4fc   : > { %v7903_v63 = vcombine.low %v21062_v0, %v21061_v42  ;;  %v18179_v16 = vrot.slane %v7919_v58, %v15424_v57  ;;  %v7544_v37 = vcombine.high %v21019_v39, %v21018_v54  ;;  %v7871_v48 = vrot.slane %v7863_v19, %v15499_v43 }
 0x4fd   : > { %9590 = vmax.xlane.f32.xlu1 %v9589_v60  ;;  %v18184_v45 = vpop.xlane.xlu0 %9368  ;;  %v7624_v60 = vcombine.high %v7567_v17, %v7599_v61  ;;  %v7999_v6 = vcombine.low %v18182_v47, %v18159_v11  ;;  %v9592_v15 = vsel %vm487_vm1, %v7492_v51, -inf  ;;  %v7759_v1 = vcombine.low %v7703_v50, %v7735_v29 }
 0x4fe   : > { %v18169_v27 = vpop.xlane.xlu1 %9371  ;;  %v18192_v38 = vrot.slane %v7903_v63, %v15424_v57  ;;  %v7528_v31 = vcombine.high %v21023_v4, %v21022_v9  ;;  %v7839_v39 = vrot.slane %v7831_v7, %v15499_v43  ;;  %v18203_v36 = vsel %vm487_vm1, %v7085_v28, -inf }
 0x4ff   : > { %9593 = vmax.xlane.f32.xlu0 %v9592_v15  ;;  %v21063_v63 = vcombine.high %v17804_v34, %v17788_v53  ;;  %v7168_v51 = vcombine.high %v17975_v22, %v17963_v46  ;;  %v18214_v17 = vrot.slane %v7512_v3, %v15424_v57  ;;  %v18221_v28 = vsel %vm487_vm1, %v7086_v40, -inf }
 0x500   : > { %v7967_v9 = vcombine.low %v18192_v38, %v18179_v16  ;;  %v18224_v58 = vrot.slane %v7544_v37, %v15424_v57  ;;  %v9613_v53 = vsel %vm487_vm1, %v7624_v60, -inf  ;;  %v7895_v34 = vcombine.low %v7839_v39, %v7871_v48 }
 0x501   : > { %9608 = vmax.xlane.f32.xlu1 %v9607_v5  ;;  %v18209_v61 = vrot.slane %v21063_v63, %v15499_v43  ;;  %21064 = vst [vmem:[#allocation166_spill] sm:$0xff] %v18214_v17  ;;  %v18218_v4 = vpop.xlane.xlu0 %9374  ;;  %v18230_v22 = vrot.slane %v7496_v21, %v15424_v57  ;;  %v9610_v7 = vsel %vm487_vm1, %v7759_v1, -inf  ;;  %v7760_v19 = vcombine.high %v7703_v50, %v7735_v29 }
 0x502   : > { %v18199_v54 = vpop.xlane.xlu1 %9377  ;;  %21065 = vst [vmem:[#allocation48_spill] sm:$0xff] %v18224_v58  ;;  %v8007_v3 = vrot.slane %v7999_v6, %v15499_v43  ;;  %v7768_v40 = vcombine.high %v21051_v2, %v21050_v30  ;;  %v7784_v37 = vcombine.high %v21043_v41, %v21042_v26  ;;  %v18239_v5 = vrot.slane %v7528_v31, %v15424_v57 }
 0x503   : > { %v7357_v46 = vcombine.low %v18209_v61, %v18172_v13  ;;  %v7816_v60 = vcombine.high %v21037_v10, %v21036_v20  ;;  %9611 = vmax.xlane.f32.xlu0 %v9610_v7  ;;  %v7560_v29 = vcombine.high %v18074_v14, %v18052_v25  ;;  %v7575_v50 = vcombine.low %v18230_v22, %v18214_v17  ;;  %v21131_v17 = vld [vmem:[#allocation190_spill] sm:$0xff] }
 0x504   : > { %21066 = vst [vmem:[#allocation45_spill] sm:$0xff] %v18239_v5  ;;  %v7592_v30 = vcombine.high %v18055_v18, %v18039_v55  ;;  %v7975_v41 = vrot.slane %v7967_v9, %v15499_v43  ;;  %v7607_v26 = vcombine.low %v18239_v5, %v18224_v58  ;;  %v7800_v20 = vcombine.high %v21045_v8, %v21044_v35  ;;  %v21130_v5 = vld [vmem:[#allocation39_spill] sm:$0xff] }
 0x505   : > { %9614 = vmax.xlane.f32.xlu1 %v9613_v53  ;;  %v18251_v2 = vpop.xlane.xlu0 %9380  ;;  %v9655_v10 = vsel %vm487_vm1, %v7895_v34, -inf  ;;  %v7896_v6 = vcombine.high %v7839_v39, %v7871_v48  ;;  %v7200_v25 = vcombine.high %v17968_v52, %v17945_v33  ;;  %v9616_v14 = vsel %vm487_vm1, %v7760_v19, -inf }
 0x506   : > { %v18243_v21 = vpop.xlane.xlu1 %9383  ;;  %v8031_v55 = vcombine.low %v7975_v41, %v8007_v3  ;;  %v7358_v18 = vcombine.high %v18209_v61, %v18172_v13  ;;  %v18265_v15 = vrot.slane %v7784_v37, %v15424_v57  ;;  %v18268_v1 = vrot.slane %v7816_v60, %v15424_v57 }
 0x507   : > { %9617 = vmax.xlane.f32.xlu0 %v9616_v14  ;;  %v18273_v35 = vrot.slane %v7168_v51, %v15499_v43  ;;  %v9595_v33 = vsel %vm487_vm1, %v7357_v46, -inf  ;;  %v7440_v52 = vcombine.high %v18006_v59, %v17999_v49  ;;  %v18279_v48 = vrot.slane %v7768_v40, %v15424_v57 }
 0x508   : > { %21067 = vst [vmem:[#allocation53_spill] sm:$0xff] %v18265_v15  ;;  %21068 = vst [vmem:[#allocation49_spill] sm:$0xff] %v18268_v1  ;;  %v7574_v31 = vrot.slane %v7560_v29, %v15499_v43  ;;  %v7606_v39 = vrot.slane %v7592_v30, %v15499_v43  ;;  %v18286_v63 = vrot.slane %v7800_v20, %v15424_v57  ;;  %v9661_v61 = vsel %vm487_vm1, %v7896_v6, -inf }
 0x509   : > { %9656 = vmax.xlane.f32.xlu1 %v9655_v10  ;;  %21069 = vst [vmem:[#allocation54_spill] sm:$0xff] %v18279_v48  ;;  %v18281_v13 = vpop.xlane.xlu0 %9386  ;;  %v7583_v51 = vrot.slane %v7575_v50, %v15499_v43  ;;  %v7615_v9 = vrot.slane %v7607_v26, %v15499_v43  ;;  %v7472_v49 = vcombine.high %v18002_v56, %v17985_v23  ;;  %v9658_v59 = vsel %vm487_vm1, %v8031_v55, -inf  ;;  %v21074_v26 = vld [vmem:[#allocation36_spill] sm:$0xff] }
 0x50a   : > { %v18270_v8 = vpop.xlane.xlu1 %9389  ;;  %21070 = vst [vmem:[#allocation5_spill] sm:$0xff] %v18286_v63  ;;  %v8032_v53 = vcombine.high %v7975_v41, %v8007_v3  ;;  %v18295_v34 = vrot.slane %v7200_v25, %v15499_v43  ;;  %v7832_v46 = vcombine.high %v18152_v24, %v18132_v12  ;;  %v7847_v7 = vcombine.low %v18279_v48, %v18265_v15  ;;  %v21073_v41 = vld [vmem:[#allocation43_spill] sm:$0xff] }
 0x50b   : > { %v7864_v19 = vcombine.high %v18135_v62, %v18118_v44  ;;  %v7879_v40 = vcombine.low %v18286_v63, %v18268_v1  ;;  %9659 = vmax.xlane.f32.xlu0 %v9658_v59  ;;  %v18310_v3 = vrot.slane %v7440_v52, %v15499_v43  ;;  %v7625_v37 = vcombine.low %v7574_v31, %v7606_v39  ;;  %v21071_v44 = vld [vmem:[#allocation115_spill] sm:$0xff] }
 0x50c   : > { %v18313_v12 = vsel %vm487_vm1, %v7358_v18, -inf  ;;  %v7626_v24 = vcombine.high %v7574_v31, %v7606_v39  ;;  %v21072_v62 = vld [vmem:[#allocation111_spill] sm:$0xff]  ;;  %v7627_v50 = vcombine.low %v7583_v51, %v7615_v9  ;;  %v7628_v30 = vcombine.high %v7583_v51, %v7615_v9  ;;  %v21075_v39 = vld [vmem:[#allocation41_spill] sm:$0xff] }
 0x50d   : > { %9662 = vmax.xlane.f32.xlu1 %v9661_v61  ;;  %v18307_v56 = vpop.xlane.xlu0 %9392  ;;  %v7632_v29 = vcombine.high %v21072_v62, %v21071_v44  ;;  %v7728_v20 = vcombine.high %v21074_v26, %v21073_v41  ;;  %v9664_v10 = vsel %vm487_vm1, %v8032_v53, -inf  ;;  %v7221_v6 = vcombine.low %v18273_v35, %v18295_v34  ;;  %v21076_v61 = vld [vmem:[#allocation50_spill] sm:$0xff]  ;;  %v21080_v41 = vld [vmem:[#allocation116_spill] sm:$0xff] }
 0x50e   : > { %v18305_v23 = vpop.xlane.xlu1 %9395  ;;  %v18326_v25 = vrot.slane %v7472_v49, %v15499_v43  ;;  %v7846_v55 = vrot.slane %v7832_v46, %v15499_v43  ;;  %v7878_v18 = vrot.slane %v7864_v19, %v15499_v43  ;;  %v18333_v52 = vrot.slane %v7847_v7, %v15499_v43  ;;  %v21078_v46 = vld [vmem:[#allocation117_spill] sm:$0xff] }
 0x50f   : > { %9665 = vmax.xlane.f32.xlu0 %v9664_v10  ;;  %v18336_v31 = vrot.slane %v7879_v40, %v15499_v43  ;;  %v7696_v51 = vcombine.high %v21076_v61, %v21075_v39  ;;  %v9619_v49 = vsel %vm487_vm1, %v7625_v37, -inf  ;;  %v18346_v59 = vsel %vm487_vm1, %v7626_v24, -inf  ;;  %v21079_v7 = vld [vmem:[#allocation113_spill] sm:$0xff] }
 0x510   : > { %v18349_v53 = vrot.slane %v7632_v29, %v15424_v57  ;;  %v7648_v19 = vcombine.high %v21079_v7, %v21078_v46  ;;  %v18354_v40 = vsel %vm487_vm1, %v7627_v50, -inf  ;;  %v18357_v44 = vsel %vm487_vm1, %v7628_v30, -inf  ;;  %v21084_v46 = vld [vmem:[#allocation119_spill] sm:$0xff] }
 0x511   : > { %9548 = vmax.xlane.f32.xlu1 %v18203_v36  ;;  %v18342_v9 = vpop.xlane.xlu0 %9398  ;;  %v8000_v62 = vcombine.high %v18182_v47, %v18159_v11  ;;  %v9550_v37 = vsel %vm487_vm1, %v7221_v6, -inf  ;;  %v7493_v24 = vcombine.low %v18310_v3, %v18326_v25  ;;  %v18365_v29 = vrot.slane %v7728_v20, %v15499_v43 }
 0x512   : > { %v18328_v14 = vpop.xlane.xlu1 %9401  ;;  %21077 = vst [vmem:[#allocation56_spill] sm:$0xff] %v18349_v53  ;;  %v7920_v26 = vcombine.high %v21080_v41, %v21056_v32  ;;  %v7897_v10 = vcombine.low %v7846_v55, %v7878_v18  ;;  %v7898_v30 = vcombine.high %v7846_v55, %v7878_v18  ;;  %v7899_v39 = vcombine.low %v18333_v52, %v18336_v31  ;;  %v21083_v18 = vld [vmem:[#allocation123_spill] sm:$0xff]  ;;  %v21087_v41 = vld [vmem:[#allocation180_spill] sm:$0xff] }
 0x513   : > { %9551 = vmax.xlane.f32.xlu0 %v9550_v37  ;;  %v7968_v11 = vcombine.high %v18192_v38, %v18179_v16  ;;  %v18375_v61 = vrot.slane %v7696_v51, %v15499_v43  ;;  %v18380_v32 = vrot.slane %v7648_v19, %v15424_v57  ;;  %v7904_v55 = vcombine.high %v21062_v0, %v21061_v42  ;;  %v21085_v37 = vld [vmem:[#allocation27_spill] sm:$0xff]  ;;  %v21086_v38 = vld [vmem:[#allocation22_spill] sm:$0xff]  ;;  %v21089_v0 = vld [vmem:[#allocation121_spill] sm:$0xff] }
 0x514   : > { %v8055_v7 = vcombine.low %v21084_v46, %v21083_v18  ;;  %v9598_v51 = vsel %vm487_vm1, %v7493_v24, -inf  ;;  %v18393_v19 = vrot.slane %v8000_v62, %v15499_v43  ;;  %v18396_v60 = vrot.slane %v7920_v26, %v15424_v57  ;;  %v21090_v42 = vld [vmem:[#allocation58_spill] sm:$0xff]  ;;  %v21091_v24 = vld [vmem:[#allocation191_spill] sm:$0xff] }
 0x515   : > { %9596 = vmax.xlane.f32.xlu1 %v9595_v33  ;;  %v9417_v47 = vpop.xlane.xlu0 %9416  ;;  %v21081_v33 = vld [vmem:[#allocation21_spill] sm:$0xff]  ;;  %21082 = vst [vmem:[#allocation52_spill] sm:$0xff] %v18380_v32  ;;  %v7761_v36 = vcombine.low %v18375_v61, %v18365_v29  ;;  %v8039_v20 = vcombine.low %v21090_v42, %v21089_v0  ;;  %v18406_v62 = vrot.slane %v7968_v11, %v15499_v43  ;;  %v18409_v26 = vsel %vm487_vm1, %v7898_v30, -inf  ;;  %v21097_v11 = vld [vmem:[#allocation183_spill] sm:$0xff] }
 0x516   : > { %v9420_v50 = vpop.xlane.xlu1 %9419  ;;  %v10942_v16 = vrot.slane %v9417_v47, %v21085_v37  ;;  %21088 = vst [vmem:[#allocation3_spill] sm:$0xff] %v18396_v60 }
 0x517   : > { %v10946_v6 = vrot.slane %v9420_v50, %v21081_v33  ;;  %v7680_v50 = vcombine.high %v21087_v41, %v21086_v38  ;;  %9599 = vmax.xlane.f32.xlu0 %v9598_v51  ;;  %v9667_v38 = vsel %vm487_vm1, %v7897_v10, -inf  ;;  %v7711_v51 = vcombine.low %v18349_v53, %v18380_v32  ;;  %v21099_v32 = vld [vmem:[#allocation131_spill] sm:$0xff] }
 0x518   : > { %v18417_v10 = vrot.slane %v8055_v7, %v15424_v57  ;;  %v9622_v30 = vsel %vm487_vm1, %v7761_v36, -inf  ;;  %v8033_v53 = vcombine.low %v18406_v62, %v18393_v19  ;;  %v18431_v7 = vrot.slane %v8039_v20, %v15424_v57  ;;  %v21102_v36 = vld [vmem:[#allocation196_spill] sm:$0xff] }
 0x519   : > { %9620 = vmax.xlane.f32.xlu1 %v9619_v49  ;;  %v10947_v47 = vsel %vm9940_vm2, %v10946_v6, %v10942_v16  ;;  %v21092_v49 = vld [vmem:[#allocation169_spill] sm:$0xff]  ;;  %v9423_v18 = vpop.xlane.xlu0 %9422  ;;  %v18414_v6 = vrot.slane %v7904_v55, %v15424_v57 }
 0x51a   : > { %v9426_v46 = vpop.xlane.xlu1 %9425  ;;  %v7664_v41 = vcombine.high %v21092_v49, %v21091_v24  ;;  %21094 = vst [vmem:[#allocation59_spill] sm:$0xff] %v18417_v10  ;;  %v10951_v16 = vrot.slane %v9423_v18, %v21085_v37  ;;  %v18421_v24 = vrot.slane %v7680_v50, %v15424_v57  ;;  %21098 = vst [vmem:[#allocation62_spill] sm:$0xff] %v18431_v7  ;;  %v21100_v18 = vld [vmem:[#allocation127_spill] sm:$0xff] }
 0x51b   : > { %v10955_v48 = vrot.slane %v9426_v46, %v21081_v33  ;;  %21093 = vst [vmem:[#allocation64_spill] sm:$0xff] %v18414_v6  ;;  %v21096_v46 = vld [vmem:[#allocation20_spill] sm:$0xff]  ;;  %v7983_v55 = vcombine.low %v18414_v6, %v18396_v60  ;;  %v8087_v42 = vcombine.low %v21100_v18, %v21099_v32  ;;  %9623 = vmax.xlane.f32.xlu0 %v9622_v30  ;;  %v21104_v18 = vld [vmem:[#allocation126_spill] sm:$0xff] }
 0x51c   : > { %21095 = vst [vmem:[#allocation66_spill] sm:$0xff] %v18421_v24  ;;  %v7952_v49 = vcombine.high %v21097_v11, %v21096_v46  ;;  %v18437_v46 = vrot.slane %v7664_v41, %v15424_v57  ;;  %v8103_v60 = vcombine.low %v18431_v7, %v18417_v10  ;;  %v21105_v30 = vld [vmem:[#allocation122_spill] sm:$0xff]  ;;  %v18466_v10 = vrot.slane %v7711_v51, %v15499_v43 }
 0x51d   : > { %9668 = vmax.xlane.f32.xlu1 %v9667_v38  ;;  %v10956_v50 = vsel %vm9940_vm2, %v10955_v48, %v10951_v16  ;;  %v21103_v38 = vld [vmem:[#allocation172_spill] sm:$0xff]  ;;  %v9465_v6 = vpop.xlane.xlu0 %9464  ;;  %v8327_v32 = vcombine.low %v21105_v30, %v21104_v18  ;;  %v21106_v48 = vld [vmem:[#allocation129_spill] sm:$0xff]  ;;  %v21121_v30 = vld [vmem:[#allocation2_spill] sm:$0xff] }
 0x51e   : > { %v9468_v0 = vpop.xlane.xlu1 %9467  ;;  %21101 = vst [vmem:[#allocation74_spill] sm:$0xff] %v18437_v46  ;;  %v7936_v11 = vcombine.high %v21103_v38, %v21102_v36  ;;  %v18442_v15 = vsel %vm10005_vm3, %v10956_v50, %v10947_v47  ;;  %v21107_v16 = vld [vmem:[#allocation125_spill] sm:$0xff]  ;;  %v11108_v41 = vrot.slane %v9465_v6, %v21085_v37  ;;  %v7743_v36 = vcombine.low %v18437_v46, %v18421_v24  ;;  %v21110_v46 = vld [vmem:[#allocation124_spill] sm:$0xff] }
 0x51f   : > { %v11112_v20 = vrot.slane %v9468_v0, %v21081_v33  ;;  %v8071_v63 = vcombine.low %v21107_v16, %v21106_v48  ;;  %v18455_v47 = vrot.slane %v7952_v49, %v15424_v57  ;;  %v9670_v50 = vsel %vm487_vm1, %v8033_v53, -inf  ;;  %v21111_v53 = vld [vmem:[#allocation61_spill] sm:$0xff]  ;;  %v21116_v24 = vld [vmem:[#allocation192_spill] sm:$0xff]  ;;  %v21117_v16 = vld [vmem:[#allocation171_spill] sm:$0xff] }
 0x520   : > { %v7222_v0 = vcombine.high %v18273_v35, %v18295_v34  ;;  %v18462_v38 = vrot.slane %v8087_v42, %v15424_v57  ;;  %9671 = vmax.xlane.f32.xlu0 %v9670_v50  ;;  %v18469_v49 = vsel %vm487_vm1, %v7899_v39, -inf  ;;  %v18478_v42 = vrot.slane %v7983_v55, %v15499_v43 }
 0x521   : > { %21108 = vst [vmem:[#allocation70_spill] sm:$0xff] %v18455_v47  ;;  %9554 = vmax.xlane.f32.xlu1 %v18221_v28  ;;  %v11113_v7 = vsel %vm9940_vm2, %v11112_v20, %v11108_v41  ;;  %v18474_v28 = vrot.slane %v7936_v11, %v15424_v57  ;;  %v9471_v35 = vpop.xlane.xlu0 %9470  ;;  %v18481_v20 = vrot.slane %v8327_v32, %v15424_v57 }
 0x522   : > { %21109 = vst [vmem:[#allocation193_spill] sm:$0xff] %v18462_v38  ;;  %v9474_v6 = vpop.xlane.xlu1 %9473  ;;  %v18484_v51 = vrot.slane %v8071_v63, %v15424_v57  ;;  %v11117_v39 = vrot.slane %v9471_v35, %v21085_v37  ;;  %v18488_v41 = vrot.slane %v8103_v60, %v15499_v43  ;;  %v9556_v50 = vsel %vm487_vm1, %v7222_v0, -inf  ;;  %v21115_v35 = vld [vmem:[#allocation130_spill] sm:$0xff] }
 0x523   : > { %21112 = vst [vmem:[#allocation168_spill] sm:$0xff] %v18474_v28  ;;  %v11121_v34 = vrot.slane %v9474_v6, %v21081_v33  ;;  %v8015_v11 = vcombine.low %v18474_v28, %v18455_v47  ;;  %v7494_v55 = vcombine.high %v18310_v3, %v18326_v25  ;;  %v18497_v32 = vrot.slane %v7743_v36, %v15499_v43  ;;  %v21114_v6 = vld [vmem:[#allocation134_spill] sm:$0xff] }
 0x524   : > { %21113 = vst [vmem:[#allocation51_spill] sm:$0xff] %v18484_v51  ;;  %v8135_v63 = vcombine.low %v18484_v51, %v18462_v38  ;;  %v8359_v60 = vcombine.low %v21115_v35, %v21114_v6  ;;  %v8207_v48 = vcombine.low %v21117_v16, %v21116_v24  ;;  %9557 = vmax.xlane.f32.xlu0 %v9556_v50  ;;  %v21119_v47 = vld [vmem:[#allocation182_spill] sm:$0xff]  ;;  %v21122_v16 = vld [vmem:[#allocation29_spill] sm:$0xff] }
 0x525   : > { %9602 = vmax.xlane.f32.xlu1 %v18313_v12  ;;  %v11122_v0 = vsel %vm9940_vm2, %v11121_v34, %v11117_v39  ;;  %v21118_v12 = vld [vmem:[#allocation24_spill] sm:$0xff]  ;;  %v21120_v25 = vld [vmem:[#allocation34_spill] sm:$0xff]  ;;  %v10650_v51 = vrot.slane %v21121_v30, %v21081_v33  ;;  %v18515_v35 = vpop.xlane.xlu0 %9404  ;;  %v10655_v50 = vrot.slane %v21122_v16, %v21085_v37  ;;  %v21123_v34 = vld [vmem:[#allocation177_spill] sm:$0xff]  ;;  %v7762_v24 = vcombine.high %v18375_v61, %v18365_v29 }
 0x526   : > { %v18506_v28 = vpop.xlane.xlu1 %9407  ;;  %v8223_v3 = vcombine.low %v21119_v47, %v21118_v12  ;;  %v10646_v36 = vrot.slane %v21120_v25, %v21085_v37  ;;  %v11177_v38 = vsel %vm10005_vm3, %v11122_v0, %v11113_v7  ;;  %v10659_v39 = vrot.slane %v21123_v34, %v21081_v33  ;;  %v21124_v25 = vld [vmem:[#allocation132_spill] sm:$0xff]  ;;  %v21126_v29 = vld [vmem:[#allocation137_spill] sm:$0xff] }
 0x527   : > { %v8034_v47 = vcombine.high %v18406_v62, %v18393_v19  ;;  %v21125_v12 = vld [vmem:[#allocation128_spill] sm:$0xff]  ;;  %v9604_v30 = vsel %vm487_vm1, %v7494_v55, -inf  ;;  %v7763_v7 = vcombine.low %v18466_v10, %v18497_v32  ;;  %v18532_v16 = vrot.slane %v8015_v11, %v15499_v43  ;;  %v21127_v61 = vld [vmem:[#allocation133_spill] sm:$0xff]  ;;  %v21128_v19 = vld [vmem:[#allocation139_spill] sm:$0xff] }
 0x528   : > { %v18535_v0 = vrot.slane %v8359_v60, %v15424_v57  ;;  %v21129_v62 = vld [vmem:[#allocation135_spill] sm:$0xff]  ;;  %9605 = vmax.xlane.f32.xlu0 %v9604_v30  ;;  %v18542_v55 = vrot.slane %v8135_v63, %v15499_v43  ;;  %v18548_v11 = vrot.slane %v8223_v3, %v15424_v57  ;;  %v10651_v60 = vsel %vm9940_vm2, %v10650_v51, %v10646_v36 }
 0x529   : > { %9626 = vmax.xlane.f32.xlu1 %v18346_v59  ;;  %v18545_v59 = vrot.slane %v8207_v48, %v15424_v57  ;;  %v9429_v1 = vpop.xlane.xlu0 %9428  ;;  %v10660_v34 = vsel %vm9940_vm2, %v10659_v39, %v10655_v50  ;;  %v9628_v30 = vsel %vm487_vm1, %v7762_v24, -inf  ;;  %v9676_v63 = vsel %vm487_vm1, %v8034_v47, -inf  ;;  %v21132_v36 = vld [vmem:[#allocation31_spill] sm:$0xff] }
 0x52a   : > { %v9432_v6 = vpop.xlane.xlu1 %9431  ;;  %v10960_v18 = vrot.slane %v9429_v1, %v21085_v37  ;;  %v10664_v48 = vrot.slane %v21130_v5, %v21085_v37  ;;  %v10668_v3 = vrot.slane %v21131_v17, %v21081_v33  ;;  %v9634_v51 = vsel %vm487_vm1, %v7763_v7, -inf  ;;  %v21133_v24 = vld [vmem:[#allocation47_spill] sm:$0xff] }
 0x52b   : > { %v10964_v58 = vrot.slane %v9432_v6, %v21081_v33  ;;  %v8035_v6 = vcombine.low %v18478_v42, %v18532_v16  ;;  %v10682_v1 = vsel %vm10011_vm6, %v10651_v60, %v21132_v36  ;;  %v10673_v50 = vrot.slane %v21133_v24, %v21085_v37 }
 0x52c   : > { %v10789_v47 = vrot.slane %v18199_v54, %v21081_v33  ;;  %9629 = vmax.xlane.f32.xlu0 %v9628_v30  ;;  %v10683_v36 = vsel %vm10013_vm7, %v10660_v34, %v10682_v1  ;;  %v10780_v24 = vrot.slane %v18169_v27, %v21081_v33  ;;  %v10785_v54 = vrot.slane %v18218_v4, %v21085_v37 }
 0x52d   : > { %9674 = vmax.xlane.f32.xlu1 %v18409_v26  ;;  %v10965_v5 = vsel %vm9940_vm2, %v10964_v58, %v10960_v18  ;;  %v10798_v26 = vrot.slane %v18243_v21, %v21081_v33  ;;  %v9477_v7 = vpop.xlane.xlu0 %9476  ;;  %v10807_v58 = vrot.slane %v18270_v8, %v21081_v33  ;;  %v10669_v18 = vsel %vm9940_vm2, %v10668_v3, %v10664_v48 }
 0x52e   : > { %v9480_v17 = vpop.xlane.xlu1 %9479  ;;  %v18575_v39 = vsel %vm10007_vm4, %v10965_v5, %v18442_v15  ;;  %v11126_v21 = vrot.slane %v9477_v7, %v21085_v37  ;;  %v10776_v15 = vrot.slane %v18184_v45, %v21085_v37  ;;  %v10794_v30 = vrot.slane %v18251_v2, %v21085_v37 }
 0x52f   : > { %21134 = vst [vmem:[#allocation4_spill] sm:$0xff] %v18575_v39  ;;  %v11130_v60 = vrot.slane %v9480_v17, %v21081_v33  ;;  %v10816_v34 = vrot.slane %v18305_v23, %v21081_v33  ;;  %v10790_v27 = vsel %vm9940_vm2, %v10789_v47, %v10785_v54  ;;  %v10803_v4 = vrot.slane %v18281_v13, %v21085_v37 }
 0x530   : > { %v10825_v8 = vrot.slane %v18328_v14, %v21081_v33  ;;  %9677 = vmax.xlane.f32.xlu0 %v9676_v63  ;;  %v10799_v3 = vsel %vm9940_vm2, %v10798_v26, %v10794_v30  ;;  %v10812_v2 = vrot.slane %v18307_v56, %v21085_v37  ;;  %v10834_v23 = vrot.slane %v18506_v28, %v21081_v33  ;;  %v21138_v30 = vld [vmem:[#allocation17_spill] sm:$0xff] }
 0x531   : > { %9632 = vmax.xlane.f32.xlu1 %v18354_v40  ;;  %v11131_v48 = vsel %vm9940_vm2, %v11130_v60, %v11126_v21  ;;  %v9366_v1 = vpop.xlane.xlu0 %9365  ;;  %v10781_v13 = vsel %vm9940_vm2, %v10780_v24, %v10776_v15  ;;  %v10808_v14 = vsel %vm9940_vm2, %v10807_v58, %v10803_v4  ;;  %v10821_v63 = vrot.slane %v18342_v9, %v21085_v37 }
 0x532   : > { %v9411_v45 = vpop.xlane.xlu1 %9410  ;;  %v18606_v40 = vsel %vm10007_vm4, %v11131_v48, %v11177_v38  ;;  %v10677_v47 = vrot.slane %v9366_v1, %v21081_v33  ;;  %v10845_v5 = vsel %vm10005_vm3, %v10790_v27, %v10781_v13  ;;  %v10817_v56 = vsel %vm9940_vm2, %v10816_v34, %v10812_v2  ;;  %v21139_v34 = vld [vmem:[#allocation185_spill] sm:$0xff] }
 0x533   : > { %21135 = vst [vmem:[#allocation7_spill] sm:$0xff] %v18606_v40  ;;  %v10830_v28 = vrot.slane %v18515_v35, %v21085_v37  ;;  %v10684_v38 = vsel %vm10015_vm8, %v10669_v18, %v10683_v36  ;;  %v10846_v17 = vsel %vm10007_vm4, %v10799_v3, %v10845_v5  ;;  %v10826_v26 = vsel %vm9940_vm2, %v10825_v8, %v10821_v63  ;;  %v21146_v63 = vld [vmem:[#allocation138_spill] sm:$0xff]  ;;  %v21147_v5 = vld [vmem:[#allocation197_spill] sm:$0xff] }
 0x534   : > { %9635 = vmax.xlane.f32.xlu0 %v9634_v51  ;;  %v10839_v9 = vrot.slane %v9411_v45, %v21085_v37  ;;  %v10678_v7 = vsel %vm9940_vm2, %v10677_v47, %v10673_v50  ;;  %v21136_v24 = vcombine.low %v21129_v62, %v21128_v19  ;;  %v10847_v36 = vsel %vm10009_vm5, %v10808_v14, %v10846_v17  ;;  %v21145_v14 = vld [vmem:[#allocation142_spill] sm:$0xff] }
 0x535   : > { %9680 = vmax.xlane.f32.xlu1 %v18469_v49  ;;  %v10835_v49 = vsel %vm9940_vm2, %v10834_v23, %v10830_v28  ;;  %v9414_v54 = vpop.xlane.xlu0 %9413  ;;  %v10685_v58 = vsel %vm10017_vm9, %v10678_v7, %v10684_v38  ;;  %v21137_v51 = vcombine.low %v21127_v61, %v21126_v29  ;;  %v8271_v21 = vcombine.low %v18545_v59, %v18548_v11  ;;  %v21151_v7 = vld [vmem:[#allocation136_spill] sm:$0xff] }
 0x536   : > { %v18623_v60 = vpop.xlane.xlu1 %9434  ;;  %v18629_v35 = vrot.slane %v21136_v24, %v15424_v57  ;;  %v10848_v18 = vsel %vm10011_vm6, %v10817_v56, %v10847_v36  ;;  %v10843_v15 = vrot.slane %v9414_v54, %v21081_v33  ;;  %14473 = vmatpush3.msra.mxu0 %v10685_v58  ;;  %v8495_v27 = vcombine.low %v21139_v34, %v21138_v30  ;;  %v21148_v56 = vld [vmem:[#allocation174_spill] sm:$0xff] }
 0x537   : > { %v18638_v50 = vrot.slane %v21137_v51, %v15424_v57  ;;  %v9682_v4 = vsel %vm487_vm1, %v8035_v6, -inf  ;;  %v10849_v8 = vsel %vm10013_vm7, %v10826_v26, %v10848_v18  ;;  %v7764_v48 = vcombine.high %v18466_v10, %v18497_v32  ;;  %v18669_v32 = vld [vmem:[%s20309_s7] sm:$0xff] }
 0x538   : > { %v21140_v45 = vmov 0.0   ;;  %v21141_v3 = vcombine.low %v21125_v12, %v21124_v25  ;;  %9683 = vmax.xlane.f32.xlu0 %v9682_v4  ;;  %v10844_v23 = vsel %vm9940_vm2, %v10843_v15, %v10839_v9  ;;  %v10850_v6 = vsel %vm10015_vm8, %v10835_v49, %v10849_v8  ;;  %21144 = vst [vmem:[#allocation63_spill] sm:$0xff] %v18669_v32  ;;  %v21150_v9 = vld [vmem:[#allocation140_spill] sm:$0xff] }
 0x539   : > { %9638 = vmax.xlane.f32.xlu1 %v18357_v44  ;;  %14482 = vmatprep.subr.mxu0 %v21140_v45  ;;  %v21143_v44 = vcombine.high %v18333_v52, %v18336_v31  ;;  %v8239_v13 = vcombine.low %v18638_v50, %v18629_v35  ;;  %v8463_v47 = vcombine.low %v21146_v63, %v21145_v14  ;;  %v18679_v52 = vpop.xlane.xlu0 %9437  ;;  %v9640_v54 = vsel %vm487_vm1, %v7764_v48, -inf  ;;  %v21155_v48 = vld [vmem:[#allocation45_spill] sm:$0xff] }
 0x53a   : > { %v18656_v2 = vrot.slane %v21141_v3, %v15424_v57  ;;  %v18660_v1 = vpop.xlane.xlu1 %9482  ;;  %14475 = vmatmul.mubr.msk.f32.vlgmr.msra.gmra.mrb[52].mxu0 %vm487_vm1, %v18669_v32  ;;  %v8479_v28 = vcombine.low %v21148_v56, %v21147_v5  ;;  %v10851_v31 = vsel %vm10017_vm9, %v10844_v23, %v10850_v6  ;;  %v21149_v38 = vcombine.low %v21111_v53, %v21110_v46  ;;  %v21156_v3 = vld [vmem:[#allocation48_spill] sm:$0xff] }
 0x53b   : > { %21142 = vst [vmem:[#allocation12_spill] sm:$0xff] %v18660_v1  ;;  %v9685_v10 = vsel %vm487_vm1, %v21143_v44, -inf  ;;  %14484 = vmatprep.mubr.msk.f32.mxu0 %vm14719_vm0, %v21140_v45  ;;  %v8447_v24 = vcombine.low %v21151_v7, %v21150_v9  ;;  %14478 = vmatpush3.msra.mxu1 %v10851_v31  ;;  %v8167_v36 = vcombine.low %v18488_v41, %v18542_v55  ;;  %v21170_v1 = vld [vmem:[#allocation58_spill] sm:$0xff] }
 0x53c   : > { %v18688_v17 = vrot.slane %v21149_v38, %v15424_v57  ;;  %v8407_v26 = vcombine.low %v18656_v2, %v18535_v0  ;;  %v18697_v49 = vrot.slane %v8495_v27, %v15424_v57  ;;  %v8036_v58 = vcombine.high %v18478_v42, %v18532_v16  ;;  %14487 = vmatprep.subr.mxu1 %v21140_v45  ;;  %v21153_v27 = vld [vmem:[#allocation166_spill] sm:$0xff]  ;;  %v21158_v16 = vld [vmem:[#allocation49_spill] sm:$0xff] }
 0x53d   : > { %9686 = vmax.xlane.f32.xlu1 %v9685_v10  ;;  %v8279_v51 = vrot.slane %v8271_v21, %v15499_v43  ;;  %9641 = vmax.xlane.f32.xlu0 %v9640_v54  ;;  %v21154_v4 = vcombine.high %v18230_v22, %v21153_v27  ;;  %v21157_v23 = vcombine.high %v21155_v48, %v21156_v3  ;;  %v21159_v21 = vld [vmem:[#allocation5_spill] sm:$0xff]  ;;  %v18726_v31 = vpop.xlane.xlu0 %9485  ;;  %v21162_v54 = vld [vmem:[#allocation54_spill] sm:$0xff] }
 0x53e   : > { %v8375_v18 = vcombine.low %v18688_v17, %v18481_v20  ;;  %v18706_v15 = vpop.xlane.xlu1 %9440  ;;  %14480 = vmatmul.mubr.msk.f32.vlgmr.msra.gmra.mrb[52].mxu1 %vm487_vm1, %v18669_v32  ;;  %v7880_v6 = vcombine.high %v21159_v21, %v21158_v16  ;;  %v18721_v44 = vrot.slane %v8463_v47, %v15424_v57  ;;  %v18724_v10 = vrot.slane %v8479_v28, %v15424_v57  ;;  %v21161_v38 = vld [vmem:[#allocation53_spill] sm:$0xff] }
 0x53f   : > { %21152 = vst [vmem:[#allocation57_spill] sm:$0xff] %v18706_v15  ;;  %v7590_v8 = vrot.slane %v21154_v4, %v15499_v43  ;;  %v7622_v42 = vrot.slane %v21157_v23, %v15499_v43  ;;  %21160 = vst [vmem:[#allocation8_spill] sm:$0xff] %v18726_v31  ;;  %v8247_v22 = vrot.slane %v8239_v13, %v15499_v43  ;;  %14489 = vmatprep.mubr.msk.f32.mxu1 %vm14719_vm0, %v21140_v45  ;;  %v21169_v31 = vld [vmem:[#allocation121_spill] sm:$0xff] }
 0x540   : > { %v7848_v27 = vcombine.high %v21162_v54, %v21161_v38  ;;  %v9703_v4 = vsel %vm487_vm1, %v8167_v36, -inf  ;;  %v8168_v48 = vcombine.high %v18488_v41, %v18542_v55  ;;  %v8415_v47 = vrot.slane %v8407_v26, %v15499_v43  ;;  %v21164_v38 = vld [vmem:[#allocation123_spill] sm:$0xff]  ;;  %v21174_v15 = vld [vmem:[#allocation125_spill] sm:$0xff] }
 0x541   : > { %v18738_v28 = vrot.slane %v8447_v24, %v15424_v57  ;;  %v8543_v3 = vcombine.low %v18724_v10, %v18697_v49  ;;  %v9688_v13 = vsel %vm487_vm1, %v8036_v58, -inf  ;;  %9704 = vmax.xlane.f32.xlu1 %v9703_v4  ;;  %v8303_v23 = vcombine.low %v8247_v22, %v8279_v51  ;;  %v21165_v41 = vld [vmem:[#allocation119_spill] sm:$0xff]  ;;  %v18750_v24 = vpop.xlane.xlu0 %9443 }
 0x542   : > { %9689 = vmax.xlane.f32.xlu0 %v9688_v13  ;;  %v18743_v16 = vpop.xlane.xlu1 %9488  ;;  %v8383_v36 = vrot.slane %v8375_v18, %v15499_v43  ;;  %v7629_v21 = vcombine.low %v7590_v8, %v7622_v42  ;;  %v8056_v55 = vcombine.high %v21165_v41, %v21164_v38  ;;  %21166 = vst [vmem:[#allocation60_spill] sm:$0xff] %v18750_v24  ;;  %v21167_v58 = vld [vmem:[#allocation131_spill] sm:$0xff]  ;;  %v9709_v13 = vsel %vm487_vm1, %v8168_v48, -inf  ;;  %v21171_v24 = vld [vmem:[#allocation126_spill] sm:$0xff] }
 0x543   : > { %21163 = vst [vmem:[#allocation25_spill] sm:$0xff] %v18743_v16  ;;  %v8511_v26 = vcombine.low %v18738_v28, %v18721_v44  ;;  %v7894_v54 = vrot.slane %v7880_v6, %v15499_v43  ;;  %v7630_v32 = vcombine.high %v7590_v8, %v7622_v42  ;;  %v21168_v4 = vld [vmem:[#allocation127_spill] sm:$0xff]  ;;  %v9706_v18 = vsel %vm487_vm1, %v8303_v23, -inf  ;;  %v21172_v6 = vld [vmem:[#allocation122_spill] sm:$0xff]  ;;  %v21173_v42 = vld [vmem:[#allocation129_spill] sm:$0xff] }
 0x544   : > { %v8088_v45 = vcombine.high %v21168_v4, %v21167_v58  ;;  %v8439_v40 = vcombine.low %v8383_v36, %v8415_v47  ;;  %v8304_v16 = vcombine.high %v8247_v22, %v8279_v51  ;;  %v8551_v38 = vrot.slane %v8543_v3, %v15499_v43  ;;  %v21178_v4 = vld [vmem:[#allocation66_spill] sm:$0xff] }
 0x545   : > { %9710 = vmax.xlane.f32.xlu1 %v9709_v13  ;;  %v7862_v41 = vrot.slane %v7848_v27, %v15499_v43  ;;  %v8040_v39 = vcombine.high %v21170_v1, %v21169_v31  ;;  %v8328_v8 = vcombine.high %v21172_v6, %v21171_v24  ;;  %v8072_v58 = vcombine.high %v21174_v15, %v21173_v42  ;;  %v18771_v22 = vpop.xlane.xlu0 %9491  ;;  %v21180_v42 = vld [vmem:[#allocation52_spill] sm:$0xff] }
 0x546   : > { %9707 = vmax.xlane.f32.xlu0 %v9706_v18  ;;  %v18765_v48 = vpop.xlane.xlu1 %9446  ;;  %v9643_v23 = vsel %vm487_vm1, %v7629_v21, -inf  ;;  %v18769_v51 = vrot.slane %v8056_v55, %v15424_v57  ;;  %21177 = vst [vmem:[#allocation176_spill] sm:$0xff] %v18771_v22  ;;  %v8519_v27 = vrot.slane %v8511_v26, %v15499_v43  ;;  %v18775_v1 = vsel %vm487_vm1, %v7630_v32, -inf  ;;  %v21179_v55 = vld [vmem:[#allocation74_spill] sm:$0xff]  ;;  %v21181_v32 = vld [vmem:[#allocation56_spill] sm:$0xff] }
 0x547   : > { %21175 = vst [vmem:[#allocation55_spill] sm:$0xff] %v18765_v48  ;;  %v7901_v3 = vcombine.low %v7862_v41, %v7894_v54  ;;  %v8312_v31 = vcombine.high %v21111_v53, %v21110_v46  ;;  %v18780_v15 = vrot.slane %v8088_v45, %v15424_v57  ;;  %v9751_v24 = vsel %vm487_vm1, %v8439_v40, -inf  ;;  %v21184_v45 = vld [vmem:[#allocation3_spill] sm:$0xff] }
 0x548   : > { %21176 = vst [vmem:[#allocation9_spill] sm:$0xff] %v18769_v51  ;;  %v8440_v21 = vcombine.high %v8383_v36, %v8415_v47  ;;  %v7744_v13 = vcombine.high %v21179_v55, %v21178_v4  ;;  %v9712_v18 = vsel %vm487_vm1, %v8304_v16, -inf  ;;  %v8575_v26 = vcombine.low %v8519_v27, %v8551_v38  ;;  %v21185_v47 = vld [vmem:[#allocation64_spill] sm:$0xff]  ;;  %v21186_v36 = vld [vmem:[#allocation59_spill] sm:$0xff] }
 0x549   : > { %9752 = vmax.xlane.f32.xlu1 %v9751_v24  ;;  %v7902_v6 = vcombine.high %v7862_v41, %v7894_v54  ;;  %v7712_v22 = vcombine.high %v21181_v32, %v21180_v42  ;;  %v18789_v48 = vrot.slane %v8040_v39, %v15424_v57  ;;  %v18792_v46 = vrot.slane %v8328_v8, %v15424_v57  ;;  %v21187_v54 = vld [vmem:[#allocation62_spill] sm:$0xff]  ;;  %v21188_v24 = vld [vmem:[#allocation193_spill] sm:$0xff]  ;;  %v21189_v4 = vld [vmem:[#allocation51_spill] sm:$0xff]  ;;  %v18805_v39 = vpop.xlane.xlu0 %9449 }
 0x54a   : > { %v18795_v53 = vrot.slane %v8072_v58, %v15424_v57  ;;  %9713 = vmax.xlane.f32.xlu0 %v9712_v18  ;;  %v18797_v40 = vpop.xlane.xlu1 %9494  ;;  %v7984_v16 = vcombine.high %v21185_v47, %v21184_v45  ;;  %v8104_v41 = vcombine.high %v21187_v54, %v21186_v36  ;;  %v8136_v55 = vcombine.high %v21189_v4, %v21188_v24  ;;  %v21190_v45 = vld [vmem:[#allocation70_spill] sm:$0xff]  ;;  %v21191_v47 = vld [vmem:[#allocation168_spill] sm:$0xff] }
 0x54b   : > { %21182 = vst [vmem:[#allocation10_spill] sm:$0xff] %v18789_v48  ;;  %v9691_v8 = vsel %vm487_vm1, %v7901_v3, -inf  ;;  %v8119_v58 = vcombine.low %v18789_v48, %v18769_v51  ;;  %v18811_v18 = vrot.slane %v8312_v31, %v15424_v57  ;;  %v9757_v32 = vsel %vm487_vm1, %v8440_v21, -inf  ;;  %v21192_v48 = vld [vmem:[#allocation134_spill] sm:$0xff] }
 0x54c   : > { %21183 = vst [vmem:[#allocation15_spill] sm:$0xff] %v18795_v53  ;;  %v8151_v42 = vcombine.low %v18795_v53, %v18780_v15  ;;  %v8016_v36 = vcombine.high %v21191_v47, %v21190_v45  ;;  %v9754_v54 = vsel %vm487_vm1, %v8575_v26, -inf  ;;  %v8576_v24 = vcombine.high %v8519_v27, %v8551_v38  ;;  %v21193_v51 = vld [vmem:[#allocation130_spill] sm:$0xff] }
 0x54d   : > { %9758 = vmax.xlane.f32.xlu1 %v9757_v32  ;;  %v18820_v3 = vrot.slane %v7744_v13, %v15499_v43  ;;  %v8376_v4 = vcombine.high %v18688_v17, %v18481_v20  ;;  %v8391_v31 = vcombine.low %v18811_v18, %v18792_v46  ;;  %v8360_v53 = vcombine.high %v21193_v51, %v21192_v48  ;;  %v18833_v27 = vpop.xlane.xlu0 %9497 }
 0x54e   : > { %9755 = vmax.xlane.f32.xlu0 %v9754_v54  ;;  %v9513_v21 = vpop.xlane.xlu1 %9512  ;;  %v18829_v45 = vsel %vm487_vm1, %v7902_v6, -inf  ;;  %v8344_v38 = vcombine.high %v21125_v12, %v21124_v25  ;;  %v18836_v13 = vrot.slane %v7712_v22, %v15499_v43  ;;  %v18839_v20 = vrot.slane %v7984_v16, %v15499_v43 }
 0x54f   : > { %v8150_v17 = vrot.slane %v8136_v55, %v15499_v43  ;;  %v8408_v48 = vcombine.high %v18656_v2, %v18535_v0  ;;  %v8118_v51 = vrot.slane %v8104_v41, %v15499_v43  ;;  %v8127_v26 = vrot.slane %v8119_v58, %v15499_v43 }
 0x550   : > { %v8159_v6 = vrot.slane %v8151_v42, %v15499_v43  ;;  %v8272_v12 = vcombine.high %v18545_v59, %v18548_v11  ;;  %v9760_v25 = vsel %vm487_vm1, %v8576_v24, -inf  ;;  %v7765_v22 = vcombine.low %v18836_v13, %v18820_v3 }
 0x551   : > { %9644 = vmax.xlane.f32.xlu1 %v9643_v23  ;;  %v18853_v16 = vrot.slane %v8016_v36, %v15499_v43  ;;  %v18856_v0 = vrot.slane %v8360_v53, %v15424_v57  ;;  %v11274_v2 = vrot.slane %v9513_v21, %v21085_v37  ;;  %v18860_v55 = vrot.slane %v8376_v4, %v15499_v43  ;;  %v9516_v58 = vpop.xlane.xlu0 %9515 }
 0x552   : > { %9761 = vmax.xlane.f32.xlu0 %v9760_v25  ;;  %v9519_v41 = vpop.xlane.xlu1 %9518  ;;  %v18863_v59 = vrot.slane %v8391_v31, %v15499_v43  ;;  %v18866_v11 = vrot.slane %v8344_v38, %v15424_v57  ;;  %v8240_v23 = vcombine.high %v18638_v50, %v18629_v35  ;;  %v8169_v42 = vcombine.low %v8118_v51, %v8150_v17 }
 0x553   : > { %v8170_v53 = vcombine.high %v8118_v51, %v8150_v17  ;;  %v11278_v32 = vrot.slane %v9516_v58, %v21081_v33  ;;  %v18872_v47 = vrot.slane %v8408_v48, %v15499_v43  ;;  %v8171_v36 = vcombine.low %v8127_v26, %v8159_v6 }
 0x554   : > { %v8172_v54 = vcombine.high %v8127_v26, %v8159_v6  ;;  %v8544_v24 = vcombine.high %v18724_v10, %v18697_v49  ;;  %v9646_v4 = vsel %vm487_vm1, %v7765_v22, -inf  ;;  %v8037_v31 = vcombine.low %v18839_v20, %v18853_v16 }
 0x555   : > { %9692 = vmax.xlane.f32.xlu1 %v9691_v8  ;;  %v18880_v35 = vrot.slane %v8272_v12, %v15499_v43  ;;  %v8423_v50 = vcombine.low %v18866_v11, %v18856_v0  ;;  %v8176_v21 = vcombine.high %v21127_v61, %v21126_v29  ;;  %v11279_v38 = vsel %vm9940_vm2, %v11278_v32, %v11274_v2  ;;  %v9522_v48 = vpop.xlane.xlu0 %9521 }
 0x556   : > { %9647 = vmax.xlane.f32.xlu0 %v9646_v4  ;;  %v11283_v49 = vrot.slane %v9519_v41, %v21085_v37  ;;  %v9561_v10 = vpop.xlane.xlu1 %9560  ;;  %v8192_v8 = vcombine.high %v21129_v62, %v21128_v19  ;;  %v8512_v17 = vcombine.high %v18738_v28, %v18721_v44  ;;  %v9715_v51 = vsel %vm487_vm1, %v8169_v42, -inf }
 0x557   : > { %v18894_v26 = vrot.slane %v8240_v23, %v15499_v43  ;;  %v11287_v29 = vrot.slane %v9522_v48, %v21081_v33  ;;  %v8441_v61 = vcombine.low %v18860_v55, %v18872_v47  ;;  %v18900_v6 = vsel %vm487_vm1, %v8170_v53, -inf }
 0x558   : > { %v18903_v12 = vsel %vm487_vm1, %v8171_v36, -inf  ;;  %v9694_v19 = vsel %vm487_vm1, %v8037_v31, -inf  ;;  %v18909_v44 = vrot.slane %v8544_v24, %v15499_v43  ;;  %v18912_v28 = vsel %vm487_vm1, %v8172_v54, -inf  ;;  %v21195_v54 = vld [vmem:[#allocation145_spill] sm:$0xff]  ;;  %v21197_v31 = vld [vmem:[#allocation24_spill] sm:$0xff] }
 0x559   : > { %9716 = vmax.xlane.f32.xlu1 %v9715_v51  ;;  %v8305_v62 = vcombine.low %v18894_v26, %v18880_v35  ;;  %v18915_v25 = vrot.slane %v8176_v21, %v15424_v57  ;;  %v11288_v22 = vsel %vm9940_vm2, %v11287_v29, %v11283_v49  ;;  %v11440_v2 = vrot.slane %v9561_v10, %v21085_v37  ;;  %v9564_v32 = vpop.xlane.xlu0 %9563  ;;  %v21196_v24 = vld [vmem:[#allocation141_spill] sm:$0xff]  ;;  %v21198_v21 = vld [vmem:[#allocation182_spill] sm:$0xff] }
 0x55a   : > { %9695 = vmax.xlane.f32.xlu0 %v9694_v19  ;;  %v9567_v41 = vpop.xlane.xlu1 %9566  ;;  %v18920_v23 = vrot.slane %v8423_v50, %v15499_v43  ;;  %v18923_v58 = vrot.slane %v8192_v8, %v15424_v57  ;;  %v8464_v42 = vcombine.high %v21146_v63, %v21145_v14  ;;  %v18928_v53 = vsel %vm10005_vm3, %v11288_v22, %v11279_v38  ;;  %v21199_v63 = vld [vmem:[#allocation143_spill] sm:$0xff]  ;;  %v21200_v38 = vld [vmem:[#allocation82_spill] sm:$0xff]  ;;  %v21201_v51 = vld [vmem:[#allocation153_spill] sm:$0xff] }
 0x55b   : > { %21194 = vst [vmem:[#allocation77_spill] sm:$0xff] %v18915_v25  ;;  %v18931_v36 = vrot.slane %v8512_v17, %v15499_v43  ;;  %v8599_v4 = vcombine.low %v21196_v24, %v21195_v54  ;;  %v8224_v50 = vcombine.high %v21198_v21, %v21197_v31  ;;  %v11444_v49 = vrot.slane %v9564_v32, %v21081_v33  ;;  %v21202_v29 = vld [vmem:[#allocation149_spill] sm:$0xff]  ;;  %v21203_v22 = vld [vmem:[#allocation192_spill] sm:$0xff]  ;;  %v21204_v31 = vld [vmem:[#allocation171_spill] sm:$0xff] }
 0x55c   : > { %v9763_v10 = vsel %vm487_vm1, %v8441_v61, -inf  ;;  %v8448_v14 = vcombine.high %v21151_v7, %v21150_v9  ;;  %v8583_v8 = vcombine.low %v21200_v38, %v21199_v63  ;;  %v9718_v48 = vsel %vm487_vm1, %v8305_v62, -inf  ;;  %v21219_v24 = vld [vmem:[#allocation85_spill] sm:$0xff] }
 0x55d   : > { %9764 = vmax.xlane.f32.xlu1 %v9763_v10  ;;  %v8577_v17 = vcombine.low %v18931_v36, %v18909_v44  ;;  %v8631_v19 = vcombine.low %v21202_v29, %v21201_v51  ;;  %v8208_v32 = vcombine.high %v21204_v31, %v21203_v22  ;;  %v11445_v61 = vsel %vm9940_vm2, %v11444_v49, %v11440_v2  ;;  %v9570_v10 = vpop.xlane.xlu0 %9569  ;;  %v21207_v49 = vld [vmem:[#allocation151_spill] sm:$0xff] }
 0x55e   : > { %9719 = vmax.xlane.f32.xlu0 %v9718_v48  ;;  %v11449_v9 = vrot.slane %v9567_v41, %v21085_v37  ;;  %v18952_v7 = vpop.xlane.xlu1 %9452  ;;  %v8255_v62 = vcombine.low %v18915_v25, %v18923_v58  ;;  %v18957_v21 = vrot.slane %v8464_v42, %v15424_v57  ;;  %v8442_v29 = vcombine.high %v18860_v55, %v18872_v47  ;;  %v21208_v41 = vld [vmem:[#allocation147_spill] sm:$0xff]  ;;  %v21238_v25 = vld [vmem:[#allocation25_spill] sm:$0xff] }
 0x55f   : > { %v8443_v22 = vcombine.low %v18863_v59, %v18920_v23  ;;  %v18964_v2 = vrot.slane %v8599_v4, %v15424_v57  ;;  %v8615_v48 = vcombine.low %v21208_v41, %v21207_v49  ;;  %v18969_v31 = vrot.slane %v8224_v50, %v15424_v57  ;;  %v21217_v49 = vld [vmem:[#allocation152_spill] sm:$0xff] }
 0x560   : > { %21205 = vst [vmem:[#allocation73_spill] sm:$0xff] %v18957_v21  ;;  %v11453_v51 = vrot.slane %v9570_v10, %v21081_v33  ;;  %v18973_v42 = vrot.slane %v8448_v14, %v15424_v57  ;;  %v8496_v55 = vcombine.high %v21139_v34, %v21138_v30  ;;  %v9766_v47 = vsel %vm487_vm1, %v8577_v17, -inf }
 0x561   : > { %21206 = vst [vmem:[#allocation71_spill] sm:$0xff] %v18964_v2  ;;  %9650 = vmax.xlane.f32.xlu1 %v18775_v1  ;;  %v7766_v4 = vcombine.high %v18836_v13, %v18820_v3  ;;  %v18982_v41 = vrot.slane %v8583_v8, %v15424_v57  ;;  %v18985_v50 = vrot.slane %v8631_v19, %v15424_v57  ;;  %v19000_v13 = vpop.xlane.xlu0 %9455  ;;  %v21213_v19 = vld [vmem:[#allocation144_spill] sm:$0xff] }
 0x562   : > { %21209 = vst [vmem:[#allocation67_spill] sm:$0xff] %v18973_v42  ;;  %v18988_v10 = vrot.slane %v8208_v32, %v15424_v57  ;;  %v11454_v14 = vsel %vm9940_vm2, %v11453_v51, %v11449_v9  ;;  %9767 = vmax.xlane.f32.xlu0 %v9766_v47  ;;  %v18991_v30 = vpop.xlane.xlu1 %9500  ;;  %v8527_v34 = vcombine.low %v18973_v42, %v18957_v21  ;;  %v21212_v51 = vld [vmem:[#allocation148_spill] sm:$0xff]  ;;  %v21226_v21 = vld [vmem:[#allocation155_spill] sm:$0xff] }
 0x563   : > { %21210 = vst [vmem:[#allocation188_spill] sm:$0xff] %v18982_v41  ;;  %21211 = vst [vmem:[#allocation165_spill] sm:$0xff] %v18985_v50  ;;  %v8480_v1 = vcombine.high %v21148_v56, %v21147_v5  ;;  %v18998_v3 = vsel %vm10005_vm3, %v11454_v14, %v11445_v61  ;;  %v8647_v17 = vcombine.low %v18982_v41, %v18964_v2  ;;  %v9652_v61 = vsel %vm487_vm1, %v7766_v4, -inf  ;;  %v21227_v41 = vld [vmem:[#allocation161_spill] sm:$0xff] }
 0x564   : > { %v8871_v32 = vcombine.low %v21213_v19, %v21212_v51  ;;  %v19009_v9 = vrot.slane %v8615_v48, %v15424_v57  ;;  %v8287_v5 = vcombine.low %v18988_v10, %v18969_v31  ;;  %v19014_v56 = vrot.slane %v8496_v55, %v15424_v57  ;;  %v21216_v48 = vld [vmem:[#allocation156_spill] sm:$0xff] }
 0x565   : > { %9698 = vmax.xlane.f32.xlu1 %v18829_v45  ;;  %v8038_v47 = vcombine.high %v18839_v20, %v18853_v16  ;;  %v9769_v14 = vsel %vm487_vm1, %v8442_v29, -inf  ;;  %v8903_v19 = vcombine.low %v21217_v49, %v21216_v48  ;;  %v19026_v55 = vrot.slane %v8255_v62, %v15499_v43  ;;  %v21218_v45 = vld [vmem:[#allocation146_spill] sm:$0xff]  ;;  %v21221_v16 = vld [vmem:[#allocation173_spill] sm:$0xff]  ;;  %v19038_v63 = vpop.xlane.xlu0 %9503 }
 0x566   : > { %21214 = vst [vmem:[#allocation69_spill] sm:$0xff] %v19009_v9  ;;  %21215 = vst [vmem:[#allocation65_spill] sm:$0xff] %v19014_v56  ;;  %v8679_v8 = vcombine.low %v19009_v9, %v18985_v50  ;;  %9653 = vmax.xlane.f32.xlu0 %v9652_v61  ;;  %v9525_v51 = vpop.xlane.xlu1 %9524  ;;  %v19029_v4 = vsel %vm487_vm1, %v8443_v22, -inf  ;;  %v21220_v20 = vld [vmem:[#allocation194_spill] sm:$0xff]  ;;  %v19036_v38 = vrot.slane %v8480_v1, %v15424_v57 }
 0x567   : > { %v8751_v29 = vcombine.low %v21221_v16, %v21220_v20  ;;  %v19041_v61 = vrot.slane %v8527_v34, %v15499_v43  ;;  %v19044_v62 = vrot.slane %v8871_v32, %v15424_v57  ;;  %v8306_v22 = vcombine.high %v18894_v26, %v18880_v35  ;;  %v21223_v35 = vld [vmem:[#allocation154_spill] sm:$0xff] }
 0x568   : > { %21222 = vst [vmem:[#allocation75_spill] sm:$0xff] %v19036_v38  ;;  %v19049_v49 = vrot.slane %v8287_v5, %v15499_v43  ;;  %v19052_v54 = vrot.slane %v8647_v17, %v15499_v43  ;;  %v8559_v1 = vcombine.low %v19036_v38, %v19014_v56  ;;  %v10969_v16 = vrot.slane %v18623_v60, %v21085_v37  ;;  %v21224_v26 = vld [vmem:[#allocation150_spill] sm:$0xff]  ;;  %v21225_v60 = vld [vmem:[#allocation159_spill] sm:$0xff]  ;;  %v21230_v38 = vld [vmem:[#allocation184_spill] sm:$0xff] }
 0x569   : > { %v10973_v34 = vrot.slane %v18679_v52, %v21081_v33  ;;  %v9700_v32 = vsel %vm487_vm1, %v8038_v47, -inf  ;;  %9722 = vmax.xlane.f32.xlu1 %v18900_v6  ;;  %v19065_v20 = vrot.slane %v8903_v19, %v15424_v57  ;;  %v11292_v17 = vrot.slane %v9525_v51, %v21085_v37  ;;  %v21228_v47 = vld [vmem:[#allocation157_spill] sm:$0xff]  ;;  %v9528_v5 = vpop.xlane.xlu0 %9527 }
 0x56a   : > { %9701 = vmax.xlane.f32.xlu0 %v9700_v32  ;;  %v9573_v48 = vpop.xlane.xlu1 %9572  ;;  %v19069_v42 = vrot.slane %v8679_v8, %v15499_v43  ;;  %v8735_v2 = vcombine.low %v21228_v47, %v21227_v41  ;;  %v19076_v6 = vrot.slane %v8751_v29, %v15424_v57  ;;  %v8578_v19 = vcombine.high %v18931_v36, %v18909_v44  ;;  %v21229_v32 = vld [vmem:[#allocation16_spill] sm:$0xff]  ;;  %v21231_v47 = vld [vmem:[#allocation57_spill] sm:$0xff]  ;;  %v21233_v36 = vld [vmem:[#allocation55_spill] sm:$0xff] }
 0x56b   : > { %v8767_v51 = vcombine.low %v21230_v38, %v21229_v32  ;;  %v11296_v56 = vrot.slane %v9528_v5, %v21081_v33  ;;  %v9724_v8 = vsel %vm487_vm1, %v8306_v22, -inf  ;;  %v8307_v52 = vcombine.low %v19026_v55, %v19049_v49  ;;  %v21232_v41 = vld [vmem:[#allocation60_spill] sm:$0xff] }
 0x56c   : > { %v10974_v9 = vsel %vm9940_vm2, %v10973_v34, %v10969_v16  ;;  %v10978_v29 = vrot.slane %v21231_v47, %v21085_v37  ;;  %v10982_v50 = vrot.slane %v21232_v41, %v21081_v33  ;;  %v19092_v44 = vrot.slane %v8559_v1, %v15499_v43 }
 0x56d   : > { %9770 = vmax.xlane.f32.xlu1 %v9769_v14  ;;  %v10987_v5 = vrot.slane %v21233_v36, %v21085_v37  ;;  %v10991_v22 = vrot.slane %v18805_v39, %v21081_v33  ;;  %v11297_v38 = vsel %vm9940_vm2, %v11296_v56, %v11292_v17  ;;  %v11458_v16 = vrot.slane %v9573_v48, %v21085_v37  ;;  %v9576_v1 = vpop.xlane.xlu0 %9575  ;;  %v21235_v39 = vld [vmem:[#allocation4_spill] sm:$0xff] }
 0x56e   : > { %9725 = vmax.xlane.f32.xlu0 %v9724_v8  ;;  %v9459_v34 = vpop.xlane.xlu1 %9458  ;;  %v10996_v47 = vrot.slane %v18952_v7, %v21085_v37  ;;  %v11000_v41 = vrot.slane %v19000_v13, %v21081_v33  ;;  %v19106_v14 = vsel %vm10007_vm4, %v11297_v38, %v18928_v53  ;;  %v9772_v36 = vsel %vm487_vm1, %v8578_v19, -inf  ;;  %v21236_v17 = vld [vmem:[#allocation12_spill] sm:$0xff] }
 0x56f   : > { %21234 = vst [vmem:[#allocation11_spill] sm:$0xff] %v19106_v14  ;;  %v11013_v56 = vsel %vm10009_vm5, %v10974_v9, %v21235_v39  ;;  %v11135_v48 = vrot.slane %v21236_v17, %v21085_v37  ;;  %v21237_v8 = vld [vmem:[#allocation8_spill] sm:$0xff]  ;;  %v11462_v7 = vrot.slane %v9576_v1, %v21081_v33  ;;  %v10983_v13 = vsel %vm9940_vm2, %v10982_v50, %v10978_v29 }
 0x570   : > { %v11139_v32 = vrot.slane %v21237_v8, %v21081_v33  ;;  %v11144_v53 = vrot.slane %v21238_v25, %v21085_v37  ;;  %v21239_v38 = vld [vmem:[#allocation176_spill] sm:$0xff]  ;;  %v11153_v19 = vrot.slane %v18797_v40, %v21085_v37  ;;  %v10992_v9 = vsel %vm9940_vm2, %v10991_v22, %v10987_v5 }
 0x571   : > { %v11148_v14 = vrot.slane %v21239_v38, %v21081_v33  ;;  %9728 = vmax.xlane.f32.xlu1 %v18903_v12  ;;  %v11157_v39 = vrot.slane %v18833_v27, %v21081_v33  ;;  %v11463_v1 = vsel %vm9940_vm2, %v11462_v7, %v11458_v16  ;;  %v11005_v50 = vrot.slane %v9459_v34, %v21085_v37  ;;  %v9462_v5 = vpop.xlane.xlu0 %9461 }
 0x572   : > { %9773 = vmax.xlane.f32.xlu0 %v9772_v36  ;;  %v9507_v29 = vpop.xlane.xlu1 %9506  ;;  %v11001_v25 = vsel %vm9940_vm2, %v11000_v41, %v10996_v47  ;;  %v11162_v17 = vrot.slane %v18991_v30, %v21085_v37  ;;  %v11166_v40 = vrot.slane %v19038_v63, %v21081_v33  ;;  %v19136_v12 = vsel %vm10007_vm4, %v11463_v1, %v18998_v3 }
 0x573   : > { %21240 = vst [vmem:[#allocation179_spill] sm:$0xff] %v19136_v12  ;;  %v19139_v27 = vrot.slane %v8767_v51, %v15424_v57  ;;  %v11140_v22 = vsel %vm9940_vm2, %v11139_v32, %v11135_v48  ;;  %v11014_v16 = vsel %vm10011_vm6, %v10983_v13, %v11013_v56  ;;  %v11009_v34 = vrot.slane %v9462_v5, %v21081_v33 }
 0x574   : > { %v11149_v47 = vsel %vm9940_vm2, %v11148_v14, %v11144_v53  ;;  %v9730_v30 = vsel %vm487_vm1, %v8307_v52, -inf  ;;  %v11015_v63 = vsel %vm10013_vm7, %v10992_v9, %v11014_v16  ;;  %v8579_v3 = vcombine.low %v19041_v61, %v19092_v44  ;;  %v21241_v14 = vld [vmem:[#allocation7_spill] sm:$0xff]  ;;  %v21243_v9 = vld [vmem:[#allocation13_spill] sm:$0xff] }
 0x575   : > { %9776 = vmax.xlane.f32.xlu1 %v19029_v4  ;;  %v11158_v51 = vsel %vm9940_vm2, %v11157_v39, %v11153_v19  ;;  %v11171_v32 = vrot.slane %v9507_v29, %v21085_v37  ;;  %v11010_v41 = vsel %vm9940_vm2, %v11009_v34, %v11005_v50  ;;  %v11016_v36 = vsel %vm10015_vm8, %v11001_v25, %v11015_v63  ;;  %v9510_v8 = vpop.xlane.xlu0 %9509  ;;  %v21244_v39 = vld [vmem:[#allocation186_spill] sm:$0xff]  ;;  %v21251_v63 = vld [vmem:[#allocation160_spill] sm:$0xff] }
 0x576   : > { %9731 = vmax.xlane.f32.xlu0 %v9730_v30  ;;  %v19154_v56 = vpop.xlane.xlu1 %9530  ;;  %v19157_v52 = vrot.slane %v8735_v2, %v15424_v57  ;;  %v11179_v4 = vsel %vm10009_vm5, %v11140_v22, %v21241_v14  ;;  %v11167_v48 = vsel %vm9940_vm2, %v11166_v40, %v11162_v17  ;;  %v11017_v7 = vsel %vm10017_vm9, %v11010_v41, %v11016_v36  ;;  %v21250_v30 = vld [vmem:[#allocation164_spill] sm:$0xff] }
 0x577   : > { %v21242_v13 = vcombine.low %v21226_v21, %v21225_v60  ;;  %v8815_v38 = vcombine.low %v19076_v6, %v19139_v27  ;;  %v11180_v2 = vsel %vm10011_vm6, %v11149_v47, %v11179_v4  ;;  %v11175_v19 = vrot.slane %v9510_v8, %v21081_v33  ;;  %14483 = vmatpush3.msra.mxu0 %v11017_v7  ;;  %v21256_v8 = vld [vmem:[#allocation158_spill] sm:$0xff] }
 0x578   : > { %v9039_v1 = vcombine.low %v21244_v39, %v21243_v9  ;;  %v9778_v50 = vsel %vm487_vm1, %v8579_v3, -inf  ;;  %v11181_v29 = vsel %vm10013_vm7, %v11158_v51, %v11180_v2  ;;  %v8308_v25 = vcombine.high %v19026_v55, %v19049_v49  ;;  %v21249_v55 = vld [vmem:[#allocation63_spill] sm:$0xff]  ;;  %v21252_v51 = vld [vmem:[#allocation198_spill] sm:$0xff] }
 0x579   : > { %v19167_v53 = vrot.slane %v21242_v13, %v15424_v57  ;;  %9734 = vmax.xlane.f32.xlu1 %v18912_v28  ;;  %v21245_v17 = vmov 0.0   ;;  %v21246_v40 = vcombine.low %v21224_v26, %v21223_v35  ;;  %v11176_v22 = vsel %vm9940_vm2, %v11175_v19, %v11171_v32  ;;  %14485 = vmatmul.mubr.msk.f32.vlgmr.msra.gmra.mrb[54].mxu0 %vm487_vm1, %v21249_v55  ;;  %v21253_v32 = vld [vmem:[#allocation175_spill] sm:$0xff]  ;;  %v19203_v36 = vpop.xlane.xlu0 %9533 }
 0x57a   : > { %14492 = vmatprep.subr.mxu0 %v21245_v17  ;;  %9779 = vmax.xlane.f32.xlu0 %v9778_v50  ;;  %v11182_v16 = vsel %vm10015_vm8, %v11167_v48, %v11181_v29  ;;  %v19189_v34 = vpop.xlane.xlu1 %9578  ;;  %v21248_v28 = vcombine.high %v18863_v59, %v18920_v23  ;;  %v9007_v3 = vcombine.low %v21251_v63, %v21250_v30  ;;  %v21255_v48 = vld [vmem:[#allocation162_spill] sm:$0xff]  ;;  %v9736_v19 = vsel %vm487_vm1, %v8308_v25, -inf }
 0x57b   : > { %v19185_v5 = vrot.slane %v21246_v40, %v15424_v57  ;;  %21247 = vst [vmem:[#allocation72_spill] sm:$0xff] %v19189_v34  ;;  %v8783_v47 = vcombine.low %v19167_v53, %v19157_v52  ;;  %v9023_v41 = vcombine.low %v21253_v32, %v21252_v51  ;;  %v11183_v14 = vsel %vm10017_vm9, %v11176_v22, %v11182_v16 }
 0x57c   : > { %v9781_v49 = vsel %vm487_vm1, %v21248_v28, -inf  ;;  %14494 = vmatprep.mubr.msk.f32.mxu0 %vm14719_vm0, %v21245_v17  ;;  %v21254_v59 = vcombine.low %v21219_v24, %v21218_v45  ;;  %v8991_v7 = vcombine.low %v21256_v8, %v21255_v48  ;;  %14488 = vmatpush3.msra.mxu1 %v11183_v14  ;;  %v8711_v13 = vcombine.low %v19052_v54, %v19069_v42 }
 0x57d   : > { %v8951_v4 = vcombine.low %v19185_v5, %v19065_v20  ;;  %v19221_v2 = vrot.slane %v9039_v1, %v15424_v57  ;;  %9782 = vmax.xlane.f32.xlu1 %v9781_v49  ;;  %v8580_v50 = vcombine.high %v19041_v61, %v19092_v44  ;;  %v8823_v29 = vrot.slane %v8815_v38, %v15499_v43  ;;  %v19240_v61 = vpop.xlane.xlu0 %9581 }
 0x57e   : > { %v19212_v23 = vrot.slane %v21254_v59, %v15424_v57  ;;  %14497 = vmatprep.subr.mxu1 %v21245_v17  ;;  %9737 = vmax.xlane.f32.xlu0 %v9736_v19  ;;  %v19230_v22 = vpop.xlane.xlu1 %9536  ;;  %v19235_v1 = vrot.slane %v9007_v3, %v15424_v57  ;;  %v19238_v25 = vrot.slane %v9023_v41, %v15424_v57  ;;  %v9799_v38 = vsel %vm487_vm1, %v8711_v13, -inf  ;;  %v21258_v41 = vld [vmem:[#allocation15_spill] sm:$0xff]  ;;  %v21261_v13 = vld [vmem:[#allocation10_spill] sm:$0xff] }
 0x57f   : > { %14490 = vmatmul.mubr.msk.f32.vlgmr.msra.gmra.mrb[54].mxu1 %vm487_vm1, %v21249_v55  ;;  %21257 = vst [vmem:[#allocation68_spill] sm:$0xff] %v19240_v61  ;;  %v8791_v44 = vrot.slane %v8783_v47, %v15499_v43  ;;  %v8712_v16 = vcombine.high %v19052_v54, %v19069_v42  ;;  %v8959_v28 = vrot.slane %v8951_v4, %v15499_v43  ;;  %v9784_v3 = vsel %vm487_vm1, %v8580_v50, -inf  ;;  %v21273_v61 = vld [vmem:[#allocation67_spill] sm:$0xff] }
 0x580   : > { %v8919_v40 = vcombine.low %v19212_v23, %v19044_v62  ;;  %14499 = vmatprep.mubr.msk.f32.mxu1 %vm14719_vm0, %v21245_v17  ;;  %v19250_v49 = vrot.slane %v8991_v7, %v15424_v57  ;;  %v9087_v55 = vcombine.low %v19238_v25, %v19221_v2  ;;  %v8152_v14 = vcombine.high %v21258_v41, %v18780_v15  ;;  %v21260_v7 = vld [vmem:[#allocation9_spill] sm:$0xff] }
 0x581   : > { %9800 = vmax.xlane.f32.xlu1 %v9799_v38  ;;  %v8847_v47 = vcombine.low %v8791_v44, %v8823_v29  ;;  %v19262_v4 = vpop.xlane.xlu0 %9539  ;;  %v8120_v19 = vcombine.high %v21261_v13, %v21260_v7  ;;  %v8424_v50 = vcombine.high %v18866_v11, %v18856_v0  ;;  %v9805_v38 = vsel %vm487_vm1, %v8712_v16, -inf }
 0x582   : > { %9785 = vmax.xlane.f32.xlu0 %v9784_v3  ;;  %v19257_v59 = vpop.xlane.xlu1 %9584  ;;  %v8927_v54 = vrot.slane %v8919_v40, %v15499_v43  ;;  %v9055_v42 = vcombine.low %v19250_v49, %v19235_v1  ;;  %v8848_v3 = vcombine.high %v8791_v44, %v8823_v29  ;;  %v9095_v40 = vrot.slane %v9087_v55, %v15499_v43 }
 0x583   : > { %21259 = vst [vmem:[#allocation98_spill] sm:$0xff] %v19257_v59  ;;  %v9802_v15 = vsel %vm487_vm1, %v8847_v47, -inf  ;;  %v8392_v41 = vcombine.high %v18811_v18, %v18792_v46  ;;  %v8166_v7 = vrot.slane %v8152_v14, %v15499_v43  ;;  %v8134_v47 = vrot.slane %v8120_v19, %v15499_v43  ;;  %v21266_v19 = vld [vmem:[#allocation165_spill] sm:$0xff] }
 0x584   : > { %v8983_v17 = vcombine.low %v8927_v54, %v8959_v28  ;;  %v9063_v0 = vrot.slane %v9055_v42, %v15499_v43  ;;  %v8984_v16 = vcombine.high %v8927_v54, %v8959_v28  ;;  %v8438_v29 = vrot.slane %v8424_v50, %v15499_v43  ;;  %v21267_v50 = vld [vmem:[#allocation69_spill] sm:$0xff] }
 0x585   : > { %9806 = vmax.xlane.f32.xlu1 %v9805_v38  ;;  %v19276_v13 = vpop.xlane.xlu0 %9587  ;;  %v8288_v44 = vcombine.high %v18988_v10, %v18969_v31  ;;  %v9808_v46 = vsel %vm487_vm1, %v8848_v3, -inf  ;;  %v8173_v14 = vcombine.low %v8134_v47, %v8166_v7  ;;  %v8406_v42 = vrot.slane %v8392_v41, %v15499_v43  ;;  %v21269_v3 = vld [vmem:[#allocation75_spill] sm:$0xff] }
 0x586   : > { %9803 = vmax.xlane.f32.xlu0 %v9802_v15  ;;  %v19273_v12 = vpop.xlane.xlu1 %9542  ;;  %21262 = vst [vmem:[#allocation195_spill] sm:$0xff] %v19276_v13  ;;  %v9847_v11 = vsel %vm487_vm1, %v8983_v17, -inf  ;;  %v9119_v18 = vcombine.low %v9063_v0, %v9095_v40  ;;  %v21264_v17 = vld [vmem:[#allocation77_spill] sm:$0xff]  ;;  %v8680_v38 = vcombine.high %v21267_v50, %v21266_v19  ;;  %v9853_v31 = vsel %vm487_vm1, %v8984_v16, -inf  ;;  %v21270_v13 = vld [vmem:[#allocation71_spill] sm:$0xff] }
 0x587   : > { %v8256_v28 = vcombine.high %v21264_v17, %v18923_v58  ;;  %v8445_v10 = vcombine.low %v8406_v42, %v8438_v29  ;;  %v21268_v15 = vld [vmem:[#allocation65_spill] sm:$0xff]  ;;  %v19299_v41 = vrot.slane %v8288_v44, %v15499_v43  ;;  %v21271_v58 = vld [vmem:[#allocation188_spill] sm:$0xff]  ;;  %v9739_v19 = vsel %vm487_vm1, %v8173_v14, -inf }
 0x588   : > { %v8648_v17 = vcombine.high %v21271_v58, %v21270_v13  ;;  %v8174_v50 = vcombine.high %v8134_v47, %v8166_v7  ;;  %v21272_v16 = vld [vmem:[#allocation73_spill] sm:$0xff]  ;;  %v19319_v47 = vrot.slane %v8680_v38, %v15499_v43 }
 0x589   : > { %9848 = vmax.xlane.f32.xlu1 %v9847_v11  ;;  %v19290_v54 = vpop.xlane.xlu0 %9545  ;;  %v8560_v11 = vcombine.high %v21269_v3, %v21268_v15  ;;  %v8528_v34 = vcombine.high %v21273_v61, %v21272_v16  ;;  %v21275_v15 = vld [vmem:[#allocation82_spill] sm:$0xff]  ;;  %v21276_v44 = vld [vmem:[#allocation145_spill] sm:$0xff]  ;;  %v9787_v7 = vsel %vm487_vm1, %v8445_v10, -inf  ;;  %v8816_v61 = vcombine.high %v19076_v6, %v19139_v27 }
 0x58a   : > { %9809 = vmax.xlane.f32.xlu0 %v9808_v46  ;;  %v19285_v55 = vpop.xlane.xlu1 %9590  ;;  %21265 = vst [vmem:[#allocation19_spill] sm:$0xff] %v19290_v54  ;;  %v9850_v46 = vsel %vm487_vm1, %v9119_v18, -inf  ;;  %v21274_v54 = vld [vmem:[#allocation143_spill] sm:$0xff]  ;;  %v19336_v6 = vsel %vm487_vm1, %v8174_v50, -inf  ;;  %v21279_v50 = vld [vmem:[#allocation149_spill] sm:$0xff] }
 0x58b   : > { %21263 = vst [vmem:[#allocation170_spill] sm:$0xff] %v19285_v55  ;;  %v9120_v55 = vcombine.high %v9063_v0, %v9095_v40  ;;  %v8584_v3 = vcombine.high %v21275_v15, %v21274_v54  ;;  %v19311_v40 = vrot.slane %v8256_v28, %v15499_v43  ;;  %v8446_v0 = vcombine.high %v8406_v42, %v8438_v29 }
 0x58c   : > { %v19327_v42 = vrot.slane %v8560_v11, %v15499_v43  ;;  %v19333_v54 = vrot.slane %v8648_v17, %v15499_v43  ;;  %v19342_v10 = vrot.slane %v8528_v34, %v15499_v43  ;;  %v19360_v17 = vrot.slane %v8816_v61, %v15499_v43 }
 0x58d   : > { %9854 = vmax.xlane.f32.xlu1 %v9853_v31  ;;  %v19308_v18 = vpop.xlane.xlu0 %9593  ;;  %v21277_v31 = vld [vmem:[#allocation141_spill] sm:$0xff]  ;;  %v9856_v14 = vsel %vm487_vm1, %v9120_v55, -inf  ;;  %v8309_v29 = vcombine.low %v19311_v40, %v19299_v41  ;;  %v8598_v27 = vrot.slane %v8584_v3, %v15424_v57  ;;  %v8784_v55 = vcombine.high %v19167_v53, %v19157_v52 }
 0x58e   : > { %9851 = vmax.xlane.f32.xlu0 %v9850_v46  ;;  %v9609_v59 = vpop.xlane.xlu1 %9608  ;;  %v8600_v13 = vcombine.high %v21277_v31, %v21276_v44  ;;  %v8952_v46 = vcombine.high %v19185_v5, %v19065_v20  ;;  %v8920_v20 = vcombine.high %v19212_v23, %v19044_v62  ;;  %v19345_v62 = vsel %vm487_vm1, %v8446_v0, -inf  ;;  %v21280_v44 = vld [vmem:[#allocation148_spill] sm:$0xff] }
 0x58f   : > { %v11606_v5 = vrot.slane %v9609_v59, %v21085_v37  ;;  %v8713_v11 = vcombine.low %v19333_v54, %v19319_v47  ;;  %v9088_v52 = vcombine.high %v19238_v25, %v19221_v2  ;;  %v9742_v53 = vsel %vm487_vm1, %v8309_v29, -inf  ;;  %v21281_v31 = vld [vmem:[#allocation144_spill] sm:$0xff]  ;;  %v21283_v29 = vld [vmem:[#allocation147_spill] sm:$0xff] }
 0x590   : > { %v8614_v23 = vrot.slane %v8600_v13, %v15424_v57  ;;  %v19352_v58 = vrot.slane %v8952_v46, %v15499_v43  ;;  %v8581_v34 = vcombine.low %v19342_v10, %v19327_v42  ;;  %v19367_v2 = vrot.slane %v8920_v20, %v15499_v43 }
 0x591   : > { %9740 = vmax.xlane.f32.xlu1 %v9739_v19  ;;  %v9612_v38 = vpop.xlane.xlu0 %9611  ;;  %v21278_v19 = vld [vmem:[#allocation153_spill] sm:$0xff]  ;;  %v8856_v25 = vcombine.high %v21219_v24, %v21218_v45  ;;  %v8872_v13 = vcombine.high %v21281_v31, %v21280_v44  ;;  %v9056_v46 = vcombine.high %v19250_v49, %v19235_v1  ;;  %v19376_v61 = vrot.slane %v8784_v55, %v15499_v43  ;;  %v21285_v44 = vld [vmem:[#allocation152_spill] sm:$0xff] }
 0x592   : > { %9857 = vmax.xlane.f32.xlu0 %v9856_v14  ;;  %v9615_v28 = vpop.xlane.xlu1 %9614  ;;  %v11610_v59 = vrot.slane %v9612_v38, %v21081_v33  ;;  %v8632_v16 = vcombine.high %v21279_v50, %v21278_v19  ;;  %v21282_v14 = vld [vmem:[#allocation151_spill] sm:$0xff]  ;;  %v9811_v20 = vsel %vm487_vm1, %v8713_v11, -inf  ;;  %v8985_v24 = vcombine.low %v19367_v2, %v19352_v58 }
 0x593   : > { %v11615_v3 = vrot.slane %v9615_v28, %v21085_v37  ;;  %v8663_v45 = vcombine.low %v8598_v27, %v8614_v23  ;;  %v9790_v38 = vsel %vm487_vm1, %v8581_v34, -inf  ;;  %v8849_v1 = vcombine.low %v19376_v61, %v19360_v17  ;;  %v21284_v34 = vld [vmem:[#allocation156_spill] sm:$0xff] }
 0x594   : > { %v11611_v15 = vsel %vm9940_vm2, %v11610_v59, %v11606_v5  ;;  %v8616_v5 = vcombine.high %v21283_v29, %v21282_v14  ;;  %v19388_v49 = vrot.slane %v9088_v52, %v15499_v43  ;;  %v8664_v55 = vcombine.high %v8598_v27, %v8614_v23 }
 0x595   : > { %9788 = vmax.xlane.f32.xlu1 %v9787_v7  ;;  %v9618_v7 = vpop.xlane.xlu0 %9617  ;;  %v19391_v59 = vrot.slane %v8632_v16, %v15424_v57  ;;  %v19396_v50 = vrot.slane %v8872_v13, %v15424_v57  ;;  %v8904_v31 = vcombine.high %v21285_v44, %v21284_v34  ;;  %v19404_v27 = vrot.slane %v9056_v46, %v15499_v43 }
 0x596   : > { %9743 = vmax.xlane.f32.xlu0 %v9742_v53  ;;  %v9657_v0 = vpop.xlane.xlu1 %9656  ;;  %v11619_v28 = vrot.slane %v9618_v7, %v21081_v33  ;;  %v19407_v23 = vrot.slane %v8616_v5, %v15424_v57  ;;  %v8888_v16 = vcombine.high %v21224_v26, %v21223_v35  ;;  %v19414_v13 = vrot.slane %v8856_v25, %v15424_v57 }
 0x597   : > { %v11772_v11 = vrot.slane %v9657_v0, %v21085_v37  ;;  %v9859_v0 = vsel %vm487_vm1, %v8985_v24, -inf  ;;  %v9121_v46 = vcombine.low %v19404_v27, %v19388_v49  ;;  %v19420_v14 = vrot.slane %v8663_v45, %v15499_v43  ;;  %v21286_v24 = vld [vmem:[#allocation161_spill] sm:$0xff] }
 0x598   : > { %v11620_v53 = vsel %vm9940_vm2, %v11619_v28, %v11615_v3  ;;  %v8695_v29 = vcombine.low %v19407_v23, %v19391_v59  ;;  %v19429_v25 = vrot.slane %v8664_v55, %v15499_v43  ;;  %v8935_v28 = vcombine.low %v19414_v13, %v19396_v50  ;;  %v21287_v45 = vld [vmem:[#allocation157_spill] sm:$0xff] }
 0x599   : > { %9812 = vmax.xlane.f32.xlu1 %v9811_v20  ;;  %v19401_v7 = vsel %vm10005_vm3, %v11620_v53, %v11611_v15  ;;  %v9660_v52 = vpop.xlane.xlu0 %9659  ;;  %v9814_v15 = vsel %vm487_vm1, %v8849_v1, -inf  ;;  %v19434_v20 = vrot.slane %v8904_v31, %v15424_v57  ;;  %v21288_v1 = vld [vmem:[#allocation16_spill] sm:$0xff]  ;;  %v9008_v55 = vcombine.high %v21251_v63, %v21250_v30 }
 0x59a   : > { %9791 = vmax.xlane.f32.xlu0 %v9790_v38  ;;  %v9663_v19 = vpop.xlane.xlu1 %9662  ;;  %v11776_v3 = vrot.slane %v9660_v52, %v21081_v33  ;;  %v8736_v38 = vcombine.high %v21287_v45, %v21286_v24  ;;  %v21289_v53 = vld [vmem:[#allocation184_spill] sm:$0xff]  ;;  %v9040_v44 = vcombine.high %v21244_v39, %v21243_v9  ;;  %v8720_v31 = vcombine.high %v21226_v21, %v21225_v60 }
 0x59b   : > { %v11781_v26 = vrot.slane %v9663_v19, %v21085_v37  ;;  %v19441_v19 = vrot.slane %v8888_v16, %v15424_v57  ;;  %v9862_v24 = vsel %vm487_vm1, %v9121_v46, -inf  ;;  %v8310_v16 = vcombine.high %v19311_v40, %v19299_v41 }
 0x59c   : > { %v11777_v35 = vsel %vm9940_vm2, %v11776_v3, %v11772_v11  ;;  %v8768_v11 = vcombine.high %v21289_v53, %v21288_v1  ;;  %v21290_v3 = vld [vmem:[#allocation194_spill] sm:$0xff]  ;;  %v8992_v30 = vcombine.high %v21256_v8, %v21255_v48  ;;  %v9024_v9 = vcombine.high %v21253_v32, %v21252_v51 }
 0x59d   : > { %9860 = vmax.xlane.f32.xlu1 %v9859_v0  ;;  %v9666_v34 = vpop.xlane.xlu0 %9665  ;;  %v21291_v0 = vld [vmem:[#allocation173_spill] sm:$0xff]  ;;  %v19464_v60 = vrot.slane %v8695_v29, %v15499_v43  ;;  %v8967_v63 = vcombine.low %v19441_v19, %v19434_v20  ;;  %v19480_v32 = vrot.slane %v9008_v55, %v15424_v57  ;;  %v19483_v8 = vrot.slane %v9040_v44, %v15424_v57 }
 0x59e   : > { %9815 = vmax.xlane.f32.xlu0 %v9814_v15  ;;  %v19426_v5 = vpop.xlane.xlu1 %9548  ;;  %v11785_v52 = vrot.slane %v9666_v34, %v21081_v33  ;;  %v8752_v15 = vcombine.high %v21291_v0, %v21290_v3  ;;  %v19472_v41 = vrot.slane %v8768_v11, %v15424_v57  ;;  %v8714_v40 = vcombine.high %v19333_v54, %v19319_v47 }
 0x59f   : > { %v19488_v46 = vrot.slane %v8935_v28, %v15499_v43  ;;  %v19491_v29 = vrot.slane %v8720_v31, %v15424_v57  ;;  %v8582_v45 = vcombine.high %v19342_v10, %v19327_v42  ;;  %v19503_v47 = vrot.slane %v8992_v30, %v15424_v57 }
 0x5a0   : > { %v11786_v39 = vsel %vm9940_vm2, %v11785_v52, %v11781_v26  ;;  %v9748_v26 = vsel %vm487_vm1, %v8310_v16, -inf  ;;  %v19506_v54 = vrot.slane %v9024_v9, %v15424_v57  ;;  %v8715_v1 = vcombine.low %v19420_v14, %v19464_v60 }
 0x5a1   : > { %9746 = vmax.xlane.f32.xlu1 %v19336_v6  ;;  %v19469_v6 = vrot.slane %v8736_v38, %v15424_v57  ;;  %v19475_v48 = vsel %vm10005_vm3, %v11786_v39, %v11777_v35  ;;  %v19477_v51 = vpop.xlane.xlu0 %9551  ;;  %v19494_v35 = vrot.slane %v8752_v15, %v15424_v57  ;;  %v8696_v38 = vcombine.high %v19407_v23, %v19391_v59 }
 0x5a2   : > { %9863 = vmax.xlane.f32.xlu0 %v9862_v24  ;;  %v19461_v21 = vpop.xlane.xlu1 %9596  ;;  %v8986_v59 = vcombine.high %v19367_v2, %v19352_v58  ;;  %v19519_v23 = vrot.slane %v8967_v63, %v15499_v43  ;;  %v9071_v57 = vcombine.low %v19503_v47, %v19480_v32  ;;  %v9103_v53 = vcombine.low %v19506_v54, %v19483_v8 }
 0x5a3   : > { %v8831_v42 = vcombine.low %v19494_v35, %v19472_v41  ;;  %v9817_v11 = vsel %vm487_vm1, %v8714_v40, -inf  ;;  %v8850_v34 = vcombine.high %v19376_v61, %v19360_v17  ;;  %v11301_v55 = vrot.slane %v19154_v56, %v21085_v37 }
 0x5a4   : > { %v11305_v58 = vrot.slane %v19203_v36, %v21081_v33  ;;  %v9796_v2 = vsel %vm487_vm1, %v8582_v45, -inf  ;;  %v9122_v44 = vcombine.high %v19404_v27, %v19388_v49  ;;  %v9823_v3 = vsel %vm487_vm1, %v8715_v1, -inf  ;;  %v21292_v45 = vld [vmem:[#allocation19_spill] sm:$0xff] }
 0x5a5   : > { %9794 = vmax.xlane.f32.xlu1 %v19345_v62  ;;  %v8799_v62 = vcombine.low %v19491_v29, %v19469_v6  ;;  %v19514_v10 = vpop.xlane.xlu0 %9599  ;;  %v8716_v17 = vcombine.high %v19420_v14, %v19464_v60  ;;  %v19540_v56 = vrot.slane %v8696_v38, %v15499_v43  ;;  %v9865_v36 = vsel %vm487_vm1, %v8986_v59, -inf }
 0x5a6   : > { %9749 = vmax.xlane.f32.xlu0 %v9748_v26  ;;  %v9621_v28 = vpop.xlane.xlu1 %9620  ;;  %v19547_v49 = vrot.slane %v8831_v42, %v15499_v43  ;;  %v8987_v27 = vcombine.low %v19488_v46, %v19519_v23  ;;  %v9820_v24 = vsel %vm487_vm1, %v8850_v34, -inf  ;;  %v19554_v16 = vrot.slane %v9071_v57, %v15499_v43  ;;  %v21293_v57 = vld [vmem:[#allocation11_spill] sm:$0xff] }
 0x5a7   : > { %v11624_v52 = vrot.slane %v9621_v28, %v21085_v37  ;;  %v19544_v0 = vrot.slane %v8799_v62, %v15499_v43  ;;  %v19557_v30 = vrot.slane %v9103_v53, %v15499_v43  ;;  %v11306_v9 = vsel %vm9940_vm2, %v11305_v58, %v11301_v55  ;;  %v21295_v55 = vld [vmem:[#allocation68_spill] sm:$0xff] }
 0x5a8   : > { %v11310_v39 = vrot.slane %v19230_v22, %v21085_v37  ;;  %v11314_v63 = vrot.slane %v19262_v4, %v21081_v33  ;;  %v9868_v40 = vsel %vm487_vm1, %v9122_v44, -inf  ;;  %v11319_v26 = vrot.slane %v19273_v12, %v21085_v37  ;;  %v21297_v44 = vld [vmem:[#allocation195_spill] sm:$0xff] }
 0x5a9   : > { %9818 = vmax.xlane.f32.xlu1 %v9817_v11  ;;  %v9624_v61 = vpop.xlane.xlu0 %9623  ;;  %v11323_v38 = vrot.slane %v21292_v45, %v21081_v33  ;;  %v11328_v22 = vrot.slane %v19426_v5, %v21085_v37  ;;  %v11332_v4 = vrot.slane %v19477_v51, %v21081_v33  ;;  %v8851_v59 = vcombine.low %v19544_v0, %v19547_v49  ;;  %v21294_v11 = vld [vmem:[#allocation72_spill] sm:$0xff] }
 0x5aa   : > { %9797 = vmax.xlane.f32.xlu0 %v9796_v2  ;;  %v9669_v31 = vpop.xlane.xlu1 %9668  ;;  %v11628_v15 = vrot.slane %v9624_v61, %v21081_v33  ;;  %v11345_v53 = vsel %vm10009_vm5, %v11306_v9, %v21293_v57  ;;  %v11467_v34 = vrot.slane %v21294_v11, %v21085_v37  ;;  %v11471_v5 = vrot.slane %v21295_v55, %v21081_v33 }
 0x5ab   : > { %v11790_v1 = vrot.slane %v9669_v31, %v21085_v37  ;;  %v11315_v51 = vsel %vm9940_vm2, %v11314_v63, %v11310_v39  ;;  %v21298_v31 = vld [vmem:[#allocation170_spill] sm:$0xff]  ;;  %v11333_v63 = vsel %vm9940_vm2, %v11332_v4, %v11328_v22  ;;  %v11494_v45 = vrot.slane %v19461_v21, %v21085_v37 }
 0x5ac   : > { %v11629_v28 = vsel %vm9940_vm2, %v11628_v15, %v11624_v52  ;;  %v11480_v52 = vrot.slane %v21297_v44, %v21081_v33  ;;  %v11485_v61 = vrot.slane %v21298_v31, %v21085_v37  ;;  %v11489_v15 = vrot.slane %v19308_v18, %v21081_v33 }
 0x5ad   : > { %9866 = vmax.xlane.f32.xlu1 %v9865_v36  ;;  %v19577_v42 = vsel %vm10007_vm4, %v11629_v28, %v19401_v7  ;;  %v9672_v12 = vpop.xlane.xlu0 %9671  ;;  %v21296_v7 = vld [vmem:[#allocation98_spill] sm:$0xff]  ;;  %v11324_v36 = vsel %vm9940_vm2, %v11323_v38, %v11319_v26  ;;  %v11498_v28 = vrot.slane %v19514_v10, %v21081_v33  ;;  %v11472_v18 = vsel %vm9940_vm2, %v11471_v5, %v11467_v34 }
 0x5ae   : > { %9821 = vmax.xlane.f32.xlu0 %v9820_v24  ;;  %v9555_v62 = vpop.xlane.xlu1 %9554  ;;  %v11794_v58 = vrot.slane %v9672_v12, %v21081_v33  ;;  %v11476_v2 = vrot.slane %v21296_v7, %v21085_v37  ;;  %v9826_v21 = vsel %vm487_vm1, %v8851_v59, -inf  ;;  %v11490_v10 = vsel %vm9940_vm2, %v11489_v15, %v11485_v61 }
 0x5af   : > { %v11337_v9 = vrot.slane %v9555_v62, %v21085_v37  ;;  %v8968_v59 = vcombine.high %v19441_v19, %v19434_v20  ;;  %v11499_v34 = vsel %vm9940_vm2, %v11498_v28, %v11494_v45  ;;  %v9829_v7 = vsel %vm487_vm1, %v8716_v17, -inf }
 0x5b0   : > { %v11795_v24 = vsel %vm9940_vm2, %v11794_v58, %v11790_v1  ;;  %v9871_v1 = vsel %vm487_vm1, %v8987_v27, -inf  ;;  %v11481_v62 = vsel %vm9940_vm2, %v11480_v52, %v11476_v2  ;;  %v8988_v20 = vcombine.high %v19488_v46, %v19519_v23 }
 0x5b1   : > { %9824 = vmax.xlane.f32.xlu1 %v9823_v3  ;;  %v19607_v3 = vsel %vm10007_vm4, %v11795_v24, %v19475_v48  ;;  %v9558_v26 = vpop.xlane.xlu0 %9557  ;;  %v9123_v48 = vcombine.low %v19554_v16, %v19557_v30  ;;  %v8832_v19 = vcombine.high %v19494_v35, %v19472_v41  ;;  %v8852_v52 = vcombine.high %v19544_v0, %v19547_v49  ;;  %v19654_v41 = vld [vmem:[%s20309_s7] sm:$0xff] }
 0x5b2   : > { %9869 = vmax.xlane.f32.xlu0 %v9868_v40  ;;  %v9603_v39 = vpop.xlane.xlu1 %9602  ;;  %v11346_v40 = vsel %vm10011_vm6, %v11315_v51, %v11345_v53  ;;  %v11341_v38 = vrot.slane %v9558_v26, %v21081_v33  ;;  %v21299_v53 = vld [vmem:[#allocation179_spill] sm:$0xff]  ;;  %v21300_v31 = vmov 0.0   ;;  %v8936_v14 = vcombine.high %v19414_v13, %v19396_v50 }
 0x5b3   : > { %v11347_v22 = vsel %vm10013_vm7, %v11324_v36, %v11346_v40  ;;  %v11503_v12 = vrot.slane %v9603_v39, %v21085_v37  ;;  %v11511_v11 = vsel %vm10009_vm5, %v11472_v18, %v21299_v53  ;;  %v9874_v2 = vsel %vm487_vm1, %v9123_v48, -inf }
 0x5b4   : > { %v11342_v4 = vsel %vm9940_vm2, %v11341_v38, %v11337_v9  ;;  %v11348_v57 = vsel %vm10015_vm8, %v11333_v63, %v11347_v22  ;;  %v11512_v58 = vsel %vm10011_vm6, %v11481_v62, %v11511_v11  ;;  %v8800_v35 = vcombine.high %v19491_v29, %v19469_v6 }
 0x5b5   : > { %9872 = vmax.xlane.f32.xlu1 %v9871_v1  ;;  %v9606_v55 = vpop.xlane.xlu0 %9605  ;;  %v11349_v5 = vsel %vm10017_vm9, %v11342_v4, %v11348_v57  ;;  %v11513_v44 = vsel %vm10013_vm7, %v11490_v10, %v11512_v58  ;;  %v9877_v13 = vsel %vm487_vm1, %v8988_v20, -inf  ;;  %v8717_v0 = vcombine.low %v19429_v25, %v19540_v56 }
 0x5b6   : > { %9827 = vmax.xlane.f32.xlu0 %v9826_v21  ;;  %v19622_v27 = vpop.xlane.xlu1 %9626  ;;  %v11507_v51 = vrot.slane %v9606_v55, %v21081_v33  ;;  %14493 = vmatpush3.msra.mxu0 %v11349_v5  ;;  %v11514_v46 = vsel %vm10015_vm8, %v11499_v34, %v11513_v44  ;;  %v8982_v49 = vrot.slane %v8968_v59, %v15499_v43  ;;  %v9832_v6 = vsel %vm487_vm1, %v8852_v52, -inf }
 0x5b7   : > { %14502 = vmatprep.subr.mxu0 %v21300_v31  ;;  %14495 = vmatmul.mubr.msk.f32.vlgmr.msra.gmra.mrb[56].mxu0 %vm487_vm1, %v19654_v41  ;;  %v9104_v61 = vcombine.high %v19506_v54, %v19483_v8  ;;  %v9124_v29 = vcombine.high %v19554_v16, %v19557_v30  ;;  %v8846_v36 = vrot.slane %v8832_v19, %v15499_v43  ;;  %v9835_v16 = vsel %vm487_vm1, %v8717_v0, -inf }
 0x5b8   : > { %v11508_v60 = vsel %vm9940_vm2, %v11507_v51, %v11503_v12  ;;  %14504 = vmatprep.mubr.msk.f32.mxu0 %vm14719_vm0, %v21300_v31  ;;  %v8950_v24 = vrot.slane %v8936_v14, %v15499_v43  ;;  %v9072_v8 = vcombine.high %v19503_v47, %v19480_v32  ;;  %v8814_v9 = vrot.slane %v8800_v35, %v15499_v43 }
 0x5b9   : > { %9830 = vmax.xlane.f32.xlu1 %v9829_v7  ;;  %v19660_v17 = vpop.xlane.xlu0 %9629  ;;  %v11515_v50 = vsel %vm10017_vm9, %v11508_v60, %v11514_v46  ;;  %v9880_v39 = vsel %vm487_vm1, %v9124_v29, -inf  ;;  %v9118_v45 = vrot.slane %v9104_v61, %v15499_v43  ;;  %v8718_v18 = vcombine.high %v19429_v25, %v19540_v56 }
 0x5ba   : > { %9875 = vmax.xlane.f32.xlu0 %v9874_v2  ;;  %v19649_v23 = vpop.xlane.xlu1 %9674  ;;  %14498 = vmatpush3.msra.mxu1 %v11515_v50  ;;  %v8989_v30 = vcombine.low %v8950_v24, %v8982_v49  ;;  %v8853_v63 = vcombine.low %v8814_v9, %v8846_v36  ;;  %v9086_v47 = vrot.slane %v9072_v8, %v15499_v43 }
 0x5bb   : > { %14507 = vmatprep.subr.mxu1 %v21300_v31  ;;  %14500 = vmatmul.mubr.msk.f32.vlgmr.msra.gmra.mrb[56].mxu1 %vm487_vm1, %v19654_v41  ;;  %v9841_v21 = vsel %vm487_vm1, %v8718_v18, -inf  ;;  %v8990_v22 = vcombine.high %v8950_v24, %v8982_v49  ;;  %v8854_v43 = vcombine.high %v8814_v9, %v8846_v36  ;;  %v11633_v9 = vrot.slane %v19622_v27, %v21085_v37 }
 0x5bc   : > { %14509 = vmatprep.mubr.msk.f32.mxu1 %vm14719_vm0, %v21300_v31  ;;  %v9883_v26 = vsel %vm487_vm1, %v8989_v30, -inf  ;;  %v9838_v40 = vsel %vm487_vm1, %v8853_v63, -inf  ;;  %v9125_v38 = vcombine.low %v9086_v47, %v9118_v45  ;;  %v9126_v12 = vcombine.high %v9086_v47, %v9118_v45 }
 0x5bd   : > { %9878 = vmax.xlane.f32.xlu1 %v9877_v13  ;;  %v19683_v54 = vpop.xlane.xlu0 %9677  ;;  %v9889_v56 = vsel %vm487_vm1, %v8990_v22, -inf  ;;  %v9844_v4 = vsel %vm487_vm1, %v8854_v43, -inf }
 0x5be   : > { %9833 = vmax.xlane.f32.xlu0 %v9832_v6  ;;  %v19676_v15 = vpop.xlane.xlu1 %9632  ;;  %v9886_v48 = vsel %vm487_vm1, %v9125_v38, -inf  ;;  %v9892_v53 = vsel %vm487_vm1, %v9126_v12, -inf }
 0x5c1   : > { %9836 = vmax.xlane.f32.xlu1 %v9835_v16  ;;  %v19693_v32 = vpop.xlane.xlu0 %9635  ;;  %v11637_v16 = vrot.slane %v19660_v17, %v21081_v33 }
 0x5c2   : > { %9881 = vmax.xlane.f32.xlu0 %v9880_v39  ;;  %v19691_v28 = vpop.xlane.xlu1 %9680  ;;  %v11646_v18 = vrot.slane %v19693_v32, %v21081_v33 }
 0x5c3   : > { %v11638_v47 = vsel %vm9940_vm2, %v11637_v16, %v11633_v9  ;;  %v11808_v12 = vrot.slane %v19691_v28, %v21085_v37 }
 0x5c4   : > { %v11677_v32 = vsel %vm10009_vm5, %v11638_v47, %v19577_v42 }
 0x5c5   : > { %9884 = vmax.xlane.f32.xlu1 %v9883_v26  ;;  %v19702_v62 = vpop.xlane.xlu0 %9683  ;;  %v11642_v26 = vrot.slane %v19676_v15, %v21085_v37 }
 0x5c6   : > { %9839 = vmax.xlane.f32.xlu0 %v9838_v40  ;;  %v19700_v1 = vpop.xlane.xlu1 %9638 }
 0x5c7   : > { %v11651_v27 = vrot.slane %v19700_v1, %v21085_v37  ;;  %v11799_v1 = vrot.slane %v19649_v23, %v21085_v37 }
 0x5c9   : > { %9842 = vmax.xlane.f32.xlu1 %v9841_v21 }
 0x5ca   : > { %9887 = vmax.xlane.f32.xlu0 %v9886_v48  ;;  %v19706_v10 = vpop.xlane.xlu1 %9686  ;;  %v19708_v25 = vpop.xlane.xlu0 %9641 }
 0x5cb   : > { %v11655_v17 = vrot.slane %v19708_v25, %v21081_v33  ;;  %v11803_v25 = vrot.slane %v19683_v54, %v21081_v33 }
 0x5cd   : > { %9890 = vmax.xlane.f32.xlu1 %v9889_v56  ;;  %v11656_v42 = vsel %vm9940_vm2, %v11655_v17, %v11651_v27 }
 0x5ce   : > { %9845 = vmax.xlane.f32.xlu0 %v9844_v4  ;;  %v9705_v57 = vpop.xlane.xlu1 %9704  ;;  %v11647_v4 = vsel %vm9940_vm2, %v11646_v18, %v11642_v26 }
 0x5cf   : > { %v19712_v59 = vpop.xlane.xlu0 %9689  ;;  %v11938_v11 = vrot.slane %v9705_v57, %v21085_v37  ;;  %v11812_v57 = vrot.slane %v19702_v62, %v21081_v33 }
 0x5d0   : > { %v11821_v23 = vrot.slane %v19712_v59, %v21081_v33 }
 0x5d2   : > { %9893 = vmax.xlane.f32.xlu0 %v9892_v53  ;;  %v9711_v34 = vpop.xlane.xlu1 %9710  ;;  %v11817_v53 = vrot.slane %v19706_v10, %v21085_v37 }
 0x5d3   : > { %v9708_v55 = vpop.xlane.xlu0 %9707  ;;  %v11947_v51 = vrot.slane %v9711_v34, %v21085_v37 }
 0x5d4   : > { %v11942_v5 = vrot.slane %v9708_v55, %v21081_v33 }
 0x5d6   : > { %v11943_v58 = vsel %vm9940_vm2, %v11942_v5, %v11938_v11  ;;  %v9753_v7 = vpop.xlane.xlu1 %9752 }
 0x5d7   : > { %v9714_v20 = vpop.xlane.xlu0 %9713  ;;  %v12104_v44 = vrot.slane %v9753_v7, %v21085_v37  ;;  %v11813_v7 = vsel %vm9940_vm2, %v11812_v57, %v11808_v12 }
 0x5d8   : > { %v11951_v19 = vrot.slane %v9714_v20, %v21081_v33 }
 0x5da   : > { %v11952_v2 = vsel %vm9940_vm2, %v11951_v19, %v11947_v51  ;;  %v9759_v52 = vpop.xlane.xlu1 %9758  ;;  %v11678_v51 = vsel %vm10011_vm6, %v11647_v4, %v11677_v32  ;;  %v11822_v19 = vsel %vm9940_vm2, %v11821_v23, %v11817_v53 }
 0x5db   : > { %v12007_v14 = vsel %vm10005_vm3, %v11952_v2, %v11943_v58  ;;  %v9756_v60 = vpop.xlane.xlu0 %9755  ;;  %v12113_v50 = vrot.slane %v9759_v52, %v21085_v37  ;;  %v11804_v58 = vsel %vm9940_vm2, %v11803_v25, %v11799_v1  ;;  %v11679_v20 = vsel %vm10013_vm7, %v11656_v42, %v11678_v51 }
 0x5dc   : > { %v12108_v46 = vrot.slane %v9756_v60, %v21081_v33  ;;  %v11843_v60 = vsel %vm10009_vm5, %v11804_v58, %v19607_v3 }
 0x5de   : > { %v12109_v35 = vsel %vm9940_vm2, %v12108_v46, %v12104_v44  ;;  %v9645_v13 = vpop.xlane.xlu1 %9644 }
 0x5df   : > { %v9762_v0 = vpop.xlane.xlu0 %9761  ;;  %v11660_v22 = vrot.slane %v9645_v13, %v21085_v37  ;;  %v11844_v13 = vsel %vm10011_vm6, %v11813_v7, %v11843_v60 }
 0x5e0   : > { %v12117_v49 = vrot.slane %v9762_v0, %v21081_v33 }
 0x5e2   : > { %v12118_v61 = vsel %vm9940_vm2, %v12117_v49, %v12113_v50  ;;  %v9693_v6 = vpop.xlane.xlu1 %9692  ;;  %v11845_v49 = vsel %vm10013_vm7, %v11822_v19, %v11844_v13 }
 0x5e3   : > { %v12173_v29 = vsel %vm10005_vm3, %v12118_v61, %v12109_v35  ;;  %v9648_v36 = vpop.xlane.xlu0 %9647  ;;  %v11826_v28 = vrot.slane %v9693_v6, %v21085_v37 }
 0x5e4   : > { %v11664_v48 = vrot.slane %v9648_v36, %v21081_v33 }
 0x5e6   : > { %v9717_v24 = vpop.xlane.xlu1 %9716  ;;  %v11665_v55 = vsel %vm9940_vm2, %v11664_v48, %v11660_v22 }
 0x5e7   : > { %v9696_v8 = vpop.xlane.xlu0 %9695  ;;  %v11956_v30 = vrot.slane %v9717_v24, %v21085_v37  ;;  %v11680_v52 = vsel %vm10015_vm8, %v11665_v55, %v11679_v20 }
 0x5e8   : > { %v11830_v5 = vrot.slane %v9696_v8, %v21081_v33 }
 0x5ea   : > { %v9765_v39 = vpop.xlane.xlu1 %9764  ;;  %v11831_v46 = vsel %vm9940_vm2, %v11830_v5, %v11826_v28 }
 0x5eb   : > { %v9720_v63 = vpop.xlane.xlu0 %9719  ;;  %v12122_v38 = vrot.slane %v9765_v39, %v21085_v37  ;;  %v11846_v3 = vsel %vm10015_vm8, %v11831_v46, %v11845_v49  ;;  %v19816_v39 = vpop.f32.mrb[48].mxu0 }
 0x5ec   : > { %v11960_v45 = vrot.slane %v9720_v63, %v21081_v33  ;;  %v19818_v63 = vpop.f32.mrb[48].mxu1  ;;  %v14456_v47 = vpop.f32.mrb[49].mxu0 }
 0x5ed   : > { %v14461_v18 = vpop.f32.mrb[49].mxu1  ;;  %v19820_v27 = vpop.f32.mrb[50].mxu0 }
 0x5ee   : > { %v11961_v40 = vsel %vm9940_vm2, %v11960_v45, %v11956_v30  ;;  %v9651_v21 = vpop.xlane.xlu1 %9650  ;;  %v13706_v30 = vld [vmem:[%s20310_s8] sm:$0xff]  ;;  %v19822_v17 = vpop.f32.mrb[50].mxu1 }
 0x5ef   : > { %v19749_v15 = vsel %vm10007_vm4, %v11961_v40, %v12007_v14  ;;  %v9768_v43 = vpop.xlane.xlu0 %9767  ;;  %v11669_v11 = vrot.slane %v9651_v21, %v21085_v37  ;;  %13709 = vperm.xlu1 %14643, %v13706_v30   ;;  %v14466_v40 = vpop.f32.mrb[51].mxu0 }
 0x5f0   : > { %v12126_v56 = vrot.slane %v9768_v43, %v21081_v33 }
 0x5f2   : > { %v12127_v54 = vsel %vm9940_vm2, %v12126_v56, %v12122_v38  ;;  %v9699_v34 = vpop.xlane.xlu1 %9698  ;;  %v14471_v38 = vpop.f32.mrb[51].mxu1 }
 0x5f3   : > { %v19774_v62 = vsel %vm10007_vm4, %v12127_v54, %v12173_v29  ;;  %v9654_v10 = vpop.xlane.xlu0 %9653  ;;  %v11835_v44 = vrot.slane %v9699_v34, %v21085_v37 }
 0x5f4   : > { %v11673_v59 = vrot.slane %v9654_v10, %v21081_v33 }
 0x5f6   : > { %v11674_v2 = vsel %vm9940_vm2, %v11673_v59, %v11669_v11  ;;  %v19785_v14 = vpop.xlane.xlu1 %9722 }
 0x5f7   : > { %v9702_v35 = vpop.xlane.xlu0 %9701  ;;  %v11681_v50 = vsel %vm10017_vm9, %v11674_v2, %v11680_v52  ;;  %v11965_v20 = vrot.slane %v19785_v14, %v21085_v37 }
 0x5f8   : > { %v11839_v0 = vrot.slane %v9702_v35, %v21081_v33  ;;  %14503 = vmatpush3.msra.mxu0 %v11681_v50 }
 0x5f9   : > { %14512 = vmatprep.subr.mxu0 %v21300_v31  ;;  %14505 = vmatmul.mubr.msk.f32.vlgmr.msra.gmra.mrb[58].mxu0 %vm487_vm1, %v19654_v41 }
 0x5fa   : > { %v11840_v61 = vsel %vm9940_vm2, %v11839_v0, %v11835_v44  ;;  %v19799_v6 = vpop.xlane.xlu1 %9770  ;;  %14514 = vmatprep.mubr.msk.f32.mxu0 %vm14719_vm0, %v21300_v31 }
 0x5fb   : > { %v9726_v29 = vpop.xlane.xlu0 %9725  ;;  %v11847_v36 = vsel %vm10017_vm9, %v11840_v61, %v11846_v3  ;;  %v12131_v14 = vrot.slane %v19799_v6, %v21085_v37 }
 0x5fc   : > { %14508 = vmatpush3.msra.mxu1 %v11847_v36  ;;  %v11969_v19 = vrot.slane %v9726_v29, %v21081_v33 }
 0x5fd   : > { %14517 = vmatprep.subr.mxu1 %v21300_v31  ;;  %14510 = vmatmul.mubr.msk.f32.vlgmr.msra.gmra.mrb[58].mxu1 %vm487_vm1, %v19654_v41 }
 0x5fe   : > { %v9729_v24 = vpop.xlane.xlu1 %9728  ;;  %14519 = vmatprep.mubr.msk.f32.mxu1 %vm14719_vm0, %v21300_v31  ;;  %v11970_v0 = vsel %vm9940_vm2, %v11969_v19, %v11965_v20 }
 0x5ff   : > { %v19809_v8 = vpop.xlane.xlu0 %9773  ;;  %v11974_v2 = vrot.slane %v9729_v24, %v21085_v37  ;;  %v12009_v6 = vsel %vm10009_vm5, %v11970_v0, %v19749_v15 }
 0x600   : > { %v12135_v49 = vrot.slane %v19809_v8, %v21081_v33 }
 0x602   : > { %v19811_v9 = vpop.xlane.xlu1 %9776 }
 0x603   : > { %v9732_v16 = vpop.xlane.xlu0 %9731  ;;  %v12140_v3 = vrot.slane %v19811_v9, %v21085_v37 }
 0x604   : > { %v11978_v44 = vrot.slane %v9732_v16, %v21081_v33 }
 0x606   : > { %v9735_v45 = vpop.xlane.xlu1 %9734  ;;  %v11979_v61 = vsel %vm9940_vm2, %v11978_v44, %v11974_v2 }
 0x607   : > { %v9780_v26 = vpop.xlane.xlu0 %9779  ;;  %v11983_v52 = vrot.slane %v9735_v45, %v21085_v37  ;;  %v12010_v40 = vsel %vm10011_vm6, %v11979_v61, %v12009_v6 }
 0x608   : > { %v12144_v29 = vrot.slane %v9780_v26, %v21081_v33  ;;  %v12136_v26 = vsel %vm9940_vm2, %v12135_v49, %v12131_v14 }
 0x60a   : > { %v9783_v21 = vpop.xlane.xlu1 %9782 }
 0x60b   : > { %v9738_v22 = vpop.xlane.xlu0 %9737  ;;  %v12149_v24 = vrot.slane %v9783_v21, %v21085_v37  ;;  %v12145_v21 = vsel %vm9940_vm2, %v12144_v29, %v12140_v3 }
 0x60c   : > { %v11987_v60 = vrot.slane %v9738_v22, %v21081_v33 }
 0x60d   : > { %v19824_v48 = vpop.f32.mrb[52].mxu0 }
 0x60e   : > { %v9801_v43 = vpop.xlane.xlu1 %9800  ;;  %v14476_v32 = vpop.f32.mrb[53].mxu0  ;;  %v11988_v36 = vsel %vm9940_vm2, %v11987_v60, %v11983_v52 }
 0x60f   : > { %v9786_v1 = vpop.xlane.xlu0 %9785  ;;  %v12270_v56 = vrot.slane %v9801_v43, %v21085_v37  ;;  %v12011_v22 = vsel %vm10013_vm7, %v11988_v36, %v12010_v40 }
 0x610   : > { %v12153_v16 = vrot.slane %v9786_v1, %v21081_v33 }
 0x611   : > { %v19826_v25 = vpop.f32.mrb[52].mxu1 }
 0x612   : > { %v19829_v4 = vpop.xlane.xlu1 %9806  ;;  %v14481_v12 = vpop.f32.mrb[53].mxu1  ;;  %v12154_v43 = vsel %vm9940_vm2, %v12153_v16, %v12149_v24 }
 0x613   : > { %v9804_v57 = vpop.xlane.xlu0 %9803  ;;  %v12175_v12 = vsel %vm10009_vm5, %v12136_v26, %v19774_v62  ;;  %v12279_v36 = vrot.slane %v19829_v4, %v21085_v37 }
 0x614   : > { %v12274_v53 = vrot.slane %v9804_v57, %v21081_v33 }
 0x616   : > { %v19833_v42 = vsel %vm9940_vm2, %v12274_v53, %v12270_v56  ;;  %v19835_v23 = vpop.xlane.xlu1 %9848 }
 0x617   : > { %v19837_v54 = vpop.xlane.xlu0 %9809 }
 0x618   : > { %v12283_v24 = vrot.slane %v19837_v54, %v21081_v33 }
 0x61a   : > { %v19839_v11 = vpop.xlane.xlu1 %9854 }
 0x61b   : > { %v19841_v34 = vpop.xlane.xlu0 %9851  ;;  %v12445_v54 = vrot.slane %v19839_v11, %v21085_v37 }
 0x61c   : > { %v12440_v4 = vrot.slane %v19841_v34, %v21081_v33 }
 0x61e   : > { %v9741_v55 = vpop.xlane.xlu1 %9740 }
 0x61f   : > { %v19843_v28 = vpop.xlane.xlu0 %9857  ;;  %v11992_v35 = vrot.slane %v9741_v55, %v21085_v37 }
 0x622   : > { %v9789_v5 = vpop.xlane.xlu1 %9788 }
 0x623   : > { %v9744_v10 = vpop.xlane.xlu0 %9743  ;;  %v12158_v47 = vrot.slane %v9789_v5, %v21085_v37  ;;  %v12176_v5 = vsel %vm10011_vm6, %v12145_v21, %v12175_v12 }
 0x624   : > { %v11996_v50 = vrot.slane %v9744_v10, %v21081_v33 }
 0x626   : > { %v19845_v58 = vpop.xlane.xlu1 %9812  ;;  %v11997_v8 = vsel %vm9940_vm2, %v11996_v50, %v11992_v35 }
 0x627   : > { %v9792_v51 = vpop.xlane.xlu0 %9791  ;;  %v12012_v1 = vsel %vm10015_vm8, %v11997_v8, %v12011_v22  ;;  %v12436_v8 = vrot.slane %v19835_v23, %v21085_v37 }
 0x628   : > { %v12162_v9 = vrot.slane %v9792_v51, %v21081_v33  ;;  %v12177_v51 = vsel %vm10013_vm7, %v12154_v43, %v12176_v5 }
 0x62a   : > { %v19847_v59 = vpop.xlane.xlu1 %9860  ;;  %v12163_v57 = vsel %vm9940_vm2, %v12162_v9, %v12158_v47 }
 0x62b   : > { %v19849_v7 = vpop.xlane.xlu0 %9815  ;;  %v12178_v62 = vsel %vm10015_vm8, %v12163_v57, %v12177_v51 }
 0x62e   : > { %v9747_v46 = vpop.xlane.xlu1 %9746 }
 0x62f   : > { %v19860_v13 = vpop.xlane.xlu0 %9863  ;;  %v12001_v30 = vrot.slane %v9747_v46, %v21085_v37 }
 0x630   : > { %v12458_v34 = vrot.slane %v19860_v13, %v21081_v33 }
 0x632   : > { %v9795_v45 = vpop.xlane.xlu1 %9794 }
 0x633   : > { %v9750_v18 = vpop.xlane.xlu0 %9749  ;;  %v12167_v32 = vrot.slane %v9795_v45, %v21085_v37  ;;  %v12292_v45 = vrot.slane %v19849_v7, %v21081_v33  ;;  %v12454_v7 = vrot.slane %v19847_v59, %v21085_v37 }
 0x634   : > { %v12005_v38 = vrot.slane %v9750_v18, %v21081_v33  ;;  %v12284_v18 = vsel %vm9940_vm2, %v12283_v24, %v12279_v36 }
 0x636   : > { %v12006_v15 = vsel %vm9940_vm2, %v12005_v38, %v12001_v30  ;;  %v19889_v56 = vpop.xlane.xlu1 %9818  ;;  %v12288_v30 = vrot.slane %v19845_v58, %v21085_v37  ;;  %v12449_v58 = vrot.slane %v19843_v28, %v21081_v33  ;;  %v12339_v28 = vsel %vm10005_vm3, %v12284_v18, %v19833_v42 }
 0x637   : > { %v9798_v53 = vpop.xlane.xlu0 %9797  ;;  %v12013_v55 = vsel %vm10017_vm9, %v12006_v15, %v12012_v1  ;;  %v12297_v23 = vrot.slane %v19889_v56, %v21085_v37  ;;  %v12441_v15 = vsel %vm9940_vm2, %v12440_v4, %v12436_v8 }
 0x638   : > { %v12171_v10 = vrot.slane %v9798_v53, %v21081_v33  ;;  %14513 = vmatpush3.msra.mxu0 %v12013_v55  ;;  %v12293_v38 = vsel %vm9940_vm2, %v12292_v45, %v12288_v30  ;;  %v12459_v55 = vsel %vm9940_vm2, %v12458_v34, %v12454_v7  ;;  %v9897_v34 = vld [vmem:[%s19983_s17 + $0x10] sm:$0xff] }
 0x639   : > { %14515 = vmatmul.mubr.msk.f32.vlgmr.msra.gmra.mrb[60].mxu0 %vm487_vm1, %v19654_v41  ;;  %14522 = vmatprep.subr.mxu0 %v21300_v31  ;;  %v12340_v12 = vsel %vm10007_vm4, %v12293_v38, %v12339_v28  ;;  %v9896_v38 = vld [vmem:[%s19983_s17 + $0x8] sm:$0xff]  ;;  %v9901_v28 = vld [vmem:[%s19983_s17 + $0x30] sm:$0xff] }
 0x63a   : > { %v12172_v20 = vsel %vm9940_vm2, %v12171_v10, %v12167_v32  ;;  %v19903_v19 = vpop.xlane.xlu1 %9866  ;;  %14524 = vmatprep.mubr.msk.f32.mxu0 %vm14719_vm0, %v21300_v31  ;;  %v12450_v32 = vsel %vm9940_vm2, %v12449_v58, %v12445_v54  ;;  %v9895_v54 = vld [vmem:[%s19983_s17] sm:$0xff] }
 0x63b   : > { %v9822_v2 = vpop.xlane.xlu0 %9821  ;;  %v12179_v44 = vsel %vm10017_vm9, %v12172_v20, %v12178_v62  ;;  %v12463_v42 = vrot.slane %v19903_v19, %v21085_v37 }
 0x63c   : > { %14518 = vmatpush3.msra.mxu1 %v12179_v44  ;;  %v12301_v40 = vrot.slane %v9822_v2, %v21081_v33 }
 0x63d   : > { %14520 = vmatmul.mubr.msk.f32.vlgmr.msra.gmra.mrb[60].mxu1 %vm487_vm1, %v19654_v41  ;;  %14527 = vmatprep.subr.mxu1 %v21300_v31 }
 0x63e   : > { %v9825_v52 = vpop.xlane.xlu1 %9824  ;;  %14529 = vmatprep.mubr.msk.f32.mxu1 %vm14719_vm0, %v21300_v31  ;;  %v12302_v57 = vsel %vm9940_vm2, %v12301_v40, %v12297_v23 }
 0x63f   : > { %v9870_v60 = vpop.xlane.xlu0 %9869  ;;  %v12306_v21 = vrot.slane %v9825_v52, %v21085_v37  ;;  %v12341_v44 = vsel %vm10009_vm5, %v12302_v57, %v12340_v12  ;;  %v9910_v12 = vld [vmem:[%s19983_s17 + $0x78] sm:$0xff] }
 0x640   : > { %v12467_v53 = vrot.slane %v9870_v60, %v21081_v33 }
 0x642   : > { %v19913_v46 = vpop.xlane.xlu1 %9872 }
 0x643   : > { %v9828_v35 = vpop.xlane.xlu0 %9827  ;;  %v12472_v10 = vrot.slane %v19913_v46, %v21085_v37 }
 0x644   : > { %v12310_v11 = vrot.slane %v9828_v35, %v21081_v33 }
 0x646   : > { %v9831_v50 = vpop.xlane.xlu1 %9830  ;;  %v12311_v5 = vsel %vm9940_vm2, %v12310_v11, %v12306_v21  ;;  %v9898_v21 = vld [vmem:[%s19983_s17 + $0x18] sm:$0xff]  ;;  %v9899_v11 = vld [vmem:[%s19983_s17 + $0x20] sm:$0xff] }
 0x647   : > { %v9876_v0 = vpop.xlane.xlu0 %9875  ;;  %v12315_v22 = vrot.slane %v9831_v50, %v21085_v37 }
 0x648   : > { %v12476_v51 = vrot.slane %v9876_v0, %v21081_v33  ;;  %v12505_v0 = vsel %vm10005_vm3, %v12450_v32, %v12441_v15  ;;  %v9905_v15 = vld [vmem:[%s19983_s17 + $0x50] sm:$0xff]  ;;  %v9906_v32 = vld [vmem:[%s19983_s17 + $0x58] sm:$0xff] }
 0x64a   : > { %v19915_v14 = vpop.xlane.xlu1 %9878  ;;  %v12477_v36 = vsel %vm9940_vm2, %v12476_v51, %v12472_v10 }
 0x64b   : > { %v9834_v49 = vpop.xlane.xlu0 %9833  ;;  %v12481_v62 = vrot.slane %v19915_v14, %v21085_v37  ;;  %v12342_v14 = vsel %vm10011_vm6, %v12311_v5, %v12341_v44 }
 0x64c   : > { %v19917_v61 = vpop.f32.mrb[54].mxu0  ;;  %v12319_v59 = vrot.slane %v9834_v49, %v21081_v33  ;;  %v12468_v49 = vsel %vm9940_vm2, %v12467_v53, %v12463_v42 }
 0x64d   : > { %v14486_v29 = vpop.f32.mrb[55].mxu0 }
 0x64e   : > { %v9837_v3 = vpop.xlane.xlu1 %9836  ;;  %v12320_v20 = vsel %vm9940_vm2, %v12319_v59, %v12315_v22  ;;  %v12506_v29 = vsel %vm10007_vm4, %v12459_v55, %v12505_v0  ;;  %v9902_v22 = vld [vmem:[%s19983_s17 + $0x38] sm:$0xff]  ;;  %v9903_v59 = vld [vmem:[%s19983_s17 + $0x40] sm:$0xff] }
 0x64f   : > { %v9882_v16 = vpop.xlane.xlu0 %9881  ;;  %v12324_v1 = vrot.slane %v9837_v3, %v21085_v37  ;;  %v12343_v24 = vsel %vm10013_vm7, %v12320_v20, %v12342_v14 }
 0x650   : > { %v12485_v2 = vrot.slane %v9882_v16, %v21081_v33 }
 0x652   : > { %v19927_v6 = vpop.f32.mrb[54].mxu1  ;;  %v9885_v47 = vpop.xlane.xlu1 %9884  ;;  %v12486_v16 = vsel %vm9940_vm2, %v12485_v2, %v12481_v62 }
 0x653   : > { %v14491_v9 = vpop.f32.mrb[55].mxu1  ;;  %v9840_v26 = vpop.xlane.xlu0 %9839  ;;  %v12490_v60 = vrot.slane %v9885_v47, %v21085_v37  ;;  %v12507_v47 = vsel %vm10009_vm5, %v12468_v49, %v12506_v29 }
 0x654   : > { %v12328_v13 = vrot.slane %v9840_v26, %v21081_v33  ;;  %v12508_v58 = vsel %vm10011_vm6, %v12477_v36, %v12507_v47 }
 0x655   : > { %v12509_v7 = vsel %vm10013_vm7, %v12486_v16, %v12508_v58 }
 0x656   : > { %v9843_v43 = vpop.xlane.xlu1 %9842  ;;  %v12329_v52 = vsel %vm9940_vm2, %v12328_v13, %v12324_v1  ;;  %v9907_v1 = vld [vmem:[%s19983_s17 + $0x60] sm:$0xff]  ;;  %v9908_v13 = vld [vmem:[%s19983_s17 + $0x68] sm:$0xff] }
 0x657   : > { %v9888_v56 = vpop.xlane.xlu0 %9887  ;;  %v12333_v19 = vrot.slane %v9843_v43, %v21085_v37  ;;  %v12344_v8 = vsel %vm10015_vm8, %v12329_v52, %v12343_v24  ;;  %v9904_v43 = vld [vmem:[%s19983_s17 + $0x48] sm:$0xff] }
 0x658   : > { %v12494_v46 = vrot.slane %v9888_v56, %v21081_v33  ;;  %v9909_v56 = vld [vmem:[%s19983_s17 + $0x70] sm:$0xff] }
 0x65a   : > { %v9891_v50 = vpop.xlane.xlu1 %9890  ;;  %v12495_v9 = vsel %vm9940_vm2, %v12494_v46, %v12490_v60 }
 0x65b   : > { %v9846_v35 = vpop.xlane.xlu0 %9845  ;;  %v12499_v45 = vrot.slane %v9891_v50, %v21085_v37  ;;  %v12510_v23 = vsel %vm10015_vm8, %v12495_v9, %v12509_v7 }
 0x65c   : > { %v12337_v3 = vrot.slane %v9846_v35, %v21081_v33 }
 0x65e   : > { %v12338_v30 = vsel %vm9940_vm2, %v12337_v3, %v12333_v19 }
 0x65f   : > { %v9894_v18 = vpop.xlane.xlu0 %9893  ;;  %v12345_v4 = vsel %vm10017_vm9, %v12338_v30, %v12344_v8 }
 0x660   : > { %v12503_v26 = vrot.slane %v9894_v18, %v21081_v33  ;;  %14523 = vmatpush3.msra.mxu0 %v12345_v4  ;;  %v20009_v33 = vld [vmem:[%s20308_s6] sm:$0xff] }
 0x661   : > { %14525 = vmatmul.mubr.msk.f32.vlgmr.msra.gmra.mrb[62].mxu0 %vm487_vm1, %v19654_v41  ;;  %14532 = vmatprep.subr.mxu0 %v21300_v31 }
 0x662   : > { %v12504_v37 = vsel %vm9940_vm2, %v12503_v26, %v12499_v45  ;;  %14533 = vmatpush3.msra.mxu0 %v9895_v54  ;;  %14534 = vmatprep.mubr.msk.f32.mxu0 %vm14719_vm0, %v21300_v31 }
 0x663   : > { %v12511_v40 = vsel %vm10017_vm9, %v12504_v37, %v12510_v23  ;;  %14542 = vmatprep.subr.mxu0 %v21300_v31 }
 0x664   : > { %14528 = vmatpush3.msra.mxu1 %v12511_v40 }
 0x665   : > { %14530 = vmatmul.mubr.msk.f32.vlgmr.msra.gmra.mrb[62].mxu1 %vm487_vm1, %v19654_v41  ;;  %14535 = vmatmul.mubr.msk.f32.vlgmr.msra.gmra.mrb[64].mxu0 %vm487_vm1, %v20009_v33  ;;  %v9900_v41 = vld [vmem:[%s19983_s17 + $0x28] sm:$0xff] }
 0x666   : > { %14537 = vmatprep.subr.mxu1 %v21300_v31  ;;  %14539 = vmatprep.mubr.msk.f32.mxu1 %vm14719_vm0, %v21300_v31 }
 0x667   : > { %14538 = vmatpush3.msra.mxu1 %v9896_v38  ;;  %14543 = vmatpush3.msra.mxu0 %v9897_v34 }
 0x668   : > { %14544 = vmatprep.mubr.msk.f32.mxu0 %vm14719_vm0, %v21300_v31  ;;  %14547 = vmatprep.subr.mxu1 %v21300_v31 }
 0x669   : > { %14540 = vmatmul.mubr.msk.f32.vlgmr.msra.gmra.mrb[64].mxu1 %vm487_vm1, %v20009_v33  ;;  %14545 = vmatmul.mubr.msk.f32.vlgmr.msra.gmra.mrb[66].mxu0 %vm487_vm1, %v20009_v33 }
 0x66a   : > { %14552 = vmatprep.subr.mxu0 %v21300_v31  ;;  %14548 = vmatpush3.msra.mxu1 %v9898_v21 }
 0x66b   : > { %14549 = vmatprep.mubr.msk.f32.mxu1 %vm14719_vm0, %v21300_v31  ;;  %14553 = vmatpush3.msra.mxu0 %v9899_v11 }
 0x66c   : > { %14554 = vmatprep.mubr.msk.f32.mxu0 %vm14719_vm0, %v21300_v31  ;;  %14557 = vmatprep.subr.mxu1 %v21300_v31 }
 0x66d   : > { %14550 = vmatmul.mubr.msk.f32.vlgmr.msra.gmra.mrb[66].mxu1 %vm487_vm1, %v20009_v33  ;;  %14555 = vmatmul.mubr.msk.f32.vlgmr.msra.gmra.mrb[68].mxu0 %vm487_vm1, %v20009_v33 }
 0x66e   : > { %14562 = vmatprep.subr.mxu0 %v21300_v31  ;;  %14558 = vmatpush3.msra.mxu1 %v9900_v41  ;;  %v20120_v60 = vpop.permute.xlu1 %13709 }
 0x66f   : > { %14559 = vmatprep.mubr.msk.f32.mxu1 %vm14719_vm0, %v21300_v31  ;;  %14563 = vmatpush3.msra.mxu0 %v9901_v28 }
 0x670   : > { %14564 = vmatprep.mubr.msk.f32.mxu0 %vm14719_vm0, %v21300_v31  ;;  %14567 = vmatprep.subr.mxu1 %v21300_v31 }
 0x671   : > { %14560 = vmatmul.mubr.msk.f32.vlgmr.msra.gmra.mrb[68].mxu1 %vm487_vm1, %v20009_v33  ;;  %14565 = vmatmul.mubr.msk.f32.vlgmr.msra.gmra.mrb[70].mxu0 %vm487_vm1, %v20009_v33 }
 0x672   : > { %14572 = vmatprep.subr.mxu0 %v21300_v31  ;;  %14568 = vmatpush3.msra.mxu1 %v9902_v22 }
 0x673   : > { %14569 = vmatprep.mubr.msk.f32.mxu1 %vm14719_vm0, %v21300_v31  ;;  %14573 = vmatpush3.msra.mxu0 %v9903_v59 }
 0x674   : > { %14574 = vmatprep.mubr.msk.f32.mxu0 %vm14719_vm0, %v21300_v31  ;;  %14577 = vmatprep.subr.mxu1 %v21300_v31 }
 0x675   : > { %14570 = vmatmul.mubr.msk.f32.vlgmr.msra.gmra.mrb[70].mxu1 %vm487_vm1, %v20009_v33  ;;  %14575 = vmatmul.mubr.msk.f32.vlgmr.msra.gmra.mrb[72].mxu0 %vm487_vm1, %v20009_v33 }
 0x676   : > { %14582 = vmatprep.subr.mxu0 %v21300_v31  ;;  %14578 = vmatpush3.msra.mxu1 %v9904_v43 }
 0x677   : > { %14579 = vmatprep.mubr.msk.f32.mxu1 %vm14719_vm0, %v21300_v31  ;;  %14583 = vmatpush3.msra.mxu0 %v9905_v15 }
 0x678   : > { %14584 = vmatprep.mubr.msk.f32.mxu0 %vm14719_vm0, %v21300_v31  ;;  %14587 = vmatprep.subr.mxu1 %v21300_v31 }
 0x679   : > { %14580 = vmatmul.mubr.msk.f32.vlgmr.msra.gmra.mrb[72].mxu1 %vm487_vm1, %v20009_v33  ;;  %14585 = vmatmul.mubr.msk.f32.vlgmr.msra.gmra.mrb[74].mxu0 %vm487_vm1, %v20009_v33 }
 0x67a   : > { %14592 = vmatprep.subr.mxu0 %v21300_v31  ;;  %14588 = vmatpush3.msra.mxu1 %v9906_v32 }
 0x67b   : > { %14589 = vmatprep.mubr.msk.f32.mxu1 %vm14719_vm0, %v21300_v31  ;;  %14593 = vmatpush3.msra.mxu0 %v9907_v1 }
 0x67c   : > { %14594 = vmatprep.mubr.msk.f32.mxu0 %vm14719_vm0, %v21300_v31  ;;  %14597 = vmatprep.subr.mxu1 %v21300_v31 }
 0x67d   : > { %14590 = vmatmul.mubr.msk.f32.vlgmr.msra.gmra.mrb[74].mxu1 %vm487_vm1, %v20009_v33  ;;  %14595 = vmatmul.mubr.msk.f32.vlgmr.msra.gmra.mrb[76].mxu0 %vm487_vm1, %v20009_v33 }
 0x67e   : > { %14602 = vmatprep.subr.mxu0 %v21300_v31  ;;  %14598 = vmatpush3.msra.mxu1 %v9908_v13 }
 0x67f   : > { %14599 = vmatprep.mubr.msk.f32.mxu1 %vm14719_vm0, %v21300_v31  ;;  %14603 = vmatpush3.msra.mxu0 %v9909_v56 }
 0x680   : > { %14604 = vmatprep.mubr.msk.f32.mxu0 %vm14719_vm0, %v21300_v31  ;;  %14607 = vmatprep.subr.mxu1 %v21300_v31 }
 0x681   : > { %14600 = vmatmul.mubr.msk.f32.vlgmr.msra.gmra.mrb[76].mxu1 %vm487_vm1, %v20009_v33  ;;  %14605 = vmatmul.mubr.msk.f32.vlgmr.msra.gmra.mrb[78].mxu0 %vm487_vm1, %v20009_v33 }
 0x682   : > { %14608 = vmatpush3.msra.mxu1 %v9910_v12  ;;  %14609 = vmatprep.mubr.msk.f32.mxu1 %vm14719_vm0, %v21300_v31 }
 0x685   : > { %14610 = vmatmul.mubr.msk.f32.vlgmr.msra.gmra.mrb[78].mxu1 %vm487_vm1, %v20009_v33 }
 0x68a   : > { %v20106_v57 = vpop.f32.mrb[56].mxu0 }
 0x68b   : > { %v14496_v42 = vpop.f32.mrb[57].mxu0 }
 0x68e   : > { %v20108_v53 = vpop.f32.mrb[56].mxu1 }
 0x68f   : > { %v14501_v55 = vpop.f32.mrb[57].mxu1 }
 0x6cc   : > { %v20110_v5 = vpop.f32.mrb[58].mxu0 }
 0x6cd   : > { %v14506_v10 = vpop.f32.mrb[59].mxu0 }
 0x6d0   : > { %v20112_v51 = vpop.f32.mrb[58].mxu1 }
 0x6d1   : > { %v14511_v20 = vpop.f32.mrb[59].mxu1 }
 0x70c   : > { %v20114_v62 = vpop.f32.mrb[60].mxu0 }
 0x70d   : > { %v14516_v2 = vpop.f32.mrb[61].mxu0 }
 0x710   : > { %v20116_v19 = vpop.f32.mrb[60].mxu1 }
 0x711   : > { %v14521_v31 = vpop.f32.mrb[61].mxu1 }
 0x734   : > { %v20118_v44 = vpop.f32.mrb[62].mxu0 }
 0x735   : > { %v14526_v52 = vpop.f32.mrb[63].mxu0 }
 0x738   : > { %v12652_v46 = vpop.f32.mrb[64].mxu0  ;;  %v20122_v35 = vpop.f32.mrb[62].mxu1 }
 0x739   : > { %v12653_v50 = vadd.f32 %v12652_v46, %v19816_v39  ;;  %v14531_v0 = vpop.f32.mrb[63].mxu1  ;;  %v14536_v49 = vpop.f32.mrb[65].mxu0 }
 0x73b   : > { %v20126_v14 = vadd.f32 %v20120_v60, %v12653_v50 }
 0x73c   : > { %v12722_v3 = vpop.f32.mrb[64].mxu1  ;;  %v12792_v29 = vpop.f32.mrb[66].mxu0 }
 0x73d   : > { %v13744_v36 = vmul.f32 0.044715, %v20126_v14  ;;  %v12723_v24 = vadd.f32 %v12722_v3, %v19818_v63  ;;  %v12793_v16 = vadd.f32 %v12792_v29, %v19820_v27  ;;  %v14541_v30 = vpop.f32.mrb[65].mxu1  ;;  %v14546_v45 = vpop.f32.mrb[67].mxu0 }
 0x73f   : > { %v13760_v8 = vmul.f32 %v13744_v36, %v20126_v14  ;;  %v20133_v47 = vadd.f32 %v20120_v60, %v12723_v24  ;;  %v20136_v39 = vadd.f32 %v20120_v60, %v12793_v16 }
 0x740   : > { %v12862_v9 = vpop.f32.mrb[66].mxu1  ;;  %v12932_v18 = vpop.f32.mrb[68].mxu0 }
 0x741   : > { %v13776_v4 = vmul.f32 %v13760_v8, %v20126_v14  ;;  %v13745_v54 = vmul.f32 0.044715, %v20133_v47  ;;  %v14551_v58 = vpop.f32.mrb[67].mxu1  ;;  %v14556_v63 = vpop.f32.mrb[69].mxu0  ;;  %v13746_v27 = vmul.f32 0.044715, %v20136_v39  ;;  %v12863_v26 = vadd.f32 %v12862_v9, %v19822_v17 }
 0x742   : > { %v12933_v7 = vadd.f32 %v12932_v18, %v19824_v48  ;;  %v13728_v63 = vmul.f32 0.5, %v20126_v14 }
 0x743   : > { %v13792_v37 = vadd.f32 %v13776_v4, %v20126_v14  ;;  %v13761_v23 = vmul.f32 %v13745_v54, %v20133_v47  ;;  %v13762_v33 = vmul.f32 %v13746_v27, %v20136_v39  ;;  %v20147_v40 = vadd.f32 %v20120_v60, %v12863_v26 }
 0x744   : > { %v20150_v38 = vadd.f32 %v20120_v60, %v12933_v7  ;;  %v13002_v34 = vpop.f32.mrb[68].mxu1  ;;  %v13072_v21 = vpop.f32.mrb[70].mxu0 }
 0x745   : > { %v13808_v11 = vmul.f32 0.7978846, %v13792_v37  ;;  %v13777_v41 = vmul.f32 %v13761_v23, %v20133_v47  ;;  %v13003_v17 = vadd.f32 %v13002_v34, %v19826_v25  ;;  %v13073_v48 = vadd.f32 %v13072_v21, %v19917_v61  ;;  %v14561_v28 = vpop.f32.mrb[69].mxu1  ;;  %v14566_v22 = vpop.f32.mrb[71].mxu0 }
 0x746   : > { %v13778_v59 = vmul.f32 %v13762_v33, %v20136_v39  ;;  %v13747_v43 = vmul.f32 0.044715, %v20147_v40  ;;  %v13748_v32 = vmul.f32 0.044715, %v20150_v38  ;;  %v13729_v37 = vmul.f32 0.5, %v20133_v47 }
 0x747   : > { %14676 = vtanh.f32 %v13808_v11  ;;  %v13793_v15 = vadd.f32 %v13777_v41, %v20133_v47  ;;  %v20160_v1 = vadd.f32 %v20120_v60, %v13003_v17  ;;  %v20165_v61 = vadd.f32 %v20120_v60, %v13073_v48 }
 0x748   : > { %v13794_v13 = vadd.f32 %v13778_v59, %v20136_v39  ;;  %v13763_v25 = vmul.f32 %v13747_v43, %v20147_v40  ;;  %v13142_v56 = vpop.f32.mrb[70].mxu1  ;;  %v13212_v12 = vpop.f32.mrb[72].mxu0  ;;  %v13764_v55 = vmul.f32 %v13748_v32, %v20150_v38  ;;  %v13730_v59 = vmul.f32 0.5, %v20136_v39 }
 0x749   : > { %v13809_v42 = vmul.f32 0.7978846, %v13793_v15  ;;  %v13749_v10 = vmul.f32 0.044715, %v20160_v1  ;;  %v14571_v20 = vpop.f32.mrb[71].mxu1  ;;  %v14576_v46 = vpop.f32.mrb[73].mxu0  ;;  %v13143_v49 = vadd.f32 %v13142_v56, %v19927_v6  ;;  %v13213_v36 = vadd.f32 %v13212_v12, %v20106_v57 }
 0x74a   : > { %v13810_v2 = vmul.f32 0.7978846, %v13794_v13  ;;  %v13779_v31 = vmul.f32 %v13763_v25, %v20147_v40  ;;  %v13750_v52 = vmul.f32 0.044715, %v20165_v61  ;;  %v13780_v50 = vmul.f32 %v13764_v55, %v20150_v38 }
 0x74b   : > { %14678 = vtanh.f32 %v13809_v42  ;;  %v13765_v0 = vmul.f32 %v13749_v10, %v20160_v1  ;;  %v20180_v8 = vadd.f32 %v20120_v60, %v13143_v49  ;;  %v20185_v58 = vadd.f32 %v20120_v60, %v13213_v36 }
 0x74c   : > { %14680 = vtanh.f32 %v13810_v2  ;;  %v13795_v3 = vadd.f32 %v13779_v31, %v20147_v40  ;;  %v13766_v29 = vmul.f32 %v13750_v52, %v20165_v61  ;;  %v13282_v24 = vpop.f32.mrb[72].mxu1  ;;  %v13352_v16 = vpop.f32.mrb[74].mxu0  ;;  %v13796_v30 = vadd.f32 %v13780_v50, %v20150_v38 }
 0x74d   : > { %v13781_v45 = vmul.f32 %v13765_v0, %v20160_v1  ;;  %v13283_v9 = vadd.f32 %v13282_v24, %v20108_v53  ;;  %v14581_v18 = vpop.f32.mrb[73].mxu1  ;;  %v14586_v6 = vpop.f32.mrb[75].mxu0  ;;  %v13353_v57 = vadd.f32 %v13352_v16, %v20110_v5  ;;  %v13751_v7 = vmul.f32 0.044715, %v20180_v8 }
 0x74e   : > { %v13811_v4 = vmul.f32 0.7978846, %v13795_v3  ;;  %v13782_v54 = vmul.f32 %v13766_v29, %v20165_v61  ;;  %v13812_v27 = vmul.f32 0.7978846, %v13796_v30  ;;  %v13752_v23 = vmul.f32 0.044715, %v20185_v58 }
 0x74f   : > { %v13797_v26 = vadd.f32 %v13781_v45, %v20160_v1  ;;  %v13767_v14 = vmul.f32 %v13751_v7, %v20180_v8  ;;  %v20196_v11 = vadd.f32 %v20120_v60, %v13283_v9  ;;  %v20200_v22 = vadd.f32 %v20120_v60, %v13353_v57 }
 0x750   : > { %14682 = vtanh.f32 %v13811_v4  ;;  %v13798_v53 = vadd.f32 %v13782_v54, %v20165_v61  ;;  %v13422_v33 = vpop.f32.mrb[74].mxu1  ;;  %v13492_v34 = vpop.f32.mrb[76].mxu0  ;;  %v13768_v28 = vmul.f32 %v13752_v23, %v20185_v58  ;;  %v13731_v13 = vmul.f32 0.5, %v20147_v40 }
 0x751   : > { %v14677_v21 = vpop.eup %14676  ;;  %14684 = vtanh.f32 %v13812_v27  ;;  %v13813_v5 = vmul.f32 0.7978846, %v13797_v26  ;;  %v14591_v41 = vpop.f32.mrb[75].mxu1  ;;  %v13783_v43 = vmul.f32 %v13767_v14, %v20180_v8  ;;  %v13753_v15 = vmul.f32 0.044715, %v20196_v11 }
 0x752   : > { %v14596_v17 = vpop.f32.mrb[77].mxu0  ;;  %v13840_v48 = vadd.f32 1.0, %v14677_v21  ;;  %v13814_v47 = vmul.f32 0.7978846, %v13798_v53  ;;  %v13784_v25 = vmul.f32 %v13768_v28, %v20185_v58  ;;  %v13754_v39 = vmul.f32 0.044715, %v20200_v22 }
 0x753   : > { %14686 = vtanh.f32 %v13813_v5  ;;  %v13799_v55 = vadd.f32 %v13783_v43, %v20180_v8  ;;  %v13769_v10 = vmul.f32 %v13753_v15, %v20196_v11  ;;  %v13423_v20 = vadd.f32 %v13422_v33, %v20112_v51 }
 0x754   : > { %v13856_v32 = vmul.f32 %v13840_v48, %v13728_v63  ;;  %14688 = vtanh.f32 %v13814_v47  ;;  %v13562_v56 = vpop.f32.mrb[76].mxu1  ;;  %v13632_v12 = vpop.f32.mrb[78].mxu0  ;;  %v13800_v46 = vadd.f32 %v13784_v25, %v20185_v58  ;;  %v13493_v50 = vadd.f32 %v13492_v34, %v20114_v62 }
 0x755   : > { %v14679_v42 = vpop.eup %14678  ;;  %v14601_v2 = vpop.f32.mrb[77].mxu1  ;;  %v13563_v0 = vadd.f32 %v13562_v56, %v20116_v19  ;;  %v13815_v3 = vmul.f32 0.7978846, %v13799_v55  ;;  %v13785_v29 = vmul.f32 %v13769_v10, %v20196_v11  ;;  %v13770_v36 = vmul.f32 %v13754_v39, %v20200_v22 }
 0x756   : > { %v14606_v31 = vpop.f32.mrb[79].mxu0  ;;  %v14681_v52 = vpop.eup %14680  ;;  %13873 = vst.msk [vmem:[%s20206_s22] sm:$0xff] %vm13872_vm10, %v13856_v32  ;;  %v13841_v40 = vadd.f32 1.0, %v14679_v42  ;;  %v13816_v24 = vmul.f32 0.7978846, %v13800_v46  ;;  %v20225_v16 = vadd.f32 %v20120_v60, %v13423_v20  ;;  %v20228_v30 = vadd.f32 %v20120_v60, %v13493_v50 }
 0x757   : > { %v13842_v49 = vadd.f32 1.0, %v14681_v52  ;;  %14690 = vtanh.f32 %v13815_v3  ;;  %v13801_v19 = vadd.f32 %v13785_v29, %v20196_v11  ;;  %v13786_v9 = vmul.f32 %v13770_v36, %v20200_v22 }
 0x758   : > { %v13857_v51 = vmul.f32 %v13841_v40, %v13729_v37  ;;  %v13702_v45 = vpop.f32.mrb[78].mxu1  ;;  %v13732_v4 = vmul.f32 0.5, %v20150_v38  ;;  %v13733_v54 = vmul.f32 0.5, %v20160_v1  ;;  %14692 = vtanh.f32 %v13816_v24 }
 0x759   : > { %v13858_v62 = vmul.f32 %v13842_v49, %v13730_v59  ;;  %v14611_v18 = vpop.f32.mrb[79].mxu1  ;;  %v13755_v57 = vmul.f32 0.044715, %v20225_v16  ;;  %v13817_v26 = vmul.f32 0.7978846, %v13801_v19  ;;  %v13802_v7 = vadd.f32 %v13786_v9, %v20200_v22 }
 0x75a   : > { %v14683_v6 = vpop.eup %14682  ;;  %13874 = vst.msk [vmem:[%s20206_s22 + $0x8] sm:$0xff] %vm13872_vm10, %v13857_v51  ;;  %v13756_v37 = vmul.f32 0.044715, %v20228_v30  ;;  %v20243_v38 = vadd.f32 %v20120_v60, %v13563_v0  ;;  %v13633_v1 = vadd.f32 %v13632_v12, %v20118_v44  ;;  %v13734_v48 = vmul.f32 0.5, %v20165_v61 }
 0x75b   : > { %v14685_v63 = vpop.eup %14684  ;;  %13875 = vst.msk [vmem:[%s20206_s22 + $0x10] sm:$0xff] %vm13872_vm10, %v13858_v62  ;;  %v13843_v27 = vadd.f32 1.0, %v14683_v6  ;;  %v13771_v23 = vmul.f32 %v13755_v57, %v20225_v16  ;;  %14694 = vtanh.f32 %v13817_v26  ;;  %v13818_v21 = vmul.f32 0.7978846, %v13802_v7 }
 0x75c   : > { %v13844_v53 = vadd.f32 1.0, %v14685_v63  ;;  %v13772_v5 = vmul.f32 %v13756_v37, %v20228_v30  ;;  %v13757_v59 = vmul.f32 0.044715, %v20243_v38  ;;  %v20257_v32 = vadd.f32 %v20120_v60, %v13633_v1 }
 0x75d   : > { %v14687_v33 = vpop.eup %14686  ;;  %v13859_v34 = vmul.f32 %v13843_v27, %v13731_v13  ;;  %v13787_v47 = vmul.f32 %v13771_v23, %v20225_v16  ;;  %14696 = vtanh.f32 %v13818_v21  ;;  %v13703_v61 = vadd.f32 %v13702_v45, %v20122_v35 }
 0x75e   : > { %v14689_v14 = vpop.eup %14688  ;;  %v13860_v41 = vmul.f32 %v13844_v53, %v13732_v4  ;;  %v13845_v17 = vadd.f32 1.0, %v14687_v33  ;;  %v13788_v44 = vmul.f32 %v13772_v5, %v20228_v30  ;;  %v13773_v56 = vmul.f32 %v13757_v59, %v20243_v38 }
 0x75f   : > { %13876 = vst.msk [vmem:[%s20206_s22 + $0x18] sm:$0xff] %vm13872_vm10, %v13859_v34  ;;  %v13846_v28 = vadd.f32 1.0, %v14689_v14  ;;  %v13803_v15 = vadd.f32 %v13787_v47, %v20225_v16  ;;  %v13758_v42 = vmul.f32 0.044715, %v20257_v32  ;;  %v13727_v55 = vadd.f32 %v20120_v60, %v13703_v61 }
 0x760   : > { %13877 = vst.msk [vmem:[%s20206_s22 + $0x20] sm:$0xff] %vm13872_vm10, %v13860_v41  ;;  %v13861_v43 = vmul.f32 %v13845_v17, %v13733_v54  ;;  %v13804_v25 = vadd.f32 %v13788_v44, %v20228_v30  ;;  %v13735_v39 = vmul.f32 0.5, %v20180_v8  ;;  %v13789_v35 = vmul.f32 %v13773_v56, %v20243_v38 }
 0x761   : > { %v13862_v13 = vmul.f32 %v13846_v28, %v13734_v48  ;;  %v13819_v12 = vmul.f32 0.7978846, %v13803_v15  ;;  %v14691_v10 = vpop.eup %14690  ;;  %v13736_v52 = vmul.f32 0.5, %v20185_v58  ;;  %v13774_v40 = vmul.f32 %v13758_v42, %v20257_v32 }
 0x762   : > { %13878 = vst.msk [vmem:[%s20206_s22 + $0x28] sm:$0xff] %vm13872_vm10, %v13861_v43  ;;  %v13820_v20 = vmul.f32 0.7978846, %v13804_v25  ;;  %v14693_v2 = vpop.eup %14692  ;;  %v13847_v31 = vadd.f32 1.0, %v14691_v10  ;;  %v13805_v60 = vadd.f32 %v13789_v35, %v20243_v38  ;;  %v13759_v50 = vmul.f32 0.044715, %v13727_v55 }
 0x763   : > { %13879 = vst.msk [vmem:[%s20206_s22 + $0x30] sm:$0xff] %vm13872_vm10, %v13862_v13  ;;  %14698 = vtanh.f32 %v13819_v12  ;;  %v13848_v46 = vadd.f32 1.0, %v14693_v2  ;;  %v13790_v8 = vmul.f32 %v13774_v40, %v20257_v32  ;;  %v13737_v58 = vmul.f32 0.5, %v20196_v11 }
 0x764   : > { %14700 = vtanh.f32 %v13820_v20  ;;  %v13863_v0 = vmul.f32 %v13847_v31, %v13735_v39  ;;  %v13821_v29 = vmul.f32 0.7978846, %v13805_v60  ;;  %v13775_v36 = vmul.f32 %v13759_v50, %v13727_v55 }
 0x765   : > { %v14695_v49 = vpop.eup %14694  ;;  %v13864_v3 = vmul.f32 %v13848_v46, %v13736_v52  ;;  %v13806_v24 = vadd.f32 %v13790_v8, %v20257_v32  ;;  %v13738_v9 = vmul.f32 0.5, %v20200_v22  ;;  %v13739_v27 = vmul.f32 0.5, %v20225_v16 }
 0x766   : > { %13880 = vst.msk [vmem:[%s20206_s22 + $0x38] sm:$0xff] %vm13872_vm10, %v13863_v0  ;;  %v13849_v51 = vadd.f32 1.0, %v14695_v49  ;;  %14702 = vtanh.f32 %v13821_v29  ;;  %v13791_v62 = vmul.f32 %v13775_v36, %v13727_v55  ;;  %v13740_v22 = vmul.f32 0.5, %v20228_v30 }
 0x767   : > { %v14697_v45 = vpop.eup %14696  ;;  %13881 = vst.msk [vmem:[%s20206_s22 + $0x40] sm:$0xff] %vm13872_vm10, %v13864_v3  ;;  %v13822_v6 = vmul.f32 0.7978846, %v13806_v24  ;;  %v13741_v1 = vmul.f32 0.5, %v20243_v38  ;;  %v13742_v21 = vmul.f32 0.5, %v20257_v32  ;;  %v13743_v41 = vmul.f32 0.5, %v13727_v55 }
 0x768   : > { %v13865_v19 = vmul.f32 %v13849_v51, %v13737_v58  ;;  %v13850_v18 = vadd.f32 1.0, %v14697_v45  ;;  %v13807_v4 = vadd.f32 %v13791_v62, %v13727_v55 }
 0x769   : > { %14704 = vtanh.f32 %v13822_v6 }
 0x76a   : > { %13882 = vst.msk [vmem:[%s20206_s22 + $0x48] sm:$0xff] %vm13872_vm10, %v13865_v19  ;;  %v13866_v11 = vmul.f32 %v13850_v18, %v13738_v9  ;;  %v13823_v54 = vmul.f32 0.7978846, %v13807_v4 }
 0x76c   : > { %13883 = vst.msk [vmem:[%s20206_s22 + $0x50] sm:$0xff] %vm13872_vm10, %v13866_v11  ;;  %14706 = vtanh.f32 %v13823_v54 }
 0x76d   : > { %v14699_v57 = vpop.eup %14698 }
 0x76e   : > { %v14701_v63 = vpop.eup %14700  ;;  %v13851_v26 = vadd.f32 1.0, %v14699_v57 }
 0x76f   : > { %v13852_v7 = vadd.f32 1.0, %v14701_v63 }
 0x770   : > { %v13867_v37 = vmul.f32 %v13851_v26, %v13739_v27  ;;  %v14703_v23 = vpop.eup %14702 }
 0x771   : > { %v13868_v53 = vmul.f32 %v13852_v7, %v13740_v22  ;;  %v13853_v33 = vadd.f32 1.0, %v14703_v23 }
 0x772   : > { %13884 = vst.msk [vmem:[%s20206_s22 + $0x58] sm:$0xff] %vm13872_vm10, %v13867_v37 }
 0x773   : > { %13885 = vst.msk [vmem:[%s20206_s22 + $0x60] sm:$0xff] %vm13872_vm10, %v13868_v53  ;;  %v14705_v34 = vpop.eup %14704  ;;  %v13869_v16 = vmul.f32 %v13853_v33, %v13741_v1 }
 0x774   : > { %v13854_v5 = vadd.f32 1.0, %v14705_v34 }
 0x775   : > { %13886 = vst.msk [vmem:[%s20206_s22 + $0x68] sm:$0xff] %vm13872_vm10, %v13869_v16 }
 0x776   : > { %v14707_v30 = vpop.eup %14706  ;;  %v13870_v14 = vmul.f32 %v13854_v5, %v13742_v21 }
 0x777   : > { %v13855_v17 = vadd.f32 1.0, %v14707_v30 }
 0x778   : > { %13887 = vst.msk [vmem:[%s20206_s22 + $0x70] sm:$0xff] %vm13872_vm10, %v13870_v14 }
 0x779   : > { %v13871_v48 = vmul.f32 %v13855_v17, %v13743_v41 }
 0x77b   : > { %13888 = vst.msk [vmem:[%s20206_s22 + $0x78] sm:$0xff] %vm13872_vm10, %v13871_v48 }
 0x77c PF: > { %s19_s30 = sadd.s32 1, %s14716_s30  }
 0x77d   : > { %p16_p4 = scmp.ge.s32.totalorder %s19_s30, 4  }
 0x77f   :  { %18 = sbr.rel (!%p16_p4) target bundleno = 1 (0x1), region = 89 }

</bundles_post_ra>
